<compile_context>
chip_gen: v7x
topology: tpu7x:2x2x1
jax: 0.10.0
libtpu: 0.0.40
codegen_flags: <defaults>
</compile_context>

<pallas_src>
import functools

import jax
import jax.numpy as jnp
from jax.experimental import pallas as pl
from jax.experimental.pallas import tpu as pltpu

IN_FEATURES = 512


# ----------------------------------------------------------------------------
# Branch kernel: 3x3 "same" conv (C -> F) + bias + ReLU + global average pool.
# Grid = (image, row-band); GAP accumulated across row-bands into the output.
# ----------------------------------------------------------------------------
def _branch_kernel(band_ref, wt_ref, bias_ref, mask_ref, out_ref, *, wpad, tile_p):
    """One (image b, row-band r) grid step.

    band_ref: (1, 1, C, Lpad) bf16  flattened padded row-band (1px halo):
                                    band[c, y*wpad + x] = padded_img[c, r*TH+y, x]
    wt_ref:   (9, F, C)  bf16       conv weights per tap t = dy*3 + dx
    bias_ref: (F, 1)     f32
    mask_ref: (1, tile_p) f32       1/(H*W) at valid output columns, 0 at junk
    out_ref:  (1, 1, F)  f32        GAP accumulator for image b (revisited on r)
    """
    @pl.when(pl.program_id(1) == 0)
    def _init():
        out_ref[...] = jnp.zeros_like(out_ref)

    band = band_ref[0, 0]                                   # (C, Lpad) bf16
    acc = None
    for dy in range(3):
        for dx in range(3):
            off = dy * wpad + dx                            # static tap offset
            x = band[:, off:off + tile_p]                   # (C, tile_p) bf16
            w = wt_ref[dy * 3 + dx]                         # (F, C)      bf16
            d = jnp.dot(w, x, preferred_element_type=jnp.float32)  # (F, tile_p)
            acc = d if acc is None else acc + d
    acc = jnp.maximum(acc + bias_ref[...], 0.0)             # bias + ReLU (f32)
    acc = acc * mask_ref[...]                               # drop junk cols, *1/(H*W)
    partial = jnp.sum(acc, axis=1, keepdims=True)           # (F, 1) partial GAP
    out_ref[...] += jnp.transpose(partial)[None]            # accumulate (1, 1, F)


# ----------------------------------------------------------------------------
# Head kernel: pairwise feature combine + tiny "convs" + dense + sigmoid,
# kept lane-dense (F=512 on lanes), small weights read as SMEM scalars.
# ----------------------------------------------------------------------------
def _head_kernel(fa_ref, fb_ref, wf_ref, wc_ref, bc_ref, wr_ref, sc_ref, o_ref,
                 *, mid):
    """fa_ref, fb_ref: (B, F) f32 VMEM
    wf_ref: (1, F) f32 VMEM          dense weights (row layout)
    wc_ref: (4*mid,) f32 SMEM        combine weights, index k*mid + m
    bc_ref: (mid,)   f32 SMEM
    wr_ref: (mid,)   f32 SMEM
    sc_ref: (2,)     f32 SMEM        [br, bf]
    o_ref:  (B, 1)   f32
    """
    xa = fa_ref[...]
    xb = fb_ref[...]
    x1 = xa * xb
    x2 = xa + xb
    diff = xa - xb
    x3 = jnp.abs(diff)
    x4 = diff * diff

    racc = jnp.zeros_like(xa)                               # (B, F) f32
    for m in range(mid):                                    # static unroll (mid=32)
        hm = (x1 * wc_ref[m] + x2 * wc_ref[mid + m] + x3 * wc_ref[2 * mid + m]
              + x4 * wc_ref[3 * mid + m] + bc_ref[m])
        racc = racc + jnp.maximum(hm, 0.0) * wr_ref[m]
    r = jnp.maximum(racc + sc_ref[0], 0.0)                  # (B, F)

    logit = jnp.sum(r * wf_ref[...], axis=-1, keepdims=True) + sc_ref[1]  # (B, 1)
    o_ref[...] = jax.nn.sigmoid(logit)


# ----------------------------------------------------------------------------
# Wrappers
# ----------------------------------------------------------------------------
def _pick_tile_rows(h, target):
    th = int(max(1, min(h, target)))
    while h % th:
        th -= 1
    return th


def branch_model(imgs, wt, bias, *, tile_rows=8):
    """Conv3x3(same) + bias + ReLU + GAP.  imgs: (N, C, H, W) f32 -> (N, F) f32."""
    n, c, h, w = imgs.shape
    f = wt.shape[1]
    th = _pick_tile_rows(h, tile_rows)                     # output rows per tile
    rt = h // th
    wpad = w + 2
    tile_p = th * wpad                                     # flat outputs per tile
    band_rows = th + 2
    band_len = band_rows * wpad
    # pad flat band length so the largest tap offset (2*wpad+2) never runs off
    lpad = ((tile_p + 2 * wpad + 2 + 127) // 128) * 128

    xp = jnp.pad(imgs, ((0, 0), (0, 0), (1, 1), (1, 1)))   # (N, C, H+2, W+2)
    bands = jnp.stack(
        [xp[:, :, r * th:r * th + band_rows, :] for r in range(rt)], axis=1)
    bands = bands.reshape(n, rt, c, band_len)
    bands = jnp.pad(bands, ((0, 0), (0, 0), (0, 0), (0, lpad - band_len)))
    bands = bands.astype(jnp.bfloat16)

    # GAP mask: columns w >= W within each (W+2)-wide row are junk; fold 1/(H*W).
    cols = jnp.arange(tile_p, dtype=jnp.int32) % wpad
    mask = jnp.where(cols < w, 1.0 / (h * w), 0.0).astype(jnp.float32)
    mask = mask.reshape(1, tile_p)

    out = pl.pallas_call(
        functools.partial(_branch_kernel, wpad=wpad, tile_p=tile_p),
        grid=(n, rt),
        in_specs=[
            pl.BlockSpec((1, 1, c, lpad), lambda b, r: (b, r, 0, 0)),
            pl.BlockSpec((9, f, c), lambda b, r: (0, 0, 0)),
            pl.BlockSpec((f, 1), lambda b, r: (0, 0)),
            pl.BlockSpec((1, tile_p), lambda b, r: (0, 0)),
        ],
        out_specs=pl.BlockSpec((1, 1, f), lambda b, r: (b, 0, 0)),
        out_shape=jax.ShapeDtypeStruct((n, 1, f), jnp.float32),
        compiler_params=pltpu.CompilerParams(
            dimension_semantics=("parallel", "arbitrary"),
            vmem_limit_bytes=32 * 1024 * 1024),
    )(bands, wt, bias, mask)
    return out.reshape(n, f)


def head_model(feats_a, feats_b, params):
    b, f = feats_a.shape
    mid = params["wc"].shape[1]
    wf_row = params["wf"].reshape(1, f).astype(jnp.float32)
    wc_flat = params["wc"].reshape(-1).astype(jnp.float32)      # (4*mid,)
    bc_flat = params["bc"].reshape(-1).astype(jnp.float32)      # (mid,)
    wr_flat = params["wr"].reshape(-1).astype(jnp.float32)      # (mid,)
    scalars = jnp.stack(
        [params["br"].reshape(()), params["bf"].reshape(())]).astype(jnp.float32)

    vmem = pl.BlockSpec(memory_space=pltpu.MemorySpace.VMEM)
    smem = pl.BlockSpec(memory_space=pltpu.MemorySpace.SMEM)
    return pl.pallas_call(
        functools.partial(_head_kernel, mid=mid),
        out_shape=jax.ShapeDtypeStruct((b, 1), jnp.float32),
        in_specs=[vmem, vmem, vmem, smem, smem, smem, smem],
        out_specs=vmem,
        compiler_params=pltpu.CompilerParams(vmem_limit_bytes=32 * 1024 * 1024),
    )(feats_a, feats_b, wf_row, wc_flat, bc_flat, wr_flat, scalars)


def top_model_forward(imgsA, imgsB, params, *, tile_rows=8):
    b, c, _, _ = imgsA.shape
    f = params["w_conv"].shape[1]
    # Fuse both branches into one pallas_call (shared weights, 2B-wide grid).
    imgs = jnp.concatenate([imgsA, imgsB], axis=0)              # (2B, C, H, W)
    # w_conv is (C*9, F) with row index c*9 + dy*3 + dx -> per-tap (F, C) bf16.
    wt = (params["w_conv"].reshape(c, 3, 3, f)
          .transpose(1, 2, 3, 0).reshape(9, f, c).astype(jnp.bfloat16))
    bias = params["b_conv"].reshape(f, 1).astype(jnp.float32)
    feats = branch_model(imgs, wt, bias, tile_rows=tile_rows)   # (2B, F) f32
    return head_model(feats[:b], feats[b:], params)


# ----------------------------------------------------------------------------
# Deterministic parameter init (synthetic weights, matching module dims)
# ----------------------------------------------------------------------------
def init_params(in_features=IN_FEATURES, mid=32, in_ch=3, kh=3, kw=3):
    keys = jax.random.split(jax.random.PRNGKey(42), 8)
    k = in_ch * kh * kw
    return {
        "w_conv": 0.05 * jax.random.normal(keys[0], (k, in_features), jnp.float32),
        "b_conv": 0.01 * jax.random.normal(keys[1], (1, in_features), jnp.float32),
        "wc": 0.2 * jax.random.normal(keys[2], (4, mid), jnp.float32),
        "bc": 0.01 * jax.random.normal(keys[3], (1, mid), jnp.float32),
        "wr": 0.2 * jax.random.normal(keys[4], (mid, 1), jnp.float32),
        "br": 0.01 * jax.random.normal(keys[5], (1, 1), jnp.float32),
        "wf": 0.1 * jax.random.normal(keys[6], (in_features, 1), jnp.float32),
        "bf": 0.01 * jax.random.normal(keys[7], (1, 1), jnp.float32),
    }


# ----------------------------------------------------------------------------
# Pure-JAX f32 reference (identical math) for a numerical self-check
# ----------------------------------------------------------------------------
def _reference_forward(imgsA, imgsB, params):
    def branch(x):
        n, c, h, w = x.shape
        xp = jnp.pad(x, ((0, 0), (0, 0), (1, 1), (1, 1)))
        cols = [xp[:, :, dy:dy + h, dx:dx + w] for dy in range(3) for dx in range(3)]
        p = jnp.stack(cols, axis=2)                        # (N, C, 9, H, W)
        p = p.transpose(0, 3, 4, 1, 2).reshape(n * h * w, c * 9)
        feats = jnp.maximum(p @ params["w_conv"] + params["b_conv"], 0.0)
        return feats.reshape(n, h * w, -1).mean(axis=1)

    fa, fb = branch(imgsA), branch(imgsB)
    x1, x2 = fa * fb, fa + fb
    d = fa - fb
    x3, x4 = jnp.abs(d), d * d
    wc, bc = params["wc"], params["bc"]
    hcomb = jnp.maximum(x1[..., None] * wc[0] + x2[..., None] * wc[1]
                        + x3[..., None] * wc[2] + x4[..., None] * wc[3] + bc[0], 0.0)
    r = jnp.maximum(jnp.sum(hcomb * params["wr"][:, 0], axis=-1)
                    + params["br"][0, 0], 0.0)
    logit = r @ params["wf"] + params["bf"][0, 0]
    return jax.nn.sigmoid(logit)


if __name__ == "__main__":
    # Small example inputs (PyTorch NCHW convention): batch=2, 3 channels, 16x16
    b, c, h, w = 2, 3, 16, 16
    kA, kB = jax.random.split(jax.random.PRNGKey(0))
    imgsA = jax.random.normal(kA, (b, c, h, w), jnp.float32)
    imgsB = jax.random.normal(kB, (b, c, h, w), jnp.float32)

    params = init_params(in_features=IN_FEATURES, mid=32, in_ch=c)

    fwd = jax.jit(functools.partial(top_model_forward, tile_rows=8))
    out = jax.block_until_ready(fwd(imgsA, imgsB, params))

    assert out.shape == (b, 1)
    assert bool(jnp.all(jnp.isfinite(out)))

    ref = _reference_forward(imgsA, imgsB, params)
    assert bool(jnp.allclose(out, ref, atol=5e-2, rtol=5e-2)), (out, ref)
    print("KERNEL_OK")
</pallas_src>

<mosaic_0001>
module attributes {stable_mosaic.version = 11 : i64} {
  func.func @_branch_kernel(%arg0: i32, %arg1: i32, %arg2: memref<1x1x3x256xbf16, #tpu.memory_space<vmem>>, %arg3: memref<9x512x3xbf16, #tpu.memory_space<vmem>>, %arg4: memref<512x1xf32, #tpu.memory_space<vmem>>, %arg5: memref<1x144xf32, #tpu.memory_space<vmem>>, %arg6: memref<1x1x512xf32, #tpu.memory_space<vmem>>) attributes {dimension_semantics = [#tpu.dimension_semantics<parallel>, #tpu.dimension_semantics<arbitrary>], iteration_bounds = array<i64: 4, 2>, scalar_prefetch = 0 : i64, scratch_operands = 0 : i64, tpu.core_type = #tpu.core_type<tc>, window_params = [{transform_indices = @transform_0, window_bounds = array<i64: 1, 1, 3, 256>}, {pipeline_mode = #tpu.pipeline_mode<synchronous>, transform_indices = @transform_1, window_bounds = array<i64: 9, 512, 3>}, {pipeline_mode = #tpu.pipeline_mode<synchronous>, transform_indices = @transform_2, window_bounds = array<i64: 512, 1>}, {pipeline_mode = #tpu.pipeline_mode<synchronous>, transform_indices = @transform_3, window_bounds = array<i64: 1, 144>}, {transform_indices = @transform_4, window_bounds = array<i64: 1, 1, 512>}]} {
    %c0_i32 = arith.constant 0 : i32
    %0 = arith.cmpi eq, %arg1, %c0_i32 : i32
    %1 = arith.extui %0 : i1 to i32
    %c0_i32_0 = arith.constant 0 : i32
    %2 = arith.cmpi ne, %1, %c0_i32_0 : i32
    scf.if %2 {
      %cst_43 = arith.constant 0.000000e+00 : f32
      %64 = vector.broadcast %cst_43 : f32 to vector<1x1x512xf32>
      %c0_44 = arith.constant 0 : index
      %c0_45 = arith.constant 0 : index
      %c0_46 = arith.constant 0 : index
      %65 = vector.load %arg6[%c0_44, %c0_45, %c0_46] : memref<1x1x512xf32, #tpu.memory_space<vmem>>, vector<1x1x512xf32>
      tpu.vector_store %arg6[%c0_44, %c0_45, %c0_46], %64 {strides = array<i32>} : memref<1x1x512xf32, #tpu.memory_space<vmem>>, vector<1x1x512xf32>,
    } else {
    }
    %c0 = arith.constant 0 : index
    %c0_1 = arith.constant 0 : index
    %c0_2 = arith.constant 0 : index
    %c0_3 = arith.constant 0 : index
    %3 = vector.load %arg2[%c0, %c0_1, %c0_2, %c0_3] : memref<1x1x3x256xbf16, #tpu.memory_space<vmem>>, vector<1x1x3x256xbf16>
    %4 = vector.shape_cast %3 : vector<1x1x3x256xbf16> to vector<3x256xbf16>
    %5 = vector.extract_strided_slice %4 {offsets = [0, 0], sizes = [3, 144], strides = [1, 1]} : vector<3x256xbf16> to vector<3x144xbf16>
    %c0_4 = arith.constant 0 : index
    %c0_5 = arith.constant 0 : index
    %c0_6 = arith.constant 0 : index
    %6 = vector.load %arg3[%c0_4, %c0_5, %c0_6] : memref<9x512x3xbf16, #tpu.memory_space<vmem>>, vector<1x512x3xbf16>
    %7 = vector.shape_cast %6 : vector<1x512x3xbf16> to vector<512x3xbf16>
    %cst = arith.constant dense<0.000000e+00> : vector<512x144xf32>
    %8 = tpu.matmul %7, %5, %cst {dimension_numbers = #tpu.dot_dimension_numbers<[1], [0], [0], [1], [0, 0, 1, 1], [], []>} : vector<512x3xbf16>, vector<3x144xbf16>, vector<512x144xf32> -> vector<512x144xf32>
    %9 = vector.extract_strided_slice %4 {offsets = [0, 1], sizes = [3, 144], strides = [1, 1]} : vector<3x256xbf16> to vector<3x144xbf16>
    %c1 = arith.constant 1 : index
    %c0_7 = arith.constant 0 : index
    %c0_8 = arith.constant 0 : index
    %10 = vector.load %arg3[%c1, %c0_7, %c0_8] : memref<9x512x3xbf16, #tpu.memory_space<vmem>>, vector<1x512x3xbf16>
    %11 = vector.shape_cast %10 : vector<1x512x3xbf16> to vector<512x3xbf16>
    %cst_9 = arith.constant dense<0.000000e+00> : vector<512x144xf32>
    %12 = tpu.matmul %11, %9, %cst_9 {dimension_numbers = #tpu.dot_dimension_numbers<[1], [0], [0], [1], [0, 0, 1, 1], [], []>} : vector<512x3xbf16>, vector<3x144xbf16>, vector<512x144xf32> -> vector<512x144xf32>
    %13 = arith.addf %8, %12 : vector<512x144xf32>
    %14 = vector.extract_strided_slice %4 {offsets = [0, 2], sizes = [3, 144], strides = [1, 1]} : vector<3x256xbf16> to vector<3x144xbf16>
    %c2 = arith.constant 2 : index
    %c0_10 = arith.constant 0 : index
    %c0_11 = arith.constant 0 : index
    %15 = vector.load %arg3[%c2, %c0_10, %c0_11] : memref<9x512x3xbf16, #tpu.memory_space<vmem>>, vector<1x512x3xbf16>
    %16 = vector.shape_cast %15 : vector<1x512x3xbf16> to vector<512x3xbf16>
    %cst_12 = arith.constant dense<0.000000e+00> : vector<512x144xf32>
    %17 = tpu.matmul %16, %14, %cst_12 {dimension_numbers = #tpu.dot_dimension_numbers<[1], [0], [0], [1], [0, 0, 1, 1], [], []>} : vector<512x3xbf16>, vector<3x144xbf16>, vector<512x144xf32> -> vector<512x144xf32>
    %18 = arith.addf %13, %17 : vector<512x144xf32>
    %19 = vector.extract_strided_slice %4 {offsets = [0, 18], sizes = [3, 144], strides = [1, 1]} : vector<3x256xbf16> to vector<3x144xbf16>
    %c3 = arith.constant 3 : index
    %c0_13 = arith.constant 0 : index
    %c0_14 = arith.constant 0 : index
    %20 = vector.load %arg3[%c3, %c0_13, %c0_14] : memref<9x512x3xbf16, #tpu.memory_space<vmem>>, vector<1x512x3xbf16>
    %21 = vector.shape_cast %20 : vector<1x512x3xbf16> to vector<512x3xbf16>
    %cst_15 = arith.constant dense<0.000000e+00> : vector<512x144xf32>
    %22 = tpu.matmul %21, %19, %cst_15 {dimension_numbers = #tpu.dot_dimension_numbers<[1], [0], [0], [1], [0, 0, 1, 1], [], []>} : vector<512x3xbf16>, vector<3x144xbf16>, vector<512x144xf32> -> vector<512x144xf32>
    %23 = arith.addf %18, %22 : vector<512x144xf32>
    %24 = vector.extract_strided_slice %4 {offsets = [0, 19], sizes = [3, 144], strides = [1, 1]} : vector<3x256xbf16> to vector<3x144xbf16>
    %c4 = arith.constant 4 : index
    %c0_16 = arith.constant 0 : index
    %c0_17 = arith.constant 0 : index
    %25 = vector.load %arg3[%c4, %c0_16, %c0_17] : memref<9x512x3xbf16, #tpu.memory_space<vmem>>, vector<1x512x3xbf16>
    %26 = vector.shape_cast %25 : vector<1x512x3xbf16> to vector<512x3xbf16>
    %cst_18 = arith.constant dense<0.000000e+00> : vector<512x144xf32>
    %27 = tpu.matmul %26, %24, %cst_18 {dimension_numbers = #tpu.dot_dimension_numbers<[1], [0], [0], [1], [0, 0, 1, 1], [], []>} : vector<512x3xbf16>, vector<3x144xbf16>, vector<512x144xf32> -> vector<512x144xf32>
    %28 = arith.addf %23, %27 : vector<512x144xf32>
    %29 = vector.extract_strided_slice %4 {offsets = [0, 20], sizes = [3, 144], strides = [1, 1]} : vector<3x256xbf16> to vector<3x144xbf16>
    %c5 = arith.constant 5 : index
    %c0_19 = arith.constant 0 : index
    %c0_20 = arith.constant 0 : index
    %30 = vector.load %arg3[%c5, %c0_19, %c0_20] : memref<9x512x3xbf16, #tpu.memory_space<vmem>>, vector<1x512x3xbf16>
    %31 = vector.shape_cast %30 : vector<1x512x3xbf16> to vector<512x3xbf16>
    %cst_21 = arith.constant dense<0.000000e+00> : vector<512x144xf32>
    %32 = tpu.matmul %31, %29, %cst_21 {dimension_numbers = #tpu.dot_dimension_numbers<[1], [0], [0], [1], [0, 0, 1, 1], [], []>} : vector<512x3xbf16>, vector<3x144xbf16>, vector<512x144xf32> -> vector<512x144xf32>
    %33 = arith.addf %28, %32 : vector<512x144xf32>
    %34 = vector.extract_strided_slice %4 {offsets = [0, 36], sizes = [3, 144], strides = [1, 1]} : vector<3x256xbf16> to vector<3x144xbf16>
    %c6 = arith.constant 6 : index
    %c0_22 = arith.constant 0 : index
    %c0_23 = arith.constant 0 : index
    %35 = vector.load %arg3[%c6, %c0_22, %c0_23] : memref<9x512x3xbf16, #tpu.memory_space<vmem>>, vector<1x512x3xbf16>
    %36 = vector.shape_cast %35 : vector<1x512x3xbf16> to vector<512x3xbf16>
    %cst_24 = arith.constant dense<0.000000e+00> : vector<512x144xf32>
    %37 = tpu.matmul %36, %34, %cst_24 {dimension_numbers = #tpu.dot_dimension_numbers<[1], [0], [0], [1], [0, 0, 1, 1], [], []>} : vector<512x3xbf16>, vector<3x144xbf16>, vector<512x144xf32> -> vector<512x144xf32>
    %38 = arith.addf %33, %37 : vector<512x144xf32>
    %39 = vector.extract_strided_slice %4 {offsets = [0, 37], sizes = [3, 144], strides = [1, 1]} : vector<3x256xbf16> to vector<3x144xbf16>
    %c7 = arith.constant 7 : index
    %c0_25 = arith.constant 0 : index
    %c0_26 = arith.constant 0 : index
    %40 = vector.load %arg3[%c7, %c0_25, %c0_26] : memref<9x512x3xbf16, #tpu.memory_space<vmem>>, vector<1x512x3xbf16>
    %41 = vector.shape_cast %40 : vector<1x512x3xbf16> to vector<512x3xbf16>
    %cst_27 = arith.constant dense<0.000000e+00> : vector<512x144xf32>
    %42 = tpu.matmul %41, %39, %cst_27 {dimension_numbers = #tpu.dot_dimension_numbers<[1], [0], [0], [1], [0, 0, 1, 1], [], []>} : vector<512x3xbf16>, vector<3x144xbf16>, vector<512x144xf32> -> vector<512x144xf32>
    %43 = arith.addf %38, %42 : vector<512x144xf32>
    %44 = vector.extract_strided_slice %4 {offsets = [0, 38], sizes = [3, 144], strides = [1, 1]} : vector<3x256xbf16> to vector<3x144xbf16>
    %c8 = arith.constant 8 : index
    %c0_28 = arith.constant 0 : index
    %c0_29 = arith.constant 0 : index
    %45 = vector.load %arg3[%c8, %c0_28, %c0_29] : memref<9x512x3xbf16, #tpu.memory_space<vmem>>, vector<1x512x3xbf16>
    %46 = vector.shape_cast %45 : vector<1x512x3xbf16> to vector<512x3xbf16>
    %cst_30 = arith.constant dense<0.000000e+00> : vector<512x144xf32>
    %47 = tpu.matmul %46, %44, %cst_30 {dimension_numbers = #tpu.dot_dimension_numbers<[1], [0], [0], [1], [0, 0, 1, 1], [], []>} : vector<512x3xbf16>, vector<3x144xbf16>, vector<512x144xf32> -> vector<512x144xf32>
    %48 = arith.addf %43, %47 : vector<512x144xf32>
    %c0_31 = arith.constant 0 : index
    %c0_32 = arith.constant 0 : index
    %49 = vector.load %arg4[%c0_31, %c0_32] : memref<512x1xf32, #tpu.memory_space<vmem>>, vector<512x1xf32>
    %50 = vector.broadcast %49 : vector<512x1xf32> to vector<512x144xf32>
    %51 = arith.addf %48, %50 : vector<512x144xf32>
    %cst_33 = arith.constant 0.000000e+00 : f32
    %52 = vector.broadcast %cst_33 : f32 to vector<512x144xf32>
    %53 = arith.maximumf %51, %52 : vector<512x144xf32>
    %c0_34 = arith.constant 0 : index
    %c0_35 = arith.constant 0 : index
    %54 = vector.load %arg5[%c0_34, %c0_35] : memref<1x144xf32, #tpu.memory_space<vmem>>, vector<1x144xf32>
    %55 = vector.broadcast %54 : vector<1x144xf32> to vector<512x144xf32>
    %56 = arith.mulf %53, %55 : vector<512x144xf32>
    %cst_36 = arith.constant dense<0.000000e+00> : vector<512xf32>
    %57 = vector.multi_reduction <add>, %56, %cst_36 [1] : vector<512x144xf32> to vector<512xf32>
    %58 = vector.shape_cast %57 : vector<512xf32> to vector<512x1xf32>
    %c0_37 = arith.constant 0 : index
    %c0_38 = arith.constant 0 : index
    %c0_39 = arith.constant 0 : index
    %59 = vector.load %arg6[%c0_37, %c0_38, %c0_39] : memref<1x1x512xf32, #tpu.memory_space<vmem>>, vector<1x1x512xf32>
    %60 = tpu.transpose %58, [1, 0] : vector<512x1xf32> -> vector<1x512xf32>
    %61 = vector.shape_cast %60 : vector<1x512xf32> to vector<1x1x512xf32>
    %62 = arith.addf %59, %61 : vector<1x1x512xf32>
    %c0_40 = arith.constant 0 : index
    %c0_41 = arith.constant 0 : index
    %c0_42 = arith.constant 0 : index
    %63 = vector.load %arg6[%c0_40, %c0_41, %c0_42] : memref<1x1x512xf32, #tpu.memory_space<vmem>>, vector<1x1x512xf32>
    tpu.vector_store %arg6[%c0_40, %c0_41, %c0_42], %62 {strides = array<i32>} : memref<1x1x512xf32, #tpu.memory_space<vmem>>, vector<1x1x512xf32>,
    return
  }
  func.func @transform_0(%arg0: i32, %arg1: i32) -> (i32, i32, i32, i32) {
    %c0_i32 = arith.constant 0 : i32
    %c0_i32_0 = arith.constant 0 : i32
    %c0_i32_1 = arith.constant 0 : i32
    return %arg0, %arg1, %c0_i32, %c0_i32_0 : i32, i32, i32, i32
  }
  func.func @transform_1(%arg0: i32, %arg1: i32) -> (i32, i32, i32) {
    %c0_i32 = arith.constant 0 : i32
    %c0_i32_0 = arith.constant 0 : i32
    %c0_i32_1 = arith.constant 0 : i32
    %c0_i32_2 = arith.constant 0 : i32
    return %c0_i32, %c0_i32_0, %c0_i32_1 : i32, i32, i32
  }
  func.func @transform_2(%arg0: i32, %arg1: i32) -> (i32, i32) {
    %c0_i32 = arith.constant 0 : i32
    %c0_i32_0 = arith.constant 0 : i32
    %c0_i32_1 = arith.constant 0 : i32
    return %c0_i32, %c0_i32_0 : i32, i32
  }
  func.func @transform_3(%arg0: i32, %arg1: i32) -> (i32, i32) {
    %c0_i32 = arith.constant 0 : i32
    %c0_i32_0 = arith.constant 0 : i32
    %c0_i32_1 = arith.constant 0 : i32
    return %c0_i32, %c0_i32_0 : i32, i32
  }
  func.func @transform_4(%arg0: i32, %arg1: i32) -> (i32, i32, i32) {
    %c0_i32 = arith.constant 0 : i32
    %c0_i32_0 = arith.constant 0 : i32
    %c0_i32_1 = arith.constant 0 : i32
    return %arg0, %c0_i32, %c0_i32_0 : i32, i32, i32
  }
}

module attributes {stable_mosaic.version = 11 : i64} {
  func.func @_head_kernel(%arg0: memref<2x512xf32, #tpu.memory_space<vmem>>, %arg1: memref<2x512xf32, #tpu.memory_space<vmem>>, %arg2: memref<1x512xf32, #tpu.memory_space<vmem>>, %arg3: memref<128xf32, #tpu.memory_space<smem>>, %arg4: memref<32xf32, #tpu.memory_space<smem>>, %arg5: memref<32xf32, #tpu.memory_space<smem>>, %arg6: memref<2xf32, #tpu.memory_space<smem>>, %arg7: memref<2x1xf32, #tpu.memory_space<vmem>>) attributes {dimension_semantics = [], scalar_prefetch = 0 : i64, scratch_operands = 0 : i64, tpu.core_type = #tpu.core_type<tc>} {
    %c0 = arith.constant 0 : index
    %c0_0 = arith.constant 0 : index
    %0 = vector.load %arg0[%c0, %c0_0] : memref<2x512xf32, #tpu.memory_space<vmem>>, vector<2x512xf32>
    %c0_1 = arith.constant 0 : index
    %c0_2 = arith.constant 0 : index
    %1 = vector.load %arg1[%c0_1, %c0_2] : memref<2x512xf32, #tpu.memory_space<vmem>>, vector<2x512xf32>
    %2 = arith.mulf %0, %1 : vector<2x512xf32>
    %3 = arith.addf %0, %1 : vector<2x512xf32>
    %4 = arith.subf %0, %1 : vector<2x512xf32>
    %5 = math.absf %4 : vector<2x512xf32>
    %6 = arith.mulf %4, %4 : vector<2x512xf32>
    %cst = arith.constant 0.000000e+00 : f32
    %7 = vector.broadcast %cst : f32 to vector<2x512xf32>
    %c0_3 = arith.constant 0 : index
    %8 = memref.load %arg3[%c0_3] : memref<128xf32, #tpu.memory_space<smem>>
    %9 = vector.broadcast %8 : f32 to vector<2x512xf32>
    %10 = arith.mulf %2, %9 : vector<2x512xf32>
    %c32 = arith.constant 32 : index
    %11 = memref.load %arg3[%c32] : memref<128xf32, #tpu.memory_space<smem>>
    %12 = vector.broadcast %11 : f32 to vector<2x512xf32>
    %13 = arith.mulf %3, %12 : vector<2x512xf32>
    %14 = arith.addf %10, %13 : vector<2x512xf32>
    %c64 = arith.constant 64 : index
    %15 = memref.load %arg3[%c64] : memref<128xf32, #tpu.memory_space<smem>>
    %16 = vector.broadcast %15 : f32 to vector<2x512xf32>
    %17 = arith.mulf %5, %16 : vector<2x512xf32>
    %18 = arith.addf %14, %17 : vector<2x512xf32>
    %c96 = arith.constant 96 : index
    %19 = memref.load %arg3[%c96] : memref<128xf32, #tpu.memory_space<smem>>
    %20 = vector.broadcast %19 : f32 to vector<2x512xf32>
    %21 = arith.mulf %6, %20 : vector<2x512xf32>
    %22 = arith.addf %18, %21 : vector<2x512xf32>
    %c0_4 = arith.constant 0 : index
    %23 = memref.load %arg4[%c0_4] : memref<32xf32, #tpu.memory_space<smem>>
    %24 = vector.broadcast %23 : f32 to vector<2x512xf32>
    %25 = arith.addf %22, %24 : vector<2x512xf32>
    %cst_5 = arith.constant 0.000000e+00 : f32
    %26 = vector.broadcast %cst_5 : f32 to vector<2x512xf32>
    %27 = arith.maximumf %25, %26 : vector<2x512xf32>
    %c0_6 = arith.constant 0 : index
    %28 = memref.load %arg5[%c0_6] : memref<32xf32, #tpu.memory_space<smem>>
    %29 = vector.broadcast %28 : f32 to vector<2x512xf32>
    %30 = arith.mulf %27, %29 : vector<2x512xf32>
    %31 = arith.addf %7, %30 : vector<2x512xf32>
    %c1 = arith.constant 1 : index
    %32 = memref.load %arg3[%c1] : memref<128xf32, #tpu.memory_space<smem>>
    %33 = vector.broadcast %32 : f32 to vector<2x512xf32>
    %34 = arith.mulf %2, %33 : vector<2x512xf32>
    %c33 = arith.constant 33 : index
    %35 = memref.load %arg3[%c33] : memref<128xf32, #tpu.memory_space<smem>>
    %36 = vector.broadcast %35 : f32 to vector<2x512xf32>
    %37 = arith.mulf %3, %36 : vector<2x512xf32>
    %38 = arith.addf %34, %37 : vector<2x512xf32>
    %c65 = arith.constant 65 : index
    %39 = memref.load %arg3[%c65] : memref<128xf32, #tpu.memory_space<smem>>
    %40 = vector.broadcast %39 : f32 to vector<2x512xf32>
    %41 = arith.mulf %5, %40 : vector<2x512xf32>
    %42 = arith.addf %38, %41 : vector<2x512xf32>
    %c97 = arith.constant 97 : index
    %43 = memref.load %arg3[%c97] : memref<128xf32, #tpu.memory_space<smem>>
    %44 = vector.broadcast %43 : f32 to vector<2x512xf32>
    %45 = arith.mulf %6, %44 : vector<2x512xf32>
    %46 = arith.addf %42, %45 : vector<2x512xf32>
    %c1_7 = arith.constant 1 : index
    %47 = memref.load %arg4[%c1_7] : memref<32xf32, #tpu.memory_space<smem>>
    %48 = vector.broadcast %47 : f32 to vector<2x512xf32>
    %49 = arith.addf %46, %48 : vector<2x512xf32>
    %cst_8 = arith.constant 0.000000e+00 : f32
    %50 = vector.broadcast %cst_8 : f32 to vector<2x512xf32>
    %51 = arith.maximumf %49, %50 : vector<2x512xf32>
    %c1_9 = arith.constant 1 : index
    %52 = memref.load %arg5[%c1_9] : memref<32xf32, #tpu.memory_space<smem>>
    %53 = vector.broadcast %52 : f32 to vector<2x512xf32>
    %54 = arith.mulf %51, %53 : vector<2x512xf32>
    %55 = arith.addf %31, %54 : vector<2x512xf32>
    %c2 = arith.constant 2 : index
    %56 = memref.load %arg3[%c2] : memref<128xf32, #tpu.memory_space<smem>>
    %57 = vector.broadcast %56 : f32 to vector<2x512xf32>
    %58 = arith.mulf %2, %57 : vector<2x512xf32>
    %c34 = arith.constant 34 : index
    %59 = memref.load %arg3[%c34] : memref<128xf32, #tpu.memory_space<smem>>
    %60 = vector.broadcast %59 : f32 to vector<2x512xf32>
    %61 = arith.mulf %3, %60 : vector<2x512xf32>
    %62 = arith.addf %58, %61 : vector<2x512xf32>
    %c66 = arith.constant 66 : index
    %63 = memref.load %arg3[%c66] : memref<128xf32, #tpu.memory_space<smem>>
    %64 = vector.broadcast %63 : f32 to vector<2x512xf32>
    %65 = arith.mulf %5, %64 : vector<2x512xf32>
    %66 = arith.addf %62, %65 : vector<2x512xf32>
    %c98 = arith.constant 98 : index
    %67 = memref.load %arg3[%c98] : memref<128xf32, #tpu.memory_space<smem>>
    %68 = vector.broadcast %67 : f32 to vector<2x512xf32>
    %69 = arith.mulf %6, %68 : vector<2x512xf32>
    %70 = arith.addf %66, %69 : vector<2x512xf32>
    %c2_10 = arith.constant 2 : index
    %71 = memref.load %arg4[%c2_10] : memref<32xf32, #tpu.memory_space<smem>>
    %72 = vector.broadcast %71 : f32 to vector<2x512xf32>
    %73 = arith.addf %70, %72 : vector<2x512xf32>
    %cst_11 = arith.constant 0.000000e+00 : f32
    %74 = vector.broadcast %cst_11 : f32 to vector<2x512xf32>
    %75 = arith.maximumf %73, %74 : vector<2x512xf32>
    %c2_12 = arith.constant 2 : index
    %76 = memref.load %arg5[%c2_12] : memref<32xf32, #tpu.memory_space<smem>>
    %77 = vector.broadcast %76 : f32 to vector<2x512xf32>
    %78 = arith.mulf %75, %77 : vector<2x512xf32>
    %79 = arith.addf %55, %78 : vector<2x512xf32>
    %c3 = arith.constant 3 : index
    %80 = memref.load %arg3[%c3] : memref<128xf32, #tpu.memory_space<smem>>
    %81 = vector.broadcast %80 : f32 to vector<2x512xf32>
    %82 = arith.mulf %2, %81 : vector<2x512xf32>
    %c35 = arith.constant 35 : index
    %83 = memref.load %arg3[%c35] : memref<128xf32, #tpu.memory_space<smem>>
    %84 = vector.broadcast %83 : f32 to vector<2x512xf32>
    %85 = arith.mulf %3, %84 : vector<2x512xf32>
    %86 = arith.addf %82, %85 : vector<2x512xf32>
    %c67 = arith.constant 67 : index
    %87 = memref.load %arg3[%c67] : memref<128xf32, #tpu.memory_space<smem>>
    %88 = vector.broadcast %87 : f32 to vector<2x512xf32>
    %89 = arith.mulf %5, %88 : vector<2x512xf32>
    %90 = arith.addf %86, %89 : vector<2x512xf32>
    %c99 = arith.constant 99 : index
    %91 = memref.load %arg3[%c99] : memref<128xf32, #tpu.memory_space<smem>>
    %92 = vector.broadcast %91 : f32 to vector<2x512xf32>
    %93 = arith.mulf %6, %92 : vector<2x512xf32>
    %94 = arith.addf %90, %93 : vector<2x512xf32>
    %c3_13 = arith.constant 3 : index
    %95 = memref.load %arg4[%c3_13] : memref<32xf32, #tpu.memory_space<smem>>
    %96 = vector.broadcast %95 : f32 to vector<2x512xf32>
    %97 = arith.addf %94, %96 : vector<2x512xf32>
    %cst_14 = arith.constant 0.000000e+00 : f32
    %98 = vector.broadcast %cst_14 : f32 to vector<2x512xf32>
    %99 = arith.maximumf %97, %98 : vector<2x512xf32>
    %c3_15 = arith.constant 3 : index
    %100 = memref.load %arg5[%c3_15] : memref<32xf32, #tpu.memory_space<smem>>
    %101 = vector.broadcast %100 : f32 to vector<2x512xf32>
    %102 = arith.mulf %99, %101 : vector<2x512xf32>
    %103 = arith.addf %79, %102 : vector<2x512xf32>
    %c4 = arith.constant 4 : index
    %104 = memref.load %arg3[%c4] : memref<128xf32, #tpu.memory_space<smem>>
    %105 = vector.broadcast %104 : f32 to vector<2x512xf32>
    %106 = arith.mulf %2, %105 : vector<2x512xf32>
    %c36 = arith.constant 36 : index
    %107 = memref.load %arg3[%c36] : memref<128xf32, #tpu.memory_space<smem>>
    %108 = vector.broadcast %107 : f32 to vector<2x512xf32>
    %109 = arith.mulf %3, %108 : vector<2x512xf32>
    %110 = arith.addf %106, %109 : vector<2x512xf32>
    %c68 = arith.constant 68 : index
    %111 = memref.load %arg3[%c68] : memref<128xf32, #tpu.memory_space<smem>>
    %112 = vector.broadcast %111 : f32 to vector<2x512xf32>
    %113 = arith.mulf %5, %112 : vector<2x512xf32>
    %114 = arith.addf %110, %113 : vector<2x512xf32>
    %c100 = arith.constant 100 : index
    %115 = memref.load %arg3[%c100] : memref<128xf32, #tpu.memory_space<smem>>
    %116 = vector.broadcast %115 : f32 to vector<2x512xf32>
    %117 = arith.mulf %6, %116 : vector<2x512xf32>
    %118 = arith.addf %114, %117 : vector<2x512xf32>
    %c4_16 = arith.constant 4 : index
    %119 = memref.load %arg4[%c4_16] : memref<32xf32, #tpu.memory_space<smem>>
    %120 = vector.broadcast %119 : f32 to vector<2x512xf32>
    %121 = arith.addf %118, %120 : vector<2x512xf32>
    %cst_17 = arith.constant 0.000000e+00 : f32
    %122 = vector.broadcast %cst_17 : f32 to vector<2x512xf32>
    %123 = arith.maximumf %121, %122 : vector<2x512xf32>
    %c4_18 = arith.constant 4 : index
    %124 = memref.load %arg5[%c4_18] : memref<32xf32, #tpu.memory_space<smem>>
    %125 = vector.broadcast %124 : f32 to vector<2x512xf32>
    %126 = arith.mulf %123, %125 : vector<2x512xf32>
    %127 = arith.addf %103, %126 : vector<2x512xf32>
    %c5 = arith.constant 5 : index
    %128 = memref.load %arg3[%c5] : memref<128xf32, #tpu.memory_space<smem>>
    %129 = vector.broadcast %128 : f32 to vector<2x512xf32>
    %130 = arith.mulf %2, %129 : vector<2x512xf32>
    %c37 = arith.constant 37 : index
    %131 = memref.load %arg3[%c37] : memref<128xf32, #tpu.memory_space<smem>>
    %132 = vector.broadcast %131 : f32 to vector<2x512xf32>
    %133 = arith.mulf %3, %132 : vector<2x512xf32>
    %134 = arith.addf %130, %133 : vector<2x512xf32>
    %c69 = arith.constant 69 : index
    %135 = memref.load %arg3[%c69] : memref<128xf32, #tpu.memory_space<smem>>
    %136 = vector.broadcast %135 : f32 to vector<2x512xf32>
    %137 = arith.mulf %5, %136 : vector<2x512xf32>
    %138 = arith.addf %134, %137 : vector<2x512xf32>
    %c101 = arith.constant 101 : index
    %139 = memref.load %arg3[%c101] : memref<128xf32, #tpu.memory_space<smem>>
    %140 = vector.broadcast %139 : f32 to vector<2x512xf32>
    %141 = arith.mulf %6, %140 : vector<2x512xf32>
    %142 = arith.addf %138, %141 : vector<2x512xf32>
    %c5_19 = arith.constant 5 : index
    %143 = memref.load %arg4[%c5_19] : memref<32xf32, #tpu.memory_space<smem>>
    %144 = vector.broadcast %143 : f32 to vector<2x512xf32>
    %145 = arith.addf %142, %144 : vector<2x512xf32>
    %cst_20 = arith.constant 0.000000e+00 : f32
    %146 = vector.broadcast %cst_20 : f32 to vector<2x512xf32>
    %147 = arith.maximumf %145, %146 : vector<2x512xf32>
    %c5_21 = arith.constant 5 : index
    %148 = memref.load %arg5[%c5_21] : memref<32xf32, #tpu.memory_space<smem>>
    %149 = vector.broadcast %148 : f32 to vector<2x512xf32>
    %150 = arith.mulf %147, %149 : vector<2x512xf32>
    %151 = arith.addf %127, %150 : vector<2x512xf32>
    %c6 = arith.constant 6 : index
    %152 = memref.load %arg3[%c6] : memref<128xf32, #tpu.memory_space<smem>>
    %153 = vector.broadcast %152 : f32 to vector<2x512xf32>
    %154 = arith.mulf %2, %153 : vector<2x512xf32>
    %c38 = arith.constant 38 : index
    %155 = memref.load %arg3[%c38] : memref<128xf32, #tpu.memory_space<smem>>
    %156 = vector.broadcast %155 : f32 to vector<2x512xf32>
    %157 = arith.mulf %3, %156 : vector<2x512xf32>
    %158 = arith.addf %154, %157 : vector<2x512xf32>
    %c70 = arith.constant 70 : index
    %159 = memref.load %arg3[%c70] : memref<128xf32, #tpu.memory_space<smem>>
    %160 = vector.broadcast %159 : f32 to vector<2x512xf32>
    %161 = arith.mulf %5, %160 : vector<2x512xf32>
    %162 = arith.addf %158, %161 : vector<2x512xf32>
    %c102 = arith.constant 102 : index
    %163 = memref.load %arg3[%c102] : memref<128xf32, #tpu.memory_space<smem>>
    %164 = vector.broadcast %163 : f32 to vector<2x512xf32>
    %165 = arith.mulf %6, %164 : vector<2x512xf32>
    %166 = arith.addf %162, %165 : vector<2x512xf32>
    %c6_22 = arith.constant 6 : index
    %167 = memref.load %arg4[%c6_22] : memref<32xf32, #tpu.memory_space<smem>>
    %168 = vector.broadcast %167 : f32 to vector<2x512xf32>
    %169 = arith.addf %166, %168 : vector<2x512xf32>
    %cst_23 = arith.constant 0.000000e+00 : f32
    %170 = vector.broadcast %cst_23 : f32 to vector<2x512xf32>
    %171 = arith.maximumf %169, %170 : vector<2x512xf32>
    %c6_24 = arith.constant 6 : index
    %172 = memref.load %arg5[%c6_24] : memref<32xf32, #tpu.memory_space<smem>>
    %173 = vector.broadcast %172 : f32 to vector<2x512xf32>
    %174 = arith.mulf %171, %173 : vector<2x512xf32>
    %175 = arith.addf %151, %174 : vector<2x512xf32>
    %c7 = arith.constant 7 : index
    %176 = memref.load %arg3[%c7] : memref<128xf32, #tpu.memory_space<smem>>
    %177 = vector.broadcast %176 : f32 to vector<2x512xf32>
    %178 = arith.mulf %2, %177 : vector<2x512xf32>
    %c39 = arith.constant 39 : index
    %179 = memref.load %arg3[%c39] : memref<128xf32, #tpu.memory_space<smem>>
    %180 = vector.broadcast %179 : f32 to vector<2x512xf32>
    %181 = arith.mulf %3, %180 : vector<2x512xf32>
    %182 = arith.addf %178, %181 : vector<2x512xf32>
    %c71 = arith.constant 71 : index
    %183 = memref.load %arg3[%c71] : memref<128xf32, #tpu.memory_space<smem>>
    %184 = vector.broadcast %183 : f32 to vector<2x512xf32>
    %185 = arith.mulf %5, %184 : vector<2x512xf32>
    %186 = arith.addf %182, %185 : vector<2x512xf32>
    %c103 = arith.constant 103 : index
    %187 = memref.load %arg3[%c103] : memref<128xf32, #tpu.memory_space<smem>>
    %188 = vector.broadcast %187 : f32 to vector<2x512xf32>
    %189 = arith.mulf %6, %188 : vector<2x512xf32>
    %190 = arith.addf %186, %189 : vector<2x512xf32>
    %c7_25 = arith.constant 7 : index
    %191 = memref.load %arg4[%c7_25] : memref<32xf32, #tpu.memory_space<smem>>
    %192 = vector.broadcast %191 : f32 to vector<2x512xf32>
    %193 = arith.addf %190, %192 : vector<2x512xf32>
    %cst_26 = arith.constant 0.000000e+00 : f32
    %194 = vector.broadcast %cst_26 : f32 to vector<2x512xf32>
    %195 = arith.maximumf %193, %194 : vector<2x512xf32>
    %c7_27 = arith.constant 7 : index
    %196 = memref.load %arg5[%c7_27] : memref<32xf32, #tpu.memory_space<smem>>
    %197 = vector.broadcast %196 : f32 to vector<2x512xf32>
    %198 = arith.mulf %195, %197 : vector<2x512xf32>
    %199 = arith.addf %175, %198 : vector<2x512xf32>
    %c8 = arith.constant 8 : index
    %200 = memref.load %arg3[%c8] : memref<128xf32, #tpu.memory_space<smem>>
    %201 = vector.broadcast %200 : f32 to vector<2x512xf32>
    %202 = arith.mulf %2, %201 : vector<2x512xf32>
    %c40 = arith.constant 40 : index
    %203 = memref.load %arg3[%c40] : memref<128xf32, #tpu.memory_space<smem>>
    %204 = vector.broadcast %203 : f32 to vector<2x512xf32>
    %205 = arith.mulf %3, %204 : vector<2x512xf32>
    %206 = arith.addf %202, %205 : vector<2x512xf32>
    %c72 = arith.constant 72 : index
    %207 = memref.load %arg3[%c72] : memref<128xf32, #tpu.memory_space<smem>>
    %208 = vector.broadcast %207 : f32 to vector<2x512xf32>
    %209 = arith.mulf %5, %208 : vector<2x512xf32>
    %210 = arith.addf %206, %209 : vector<2x512xf32>
    %c104 = arith.constant 104 : index
    %211 = memref.load %arg3[%c104] : memref<128xf32, #tpu.memory_space<smem>>
    %212 = vector.broadcast %211 : f32 to vector<2x512xf32>
    %213 = arith.mulf %6, %212 : vector<2x512xf32>
    %214 = arith.addf %210, %213 : vector<2x512xf32>
    %c8_28 = arith.constant 8 : index
    %215 = memref.load %arg4[%c8_28] : memref<32xf32, #tpu.memory_space<smem>>
    %216 = vector.broadcast %215 : f32 to vector<2x512xf32>
    %217 = arith.addf %214, %216 : vector<2x512xf32>
    %cst_29 = arith.constant 0.000000e+00 : f32
    %218 = vector.broadcast %cst_29 : f32 to vector<2x512xf32>
    %219 = arith.maximumf %217, %218 : vector<2x512xf32>
    %c8_30 = arith.constant 8 : index
    %220 = memref.load %arg5[%c8_30] : memref<32xf32, #tpu.memory_space<smem>>
    %221 = vector.broadcast %220 : f32 to vector<2x512xf32>
    %222 = arith.mulf %219, %221 : vector<2x512xf32>
    %223 = arith.addf %199, %222 : vector<2x512xf32>
    %c9 = arith.constant 9 : index
    %224 = memref.load %arg3[%c9] : memref<128xf32, #tpu.memory_space<smem>>
    %225 = vector.broadcast %224 : f32 to vector<2x512xf32>
    %226 = arith.mulf %2, %225 : vector<2x512xf32>
    %c41 = arith.constant 41 : index
    %227 = memref.load %arg3[%c41] : memref<128xf32, #tpu.memory_space<smem>>
    %228 = vector.broadcast %227 : f32 to vector<2x512xf32>
    %229 = arith.mulf %3, %228 : vector<2x512xf32>
    %230 = arith.addf %226, %229 : vector<2x512xf32>
    %c73 = arith.constant 73 : index
    %231 = memref.load %arg3[%c73] : memref<128xf32, #tpu.memory_space<smem>>
    %232 = vector.broadcast %231 : f32 to vector<2x512xf32>
    %233 = arith.mulf %5, %232 : vector<2x512xf32>
    %234 = arith.addf %230, %233 : vector<2x512xf32>
    %c105 = arith.constant 105 : index
    %235 = memref.load %arg3[%c105] : memref<128xf32, #tpu.memory_space<smem>>
    %236 = vector.broadcast %235 : f32 to vector<2x512xf32>
    %237 = arith.mulf %6, %236 : vector<2x512xf32>
    %238 = arith.addf %234, %237 : vector<2x512xf32>
    %c9_31 = arith.constant 9 : index
    %239 = memref.load %arg4[%c9_31] : memref<32xf32, #tpu.memory_space<smem>>
    %240 = vector.broadcast %239 : f32 to vector<2x512xf32>
    %241 = arith.addf %238, %240 : vector<2x512xf32>
    %cst_32 = arith.constant 0.000000e+00 : f32
    %242 = vector.broadcast %cst_32 : f32 to vector<2x512xf32>
    %243 = arith.maximumf %241, %242 : vector<2x512xf32>
    %c9_33 = arith.constant 9 : index
    %244 = memref.load %arg5[%c9_33] : memref<32xf32, #tpu.memory_space<smem>>
    %245 = vector.broadcast %244 : f32 to vector<2x512xf32>
    %246 = arith.mulf %243, %245 : vector<2x512xf32>
    %247 = arith.addf %223, %246 : vector<2x512xf32>
    %c10 = arith.constant 10 : index
    %248 = memref.load %arg3[%c10] : memref<128xf32, #tpu.memory_space<smem>>
    %249 = vector.broadcast %248 : f32 to vector<2x512xf32>
    %250 = arith.mulf %2, %249 : vector<2x512xf32>
    %c42 = arith.constant 42 : index
    %251 = memref.load %arg3[%c42] : memref<128xf32, #tpu.memory_space<smem>>
    %252 = vector.broadcast %251 : f32 to vector<2x512xf32>
    %253 = arith.mulf %3, %252 : vector<2x512xf32>
    %254 = arith.addf %250, %253 : vector<2x512xf32>
    %c74 = arith.constant 74 : index
    %255 = memref.load %arg3[%c74] : memref<128xf32, #tpu.memory_space<smem>>
    %256 = vector.broadcast %255 : f32 to vector<2x512xf32>
    %257 = arith.mulf %5, %256 : vector<2x512xf32>
    %258 = arith.addf %254, %257 : vector<2x512xf32>
    %c106 = arith.constant 106 : index
    %259 = memref.load %arg3[%c106] : memref<128xf32, #tpu.memory_space<smem>>
    %260 = vector.broadcast %259 : f32 to vector<2x512xf32>
    %261 = arith.mulf %6, %260 : vector<2x512xf32>
    %262 = arith.addf %258, %261 : vector<2x512xf32>
    %c10_34 = arith.constant 10 : index
    %263 = memref.load %arg4[%c10_34] : memref<32xf32, #tpu.memory_space<smem>>
    %264 = vector.broadcast %263 : f32 to vector<2x512xf32>
    %265 = arith.addf %262, %264 : vector<2x512xf32>
    %cst_35 = arith.constant 0.000000e+00 : f32
    %266 = vector.broadcast %cst_35 : f32 to vector<2x512xf32>
    %267 = arith.maximumf %265, %266 : vector<2x512xf32>
    %c10_36 = arith.constant 10 : index
    %268 = memref.load %arg5[%c10_36] : memref<32xf32, #tpu.memory_space<smem>>
    %269 = vector.broadcast %268 : f32 to vector<2x512xf32>
    %270 = arith.mulf %267, %269 : vector<2x512xf32>
    %271 = arith.addf %247, %270 : vector<2x512xf32>
    %c11 = arith.constant 11 : index
    %272 = memref.load %arg3[%c11] : memref<128xf32, #tpu.memory_space<smem>>
    %273 = vector.broadcast %272 : f32 to vector<2x512xf32>
    %274 = arith.mulf %2, %273 : vector<2x512xf32>
    %c43 = arith.constant 43 : index
    %275 = memref.load %arg3[%c43] : memref<128xf32, #tpu.memory_space<smem>>
    %276 = vector.broadcast %275 : f32 to vector<2x512xf32>
    %277 = arith.mulf %3, %276 : vector<2x512xf32>
    %278 = arith.addf %274, %277 : vector<2x512xf32>
    %c75 = arith.constant 75 : index
    %279 = memref.load %arg3[%c75] : memref<128xf32, #tpu.memory_space<smem>>
    %280 = vector.broadcast %279 : f32 to vector<2x512xf32>
    %281 = arith.mulf %5, %280 : vector<2x512xf32>
    %282 = arith.addf %278, %281 : vector<2x512xf32>
    %c107 = arith.constant 107 : index
    %283 = memref.load %arg3[%c107] : memref<128xf32, #tpu.memory_space<smem>>
    %284 = vector.broadcast %283 : f32 to vector<2x512xf32>
    %285 = arith.mulf %6, %284 : vector<2x512xf32>
    %286 = arith.addf %282, %285 : vector<2x512xf32>
    %c11_37 = arith.constant 11 : index
    %287 = memref.load %arg4[%c11_37] : memref<32xf32, #tpu.memory_space<smem>>
    %288 = vector.broadcast %287 : f32 to vector<2x512xf32>
    %289 = arith.addf %286, %288 : vector<2x512xf32>
    %cst_38 = arith.constant 0.000000e+00 : f32
    %290 = vector.broadcast %cst_38 : f32 to vector<2x512xf32>
    %291 = arith.maximumf %289, %290 : vector<2x512xf32>
    %c11_39 = arith.constant 11 : index
    %292 = memref.load %arg5[%c11_39] : memref<32xf32, #tpu.memory_space<smem>>
    %293 = vector.broadcast %292 : f32 to vector<2x512xf32>
    %294 = arith.mulf %291, %293 : vector<2x512xf32>
    %295 = arith.addf %271, %294 : vector<2x512xf32>
    %c12 = arith.constant 12 : index
    %296 = memref.load %arg3[%c12] : memref<128xf32, #tpu.memory_space<smem>>
    %297 = vector.broadcast %296 : f32 to vector<2x512xf32>
    %298 = arith.mulf %2, %297 : vector<2x512xf32>
    %c44 = arith.constant 44 : index
    %299 = memref.load %arg3[%c44] : memref<128xf32, #tpu.memory_space<smem>>
    %300 = vector.broadcast %299 : f32 to vector<2x512xf32>
    %301 = arith.mulf %3, %300 : vector<2x512xf32>
    %302 = arith.addf %298, %301 : vector<2x512xf32>
    %c76 = arith.constant 76 : index
    %303 = memref.load %arg3[%c76] : memref<128xf32, #tpu.memory_space<smem>>
    %304 = vector.broadcast %303 : f32 to vector<2x512xf32>
    %305 = arith.mulf %5, %304 : vector<2x512xf32>
    %306 = arith.addf %302, %305 : vector<2x512xf32>
    %c108 = arith.constant 108 : index
    %307 = memref.load %arg3[%c108] : memref<128xf32, #tpu.memory_space<smem>>
    %308 = vector.broadcast %307 : f32 to vector<2x512xf32>
    %309 = arith.mulf %6, %308 : vector<2x512xf32>
    %310 = arith.addf %306, %309 : vector<2x512xf32>
    %c12_40 = arith.constant 12 : index
    %311 = memref.load %arg4[%c12_40] : memref<32xf32, #tpu.memory_space<smem>>
    %312 = vector.broadcast %311 : f32 to vector<2x512xf32>
    %313 = arith.addf %310, %312 : vector<2x512xf32>
    %cst_41 = arith.constant 0.000000e+00 : f32
    %314 = vector.broadcast %cst_41 : f32 to vector<2x512xf32>
    %315 = arith.maximumf %313, %314 : vector<2x512xf32>
    %c12_42 = arith.constant 12 : index
    %316 = memref.load %arg5[%c12_42] : memref<32xf32, #tpu.memory_space<smem>>
    %317 = vector.broadcast %316 : f32 to vector<2x512xf32>
    %318 = arith.mulf %315, %317 : vector<2x512xf32>
    %319 = arith.addf %295, %318 : vector<2x512xf32>
    %c13 = arith.constant 13 : index
    %320 = memref.load %arg3[%c13] : memref<128xf32, #tpu.memory_space<smem>>
    %321 = vector.broadcast %320 : f32 to vector<2x512xf32>
    %322 = arith.mulf %2, %321 : vector<2x512xf32>
    %c45 = arith.constant 45 : index
    %323 = memref.load %arg3[%c45] : memref<128xf32, #tpu.memory_space<smem>>
    %324 = vector.broadcast %323 : f32 to vector<2x512xf32>
    %325 = arith.mulf %3, %324 : vector<2x512xf32>
    %326 = arith.addf %322, %325 : vector<2x512xf32>
    %c77 = arith.constant 77 : index
    %327 = memref.load %arg3[%c77] : memref<128xf32, #tpu.memory_space<smem>>
    %328 = vector.broadcast %327 : f32 to vector<2x512xf32>
    %329 = arith.mulf %5, %328 : vector<2x512xf32>
    %330 = arith.addf %326, %329 : vector<2x512xf32>
    %c109 = arith.constant 109 : index
    %331 = memref.load %arg3[%c109] : memref<128xf32, #tpu.memory_space<smem>>
    %332 = vector.broadcast %331 : f32 to vector<2x512xf32>
    %333 = arith.mulf %6, %332 : vector<2x512xf32>
    %334 = arith.addf %330, %333 : vector<2x512xf32>
    %c13_43 = arith.constant 13 : index
    %335 = memref.load %arg4[%c13_43] : memref<32xf32, #tpu.memory_space<smem>>
    %336 = vector.broadcast %335 : f32 to vector<2x512xf32>
    %337 = arith.addf %334, %336 : vector<2x512xf32>
    %cst_44 = arith.constant 0.000000e+00 : f32
    %338 = vector.broadcast %cst_44 : f32 to vector<2x512xf32>
    %339 = arith.maximumf %337, %338 : vector<2x512xf32>
    %c13_45 = arith.constant 13 : index
    %340 = memref.load %arg5[%c13_45] : memref<32xf32, #tpu.memory_space<smem>>
    %341 = vector.broadcast %340 : f32 to vector<2x512xf32>
    %342 = arith.mulf %339, %341 : vector<2x512xf32>
    %343 = arith.addf %319, %342 : vector<2x512xf32>
    %c14 = arith.constant 14 : index
    %344 = memref.load %arg3[%c14] : memref<128xf32, #tpu.memory_space<smem>>
    %345 = vector.broadcast %344 : f32 to vector<2x512xf32>
    %346 = arith.mulf %2, %345 : vector<2x512xf32>
    %c46 = arith.constant 46 : index
    %347 = memref.load %arg3[%c46] : memref<128xf32, #tpu.memory_space<smem>>
    %348 = vector.broadcast %347 : f32 to vector<2x512xf32>
    %349 = arith.mulf %3, %348 : vector<2x512xf32>
    %350 = arith.addf %346, %349 : vector<2x512xf32>
    %c78 = arith.constant 78 : index
    %351 = memref.load %arg3[%c78] : memref<128xf32, #tpu.memory_space<smem>>
    %352 = vector.broadcast %351 : f32 to vector<2x512xf32>
    %353 = arith.mulf %5, %352 : vector<2x512xf32>
    %354 = arith.addf %350, %353 : vector<2x512xf32>
    %c110 = arith.constant 110 : index
    %355 = memref.load %arg3[%c110] : memref<128xf32, #tpu.memory_space<smem>>
    %356 = vector.broadcast %355 : f32 to vector<2x512xf32>
    %357 = arith.mulf %6, %356 : vector<2x512xf32>
    %358 = arith.addf %354, %357 : vector<2x512xf32>
    %c14_46 = arith.constant 14 : index
    %359 = memref.load %arg4[%c14_46] : memref<32xf32, #tpu.memory_space<smem>>
    %360 = vector.broadcast %359 : f32 to vector<2x512xf32>
    %361 = arith.addf %358, %360 : vector<2x512xf32>
    %cst_47 = arith.constant 0.000000e+00 : f32
    %362 = vector.broadcast %cst_47 : f32 to vector<2x512xf32>
    %363 = arith.maximumf %361, %362 : vector<2x512xf32>
    %c14_48 = arith.constant 14 : index
    %364 = memref.load %arg5[%c14_48] : memref<32xf32, #tpu.memory_space<smem>>
    %365 = vector.broadcast %364 : f32 to vector<2x512xf32>
    %366 = arith.mulf %363, %365 : vector<2x512xf32>
    %367 = arith.addf %343, %366 : vector<2x512xf32>
    %c15 = arith.constant 15 : index
    %368 = memref.load %arg3[%c15] : memref<128xf32, #tpu.memory_space<smem>>
    %369 = vector.broadcast %368 : f32 to vector<2x512xf32>
    %370 = arith.mulf %2, %369 : vector<2x512xf32>
    %c47 = arith.constant 47 : index
    %371 = memref.load %arg3[%c47] : memref<128xf32, #tpu.memory_space<smem>>
    %372 = vector.broadcast %371 : f32 to vector<2x512xf32>
    %373 = arith.mulf %3, %372 : vector<2x512xf32>
    %374 = arith.addf %370, %373 : vector<2x512xf32>
    %c79 = arith.constant 79 : index
    %375 = memref.load %arg3[%c79] : memref<128xf32, #tpu.memory_space<smem>>
    %376 = vector.broadcast %375 : f32 to vector<2x512xf32>
    %377 = arith.mulf %5, %376 : vector<2x512xf32>
    %378 = arith.addf %374, %377 : vector<2x512xf32>
    %c111 = arith.constant 111 : index
    %379 = memref.load %arg3[%c111] : memref<128xf32, #tpu.memory_space<smem>>
    %380 = vector.broadcast %379 : f32 to vector<2x512xf32>
    %381 = arith.mulf %6, %380 : vector<2x512xf32>
    %382 = arith.addf %378, %381 : vector<2x512xf32>
    %c15_49 = arith.constant 15 : index
    %383 = memref.load %arg4[%c15_49] : memref<32xf32, #tpu.memory_space<smem>>
    %384 = vector.broadcast %383 : f32 to vector<2x512xf32>
    %385 = arith.addf %382, %384 : vector<2x512xf32>
    %cst_50 = arith.constant 0.000000e+00 : f32
    %386 = vector.broadcast %cst_50 : f32 to vector<2x512xf32>
    %387 = arith.maximumf %385, %386 : vector<2x512xf32>
    %c15_51 = arith.constant 15 : index
    %388 = memref.load %arg5[%c15_51] : memref<32xf32, #tpu.memory_space<smem>>
    %389 = vector.broadcast %388 : f32 to vector<2x512xf32>
    %390 = arith.mulf %387, %389 : vector<2x512xf32>
    %391 = arith.addf %367, %390 : vector<2x512xf32>
    %c16 = arith.constant 16 : index
    %392 = memref.load %arg3[%c16] : memref<128xf32, #tpu.memory_space<smem>>
    %393 = vector.broadcast %392 : f32 to vector<2x512xf32>
    %394 = arith.mulf %2, %393 : vector<2x512xf32>
    %c48 = arith.constant 48 : index
    %395 = memref.load %arg3[%c48] : memref<128xf32, #tpu.memory_space<smem>>
    %396 = vector.broadcast %395 : f32 to vector<2x512xf32>
    %397 = arith.mulf %3, %396 : vector<2x512xf32>
    %398 = arith.addf %394, %397 : vector<2x512xf32>
    %c80 = arith.constant 80 : index
    %399 = memref.load %arg3[%c80] : memref<128xf32, #tpu.memory_space<smem>>
    %400 = vector.broadcast %399 : f32 to vector<2x512xf32>
    %401 = arith.mulf %5, %400 : vector<2x512xf32>
    %402 = arith.addf %398, %401 : vector<2x512xf32>
    %c112 = arith.constant 112 : index
    %403 = memref.load %arg3[%c112] : memref<128xf32, #tpu.memory_space<smem>>
    %404 = vector.broadcast %403 : f32 to vector<2x512xf32>
    %405 = arith.mulf %6, %404 : vector<2x512xf32>
    %406 = arith.addf %402, %405 : vector<2x512xf32>
    %c16_52 = arith.constant 16 : index
    %407 = memref.load %arg4[%c16_52] : memref<32xf32, #tpu.memory_space<smem>>
    %408 = vector.broadcast %407 : f32 to vector<2x512xf32>
    %409 = arith.addf %406, %408 : vector<2x512xf32>
    %cst_53 = arith.constant 0.000000e+00 : f32
    %410 = vector.broadcast %cst_53 : f32 to vector<2x512xf32>
    %411 = arith.maximumf %409, %410 : vector<2x512xf32>
    %c16_54 = arith.constant 16 : index
    %412 = memref.load %arg5[%c16_54] : memref<32xf32, #tpu.memory_space<smem>>
    %413 = vector.broadcast %412 : f32 to vector<2x512xf32>
    %414 = arith.mulf %411, %413 : vector<2x512xf32>
    %415 = arith.addf %391, %414 : vector<2x512xf32>
    %c17 = arith.constant 17 : index
    %416 = memref.load %arg3[%c17] : memref<128xf32, #tpu.memory_space<smem>>
    %417 = vector.broadcast %416 : f32 to vector<2x512xf32>
    %418 = arith.mulf %2, %417 : vector<2x512xf32>
    %c49 = arith.constant 49 : index
    %419 = memref.load %arg3[%c49] : memref<128xf32, #tpu.memory_space<smem>>
    %420 = vector.broadcast %419 : f32 to vector<2x512xf32>
    %421 = arith.mulf %3, %420 : vector<2x512xf32>
    %422 = arith.addf %418, %421 : vector<2x512xf32>
    %c81 = arith.constant 81 : index
    %423 = memref.load %arg3[%c81] : memref<128xf32, #tpu.memory_space<smem>>
    %424 = vector.broadcast %423 : f32 to vector<2x512xf32>
    %425 = arith.mulf %5, %424 : vector<2x512xf32>
    %426 = arith.addf %422, %425 : vector<2x512xf32>
    %c113 = arith.constant 113 : index
    %427 = memref.load %arg3[%c113] : memref<128xf32, #tpu.memory_space<smem>>
    %428 = vector.broadcast %427 : f32 to vector<2x512xf32>
    %429 = arith.mulf %6, %428 : vector<2x512xf32>
    %430 = arith.addf %426, %429 : vector<2x512xf32>
    %c17_55 = arith.constant 17 : index
    %431 = memref.load %arg4[%c17_55] : memref<32xf32, #tpu.memory_space<smem>>
    %432 = vector.broadcast %431 : f32 to vector<2x512xf32>
    %433 = arith.addf %430, %432 : vector<2x512xf32>
    %cst_56 = arith.constant 0.000000e+00 : f32
    %434 = vector.broadcast %cst_56 : f32 to vector<2x512xf32>
    %435 = arith.maximumf %433, %434 : vector<2x512xf32>
    %c17_57 = arith.constant 17 : index
    %436 = memref.load %arg5[%c17_57] : memref<32xf32, #tpu.memory_space<smem>>
    %437 = vector.broadcast %436 : f32 to vector<2x512xf32>
    %438 = arith.mulf %435, %437 : vector<2x512xf32>
    %439 = arith.addf %415, %438 : vector<2x512xf32>
    %c18 = arith.constant 18 : index
    %440 = memref.load %arg3[%c18] : memref<128xf32, #tpu.memory_space<smem>>
    %441 = vector.broadcast %440 : f32 to vector<2x512xf32>
    %442 = arith.mulf %2, %441 : vector<2x512xf32>
    %c50 = arith.constant 50 : index
    %443 = memref.load %arg3[%c50] : memref<128xf32, #tpu.memory_space<smem>>
    %444 = vector.broadcast %443 : f32 to vector<2x512xf32>
    %445 = arith.mulf %3, %444 : vector<2x512xf32>
    %446 = arith.addf %442, %445 : vector<2x512xf32>
    %c82 = arith.constant 82 : index
    %447 = memref.load %arg3[%c82] : memref<128xf32, #tpu.memory_space<smem>>
    %448 = vector.broadcast %447 : f32 to vector<2x512xf32>
    %449 = arith.mulf %5, %448 : vector<2x512xf32>
    %450 = arith.addf %446, %449 : vector<2x512xf32>
    %c114 = arith.constant 114 : index
    %451 = memref.load %arg3[%c114] : memref<128xf32, #tpu.memory_space<smem>>
    %452 = vector.broadcast %451 : f32 to vector<2x512xf32>
    %453 = arith.mulf %6, %452 : vector<2x512xf32>
    %454 = arith.addf %450, %453 : vector<2x512xf32>
    %c18_58 = arith.constant 18 : index
    %455 = memref.load %arg4[%c18_58] : memref<32xf32, #tpu.memory_space<smem>>
    %456 = vector.broadcast %455 : f32 to vector<2x512xf32>
    %457 = arith.addf %454, %456 : vector<2x512xf32>
    %cst_59 = arith.constant 0.000000e+00 : f32
    %458 = vector.broadcast %cst_59 : f32 to vector<2x512xf32>
    %459 = arith.maximumf %457, %458 : vector<2x512xf32>
    %c18_60 = arith.constant 18 : index
    %460 = memref.load %arg5[%c18_60] : memref<32xf32, #tpu.memory_space<smem>>
    %461 = vector.broadcast %460 : f32 to vector<2x512xf32>
    %462 = arith.mulf %459, %461 : vector<2x512xf32>
    %463 = arith.addf %439, %462 : vector<2x512xf32>
    %c19 = arith.constant 19 : index
    %464 = memref.load %arg3[%c19] : memref<128xf32, #tpu.memory_space<smem>>
    %465 = vector.broadcast %464 : f32 to vector<2x512xf32>
    %466 = arith.mulf %2, %465 : vector<2x512xf32>
    %c51 = arith.constant 51 : index
    %467 = memref.load %arg3[%c51] : memref<128xf32, #tpu.memory_space<smem>>
    %468 = vector.broadcast %467 : f32 to vector<2x512xf32>
    %469 = arith.mulf %3, %468 : vector<2x512xf32>
    %470 = arith.addf %466, %469 : vector<2x512xf32>
    %c83 = arith.constant 83 : index
    %471 = memref.load %arg3[%c83] : memref<128xf32, #tpu.memory_space<smem>>
    %472 = vector.broadcast %471 : f32 to vector<2x512xf32>
    %473 = arith.mulf %5, %472 : vector<2x512xf32>
    %474 = arith.addf %470, %473 : vector<2x512xf32>
    %c115 = arith.constant 115 : index
    %475 = memref.load %arg3[%c115] : memref<128xf32, #tpu.memory_space<smem>>
    %476 = vector.broadcast %475 : f32 to vector<2x512xf32>
    %477 = arith.mulf %6, %476 : vector<2x512xf32>
    %478 = arith.addf %474, %477 : vector<2x512xf32>
    %c19_61 = arith.constant 19 : index
    %479 = memref.load %arg4[%c19_61] : memref<32xf32, #tpu.memory_space<smem>>
    %480 = vector.broadcast %479 : f32 to vector<2x512xf32>
    %481 = arith.addf %478, %480 : vector<2x512xf32>
    %cst_62 = arith.constant 0.000000e+00 : f32
    %482 = vector.broadcast %cst_62 : f32 to vector<2x512xf32>
    %483 = arith.maximumf %481, %482 : vector<2x512xf32>
    %c19_63 = arith.constant 19 : index
    %484 = memref.load %arg5[%c19_63] : memref<32xf32, #tpu.memory_space<smem>>
    %485 = vector.broadcast %484 : f32 to vector<2x512xf32>
    %486 = arith.mulf %483, %485 : vector<2x512xf32>
    %487 = arith.addf %463, %486 : vector<2x512xf32>
    %c20 = arith.constant 20 : index
    %488 = memref.load %arg3[%c20] : memref<128xf32, #tpu.memory_space<smem>>
    %489 = vector.broadcast %488 : f32 to vector<2x512xf32>
    %490 = arith.mulf %2, %489 : vector<2x512xf32>
    %c52 = arith.constant 52 : index
    %491 = memref.load %arg3[%c52] : memref<128xf32, #tpu.memory_space<smem>>
    %492 = vector.broadcast %491 : f32 to vector<2x512xf32>
    %493 = arith.mulf %3, %492 : vector<2x512xf32>
    %494 = arith.addf %490, %493 : vector<2x512xf32>
    %c84 = arith.constant 84 : index
    %495 = memref.load %arg3[%c84] : memref<128xf32, #tpu.memory_space<smem>>
    %496 = vector.broadcast %495 : f32 to vector<2x512xf32>
    %497 = arith.mulf %5, %496 : vector<2x512xf32>
    %498 = arith.addf %494, %497 : vector<2x512xf32>
    %c116 = arith.constant 116 : index
    %499 = memref.load %arg3[%c116] : memref<128xf32, #tpu.memory_space<smem>>
    %500 = vector.broadcast %499 : f32 to vector<2x512xf32>
    %501 = arith.mulf %6, %500 : vector<2x512xf32>
    %502 = arith.addf %498, %501 : vector<2x512xf32>
    %c20_64 = arith.constant 20 : index
    %503 = memref.load %arg4[%c20_64] : memref<32xf32, #tpu.memory_space<smem>>
    %504 = vector.broadcast %503 : f32 to vector<2x512xf32>
    %505 = arith.addf %502, %504 : vector<2x512xf32>
    %cst_65 = arith.constant 0.000000e+00 : f32
    %506 = vector.broadcast %cst_65 : f32 to vector<2x512xf32>
    %507 = arith.maximumf %505, %506 : vector<2x512xf32>
    %c20_66 = arith.constant 20 : index
    %508 = memref.load %arg5[%c20_66] : memref<32xf32, #tpu.memory_space<smem>>
    %509 = vector.broadcast %508 : f32 to vector<2x512xf32>
    %510 = arith.mulf %507, %509 : vector<2x512xf32>
    %511 = arith.addf %487, %510 : vector<2x512xf32>
    %c21 = arith.constant 21 : index
    %512 = memref.load %arg3[%c21] : memref<128xf32, #tpu.memory_space<smem>>
    %513 = vector.broadcast %512 : f32 to vector<2x512xf32>
    %514 = arith.mulf %2, %513 : vector<2x512xf32>
    %c53 = arith.constant 53 : index
    %515 = memref.load %arg3[%c53] : memref<128xf32, #tpu.memory_space<smem>>
    %516 = vector.broadcast %515 : f32 to vector<2x512xf32>
    %517 = arith.mulf %3, %516 : vector<2x512xf32>
    %518 = arith.addf %514, %517 : vector<2x512xf32>
    %c85 = arith.constant 85 : index
    %519 = memref.load %arg3[%c85] : memref<128xf32, #tpu.memory_space<smem>>
    %520 = vector.broadcast %519 : f32 to vector<2x512xf32>
    %521 = arith.mulf %5, %520 : vector<2x512xf32>
    %522 = arith.addf %518, %521 : vector<2x512xf32>
    %c117 = arith.constant 117 : index
    %523 = memref.load %arg3[%c117] : memref<128xf32, #tpu.memory_space<smem>>
    %524 = vector.broadcast %523 : f32 to vector<2x512xf32>
    %525 = arith.mulf %6, %524 : vector<2x512xf32>
    %526 = arith.addf %522, %525 : vector<2x512xf32>
    %c21_67 = arith.constant 21 : index
    %527 = memref.load %arg4[%c21_67] : memref<32xf32, #tpu.memory_space<smem>>
    %528 = vector.broadcast %527 : f32 to vector<2x512xf32>
    %529 = arith.addf %526, %528 : vector<2x512xf32>
    %cst_68 = arith.constant 0.000000e+00 : f32
    %530 = vector.broadcast %cst_68 : f32 to vector<2x512xf32>
    %531 = arith.maximumf %529, %530 : vector<2x512xf32>
    %c21_69 = arith.constant 21 : index
    %532 = memref.load %arg5[%c21_69] : memref<32xf32, #tpu.memory_space<smem>>
    %533 = vector.broadcast %532 : f32 to vector<2x512xf32>
    %534 = arith.mulf %531, %533 : vector<2x512xf32>
    %535 = arith.addf %511, %534 : vector<2x512xf32>
    %c22 = arith.constant 22 : index
    %536 = memref.load %arg3[%c22] : memref<128xf32, #tpu.memory_space<smem>>
    %537 = vector.broadcast %536 : f32 to vector<2x512xf32>
    %538 = arith.mulf %2, %537 : vector<2x512xf32>
    %c54 = arith.constant 54 : index
    %539 = memref.load %arg3[%c54] : memref<128xf32, #tpu.memory_space<smem>>
    %540 = vector.broadcast %539 : f32 to vector<2x512xf32>
    %541 = arith.mulf %3, %540 : vector<2x512xf32>
    %542 = arith.addf %538, %541 : vector<2x512xf32>
    %c86 = arith.constant 86 : index
    %543 = memref.load %arg3[%c86] : memref<128xf32, #tpu.memory_space<smem>>
    %544 = vector.broadcast %543 : f32 to vector<2x512xf32>
    %545 = arith.mulf %5, %544 : vector<2x512xf32>
    %546 = arith.addf %542, %545 : vector<2x512xf32>
    %c118 = arith.constant 118 : index
    %547 = memref.load %arg3[%c118] : memref<128xf32, #tpu.memory_space<smem>>
    %548 = vector.broadcast %547 : f32 to vector<2x512xf32>
    %549 = arith.mulf %6, %548 : vector<2x512xf32>
    %550 = arith.addf %546, %549 : vector<2x512xf32>
    %c22_70 = arith.constant 22 : index
    %551 = memref.load %arg4[%c22_70] : memref<32xf32, #tpu.memory_space<smem>>
    %552 = vector.broadcast %551 : f32 to vector<2x512xf32>
    %553 = arith.addf %550, %552 : vector<2x512xf32>
    %cst_71 = arith.constant 0.000000e+00 : f32
    %554 = vector.broadcast %cst_71 : f32 to vector<2x512xf32>
    %555 = arith.maximumf %553, %554 : vector<2x512xf32>
    %c22_72 = arith.constant 22 : index
    %556 = memref.load %arg5[%c22_72] : memref<32xf32, #tpu.memory_space<smem>>
    %557 = vector.broadcast %556 : f32 to vector<2x512xf32>
    %558 = arith.mulf %555, %557 : vector<2x512xf32>
    %559 = arith.addf %535, %558 : vector<2x512xf32>
    %c23 = arith.constant 23 : index
    %560 = memref.load %arg3[%c23] : memref<128xf32, #tpu.memory_space<smem>>
    %561 = vector.broadcast %560 : f32 to vector<2x512xf32>
    %562 = arith.mulf %2, %561 : vector<2x512xf32>
    %c55 = arith.constant 55 : index
    %563 = memref.load %arg3[%c55] : memref<128xf32, #tpu.memory_space<smem>>
    %564 = vector.broadcast %563 : f32 to vector<2x512xf32>
    %565 = arith.mulf %3, %564 : vector<2x512xf32>
    %566 = arith.addf %562, %565 : vector<2x512xf32>
    %c87 = arith.constant 87 : index
    %567 = memref.load %arg3[%c87] : memref<128xf32, #tpu.memory_space<smem>>
    %568 = vector.broadcast %567 : f32 to vector<2x512xf32>
    %569 = arith.mulf %5, %568 : vector<2x512xf32>
    %570 = arith.addf %566, %569 : vector<2x512xf32>
    %c119 = arith.constant 119 : index
    %571 = memref.load %arg3[%c119] : memref<128xf32, #tpu.memory_space<smem>>
    %572 = vector.broadcast %571 : f32 to vector<2x512xf32>
    %573 = arith.mulf %6, %572 : vector<2x512xf32>
    %574 = arith.addf %570, %573 : vector<2x512xf32>
    %c23_73 = arith.constant 23 : index
    %575 = memref.load %arg4[%c23_73] : memref<32xf32, #tpu.memory_space<smem>>
    %576 = vector.broadcast %575 : f32 to vector<2x512xf32>
    %577 = arith.addf %574, %576 : vector<2x512xf32>
    %cst_74 = arith.constant 0.000000e+00 : f32
    %578 = vector.broadcast %cst_74 : f32 to vector<2x512xf32>
    %579 = arith.maximumf %577, %578 : vector<2x512xf32>
    %c23_75 = arith.constant 23 : index
    %580 = memref.load %arg5[%c23_75] : memref<32xf32, #tpu.memory_space<smem>>
    %581 = vector.broadcast %580 : f32 to vector<2x512xf32>
    %582 = arith.mulf %579, %581 : vector<2x512xf32>
    %583 = arith.addf %559, %582 : vector<2x512xf32>
    %c24 = arith.constant 24 : index
    %584 = memref.load %arg3[%c24] : memref<128xf32, #tpu.memory_space<smem>>
    %585 = vector.broadcast %584 : f32 to vector<2x512xf32>
    %586 = arith.mulf %2, %585 : vector<2x512xf32>
    %c56 = arith.constant 56 : index
    %587 = memref.load %arg3[%c56] : memref<128xf32, #tpu.memory_space<smem>>
    %588 = vector.broadcast %587 : f32 to vector<2x512xf32>
    %589 = arith.mulf %3, %588 : vector<2x512xf32>
    %590 = arith.addf %586, %589 : vector<2x512xf32>
    %c88 = arith.constant 88 : index
    %591 = memref.load %arg3[%c88] : memref<128xf32, #tpu.memory_space<smem>>
    %592 = vector.broadcast %591 : f32 to vector<2x512xf32>
    %593 = arith.mulf %5, %592 : vector<2x512xf32>
    %594 = arith.addf %590, %593 : vector<2x512xf32>
    %c120 = arith.constant 120 : index
    %595 = memref.load %arg3[%c120] : memref<128xf32, #tpu.memory_space<smem>>
    %596 = vector.broadcast %595 : f32 to vector<2x512xf32>
    %597 = arith.mulf %6, %596 : vector<2x512xf32>
    %598 = arith.addf %594, %597 : vector<2x512xf32>
    %c24_76 = arith.constant 24 : index
    %599 = memref.load %arg4[%c24_76] : memref<32xf32, #tpu.memory_space<smem>>
    %600 = vector.broadcast %599 : f32 to vector<2x512xf32>
    %601 = arith.addf %598, %600 : vector<2x512xf32>
    %cst_77 = arith.constant 0.000000e+00 : f32
    %602 = vector.broadcast %cst_77 : f32 to vector<2x512xf32>
    %603 = arith.maximumf %601, %602 : vector<2x512xf32>
    %c24_78 = arith.constant 24 : index
    %604 = memref.load %arg5[%c24_78] : memref<32xf32, #tpu.memory_space<smem>>
    %605 = vector.broadcast %604 : f32 to vector<2x512xf32>
    %606 = arith.mulf %603, %605 : vector<2x512xf32>
    %607 = arith.addf %583, %606 : vector<2x512xf32>
    %c25 = arith.constant 25 : index
    %608 = memref.load %arg3[%c25] : memref<128xf32, #tpu.memory_space<smem>>
    %609 = vector.broadcast %608 : f32 to vector<2x512xf32>
    %610 = arith.mulf %2, %609 : vector<2x512xf32>
    %c57 = arith.constant 57 : index
    %611 = memref.load %arg3[%c57] : memref<128xf32, #tpu.memory_space<smem>>
    %612 = vector.broadcast %611 : f32 to vector<2x512xf32>
    %613 = arith.mulf %3, %612 : vector<2x512xf32>
    %614 = arith.addf %610, %613 : vector<2x512xf32>
    %c89 = arith.constant 89 : index
    %615 = memref.load %arg3[%c89] : memref<128xf32, #tpu.memory_space<smem>>
    %616 = vector.broadcast %615 : f32 to vector<2x512xf32>
    %617 = arith.mulf %5, %616 : vector<2x512xf32>
    %618 = arith.addf %614, %617 : vector<2x512xf32>
    %c121 = arith.constant 121 : index
    %619 = memref.load %arg3[%c121] : memref<128xf32, #tpu.memory_space<smem>>
    %620 = vector.broadcast %619 : f32 to vector<2x512xf32>
    %621 = arith.mulf %6, %620 : vector<2x512xf32>
    %622 = arith.addf %618, %621 : vector<2x512xf32>
    %c25_79 = arith.constant 25 : index
    %623 = memref.load %arg4[%c25_79] : memref<32xf32, #tpu.memory_space<smem>>
    %624 = vector.broadcast %623 : f32 to vector<2x512xf32>
    %625 = arith.addf %622, %624 : vector<2x512xf32>
    %cst_80 = arith.constant 0.000000e+00 : f32
    %626 = vector.broadcast %cst_80 : f32 to vector<2x512xf32>
    %627 = arith.maximumf %625, %626 : vector<2x512xf32>
    %c25_81 = arith.constant 25 : index
    %628 = memref.load %arg5[%c25_81] : memref<32xf32, #tpu.memory_space<smem>>
    %629 = vector.broadcast %628 : f32 to vector<2x512xf32>
    %630 = arith.mulf %627, %629 : vector<2x512xf32>
    %631 = arith.addf %607, %630 : vector<2x512xf32>
    %c26 = arith.constant 26 : index
    %632 = memref.load %arg3[%c26] : memref<128xf32, #tpu.memory_space<smem>>
    %633 = vector.broadcast %632 : f32 to vector<2x512xf32>
    %634 = arith.mulf %2, %633 : vector<2x512xf32>
    %c58 = arith.constant 58 : index
    %635 = memref.load %arg3[%c58] : memref<128xf32, #tpu.memory_space<smem>>
    %636 = vector.broadcast %635 : f32 to vector<2x512xf32>
    %637 = arith.mulf %3, %636 : vector<2x512xf32>
    %638 = arith.addf %634, %637 : vector<2x512xf32>
    %c90 = arith.constant 90 : index
    %639 = memref.load %arg3[%c90] : memref<128xf32, #tpu.memory_space<smem>>
    %640 = vector.broadcast %639 : f32 to vector<2x512xf32>
    %641 = arith.mulf %5, %640 : vector<2x512xf32>
    %642 = arith.addf %638, %641 : vector<2x512xf32>
    %c122 = arith.constant 122 : index
    %643 = memref.load %arg3[%c122] : memref<128xf32, #tpu.memory_space<smem>>
    %644 = vector.broadcast %643 : f32 to vector<2x512xf32>
    %645 = arith.mulf %6, %644 : vector<2x512xf32>
    %646 = arith.addf %642, %645 : vector<2x512xf32>
    %c26_82 = arith.constant 26 : index
    %647 = memref.load %arg4[%c26_82] : memref<32xf32, #tpu.memory_space<smem>>
    %648 = vector.broadcast %647 : f32 to vector<2x512xf32>
    %649 = arith.addf %646, %648 : vector<2x512xf32>
    %cst_83 = arith.constant 0.000000e+00 : f32
    %650 = vector.broadcast %cst_83 : f32 to vector<2x512xf32>
    %651 = arith.maximumf %649, %650 : vector<2x512xf32>
    %c26_84 = arith.constant 26 : index
    %652 = memref.load %arg5[%c26_84] : memref<32xf32, #tpu.memory_space<smem>>
    %653 = vector.broadcast %652 : f32 to vector<2x512xf32>
    %654 = arith.mulf %651, %653 : vector<2x512xf32>
    %655 = arith.addf %631, %654 : vector<2x512xf32>
    %c27 = arith.constant 27 : index
    %656 = memref.load %arg3[%c27] : memref<128xf32, #tpu.memory_space<smem>>
    %657 = vector.broadcast %656 : f32 to vector<2x512xf32>
    %658 = arith.mulf %2, %657 : vector<2x512xf32>
    %c59 = arith.constant 59 : index
    %659 = memref.load %arg3[%c59] : memref<128xf32, #tpu.memory_space<smem>>
    %660 = vector.broadcast %659 : f32 to vector<2x512xf32>
    %661 = arith.mulf %3, %660 : vector<2x512xf32>
    %662 = arith.addf %658, %661 : vector<2x512xf32>
    %c91 = arith.constant 91 : index
    %663 = memref.load %arg3[%c91] : memref<128xf32, #tpu.memory_space<smem>>
    %664 = vector.broadcast %663 : f32 to vector<2x512xf32>
    %665 = arith.mulf %5, %664 : vector<2x512xf32>
    %666 = arith.addf %662, %665 : vector<2x512xf32>
    %c123 = arith.constant 123 : index
    %667 = memref.load %arg3[%c123] : memref<128xf32, #tpu.memory_space<smem>>
    %668 = vector.broadcast %667 : f32 to vector<2x512xf32>
    %669 = arith.mulf %6, %668 : vector<2x512xf32>
    %670 = arith.addf %666, %669 : vector<2x512xf32>
    %c27_85 = arith.constant 27 : index
    %671 = memref.load %arg4[%c27_85] : memref<32xf32, #tpu.memory_space<smem>>
    %672 = vector.broadcast %671 : f32 to vector<2x512xf32>
    %673 = arith.addf %670, %672 : vector<2x512xf32>
    %cst_86 = arith.constant 0.000000e+00 : f32
    %674 = vector.broadcast %cst_86 : f32 to vector<2x512xf32>
    %675 = arith.maximumf %673, %674 : vector<2x512xf32>
    %c27_87 = arith.constant 27 : index
    %676 = memref.load %arg5[%c27_87] : memref<32xf32, #tpu.memory_space<smem>>
    %677 = vector.broadcast %676 : f32 to vector<2x512xf32>
    %678 = arith.mulf %675, %677 : vector<2x512xf32>
    %679 = arith.addf %655, %678 : vector<2x512xf32>
    %c28 = arith.constant 28 : index
    %680 = memref.load %arg3[%c28] : memref<128xf32, #tpu.memory_space<smem>>
    %681 = vector.broadcast %680 : f32 to vector<2x512xf32>
    %682 = arith.mulf %2, %681 : vector<2x512xf32>
    %c60 = arith.constant 60 : index
    %683 = memref.load %arg3[%c60] : memref<128xf32, #tpu.memory_space<smem>>
    %684 = vector.broadcast %683 : f32 to vector<2x512xf32>
    %685 = arith.mulf %3, %684 : vector<2x512xf32>
    %686 = arith.addf %682, %685 : vector<2x512xf32>
    %c92 = arith.constant 92 : index
    %687 = memref.load %arg3[%c92] : memref<128xf32, #tpu.memory_space<smem>>
    %688 = vector.broadcast %687 : f32 to vector<2x512xf32>
    %689 = arith.mulf %5, %688 : vector<2x512xf32>
    %690 = arith.addf %686, %689 : vector<2x512xf32>
    %c124 = arith.constant 124 : index
    %691 = memref.load %arg3[%c124] : memref<128xf32, #tpu.memory_space<smem>>
    %692 = vector.broadcast %691 : f32 to vector<2x512xf32>
    %693 = arith.mulf %6, %692 : vector<2x512xf32>
    %694 = arith.addf %690, %693 : vector<2x512xf32>
    %c28_88 = arith.constant 28 : index
    %695 = memref.load %arg4[%c28_88] : memref<32xf32, #tpu.memory_space<smem>>
    %696 = vector.broadcast %695 : f32 to vector<2x512xf32>
    %697 = arith.addf %694, %696 : vector<2x512xf32>
    %cst_89 = arith.constant 0.000000e+00 : f32
    %698 = vector.broadcast %cst_89 : f32 to vector<2x512xf32>
    %699 = arith.maximumf %697, %698 : vector<2x512xf32>
    %c28_90 = arith.constant 28 : index
    %700 = memref.load %arg5[%c28_90] : memref<32xf32, #tpu.memory_space<smem>>
    %701 = vector.broadcast %700 : f32 to vector<2x512xf32>
    %702 = arith.mulf %699, %701 : vector<2x512xf32>
    %703 = arith.addf %679, %702 : vector<2x512xf32>
    %c29 = arith.constant 29 : index
    %704 = memref.load %arg3[%c29] : memref<128xf32, #tpu.memory_space<smem>>
    %705 = vector.broadcast %704 : f32 to vector<2x512xf32>
    %706 = arith.mulf %2, %705 : vector<2x512xf32>
    %c61 = arith.constant 61 : index
    %707 = memref.load %arg3[%c61] : memref<128xf32, #tpu.memory_space<smem>>
    %708 = vector.broadcast %707 : f32 to vector<2x512xf32>
    %709 = arith.mulf %3, %708 : vector<2x512xf32>
    %710 = arith.addf %706, %709 : vector<2x512xf32>
    %c93 = arith.constant 93 : index
    %711 = memref.load %arg3[%c93] : memref<128xf32, #tpu.memory_space<smem>>
    %712 = vector.broadcast %711 : f32 to vector<2x512xf32>
    %713 = arith.mulf %5, %712 : vector<2x512xf32>
    %714 = arith.addf %710, %713 : vector<2x512xf32>
    %c125 = arith.constant 125 : index
    %715 = memref.load %arg3[%c125] : memref<128xf32, #tpu.memory_space<smem>>
    %716 = vector.broadcast %715 : f32 to vector<2x512xf32>
    %717 = arith.mulf %6, %716 : vector<2x512xf32>
    %718 = arith.addf %714, %717 : vector<2x512xf32>
    %c29_91 = arith.constant 29 : index
    %719 = memref.load %arg4[%c29_91] : memref<32xf32, #tpu.memory_space<smem>>
    %720 = vector.broadcast %719 : f32 to vector<2x512xf32>
    %721 = arith.addf %718, %720 : vector<2x512xf32>
    %cst_92 = arith.constant 0.000000e+00 : f32
    %722 = vector.broadcast %cst_92 : f32 to vector<2x512xf32>
    %723 = arith.maximumf %721, %722 : vector<2x512xf32>
    %c29_93 = arith.constant 29 : index
    %724 = memref.load %arg5[%c29_93] : memref<32xf32, #tpu.memory_space<smem>>
    %725 = vector.broadcast %724 : f32 to vector<2x512xf32>
    %726 = arith.mulf %723, %725 : vector<2x512xf32>
    %727 = arith.addf %703, %726 : vector<2x512xf32>
    %c30 = arith.constant 30 : index
    %728 = memref.load %arg3[%c30] : memref<128xf32, #tpu.memory_space<smem>>
    %729 = vector.broadcast %728 : f32 to vector<2x512xf32>
    %730 = arith.mulf %2, %729 : vector<2x512xf32>
    %c62 = arith.constant 62 : index
    %731 = memref.load %arg3[%c62] : memref<128xf32, #tpu.memory_space<smem>>
    %732 = vector.broadcast %731 : f32 to vector<2x512xf32>
    %733 = arith.mulf %3, %732 : vector<2x512xf32>
    %734 = arith.addf %730, %733 : vector<2x512xf32>
    %c94 = arith.constant 94 : index
    %735 = memref.load %arg3[%c94] : memref<128xf32, #tpu.memory_space<smem>>
    %736 = vector.broadcast %735 : f32 to vector<2x512xf32>
    %737 = arith.mulf %5, %736 : vector<2x512xf32>
    %738 = arith.addf %734, %737 : vector<2x512xf32>
    %c126 = arith.constant 126 : index
    %739 = memref.load %arg3[%c126] : memref<128xf32, #tpu.memory_space<smem>>
    %740 = vector.broadcast %739 : f32 to vector<2x512xf32>
    %741 = arith.mulf %6, %740 : vector<2x512xf32>
    %742 = arith.addf %738, %741 : vector<2x512xf32>
    %c30_94 = arith.constant 30 : index
    %743 = memref.load %arg4[%c30_94] : memref<32xf32, #tpu.memory_space<smem>>
    %744 = vector.broadcast %743 : f32 to vector<2x512xf32>
    %745 = arith.addf %742, %744 : vector<2x512xf32>
    %cst_95 = arith.constant 0.000000e+00 : f32
    %746 = vector.broadcast %cst_95 : f32 to vector<2x512xf32>
    %747 = arith.maximumf %745, %746 : vector<2x512xf32>
    %c30_96 = arith.constant 30 : index
    %748 = memref.load %arg5[%c30_96] : memref<32xf32, #tpu.memory_space<smem>>
    %749 = vector.broadcast %748 : f32 to vector<2x512xf32>
    %750 = arith.mulf %747, %749 : vector<2x512xf32>
    %751 = arith.addf %727, %750 : vector<2x512xf32>
    %c31 = arith.constant 31 : index
    %752 = memref.load %arg3[%c31] : memref<128xf32, #tpu.memory_space<smem>>
    %753 = vector.broadcast %752 : f32 to vector<2x512xf32>
    %754 = arith.mulf %2, %753 : vector<2x512xf32>
    %c63 = arith.constant 63 : index
    %755 = memref.load %arg3[%c63] : memref<128xf32, #tpu.memory_space<smem>>
    %756 = vector.broadcast %755 : f32 to vector<2x512xf32>
    %757 = arith.mulf %3, %756 : vector<2x512xf32>
    %758 = arith.addf %754, %757 : vector<2x512xf32>
    %c95 = arith.constant 95 : index
    %759 = memref.load %arg3[%c95] : memref<128xf32, #tpu.memory_space<smem>>
    %760 = vector.broadcast %759 : f32 to vector<2x512xf32>
    %761 = arith.mulf %5, %760 : vector<2x512xf32>
    %762 = arith.addf %758, %761 : vector<2x512xf32>
    %c127 = arith.constant 127 : index
    %763 = memref.load %arg3[%c127] : memref<128xf32, #tpu.memory_space<smem>>
    %764 = vector.broadcast %763 : f32 to vector<2x512xf32>
    %765 = arith.mulf %6, %764 : vector<2x512xf32>
    %766 = arith.addf %762, %765 : vector<2x512xf32>
    %c31_97 = arith.constant 31 : index
    %767 = memref.load %arg4[%c31_97] : memref<32xf32, #tpu.memory_space<smem>>
    %768 = vector.broadcast %767 : f32 to vector<2x512xf32>
    %769 = arith.addf %766, %768 : vector<2x512xf32>
    %cst_98 = arith.constant 0.000000e+00 : f32
    %770 = vector.broadcast %cst_98 : f32 to vector<2x512xf32>
    %771 = arith.maximumf %769, %770 : vector<2x512xf32>
    %c31_99 = arith.constant 31 : index
    %772 = memref.load %arg5[%c31_99] : memref<32xf32, #tpu.memory_space<smem>>
    %773 = vector.broadcast %772 : f32 to vector<2x512xf32>
    %774 = arith.mulf %771, %773 : vector<2x512xf32>
    %775 = arith.addf %751, %774 : vector<2x512xf32>
    %c0_100 = arith.constant 0 : index
    %776 = memref.load %arg6[%c0_100] : memref<2xf32, #tpu.memory_space<smem>>
    %777 = vector.broadcast %776 : f32 to vector<2x512xf32>
    %778 = arith.addf %775, %777 : vector<2x512xf32>
    %cst_101 = arith.constant 0.000000e+00 : f32
    %779 = vector.broadcast %cst_101 : f32 to vector<2x512xf32>
    %780 = arith.maximumf %778, %779 : vector<2x512xf32>
    %c0_102 = arith.constant 0 : index
    %c0_103 = arith.constant 0 : index
    %781 = vector.load %arg2[%c0_102, %c0_103] : memref<1x512xf32, #tpu.memory_space<vmem>>, vector<1x512xf32>
    %782 = vector.broadcast %781 : vector<1x512xf32> to vector<2x512xf32>
    %783 = arith.mulf %780, %782 : vector<2x512xf32>
    %cst_104 = arith.constant dense<0.000000e+00> : vector<2xf32>
    %784 = vector.multi_reduction <add>, %783, %cst_104 [1] : vector<2x512xf32> to vector<2xf32>
    %785 = vector.shape_cast %784 : vector<2xf32> to vector<2x1xf32>
    %c1_105 = arith.constant 1 : index
    %786 = memref.load %arg6[%c1_105] : memref<2xf32, #tpu.memory_space<smem>>
    %787 = vector.broadcast %786 : f32 to vector<2x1xf32>
    %788 = arith.addf %785, %787 : vector<2x1xf32>
    %789 = arith.negf %788 : vector<2x1xf32>
    %790 = math.exp %789 : vector<2x1xf32>
    %cst_106 = arith.constant 1.000000e+00 : f32
    %791 = vector.broadcast %cst_106 : f32 to vector<2x1xf32>
    %792 = arith.addf %791, %790 : vector<2x1xf32>
    %793 = arith.divf %791, %792 : vector<2x1xf32>
    %c0_107 = arith.constant 0 : index
    %c0_108 = arith.constant 0 : index
    %794 = vector.load %arg7[%c0_107, %c0_108] : memref<2x1xf32, #tpu.memory_space<vmem>>, vector<2x1xf32>
    tpu.vector_store %arg7[%c0_107, %c0_108], %793 {strides = array<i32>} : memref<2x1xf32, #tpu.memory_space<vmem>>, vector<2x1xf32>,
    return
  }
}

</mosaic_0001>

<bundles_post_ra>
// kernel: top_model_forward.3
= control target key start
LH: loop header
LB: loop body
LE: loop exit
PB: predicated region body
PF: predicated region fallthrough
CT: control target
= control target key end

     0   :  { %12 = vsyncpa [#allocation3], 0  ;;  %s1925_s0 = inlined_call_operand.vmem [shape: f32[2,512], index: 0, kind: input, shape index: {}]   ;;  %s1926_s1 = inlined_call_operand.vmem [shape: f32[2,512], index: 1, kind: input, shape index: {}]   ;;  %s1927_s2 = inlined_call_operand.vmem [shape: f32[1,512], index: 2, kind: input, shape index: {}]   ;;  %s1928_s3 = inlined_call_operand.vmem [shape: f32[128], index: 3, kind: input, shape index: {}]   ;;  %s1929_s4 = inlined_call_operand.vmem [shape: f32[32], index: 4, kind: input, shape index: {}]   ;;  %s1930_s5 = inlined_call_operand.vmem [shape: f32[32], index: 5, kind: input, shape index: {}]   ;;  %s1931_s6 = inlined_call_operand.vmem [shape: f32[2], index: 6, kind: input, shape index: {}]   ;;  %s1932_s7 = inlined_call_operand.vmem [shape: f32[2,1], index: 7, kind: output, shape index: {}]  }
   0x1   :  { %13 = vsyncpa [#allocation5], 0  ;;  %s37_s26 = sshll.u32 %s1929_s4, 4  ;;  %s38_s26 = int_to_ptr.vmem [resolvable:$true] %s37_s26 }
   0x2   :  { %14 = vsyncpa [#allocation8], 0  ;;  %s27_s29 = sshll.u32 %s1928_s3, 4  ;;  %s1108_s30 = scalar_lea.vmem %s38_s26, 16  ;;  %s28_s29 = int_to_ptr.vmem [resolvable:$true] %s27_s29 }
   0x3   :  { %p1109_p0 = scmp.ne.s32.totalorder %s38_s26, %s1108_s30  ;;  %p1113_p1 = scmp.lt.s32.totalorder %s38_s26, %s38_s26 }
   0x4   :  { %p1114_p2 = scmp.lt.s32.totalorder %s1108_s30, %s1108_s30 }
   0x6   :  { %p1115_p3 = por %p1114_p2, %p1113_p1 }
   0x8   :  { %p1116_p4 = pnand %p1115_p3, %p1109_p0 }
   0xa   :  { %1119 = shalt.err (!%p1116_p4)
}
   0xb   :  { %s1162_s8 = smov [#allocation4]   ;;  %s1120_s9 = scalar_lea.vmem %s28_s29, 16 }
   0xc   :  { %40 = dma.vmem_to_smem %s38_s26, 16, %s1162_s8, [#allocation5]  }
   0xd   :  { %p1121_p5 = scmp.ne.s32.totalorder %s28_s29, %s1120_s9  ;;  %p1125_p6 = scmp.lt.s32.totalorder %s28_s29, %s28_s29 }
   0xe   :  { %p1126_p7 = scmp.lt.s32.totalorder %s1120_s9, %s1120_s9 }
  0x10   :  { %p1127_p8 = por %p1126_p7, %p1125_p6 }
  0x12   :  { %p1128_p9 = pnand %p1127_p8, %p1121_p5 }
  0x14   :  { %1131 = shalt.err (!%p1128_p9)
}
  0x15   :  { %s1163_s4 = smov [#allocation2]   ;;  %s47_s11 = sshll.u32 %s1930_s5, 4  ;;  %s48_s11 = int_to_ptr.vmem [resolvable:$true] %s47_s11 }
  0x16   :  { %30 = dma.vmem_to_smem %s28_s29, 16, %s1163_s4, [#allocation3]  }
  0x17   :  { %s57_s14 = sshll.u32 %s1931_s6, 4  ;;  %s1132_s15 = scalar_lea.vmem %s48_s11, 16  ;;  %s58_s14 = int_to_ptr.vmem [resolvable:$true] %s57_s14 }
  0x18   :  { %p1133_p10 = scmp.ne.s32.totalorder %s48_s11, %s1132_s15  ;;  %p1137_p11 = scmp.lt.s32.totalorder %s48_s11, %s48_s11 }
  0x19   :  { %p1138_p12 = scmp.lt.s32.totalorder %s1132_s15, %s1132_s15 }
  0x1b   :  { %p1139_p13 = por %p1138_p12, %p1137_p11 }
  0x1d   :  { %p1140_p0 = pnand %p1139_p13, %p1133_p10 }
  0x1f   :  { %1143 = shalt.err (!%p1140_p0)
}
  0x20   :  { %s1164_s16 = smov [#allocation6]   ;;  %s1144_s17 = scalar_lea.vmem %s58_s14, 16 }
  0x21   :  { %50 = dma.vmem_to_smem %s48_s11, 16, %s1164_s16, [#allocation5]  }
  0x22   :  { %p1145_p1 = scmp.ne.s32.totalorder %s58_s14, %s1144_s17  ;;  %p1149_p2 = scmp.lt.s32.totalorder %s58_s14, %s58_s14 }
  0x23   :  { %p1150_p3 = scmp.lt.s32.totalorder %s1144_s17, %s1144_s17 }
  0x25   :  { %p1151_p4 = por %p1150_p3, %p1149_p2 }
  0x27   :  { %p1152_p5 = pnand %p1151_p4, %p1145_p1 }
  0x29   :  { %1155 = shalt.err (!%p1152_p5)
}
  0x2a   :  { %s1165_s5 = smov [#allocation7]  }
  0x2b   :  { %60 = dma.vmem_to_smem %s58_s14, 16, %s1165_s5, [#allocation8]  }
  0x2c   :  { %1156 = dma.done.wait [#allocation3], 16  }
  0x2d   :  { %1157 = vsyncadd [#allocation3], 4294967280 }
  0x2e   :  { %1158 = dma.done.wait [#allocation5], 32  }
  0x2f   :  { %1159 = vsyncadd [#allocation5], 4294967264 }
  0x30   :  { %1160 = dma.done.wait [#allocation8], 16  }
  0x31   :  { %1161 = vsyncadd [#allocation8], 4294967280 }
  0x32   :  { %73 = sfence }
  0x33   :  { %v74_v0 = vld [vmem:[%s1925_s0] sm:$0xff]  ;;  %s81_s21 = sld [smem:[#allocation2]]  ;;  %s911_s27 = sld [smem:[#allocation2 + $0x1]]  ;;  %vm880_vm0 = vcmask 1041408   ;;  %vm899_vm1 = vcmask 1024  }
  0x34   :  { %v75_v1 = vld [vmem:[%s1926_s1] sm:$0xff]  ;;  %s908_s22 = sld [smem:[#allocation2 + $0x20]]  ;;  %s912_s28 = sld [smem:[#allocation2 + $0x21]] }
  0x35   :  { %v78_v2 = vsub.f32 %v74_v0, %v75_v1  ;;  %s909_s23 = sld [smem:[#allocation2 + $0x40]]  ;;  %v1229_v3 = vmul.f32 %v75_v1, %v74_v0  ;;  %v1231_v4 = vadd.f32 %v75_v1, %v74_v0  ;;  %s1237_s0 = sld [smem:[#allocation2 + $0x41]] }
  0x36   :  { %s910_s24 = sld [smem:[#allocation2 + $0x60]]  ;;  %s1239_s1 = sld [smem:[#allocation2 + $0x61]] }
  0x37   :  { %s1225_s25 = sld [smem:[#allocation4]]  ;;  %v1233_v5 = vand.u32 2147483647, %v78_v2  ;;  %v1235_v6 = vmul.f32 %v78_v2, %v78_v2  ;;  %s1241_s29 = sld [smem:[#allocation4 + $0x1]] }
  0x38   :  { %s1227_s26 = sld [smem:[#allocation6]]  ;;  %s1243_s30 = sld [smem:[#allocation6 + $0x1]] }
  0x39   :  { %v82_v7 = vstv %s81_s21  ;;  %s1245_s8 = sld [smem:[#allocation2 + $0x2]]  ;;  %v105_v17 = vstv %s911_s27  ;;  %s1262_s12 = sld [smem:[#allocation2 + $0x3]] }
  0x3a   :  { %v85_v8 = vstv %s908_s22  ;;  %s1247_s9 = sld [smem:[#allocation2 + $0x22]]  ;;  %v83_v9 = vmul.f32 %v82_v7, %v1229_v3  ;;  %v108_v18 = vstv %s912_s28  ;;  %s1264_s13 = sld [smem:[#allocation2 + $0x23]]  ;;  %v106_v19 = vmul.f32 %v105_v17, %v1229_v3 }
  0x3b   :  { %v86_v10 = vmul.f32 %v85_v8, %v1231_v4  ;;  %v89_v11 = vstv %s909_s23  ;;  %s1251_s4 = sld [smem:[#allocation2 + $0x42]]  ;;  %v109_v20 = vmul.f32 %v108_v18, %v1231_v4  ;;  %v112_v21 = vstv %s1237_s0  ;;  %s1270_s14 = sld [smem:[#allocation2 + $0x43]] }
  0x3c   :  { %v93_v12 = vstv %s910_s24  ;;  %s1253_s3 = sld [smem:[#allocation2 + $0x62]]  ;;  %v90_v13 = vmul.f32 %v89_v11, %v1233_v5  ;;  %v116_v22 = vstv %s1239_s1  ;;  %s1272_s15 = sld [smem:[#allocation2 + $0x63]]  ;;  %v113_v25 = vmul.f32 %v112_v21, %v1233_v5 }
  0x3d   :  { %v94_v14 = vmul.f32 %v93_v12, %v1235_v6  ;;  %s1257_s10 = sld [smem:[#allocation4 + $0x2]]  ;;  %v87_v15 = vadd.f32 %v86_v10, %v83_v9  ;;  %v97_v16 = vstv %s1225_s25  ;;  %v117_v26 = vmul.f32 %v116_v22, %v1235_v6  ;;  %s1277_s16 = sld [smem:[#allocation4 + $0x3]] }
  0x3e   :  { %s1259_s11 = sld [smem:[#allocation6 + $0x2]]  ;;  %v101_v24 = vstv %s1227_s26  ;;  %v110_v27 = vadd.f32 %v109_v20, %v106_v19  ;;  %v120_v28 = vstv %s1241_s29  ;;  %s1282_s17 = sld [smem:[#allocation2 + $0x4]]  ;;  %v124_v36 = vstv %s1243_s30 }
  0x3f   :  { %v91_v23 = vadd.f32 %v90_v13, %v87_v15  ;;  %v128_v29 = vstv %s1245_s8  ;;  %s1284_s5 = sld [smem:[#allocation2 + $0x24]]  ;;  %s1289_s6 = sld [smem:[#allocation6 + $0x3]]  ;;  %v151_v44 = vstv %s1262_s12 }
  0x40   :  { %v131_v30 = vstv %s1247_s9  ;;  %v129_v32 = vmul.f32 %v128_v29, %v1229_v3  ;;  %v114_v35 = vadd.f32 %v113_v25, %v110_v27  ;;  %s1294_s18 = sld [smem:[#allocation2 + $0x44]]  ;;  %v154_v45 = vstv %s1264_s13  ;;  %s1305_s21 = sld [smem:[#allocation2 + $0x5]] }
  0x41   :  { %v95_v31 = vadd.f32 %v94_v14, %v91_v23  ;;  %v132_v33 = vmul.f32 %v131_v30, %v1231_v4  ;;  %v135_v34 = vstv %s1251_s4  ;;  %s1296_s19 = sld [smem:[#allocation2 + $0x64]]  ;;  %v158_v46 = vstv %s1270_s14  ;;  %s1311_s23 = sld [smem:[#allocation2 + $0x25]] }
  0x42   :  { %v136_v37 = vmul.f32 %v135_v34, %v1233_v5  ;;  %v139_v38 = vstv %s1253_s3  ;;  %v118_v43 = vadd.f32 %v117_v26, %v114_v35  ;;  %s1303_s20 = sld [smem:[#allocation4 + $0x4]]  ;;  %v152_v49 = vmul.f32 %v151_v44, %v1229_v3  ;;  %s1316_s24 = sld [smem:[#allocation2 + $0x45]] }
  0x43   :  { %v98_v39 = vadd.f32 %v97_v16, %v95_v31  ;;  %v133_v40 = vadd.f32 %v132_v33, %v129_v32  ;;  %v140_v41 = vmul.f32 %v139_v38, %v1235_v6  ;;  %v143_v42 = vstv %s1257_s10  ;;  %s1309_s22 = sld [smem:[#allocation6 + $0x4]]  ;;  %s1318_s25 = sld [smem:[#allocation2 + $0x65]] }
  0x44   :  { %v155_v50 = vmul.f32 %v154_v45, %v1231_v4  ;;  %v121_v51 = vadd.f32 %v120_v28, %v118_v43  ;;  %v147_v52 = vstv %s1259_s11  ;;  %v159_v53 = vmul.f32 %v158_v46, %v1233_v5  ;;  %s1322_s26 = sld [smem:[#allocation4 + $0x5]]  ;;  %s1326_s27 = sld [smem:[#allocation2 + $0x6]] }
  0x45   :  { %v99_v47 = vmax.f32 %v98_v39, 0.0  ;;  %v137_v48 = vadd.f32 %v136_v37, %v133_v40  ;;  %v162_v54 = vstv %s1272_s15  ;;  %v166_v58 = vstv %s1277_s16  ;;  %s1330_s28 = sld [smem:[#allocation6 + $0x5]]  ;;  %s1332_s0 = sld [smem:[#allocation2 + $0x26]] }
  0x46   :  { %v156_v56 = vadd.f32 %v155_v50, %v152_v49  ;;  %v163_v57 = vmul.f32 %v162_v54, %v1235_v6  ;;  %v122_v60 = vmax.f32 %v121_v51, 0.0  ;;  %v174_v61 = vstv %s1282_s17  ;;  %s1337_s1 = sld [smem:[#allocation2 + $0x46]]  ;;  %s1347_s8 = sld [smem:[#allocation2 + $0x7]] }
  0x47   :  { %v141_v55 = vadd.f32 %v140_v41, %v137_v48  ;;  %v102_v59 = vmul.f32 %v101_v24, %v99_v47  ;;  %v177_v62 = vstv %s1284_s5  ;;  %v175_v1 = vmul.f32 %v174_v61, %v1229_v3  ;;  %s1339_s29 = sld [smem:[#allocation2 + $0x66]]  ;;  %s1352_s4 = sld [smem:[#allocation2 + $0x27]] }
  0x48   :  { %v160_v0 = vadd.f32 %v159_v53, %v156_v56  ;;  %v178_v2 = vmul.f32 %v177_v62, %v1231_v4  ;;  %v125_v7 = vmul.f32 %v124_v36, %v122_v60  ;;  %v170_v8 = vstv %s1289_s6  ;;  %s1342_s30 = sld [smem:[#allocation4 + $0x6]]  ;;  %s1358_s3 = sld [smem:[#allocation2 + $0x47]] }
  0x49   :  { %v144_v63 = vadd.f32 %v143_v42, %v141_v55  ;;  %v181_v9 = vstv %s1294_s18  ;;  %v185_v10 = vstv %s1296_s19  ;;  %v189_v17 = vstv %s1303_s20  ;;  %s1350_s9 = sld [smem:[#allocation6 + $0x6]]  ;;  %s1360_s10 = sld [smem:[#allocation2 + $0x67]] }
  0x4a   :  { %v164_v12 = vadd.f32 %v163_v57, %v160_v0  ;;  %v179_v13 = vadd.f32 %v178_v2, %v175_v1  ;;  %v182_v14 = vmul.f32 %v181_v9, %v1233_v5  ;;  %v126_v15 = vadd.f32 %v125_v7, %v102_v59  ;;  %s1364_s11 = sld [smem:[#allocation4 + $0x7]]  ;;  %s1369_s12 = sld [smem:[#allocation2 + $0x8]] }
  0x4b   :  { %v145_v11 = vmax.f32 %v144_v63, 0.0  ;;  %v186_v16 = vmul.f32 %v185_v10, %v1235_v6  ;;  %v197_v18 = vstv %s1305_s21  ;;  %v193_v23 = vstv %s1309_s22  ;;  %s1372_s13 = sld [smem:[#allocation6 + $0x7]]  ;;  %s1374_s14 = sld [smem:[#allocation2 + $0x28]] }
  0x4c   :  { %v167_v20 = vadd.f32 %v166_v58, %v164_v12  ;;  %v183_v21 = vadd.f32 %v182_v14, %v179_v13  ;;  %v198_v22 = vmul.f32 %v197_v18, %v1229_v3  ;;  %v200_v24 = vstv %s1311_s23  ;;  %s1380_s15 = sld [smem:[#allocation2 + $0x48]]  ;;  %s1391_s5 = sld [smem:[#allocation2 + $0x9]] }
  0x4d   :  { %v148_v19 = vmul.f32 %v147_v52, %v145_v11  ;;  %v204_v25 = vstv %s1316_s24  ;;  %v208_v26 = vstv %s1318_s25  ;;  %v201_v29 = vmul.f32 %v200_v24, %v1231_v4  ;;  %s1382_s16 = sld [smem:[#allocation2 + $0x68]]  ;;  %s1394_s6 = sld [smem:[#allocation2 + $0x29]] }
  0x4e   :  { %v168_v27 = vmax.f32 %v167_v20, 0.0  ;;  %v187_v28 = vadd.f32 %v186_v16, %v183_v21  ;;  %v212_v30 = vstv %s1322_s26  ;;  %v205_v32 = vmul.f32 %v204_v25, %v1233_v5  ;;  %s1389_s17 = sld [smem:[#allocation4 + $0x8]]  ;;  %s1400_s18 = sld [smem:[#allocation2 + $0x49]] }
  0x4f   :  { %v149_v31 = vadd.f32 %v148_v19, %v126_v15  ;;  %v209_v33 = vmul.f32 %v208_v26, %v1235_v6  ;;  %v220_v34 = vstv %s1326_s27  ;;  %v202_v37 = vadd.f32 %v201_v29, %v198_v22  ;;  %s1402_s19 = sld [smem:[#allocation2 + $0x69]]  ;;  %s1409_s20 = sld [smem:[#allocation6 + $0x8]] }
  0x50   :  { %v171_v35 = vmul.f32 %v170_v8, %v168_v27  ;;  %v190_v36 = vadd.f32 %v189_v17, %v187_v28  ;;  %v221_v38 = vmul.f32 %v220_v34, %v1229_v3  ;;  %v216_v39 = vstv %s1330_s28  ;;  %s1411_s21 = sld [smem:[#allocation4 + $0x9]]  ;;  %s1414_s22 = sld [smem:[#allocation2 + $0xa]] }
  0x51   :  { %v223_v40 = vstv %s1332_s0  ;;  %v227_v41 = vstv %s1337_s1  ;;  %v231_v42 = vstv %s1339_s29  ;;  %v206_v44 = vadd.f32 %v205_v32, %v202_v37  ;;  %s1416_s23 = sld [smem:[#allocation2 + $0x2a]]  ;;  %s1431_s26 = sld [smem:[#allocation6 + $0x9]] }
  0x52   :  { %v191_v43 = vmax.f32 %v190_v36, 0.0  ;;  %v224_v45 = vmul.f32 %v223_v40, %v1231_v4  ;;  %v235_v46 = vstv %s1342_s30  ;;  %v172_v47 = vadd.f32 %v171_v35, %v149_v31  ;;  %s1422_s24 = sld [smem:[#allocation2 + $0x4a]]  ;;  %s1435_s28 = sld [smem:[#allocation2 + $0xb]] }
  0x53   :  { %v228_v48 = vmul.f32 %v227_v41, %v1233_v5  ;;  %v232_v49 = vmul.f32 %v231_v42, %v1235_v6  ;;  %v243_v50 = vstv %s1347_s8  ;;  %v210_v52 = vadd.f32 %v209_v33, %v206_v44  ;;  %s1424_s25 = sld [smem:[#allocation2 + $0x6a]]  ;;  %s1441_s0 = sld [smem:[#allocation2 + $0x2b]] }
  0x54   :  { %v194_v51 = vmul.f32 %v193_v23, %v191_v43  ;;  %v225_v53 = vadd.f32 %v224_v45, %v221_v38  ;;  %v244_v54 = vmul.f32 %v243_v50, %v1229_v3  ;;  %v239_v55 = vstv %s1350_s9  ;;  %s1433_s27 = sld [smem:[#allocation4 + $0xa]]  ;;  %s1443_s1 = sld [smem:[#allocation2 + $0x4b]] }
  0x55   :  { %v246_v56 = vstv %s1352_s4  ;;  %v250_v57 = vstv %s1358_s3  ;;  %v254_v58 = vstv %s1360_s10  ;;  %v213_v59 = vadd.f32 %v212_v30, %v210_v52  ;;  %s1450_s29 = sld [smem:[#allocation6 + $0xa]]  ;;  %s1452_s30 = sld [smem:[#allocation2 + $0x6b]] }
  0x56   :  { %v229_v60 = vadd.f32 %v228_v48, %v225_v53  ;;  %v247_v61 = vmul.f32 %v246_v56, %v1231_v4  ;;  %v258_v62 = vstv %s1364_s11  ;;  %v195_v63 = vadd.f32 %v194_v51, %v172_v47  ;;  %s1454_s8 = sld [smem:[#allocation4 + $0xb]]  ;;  %s1460_s9 = sld [smem:[#allocation2 + $0xc]] }
  0x57   :  { %v251_v0 = vmul.f32 %v250_v57, %v1233_v5  ;;  %v255_v1 = vmul.f32 %v254_v58, %v1235_v6  ;;  %v266_v2 = vstv %s1369_s12  ;;  %v214_v7 = vmax.f32 %v213_v59, 0.0  ;;  %s1462_s4 = sld [smem:[#allocation2 + $0x2c]]  ;;  %s1465_s3 = sld [smem:[#allocation6 + $0xb]] }
  0x58   :  { %v233_v8 = vadd.f32 %v232_v49, %v229_v60  ;;  %v248_v9 = vadd.f32 %v247_v61, %v244_v54  ;;  %v267_v10 = vmul.f32 %v266_v2, %v1229_v3  ;;  %v262_v11 = vstv %s1372_s13  ;;  %s1471_s10 = sld [smem:[#allocation2 + $0x4c]]  ;;  %s1481_s13 = sld [smem:[#allocation2 + $0xd]] }
  0x59   :  { %v269_v12 = vstv %s1374_s14  ;;  %v273_v13 = vstv %s1380_s15  ;;  %v277_v14 = vstv %s1382_s16  ;;  %v217_v15 = vmul.f32 %v216_v39, %v214_v7  ;;  %s1473_s11 = sld [smem:[#allocation2 + $0x6c]]  ;;  %s1485_s14 = sld [smem:[#allocation2 + $0x2d]] }
  0x5a   :  { %v236_v16 = vadd.f32 %v235_v46, %v233_v8  ;;  %v252_v17 = vadd.f32 %v251_v0, %v248_v9  ;;  %v270_v18 = vmul.f32 %v269_v12, %v1231_v4  ;;  %v274_v19 = vmul.f32 %v273_v13, %v1233_v5  ;;  %s1476_s12 = sld [smem:[#allocation4 + $0xc]]  ;;  %s1490_s15 = sld [smem:[#allocation2 + $0x4d]] }
  0x5b   :  { %v278_v20 = vmul.f32 %v277_v14, %v1235_v6  ;;  %v281_v21 = vstv %s1389_s17  ;;  %v289_v22 = vstv %s1391_s5  ;;  %v218_v23 = vadd.f32 %v217_v15, %v195_v63  ;;  %s1492_s16 = sld [smem:[#allocation2 + $0x6d]]  ;;  %s1496_s17 = sld [smem:[#allocation6 + $0xc]] }
  0x5c   :  { %v237_v24 = vmax.f32 %v236_v16, 0.0  ;;  %v256_v25 = vadd.f32 %v255_v1, %v252_v17  ;;  %v271_v26 = vadd.f32 %v270_v18, %v267_v10  ;;  %v290_v27 = vmul.f32 %v289_v22, %v1229_v3  ;;  %s1500_s5 = sld [smem:[#allocation4 + $0xd]] }
  0x5d   :  { %v292_v28 = vstv %s1394_s6  ;;  %v296_v29 = vstv %s1400_s18  ;;  %v300_v30 = vstv %s1402_s19  ;;  %v285_v35 = vstv %s1409_s20  ;;  %s1504_s6 = sld [smem:[#allocation2 + $0xe]] }
  0x5e   :  { %v240_v31 = vmul.f32 %v239_v55, %v237_v24  ;;  %v259_v32 = vadd.f32 %v258_v62, %v256_v25  ;;  %v275_v33 = vadd.f32 %v274_v19, %v271_v26  ;;  %v293_v34 = vmul.f32 %v292_v28, %v1231_v4  ;;  %s1506_s18 = sld [smem:[#allocation2 + $0x2e]] }
  0x5f   :  { %v297_v36 = vmul.f32 %v296_v29, %v1233_v5  ;;  %v301_v37 = vmul.f32 %v300_v30, %v1235_v6  ;;  %v304_v38 = vstv %s1411_s21  ;;  %v312_v43 = vstv %s1414_s22  ;;  %s1511_s19 = sld [smem:[#allocation2 + $0x4e]]  ;;  %s1519_s21 = sld [smem:[#allocation6 + $0xd]] }
  0x60   :  { %v241_v39 = vadd.f32 %v240_v31, %v218_v23  ;;  %v260_v40 = vmax.f32 %v259_v32, 0.0  ;;  %v279_v41 = vadd.f32 %v278_v20, %v275_v33  ;;  %v294_v42 = vadd.f32 %v293_v34, %v290_v27  ;;  %s1515_s20 = sld [smem:[#allocation2 + $0x6e]]  ;;  %s1523_s22 = sld [smem:[#allocation2 + $0xf]] }
  0x61   :  { %v315_v44 = vstv %s1416_s23  ;;  %v319_v45 = vstv %s1422_s24  ;;  %v323_v46 = vstv %s1424_s25  ;;  %v313_v50 = vmul.f32 %v312_v43, %v1229_v3  ;;  %s1525_s23 = sld [smem:[#allocation2 + $0x2f]]  ;;  %s1530_s24 = sld [smem:[#allocation4 + $0xe]] }
  0x62   :  { %v263_v47 = vmul.f32 %v262_v11, %v260_v40  ;;  %v282_v48 = vadd.f32 %v281_v21, %v279_v41  ;;  %v298_v49 = vadd.f32 %v297_v36, %v294_v42  ;;  %v308_v51 = vstv %s1431_s26  ;;  %s1534_s25 = sld [smem:[#allocation2 + $0x4f]] }
  0x63   :  { %v316_v52 = vmul.f32 %v315_v44, %v1231_v4  ;;  %v320_v53 = vmul.f32 %v319_v45, %v1233_v5  ;;  %v324_v54 = vmul.f32 %v323_v46, %v1235_v6  ;;  %v327_v58 = vstv %s1433_s27  ;;  %s1536_s26 = sld [smem:[#allocation2 + $0x6f]]  ;;  %s1540_s27 = sld [smem:[#allocation6 + $0xe]] }
  0x64   :  { %v264_v55 = vadd.f32 %v263_v47, %v241_v39  ;;  %v283_v56 = vmax.f32 %v282_v48, 0.0  ;;  %v302_v57 = vadd.f32 %v301_v37, %v298_v49  ;;  %v335_v60 = vstv %s1435_s28  ;;  %s1544_s28 = sld [smem:[#allocation2 + $0x10]] }
  0x65   :  { %v317_v59 = vadd.f32 %v316_v52, %v313_v50  ;;  %v338_v61 = vstv %s1441_s0  ;;  %v342_v62 = vstv %s1443_s1  ;;  %v336_v1 = vmul.f32 %v335_v60, %v1229_v3  ;;  %s1546_s0 = sld [smem:[#allocation2 + $0x30]]  ;;  %s1551_s1 = sld [smem:[#allocation4 + $0xf]] }
  0x66   :  { %v286_v63 = vmul.f32 %v285_v35, %v283_v56  ;;  %v305_v0 = vadd.f32 %v304_v38, %v302_v57  ;;  %v339_v2 = vmul.f32 %v338_v61, %v1231_v4  ;;  %v331_v8 = vstv %s1450_s29  ;;  %s1555_s29 = sld [smem:[#allocation2 + $0x50]] }
  0x67   :  { %v321_v7 = vadd.f32 %v320_v53, %v317_v59  ;;  %v343_v9 = vmul.f32 %v342_v62, %v1233_v5  ;;  %v346_v10 = vstv %s1452_s30  ;;  %v350_v14 = vstv %s1454_s8  ;;  %s1557_s30 = sld [smem:[#allocation2 + $0x70]]  ;;  %s1563_s8 = sld [smem:[#allocation6 + $0xf]] }
  0x68   :  { %v306_v11 = vmax.f32 %v305_v0, 0.0  ;;  %v340_v12 = vadd.f32 %v339_v2, %v336_v1  ;;  %v347_v13 = vmul.f32 %v346_v10, %v1235_v6  ;;  %v287_v15 = vadd.f32 %v286_v63, %v264_v55 }
  0x69   :  { %v325_v16 = vadd.f32 %v324_v54, %v321_v7  ;;  %v358_v17 = vstv %s1460_s9  ;;  %v361_v18 = vstv %s1462_s4  ;;  %v354_v24 = vstv %s1465_s3  ;;  %s1565_s9 = sld [smem:[#allocation2 + $0x11]] }
  0x6a   :  { %v309_v19 = vmul.f32 %v308_v51, %v306_v11  ;;  %v344_v20 = vadd.f32 %v343_v9, %v340_v12  ;;  %v359_v21 = vmul.f32 %v358_v17, %v1229_v3  ;;  %v362_v22 = vmul.f32 %v361_v18, %v1231_v4  ;;  %s1569_s4 = sld [smem:[#allocation2 + $0x31]] }
  0x6b   :  { %v328_v23 = vadd.f32 %v327_v58, %v325_v16  ;;  %v365_v25 = vstv %s1471_s10  ;;  %v369_v26 = vstv %s1473_s11  ;;  %v373_v30 = vstv %s1476_s12  ;;  %s1574_s3 = sld [smem:[#allocation2 + $0x51]]  ;;  %s1579_s11 = sld [smem:[#allocation4 + $0x10]] }
  0x6c   :  { %v348_v27 = vadd.f32 %v347_v13, %v344_v20  ;;  %v363_v28 = vadd.f32 %v362_v22, %v359_v21  ;;  %v366_v29 = vmul.f32 %v365_v25, %v1233_v5  ;;  %v310_v31 = vadd.f32 %v309_v19, %v287_v15  ;;  %s1576_s10 = sld [smem:[#allocation2 + $0x71]]  ;;  %s1585_s12 = sld [smem:[#allocation6 + $0x10]] }
  0x6d   :  { %v329_v32 = vmax.f32 %v328_v23, 0.0  ;;  %v370_v33 = vmul.f32 %v369_v26, %v1235_v6  ;;  %v381_v34 = vstv %s1481_s13  ;;  %v384_v38 = vstv %s1485_s14  ;;  %s1587_s13 = sld [smem:[#allocation2 + $0x12]] }
  0x6e   :  { %v351_v35 = vadd.f32 %v350_v14, %v348_v27  ;;  %v367_v36 = vadd.f32 %v366_v29, %v363_v28  ;;  %v382_v37 = vmul.f32 %v381_v34, %v1229_v3  ;;  %v385_v40 = vmul.f32 %v384_v38, %v1231_v4  ;;  %s1590_s14 = sld [smem:[#allocation2 + $0x32]] }
  0x6f   :  { %v332_v39 = vmul.f32 %v331_v8, %v329_v32  ;;  %v388_v41 = vstv %s1490_s15  ;;  %v392_v42 = vstv %s1492_s16  ;;  %v377_v45 = vstv %s1496_s17  ;;  %s1592_s15 = sld [smem:[#allocation2 + $0x52]]  ;;  %s1599_s16 = sld [smem:[#allocation4 + $0x11]] }
  0x70   :  { %v352_v43 = vmax.f32 %v351_v35, 0.0  ;;  %v371_v44 = vadd.f32 %v370_v33, %v367_v36  ;;  %v389_v46 = vmul.f32 %v388_v41, %v1233_v5  ;;  %v386_v48 = vadd.f32 %v385_v40, %v382_v37  ;;  %s1601_s17 = sld [smem:[#allocation2 + $0x72]] }
  0x71   :  { %v333_v47 = vadd.f32 %v332_v39, %v310_v31  ;;  %v393_v49 = vmul.f32 %v392_v42, %v1235_v6  ;;  %v396_v50 = vstv %s1500_s5  ;;  %v404_v53 = vstv %s1504_s6  ;;  %s1606_s5 = sld [smem:[#allocation6 + $0x11]]  ;;  %s1608_s6 = sld [smem:[#allocation2 + $0x13]] }
  0x72   :  { %v355_v51 = vmul.f32 %v354_v24, %v352_v43  ;;  %v374_v52 = vadd.f32 %v373_v30, %v371_v44  ;;  %v407_v54 = vstv %s1506_s18  ;;  %v390_v55 = vadd.f32 %v389_v46, %v386_v48  ;;  %s1612_s18 = sld [smem:[#allocation2 + $0x33]] }
  0x73   :  { %v405_v56 = vmul.f32 %v404_v53, %v1229_v3  ;;  %v408_v57 = vmul.f32 %v407_v54, %v1231_v4  ;;  %v411_v58 = vstv %s1511_s19  ;;  %v415_v62 = vstv %s1515_s20  ;;  %s1614_s19 = sld [smem:[#allocation2 + $0x53]]  ;;  %s1621_s20 = sld [smem:[#allocation4 + $0x12]] }
  0x74   :  { %v356_v59 = vadd.f32 %v355_v51, %v333_v47  ;;  %v375_v60 = vmax.f32 %v374_v52, 0.0  ;;  %v412_v61 = vmul.f32 %v411_v58, %v1233_v5  ;;  %v394_v63 = vadd.f32 %v393_v49, %v390_v55 }
  0x75   :  { %v409_v0 = vadd.f32 %v408_v57, %v405_v56  ;;  %v416_v1 = vmul.f32 %v415_v62, %v1235_v6  ;;  %v400_v7 = vstv %s1519_s21  ;;  %v427_v8 = vstv %s1523_s22  ;;  %s1623_s21 = sld [smem:[#allocation2 + $0x73]]  ;;  %s1627_s22 = sld [smem:[#allocation6 + $0x12]] }
  0x76   :  { %v378_v2 = vmul.f32 %v377_v45, %v375_v60  ;;  %v430_v9 = vstv %s1525_s23  ;;  %v397_v10 = vadd.f32 %v396_v50, %v394_v63  ;;  %v428_v12 = vmul.f32 %v427_v8, %v1229_v3  ;;  %s1632_s23 = sld [smem:[#allocation2 + $0x14]] }
  0x77   :  { %v413_v11 = vadd.f32 %v412_v61, %v409_v0  ;;  %v431_v13 = vmul.f32 %v430_v9, %v1231_v4  ;;  %v419_v15 = vstv %s1530_s24  ;;  %v434_v16 = vstv %s1534_s25  ;;  %s1634_s24 = sld [smem:[#allocation2 + $0x34]]  ;;  %s1638_s25 = sld [smem:[#allocation4 + $0x13]] }
  0x78   :  { %v379_v14 = vadd.f32 %v378_v2, %v356_v59  ;;  %v438_v17 = vstv %s1536_s26  ;;  %v398_v18 = vmax.f32 %v397_v10, 0.0  ;;  %v435_v21 = vmul.f32 %v434_v16, %v1233_v5  ;;  %s1643_s26 = sld [smem:[#allocation2 + $0x54]] }
  0x79   :  { %v417_v19 = vadd.f32 %v416_v1, %v413_v11  ;;  %v432_v20 = vadd.f32 %v431_v13, %v428_v12  ;;  %v423_v22 = vstv %s1540_s27  ;;  %v439_v23 = vmul.f32 %v438_v17, %v1235_v6  ;;  %s1645_s27 = sld [smem:[#allocation2 + $0x74]] }
  0x7a   :  { %v450_v24 = vstv %s1544_s28  ;;  %v453_v25 = vstv %s1546_s0  ;;  %v401_v26 = vmul.f32 %v400_v7, %v398_v18  ;;  %v442_v30 = vstv %s1551_s1  ;;  %s1648_s28 = sld [smem:[#allocation4 + $0x14]]  ;;  %s1654_s0 = sld [smem:[#allocation2 + $0x15]] }
  0x7b   :  { %v420_v27 = vadd.f32 %v419_v15, %v417_v19  ;;  %v436_v28 = vadd.f32 %v435_v21, %v432_v20  ;;  %v451_v29 = vmul.f32 %v450_v24, %v1229_v3  ;;  %v454_v31 = vmul.f32 %v453_v25, %v1231_v4  ;;  %s1657_s1 = sld [smem:[#allocation2 + $0x35]] }
  0x7c   :  { %v457_v32 = vstv %s1555_s29  ;;  %v461_v33 = vstv %s1557_s30  ;;  %v402_v34 = vadd.f32 %v401_v26, %v379_v14  ;;  %v446_v38 = vstv %s1563_s8  ;;  %s1663_s29 = sld [smem:[#allocation2 + $0x55]]  ;;  %s1668_s8 = sld [smem:[#allocation6 + $0x13]] }
  0x7d   :  { %v421_v35 = vmax.f32 %v420_v27, 0.0  ;;  %v440_v36 = vadd.f32 %v439_v23, %v436_v28  ;;  %v458_v37 = vmul.f32 %v457_v32, %v1233_v5  ;;  %v455_v39 = vadd.f32 %v454_v31, %v451_v29  ;;  %s1665_s30 = sld [smem:[#allocation2 + $0x75]] }
  0x7e   :  { %v462_v40 = vmul.f32 %v461_v33, %v1235_v6  ;;  %v473_v41 = vstv %s1565_s9  ;;  %v476_v45 = vstv %s1569_s4  ;;  %v480_v48 = vstv %s1574_s3  ;;  %s1670_s9 = sld [smem:[#allocation6 + $0x14]]  ;;  %s1675_s4 = sld [smem:[#allocation2 + $0x16]] }
  0x7f   :  { %v424_v42 = vmul.f32 %v423_v22, %v421_v35  ;;  %v443_v43 = vadd.f32 %v442_v30, %v440_v36  ;;  %v474_v44 = vmul.f32 %v473_v41, %v1229_v3  ;;  %v459_v46 = vadd.f32 %v458_v37, %v455_v39  ;;  %s1679_s3 = sld [smem:[#allocation2 + $0x36]] }
  0x80   :  { %v477_v47 = vmul.f32 %v476_v45, %v1231_v4  ;;  %v484_v49 = vstv %s1576_s10  ;;  %v465_v52 = vstv %s1579_s11  ;;  %v481_v53 = vmul.f32 %v480_v48, %v1233_v5  ;;  %s1681_s10 = sld [smem:[#allocation2 + $0x56]]  ;;  %s1688_s11 = sld [smem:[#allocation4 + $0x15]] }
  0x81   :  { %v425_v50 = vadd.f32 %v424_v42, %v402_v34  ;;  %v444_v51 = vmax.f32 %v443_v43, 0.0  ;;  %v463_v54 = vadd.f32 %v462_v40, %v459_v46  ;;  %v469_v55 = vstv %s1585_s12  ;;  %s1690_s12 = sld [smem:[#allocation2 + $0x76]] }
  0x82   :  { %v478_v56 = vadd.f32 %v477_v47, %v474_v44  ;;  %v485_v57 = vmul.f32 %v484_v49, %v1235_v6  ;;  %v496_v59 = vstv %s1587_s13  ;;  %v499_v60 = vstv %s1590_s14  ;;  %s1694_s13 = sld [smem:[#allocation6 + $0x15]]  ;;  %s1698_s14 = sld [smem:[#allocation2 + $0x17]] }
  0x83   :  { %v447_v58 = vmul.f32 %v446_v38, %v444_v51  ;;  %v503_v61 = vstv %s1592_s15  ;;  %v466_v62 = vadd.f32 %v465_v52, %v463_v54  ;;  %v497_v0 = vmul.f32 %v496_v59, %v1229_v3  ;;  %s1700_s15 = sld [smem:[#allocation2 + $0x37]] }
  0x84   :  { %v482_v63 = vadd.f32 %v481_v53, %v478_v56  ;;  %v500_v1 = vmul.f32 %v499_v60, %v1231_v4  ;;  %v488_v7 = vstv %s1599_s16  ;;  %v504_v8 = vmul.f32 %v503_v61, %v1233_v5  ;;  %s1705_s16 = sld [smem:[#allocation4 + $0x16]] }
  0x85   :  { %v448_v2 = vadd.f32 %v447_v58, %v425_v50  ;;  %v507_v9 = vstv %s1601_s17  ;;  %v467_v10 = vmax.f32 %v466_v62, 0.0  ;;  %v492_v14 = vstv %s1606_s5  ;;  %s1710_s17 = sld [smem:[#allocation2 + $0x57]] }
  0x86   :  { %v486_v11 = vadd.f32 %v485_v57, %v482_v63  ;;  %v501_v12 = vadd.f32 %v500_v1, %v497_v0  ;;  %v508_v13 = vmul.f32 %v507_v9, %v1235_v6  ;;  %v519_v15 = vstv %s1608_s6  ;;  %s1712_s5 = sld [smem:[#allocation2 + $0x77]]  ;;  %s1715_s6 = sld [smem:[#allocation6 + $0x16]] }
  0x87   :  { %v522_v16 = vstv %s1612_s18  ;;  %v526_v17 = vstv %s1614_s19  ;;  %v470_v18 = vmul.f32 %v469_v55, %v467_v10  ;;  %v520_v21 = vmul.f32 %v519_v15, %v1229_v3  ;;  %s1720_s18 = sld [smem:[#allocation2 + $0x18]] }
  0x88   :  { %v489_v19 = vadd.f32 %v488_v7, %v486_v11  ;;  %v505_v20 = vadd.f32 %v504_v8, %v501_v12  ;;  %v511_v22 = vstv %s1621_s20  ;;  %v523_v23 = vmul.f32 %v522_v16, %v1231_v4  ;;  %s1722_s19 = sld [smem:[#allocation2 + $0x38]]  ;;  %s1726_s20 = sld [smem:[#allocation4 + $0x17]] }
  0x89   :  { %v527_v24 = vmul.f32 %v526_v17, %v1233_v5  ;;  %v530_v25 = vstv %s1623_s21  ;;  %v471_v26 = vadd.f32 %v470_v18, %v448_v2  ;;  %v515_v29 = vstv %s1627_s22  ;;  %s1731_s21 = sld [smem:[#allocation2 + $0x58]] }
  0x8a   :  { %v490_v27 = vmax.f32 %v489_v19, 0.0  ;;  %v509_v28 = vadd.f32 %v508_v13, %v505_v20  ;;  %v524_v30 = vadd.f32 %v523_v23, %v520_v21  ;;  %v531_v31 = vmul.f32 %v530_v25, %v1235_v6  ;;  %s1733_s22 = sld [smem:[#allocation2 + $0x78]] }
  0x8b   :  { %v542_v32 = vstv %s1632_s23  ;;  %v545_v33 = vstv %s1634_s24  ;;  %v534_v39 = vstv %s1638_s25  ;;  %v549_v40 = vstv %s1643_s26  ;;  %s1739_s23 = sld [smem:[#allocation6 + $0x17]]  ;;  %s1741_s24 = sld [smem:[#allocation2 + $0x19]] }
  0x8c   :  { %v493_v34 = vmul.f32 %v492_v14, %v490_v27  ;;  %v512_v35 = vadd.f32 %v511_v22, %v509_v28  ;;  %v543_v36 = vmul.f32 %v542_v32, %v1229_v3  ;;  %v546_v37 = vmul.f32 %v545_v33, %v1231_v4  ;;  %s1745_s25 = sld [smem:[#allocation2 + $0x39]] }
  0x8d   :  { %v528_v38 = vadd.f32 %v527_v24, %v524_v30  ;;  %v553_v41 = vstv %s1645_s27  ;;  %v550_v44 = vmul.f32 %v549_v40, %v1233_v5  ;;  %v557_v45 = vstv %s1648_s28  ;;  %s1750_s26 = sld [smem:[#allocation2 + $0x59]]  ;;  %s1755_s28 = sld [smem:[#allocation4 + $0x18]] }
  0x8e   :  { %v513_v42 = vmax.f32 %v512_v35, 0.0  ;;  %v547_v43 = vadd.f32 %v546_v37, %v543_v36  ;;  %v494_v46 = vadd.f32 %v493_v34, %v471_v26  ;;  %v554_v48 = vmul.f32 %v553_v41, %v1235_v6  ;;  %s1752_s27 = sld [smem:[#allocation2 + $0x79]] }
  0x8f   :  { %v532_v47 = vadd.f32 %v531_v31, %v528_v38  ;;  %v565_v49 = vstv %s1654_s0  ;;  %v568_v53 = vstv %s1657_s1  ;;  %v572_v56 = vstv %s1663_s29  ;;  %s1761_s0 = sld [smem:[#allocation6 + $0x18]]  ;;  %s1763_s1 = sld [smem:[#allocation2 + $0x1a]] }
  0x90   :  { %v516_v50 = vmul.f32 %v515_v29, %v513_v42  ;;  %v551_v51 = vadd.f32 %v550_v44, %v547_v43  ;;  %v566_v52 = vmul.f32 %v565_v49, %v1229_v3  ;;  %v569_v55 = vmul.f32 %v568_v53, %v1231_v4  ;;  %s1766_s29 = sld [smem:[#allocation2 + $0x3a]] }
  0x91   :  { %v535_v54 = vadd.f32 %v534_v39, %v532_v47  ;;  %v576_v57 = vstv %s1665_s30  ;;  %v538_v58 = vstv %s1668_s8  ;;  %v561_v60 = vstv %s1670_s9  ;;  %s1768_s30 = sld [smem:[#allocation2 + $0x5a]]  ;;  %s1775_s8 = sld [smem:[#allocation4 + $0x19]] }
  0x92   :  { %v555_v59 = vadd.f32 %v554_v48, %v551_v51  ;;  %v573_v61 = vmul.f32 %v572_v56, %v1233_v5  ;;  %v517_v62 = vadd.f32 %v516_v50, %v494_v46  ;;  %v570_v0 = vadd.f32 %v569_v55, %v566_v52  ;;  %s1777_s9 = sld [smem:[#allocation2 + $0x7a]] }
  0x93   :  { %v536_v63 = vmax.f32 %v535_v54, 0.0  ;;  %v577_v1 = vmul.f32 %v576_v57, %v1235_v6  ;;  %v588_v7 = vstv %s1675_s4  ;;  %v591_v8 = vstv %s1679_s3  ;;  %s1782_s4 = sld [smem:[#allocation6 + $0x19]]  ;;  %s1784_s3 = sld [smem:[#allocation2 + $0x1b]] }
  0x94   :  { %v558_v2 = vadd.f32 %v557_v45, %v555_v59  ;;  %v595_v9 = vstv %s1681_s10  ;;  %v574_v11 = vadd.f32 %v573_v61, %v570_v0  ;;  %v589_v12 = vmul.f32 %v588_v7, %v1229_v3  ;;  %s1788_s10 = sld [smem:[#allocation2 + $0x3b]] }
  0x95   :  { %v539_v10 = vmul.f32 %v538_v58, %v536_v63  ;;  %v592_v13 = vmul.f32 %v591_v8, %v1231_v4  ;;  %v580_v15 = vstv %s1688_s11  ;;  %v596_v16 = vmul.f32 %v595_v9, %v1233_v5  ;;  %s1790_s11 = sld [smem:[#allocation2 + $0x5b]] }
  0x96   :  { %v559_v14 = vmax.f32 %v558_v2, 0.0  ;;  %v599_v17 = vstv %s1690_s12  ;;  %v578_v19 = vadd.f32 %v577_v1, %v574_v11  ;;  %v584_v23 = vstv %s1694_s13  ;;  %s1797_s12 = sld [smem:[#allocation4 + $0x1a]]  ;;  %s1799_s13 = sld [smem:[#allocation2 + $0x7b]] }
  0x97   :  { %v540_v18 = vadd.f32 %v539_v10, %v517_v62  ;;  %v593_v20 = vadd.f32 %v592_v13, %v589_v12  ;;  %v600_v21 = vmul.f32 %v599_v17, %v1235_v6  ;;  %v611_v24 = vstv %s1698_s14  ;;  %s1803_s14 = sld [smem:[#allocation6 + $0x1a]] }
  0x98   :  { %v562_v22 = vmul.f32 %v561_v60, %v559_v14  ;;  %v614_v25 = vstv %s1700_s15  ;;  %v581_v26 = vadd.f32 %v580_v15, %v578_v19  ;;  %v612_v28 = vmul.f32 %v611_v24, %v1229_v3  ;;  %s1808_s15 = sld [smem:[#allocation2 + $0x1c]] }
  0x99   :  { %v597_v27 = vadd.f32 %v596_v16, %v593_v20  ;;  %v615_v29 = vmul.f32 %v614_v25, %v1231_v4  ;;  %v603_v31 = vstv %s1705_s16  ;;  %v618_v32 = vstv %s1710_s17  ;;  %s1810_s16 = sld [smem:[#allocation2 + $0x3c]]  ;;  %s1814_s17 = sld [smem:[#allocation4 + $0x1b]] }
  0x9a   :  { %v563_v30 = vadd.f32 %v562_v22, %v540_v18  ;;  %v622_v33 = vstv %s1712_s5  ;;  %v582_v34 = vmax.f32 %v581_v26, 0.0  ;;  %v619_v37 = vmul.f32 %v618_v32, %v1233_v5  ;;  %s1819_s5 = sld [smem:[#allocation2 + $0x5c]] }
  0x9b   :  { %v601_v35 = vadd.f32 %v600_v21, %v597_v27  ;;  %v616_v36 = vadd.f32 %v615_v29, %v612_v28  ;;  %v607_v38 = vstv %s1715_s6  ;;  %v623_v39 = vmul.f32 %v622_v33, %v1235_v6  ;;  %s1821_s6 = sld [smem:[#allocation2 + $0x7c]] }
  0x9c   :  { %v634_v40 = vstv %s1720_s18  ;;  %v637_v41 = vstv %s1722_s19  ;;  %v585_v42 = vmul.f32 %v584_v23, %v582_v34  ;;  %v626_v46 = vstv %s1726_s20  ;;  %s1824_s18 = sld [smem:[#allocation4 + $0x1c]]  ;;  %s1830_s19 = sld [smem:[#allocation2 + $0x1d]] }
  0x9d   :  { %v604_v43 = vadd.f32 %v603_v31, %v601_v35  ;;  %v620_v44 = vadd.f32 %v619_v37, %v616_v36  ;;  %v635_v45 = vmul.f32 %v634_v40, %v1229_v3  ;;  %v638_v47 = vmul.f32 %v637_v41, %v1231_v4  ;;  %s1833_s20 = sld [smem:[#allocation2 + $0x3d]] }
  0x9e   :  { %v641_v48 = vstv %s1731_s21  ;;  %v645_v49 = vstv %s1733_s22  ;;  %v586_v50 = vadd.f32 %v585_v42, %v563_v30  ;;  %v630_v54 = vstv %s1739_s23  ;;  %s1839_s21 = sld [smem:[#allocation2 + $0x5d]]  ;;  %s1844_s23 = sld [smem:[#allocation6 + $0x1b]] }
  0x9f   :  { %v605_v51 = vmax.f32 %v604_v43, 0.0  ;;  %v624_v52 = vadd.f32 %v623_v39, %v620_v44  ;;  %v642_v53 = vmul.f32 %v641_v48, %v1233_v5  ;;  %v639_v55 = vadd.f32 %v638_v47, %v635_v45  ;;  %s1841_s22 = sld [smem:[#allocation2 + $0x7d]] }
  0xa0   :  { %v646_v56 = vmul.f32 %v645_v49, %v1235_v6  ;;  %v657_v57 = vstv %s1741_s24  ;;  %v660_v61 = vstv %s1745_s25  ;;  %v664_v0 = vstv %s1750_s26  ;;  %s1846_s24 = sld [smem:[#allocation6 + $0x1c]]  ;;  %s1851_s25 = sld [smem:[#allocation2 + $0x1e]] }
  0xa1   :  { %v608_v58 = vmul.f32 %v607_v38, %v605_v51  ;;  %v627_v59 = vadd.f32 %v626_v46, %v624_v52  ;;  %v658_v60 = vmul.f32 %v657_v57, %v1229_v3  ;;  %v643_v62 = vadd.f32 %v642_v53, %v639_v55  ;;  %s1855_s26 = sld [smem:[#allocation2 + $0x3e]] }
  0xa2   :  { %v661_v63 = vmul.f32 %v660_v61, %v1231_v4  ;;  %v668_v1 = vstv %s1752_s27  ;;  %v649_v8 = vstv %s1755_s28  ;;  %v665_v9 = vmul.f32 %v664_v0, %v1233_v5  ;;  %s1857_s27 = sld [smem:[#allocation2 + $0x5e]]  ;;  %s1864_s28 = sld [smem:[#allocation4 + $0x1d]] }
  0xa3   :  { %v609_v2 = vadd.f32 %v608_v58, %v586_v50  ;;  %v628_v7 = vmax.f32 %v627_v59, 0.0  ;;  %v647_v10 = vadd.f32 %v646_v56, %v643_v62  ;;  %v653_v11 = vstv %s1761_s0  ;;  %s1866_s0 = sld [smem:[#allocation2 + $0x7e]] }
  0xa4   :  { %v662_v12 = vadd.f32 %v661_v63, %v658_v60  ;;  %v669_v13 = vmul.f32 %v668_v1, %v1235_v6  ;;  %v680_v15 = vstv %s1763_s1  ;;  %v683_v16 = vstv %s1766_s29  ;;  %s1870_s1 = sld [smem:[#allocation6 + $0x1d]]  ;;  %s1874_s29 = sld [smem:[#allocation2 + $0x1f]] }
  0xa5   :  { %v631_v14 = vmul.f32 %v630_v54, %v628_v7  ;;  %v687_v17 = vstv %s1768_s30  ;;  %v650_v18 = vadd.f32 %v649_v8, %v647_v10  ;;  %v681_v20 = vmul.f32 %v680_v15, %v1229_v3  ;;  %s1876_s30 = sld [smem:[#allocation2 + $0x3f]] }
  0xa6   :  { %v666_v19 = vadd.f32 %v665_v9, %v662_v12  ;;  %v684_v21 = vmul.f32 %v683_v16, %v1231_v4  ;;  %v672_v23 = vstv %s1775_s8  ;;  %v688_v24 = vmul.f32 %v687_v17, %v1233_v5  ;;  %s1881_s8 = sld [smem:[#allocation4 + $0x1e]] }
  0xa7   :  { %v632_v22 = vadd.f32 %v631_v14, %v609_v2  ;;  %v691_v25 = vstv %s1777_s9  ;;  %v651_v26 = vmax.f32 %v650_v18, 0.0  ;;  %v676_v30 = vstv %s1782_s4  ;;  %s1886_s9 = sld [smem:[#allocation2 + $0x5f]] }
  0xa8   :  { %v670_v27 = vadd.f32 %v669_v13, %v666_v19  ;;  %v685_v28 = vadd.f32 %v684_v21, %v681_v20  ;;  %v692_v29 = vmul.f32 %v691_v25, %v1235_v6  ;;  %v703_v31 = vstv %s1784_s3  ;;  %s1888_s4 = sld [smem:[#allocation2 + $0x7f]]  ;;  %s1899_s3 = sld [smem:[#allocation6 + $0x1e]] }
  0xa9   :  { %v706_v32 = vstv %s1788_s10  ;;  %v710_v33 = vstv %s1790_s11  ;;  %v654_v34 = vmul.f32 %v653_v11, %v651_v26  ;;  %v704_v37 = vmul.f32 %v703_v31, %v1229_v3  ;;  %s1901_s10 = sld [smem:[#allocation4 + $0x1f]] }
  0xaa   :  { %v673_v35 = vadd.f32 %v672_v23, %v670_v27  ;;  %v689_v36 = vadd.f32 %v688_v24, %v685_v28  ;;  %v695_v38 = vstv %s1797_s12  ;;  %v707_v39 = vmul.f32 %v706_v32, %v1231_v4  ;;  %s1909_s11 = sld [smem:[#allocation6 + $0x1f]]  ;;  %s817_s12 = sld [smem:[#allocation7]] }
  0xab   :  { %v711_v40 = vmul.f32 %v710_v33, %v1233_v5  ;;  %v714_v41 = vstv %s1799_s13  ;;  %v655_v42 = vadd.f32 %v654_v34, %v632_v22  ;;  %v699_v45 = vstv %s1803_s14 }
  0xac   :  { %v674_v43 = vmax.f32 %v673_v35, 0.0  ;;  %v693_v44 = vadd.f32 %v692_v29, %v689_v36  ;;  %v708_v46 = vadd.f32 %v707_v39, %v704_v37  ;;  %v715_v47 = vmul.f32 %v714_v41, %v1235_v6 }
  0xad   :  { %v726_v48 = vstv %s1808_s15  ;;  %v729_v49 = vstv %s1810_s16  ;;  %v718_v55 = vstv %s1814_s17  ;;  %v733_v56 = vstv %s1819_s5 }
  0xae   :  { %v677_v50 = vmul.f32 %v676_v30, %v674_v43  ;;  %v696_v51 = vadd.f32 %v695_v38, %v693_v44  ;;  %v727_v52 = vmul.f32 %v726_v48, %v1229_v3  ;;  %v730_v53 = vmul.f32 %v729_v49, %v1231_v4 }
  0xaf   :  { %v712_v54 = vadd.f32 %v711_v40, %v708_v46  ;;  %v737_v57 = vstv %s1821_s6  ;;  %v734_v60 = vmul.f32 %v733_v56, %v1233_v5  ;;  %v741_v61 = vstv %s1824_s18 }
  0xb0   :  { %v697_v58 = vmax.f32 %v696_v51, 0.0  ;;  %v731_v59 = vadd.f32 %v730_v53, %v727_v52  ;;  %v678_v62 = vadd.f32 %v677_v50, %v655_v42  ;;  %v738_v0 = vmul.f32 %v737_v57, %v1235_v6 }
  0xb1   :  { %v716_v63 = vadd.f32 %v715_v47, %v712_v54  ;;  %v749_v1 = vstv %s1830_s19  ;;  %v752_v9 = vstv %s1833_s20  ;;  %v756_v12 = vstv %s1839_s21 }
  0xb2   :  { %v700_v2 = vmul.f32 %v699_v45, %v697_v58  ;;  %v735_v7 = vadd.f32 %v734_v60, %v731_v59  ;;  %v750_v8 = vmul.f32 %v749_v1, %v1229_v3  ;;  %v753_v11 = vmul.f32 %v752_v9, %v1231_v4 }
  0xb3   :  { %v719_v10 = vadd.f32 %v718_v55, %v716_v63  ;;  %v760_v13 = vstv %s1841_s22  ;;  %v722_v14 = vstv %s1844_s23  ;;  %v745_v16 = vstv %s1846_s24 }
  0xb4   :  { %v739_v15 = vadd.f32 %v738_v0, %v735_v7  ;;  %v757_v17 = vmul.f32 %v756_v12, %v1233_v5  ;;  %v701_v18 = vadd.f32 %v700_v2, %v678_v62  ;;  %v754_v20 = vadd.f32 %v753_v11, %v750_v8 }
  0xb5   :  { %v720_v19 = vmax.f32 %v719_v10, 0.0  ;;  %v761_v21 = vmul.f32 %v760_v13, %v1235_v6  ;;  %v772_v23 = vstv %s1851_s25  ;;  %v775_v24 = vstv %s1855_s26 }
  0xb6   :  { %v742_v22 = vadd.f32 %v741_v61, %v739_v15  ;;  %v779_v25 = vstv %s1857_s27  ;;  %v758_v27 = vadd.f32 %v757_v17, %v754_v20  ;;  %v773_v28 = vmul.f32 %v772_v23, %v1229_v3 }
  0xb7   :  { %v723_v26 = vmul.f32 %v722_v14, %v720_v19  ;;  %v776_v29 = vmul.f32 %v775_v24, %v1231_v4  ;;  %v764_v31 = vstv %s1864_s28  ;;  %v780_v32 = vmul.f32 %v779_v25, %v1233_v5 }
  0xb8   :  { %v743_v30 = vmax.f32 %v742_v22, 0.0  ;;  %v783_v33 = vstv %s1866_s0  ;;  %v762_v35 = vadd.f32 %v761_v21, %v758_v27  ;;  %v768_v39 = vstv %s1870_s1 }
  0xb9   :  { %v724_v34 = vadd.f32 %v723_v26, %v701_v18  ;;  %v777_v36 = vadd.f32 %v776_v29, %v773_v28  ;;  %v784_v37 = vmul.f32 %v783_v33, %v1235_v6  ;;  %v795_v40 = vstv %s1874_s29 }
  0xba   :  { %v746_v38 = vmul.f32 %v745_v16, %v743_v30  ;;  %v798_v41 = vstv %s1876_s30  ;;  %v765_v42 = vadd.f32 %v764_v31, %v762_v35  ;;  %v796_v44 = vmul.f32 %v795_v40, %v1229_v3 }
  0xbb   :  { %v781_v43 = vadd.f32 %v780_v32, %v777_v36  ;;  %v799_v45 = vmul.f32 %v798_v41, %v1231_v4  ;;  %v787_v47 = vstv %s1881_s8  ;;  %v802_v48 = vstv %s1886_s9 }
  0xbc   :  { %v747_v46 = vadd.f32 %v746_v38, %v724_v34  ;;  %v806_v49 = vstv %s1888_s4  ;;  %v766_v50 = vmax.f32 %v765_v42, 0.0  ;;  %v803_v53 = vmul.f32 %v802_v48, %v1233_v5  ;;  %v821_v5 = vld [vmem:[%s1927_s2] sm:$0xf]  ;;  %s1097_s2 = sld [smem:[#allocation7 + $0x1]] }
  0xbd   :  { %v785_v51 = vadd.f32 %v784_v37, %v781_v43  ;;  %v800_v52 = vadd.f32 %v799_v45, %v796_v44  ;;  %v807_v54 = vmul.f32 %v806_v49, %v1235_v6  ;;  %v823_v55 = vlaneseq }
  0xbe   :  { %v769_v56 = vmul.f32 %v768_v39, %v766_v50  ;;  %v791_v58 = vstv %s1899_s3  ;;  %v810_v4 = vstv %s1901_s10  ;;  %v1166_v60 = vmov 1983009808  }
  0xbf   :  { %v788_v3 = vadd.f32 %v787_v47, %v785_v51  ;;  %v804_v57 = vadd.f32 %v803_v53, %v800_v52  ;;  %v824_v59 = vshrl.u32 %v823_v55, 7  ;;  %v842_v61 = vunpack.c.l.s4 %v1166_v60 }
  0xc0   :  { %v770_v62 = vadd.f32 %v769_v56, %v747_v46  ;;  %v814_v10 = vstv %s1909_s11  ;;  %v818_v22 = vstv %s817_s12 }
  0xc1   :  { %v789_v63 = vmax.f32 %v788_v3, 0.0  ;;  %v808_v0 = vadd.f32 %v807_v54, %v804_v57  ;;  %v825_v1 = vsub.s32 0, %v824_v59  ;;  %v829_v6 = vsub.s32 1, %v824_v59 }
  0xc2   :  { %v833_v2 = vsub.s32 2, %v824_v59  ;;  %v837_v7 = vsub.s32 3, %v824_v59  ;;  %v843_v11 = vunpack.c.0.s8 %v842_v61  ;;  %v891_v42 = vstv %s1097_s2 }
  0xc3   :  { %v792_v8 = vmul.f32 %v791_v58, %v789_v63  ;;  %v811_v9 = vadd.f32 %v810_v4, %v808_v0  ;;  %v826_v12 = vrot.slane %v821_v5, %v825_v1  ;;  %v830_v13 = vrot.slane %v821_v5, %v829_v6 }
  0xc4   :  { %v834_v14 = vrot.slane %v821_v5, %v833_v2  ;;  %v838_v15 = vrot.slane %v821_v5, %v837_v7  ;;  %v846_v18 = vsub.s32 %v843_v11, %v824_v59 }
  0xc5   :  { %v793_v16 = vadd.f32 %v792_v8, %v770_v62  ;;  %v812_v17 = vmax.f32 %v811_v9, 0.0  ;;  %v839_v19 = vcombine.low %v826_v12, %v830_v13 }
  0xc6   :  { %v840_v20 = vcombine.low %v834_v14, %v838_v15 }
  0xc7   :  { %v815_v21 = vmul.f32 %v814_v10, %v812_v17  ;;  %v847_v23 = vrot.slane %v839_v19, %v846_v18 }
  0xc8   :  { %v854_v24 = vrot.slane %v840_v20, %v846_v18 }
  0xc9   :  { %v816_v25 = vadd.f32 %v815_v21, %v793_v16 }
  0xca   :  { %v855_v27 = vcombine.low %v847_v23, %v854_v24 }
  0xcb   :  { %v819_v26 = vadd.f32 %v818_v22, %v816_v25 }
  0xcd   :  { %v820_v28 = vmax.f32 %v819_v26, 0.0 }
  0xcf   :  { %v857_v29 = vmul.f32 %v855_v27, %v820_v28 }
  0xd1   :  { %v859_v30 = vcombine.high %v857_v29, %v857_v29  ;;  %v866_v31 = vrot.slane %v857_v29, %v846_v18 }
  0xd3   :  { %v873_v32 = vrot.slane %v859_v30, %v846_v18  ;;  %v874_v33 = vcombine.high %v866_v31, %v866_v31  ;;  %v881_v34 = vsel %vm880_vm0, %v866_v31, 0.0 }
  0xd5   :  { %v875_v35 = vcombine.high %v873_v32, %v873_v32  ;;  %v882_v36 = vsel %vm880_vm0, %v874_v33, 0.0  ;;  %v884_v37 = vsel %vm880_vm0, %v873_v32, 0.0 }
  0xd6   :  { %v883_v38 = vadd.f32 %v882_v36, %v881_v34 }
  0xd7   :  { %v886_v39 = vsel %vm880_vm0, %v875_v35, 0.0 }
  0xd8   :  { %v885_v40 = vadd.f32 %v884_v37, %v883_v38 }
  0xda   :  { %v887_v41 = vadd.f32 %v886_v39, %v885_v40 }
  0xdc   :  { %888 = vadd.xlane.f32.xlu0 %v887_v41 }
 0x169   :  { %v889_v43 = vpop.xlane.xlu0 %888 }
 0x16a   :  { %v892_v44 = vadd.f32 %v891_v42, %v889_v43 }
 0x16c   :  { %v1098_v45 = vmul.f32 -1.442695, %v892_v44 }
 0x16e   :  { %1104 = vpow2.f32 %v1098_v45 }
 0x178   :  { %v1105_v46 = vpop.eup %1104 }
 0x179   :  { %v896_v47 = vadd.f32 1.0, %v1105_v46 }
 0x17b   :  { %1106 = vrcp.f32 %v896_v47 }
 0x185   :  { %v1107_v48 = vpop.eup %1106 }
 0x186   :  { %900 = vst.msk [vmem:[%s1932_s7] sm:$0x3] %vm899_vm1, %v1107_v48 }
 0x187   :  { %905 = vsyncpa [#allocation3], 1 }
 0x188   :  { %906 = vsyncpa [#allocation5], 1 }
 0x189   :  { %907 = vsyncpa [#allocation8], 1 }

// kernel: top_model_forward.2
= control target key start
LH: loop header
LB: loop body
LE: loop exit
PB: predicated region body
PF: predicated region fallthrough
CT: control target
= control target key end

     0   :  { %s11131_s15 = smov 0   ;;  %s11133_s16 = smov 0   ;;  %s13316_s0 = inlined_call_operand.vmem [shape: bf16[4,2,3,256], index: 0, kind: input, shape index: {}]   ;;  %s13317_s1 = inlined_call_operand.vmem [shape: bf16[9,512,3], index: 1, kind: input, shape index: {}]   ;;  %s13318_s2 = inlined_call_operand.vmem [shape: f32[512,1], index: 2, kind: input, shape index: {}]   ;;  %s13319_s3 = inlined_call_operand.vmem [shape: f32[1,144], index: 3, kind: input, shape index: {}]   ;;  %s13320_s4 = inlined_call_operand.vmem [shape: f32[4,1,512], index: 4, kind: output, shape index: {}]  }
   0x1   :  { %s11135_s17 = smov 0   ;;  %s11137_s18 = smov 0  }
   0x2   :  { %s11139_s19 = smov 0  }
   0x3 LB: > { %s23_s20 = sadd.s32 1, %s11084_s17  ;;  %s26_s21 = sadd.s32 1, %s11088_s18  ;;  %s11092_s19 = sphi %s11139_s19, %s14_s19   ;;  %s11088_s18 = sphi %s11137_s18, %s13374_s18   ;;  %s11084_s17 = sphi %s11135_s17, %s13373_s17   ;;  %s11080_s16 = sphi %s11133_s16, %s13372_s16   ;;  %s11076_s15 = sphi %s11131_s15, %s13371_s15  }
   0x4   : > { %p24_p0 = scmp.ge.s32.totalorder %s23_s20, 2  ;;  %p8588_p1 = scmp.ge.s32.totalorder %s11092_s19, 1 }
   0x5   : > { %p180_p2 = scmp.lt.s32.totalorder %s11092_s19, 9 }
   0x6   : > { %s13376_s20 = smov (%p24_p0, %s23_s20), 0  ;;  %s13378_s21 = smov (!%p24_p0, %s26_s21), %s11088_s18 }
   0x7   : > { %p181_p3 = pnand %p8588_p1, %p180_p2  ;;  %p28_p4 = scmp.ge.s32.totalorder %s13378_s21, 4 }
   0x9   : > { %s13380_s21 = smov (%p28_p4, %s13378_s21), 0  ;;  %184 = sbr.rel (%p181_p3) target bundleno = 1889 (0x761), region = 36 }
  0x10   : > { %p209_p5 = scmp.lt.s32.totalorder %s11080_s16, 3  ;;  %p211_p6 = scmp.lt.s32.totalorder %s11076_s15, 1 }
  0x11   : > { %p8593_p7 = scmp.ne.s32.totalorder %s11076_s15, 0 }
  0x12   : > { %s13382_s16 = smov (!%p209_p5, %s11080_s16), 3  ;;  %v227_v0 = vlaneseq (!%p8593_p7)  ;;  %v11094_v1 = vmov (!%p8593_p7), 0.0  }
  0x13   : > { %s212_s22 = scalar_select %p211_p6, %s11076_s15, 1 }
  0x14   : > { %s8590_s23 = sshll.u32 %s13382_s16, 2  ;;  %226 = sbr.rel (%p8593_p7) target bundleno = 27 (0x1b), region = 40  ;;  %vm229_vm0 = vcmp.lt.s32.totalorder (!%p8593_p7), %v227_v0, 512 }
  0x15   : > { %s8589_s24 = sshll.u32 %s212_s22, 1  ;;  %s11164_s27 = scalar_lea.vmem %s13320_s4, %s8590_s23 }
  0x16   : > { %s215_s28 = sadd.s32 %s8590_s23, %s8589_s24  ;;  %231 = vst.msk [vmem:[%s11164_s27] sm:$0xf] (!%p8593_p7), %vm229_vm0, %v11094_v1 }
  0x17   : > { %s8591_s29 = sshll.u32 %s215_s28, 1 }
  0x18   : > { %s11169_s6 = scalar_lea.vmem %s13316_s0, %s8591_s29 }
  0x1b PF: > { %v11173_v2 = vld.sshfl [vmem:[%s11169_s6] sm:$0x33 pattern:$0x76325410]  ;;  %s11095_s7 = smov 109   ;;  %s11096_s8 = smov 127  }
  0x1c   : > { %3465 = vrot.lane.b32.xlu1 %v11173_v2, %s11095_s7  ;;  %531 = vrot.lane.b32.xlu0 %v11173_v2, %s11096_s8  ;;  %v11179_v3 = vcombine.high %v11173_v2, %v11173_v2  ;;  %v13322_v4 = vmov 0   ;;  %s11098_s9 = smov 108   ;;  %s11099_s10 = smov 92   ;;  %vm634_vm1 = vcmask 1040384   ;;  %vm635_vm2 = vcmask 1041408   ;;  %v10765_v17 = vld [vmem:[%s13317_s1 + $0x100] sm:$0xff]  }
  0x1d   : > { %676 = vmatprep.mubr.bf16.mxu1 %v13322_v4  ;;  %3605 = vmatprep.mubr.bf16.mxu0 %v13322_v4  ;;  %v11100_v5 = vmov 65535   ;;  %vm3469_vm3 = vcmask 891904   ;;  %vm535_vm4 = vcmask 1039360   ;;  %vm4283_vm5 = vcmask 883712   ;;  %v10766_v18 = vld [vmem:[%s13317_s1 + $0x400] sm:$0xff]   ;;  %v10767_v28 = vld [vmem:[%s13317_s1 + $0x108] sm:$0xff]  }
  0x1e   : > { %10764 = vset.pattern.permute.xlu1 %v13322_v4  ;;  %10763 = vset.pattern.permute.xlu0 %v13322_v4  ;;  %v636_v6 = vsel %vm634_vm1, 4294967295, %v11100_v5  ;;  %vm537_vm6 = vcmask 23552   ;;  %v10768_v29 = vld [vmem:[%s13317_s1 + $0x408] sm:$0xff]   ;;  %v10769_v31 = vld [vmem:[%s13317_s1 + $0x110] sm:$0xff]   ;;  %s11101_s29 = smov 126   ;;  %v10771_v33 = vld [vmem:[%s13317_s1 + $0x118] sm:$0xff]  }
  0x1f   : > { %v11191_v9 = vsel %vm635_vm2, %v636_v6, 0  ;;  %v10770_v32 = vld [vmem:[%s13317_s1 + $0x410] sm:$0xff]   ;;  %v10772_v34 = vld [vmem:[%s13317_s1 + $0x418] sm:$0xff]   ;;  %v10773_v35 = vld [vmem:[%s13317_s1 + $0x120] sm:$0xff]   ;;  %vm5097_vm7 = vcmask 752640   ;;  %vm1841_vm8 = vcmask 1031168  }
  0x20   : > { %3467 = vrot.lane.b32.xlu1 %v11179_v3, %s11095_s7  ;;  %533 = vrot.lane.b32.xlu0 %v11179_v3, %s11096_s8  ;;  %v1257_v12 = vand.u32 %v11191_v9, %v11179_v3  ;;  %v1254_v23 = vand.u32 %v11173_v2, %v11191_v9  ;;  %v10774_v36 = vld [vmem:[%s13317_s1 + $0x420] sm:$0xff]   ;;  %v10775_v37 = vld [vmem:[%s13317_s1 + $0x128] sm:$0xff]   ;;  %s11102_s8 = smov 91   ;;  %vm5911_vm9 = vcmask 744448   ;;  %s11104_s22 = smov 90   ;;  %vm2655_vm10 = vcmask 900096  }
  0x21   : > { %v10776_v38 = vld [vmem:[%s13317_s1 + $0x428] sm:$0xff]   ;;  %v10777_v39 = vld [vmem:[%s13317_s1 + $0x130] sm:$0xff]   ;;  %v10779_v41 = vld [vmem:[%s13317_s1 + $0x138] sm:$0xff]   ;;  %vm6725_vm11 = vcmask 736256   ;;  %vm8090_vm12 = vcmask 130048  }
  0x22   : > { %v10778_v40 = vld [vmem:[%s13317_s1 + $0x430] sm:$0xff]   ;;  %v10780_v42 = vld [vmem:[%s13317_s1 + $0x438] sm:$0xff]   ;;  %v10781_v43 = vld [vmem:[%s13317_s1 + $0x140] sm:$0xff]  }
  0x23   : > { %v10782_v44 = vld [vmem:[%s13317_s1 + $0x440] sm:$0xff]   ;;  %v10783_v45 = vld [vmem:[%s13317_s1 + $0x148] sm:$0xff]   ;;  %v10785_v47 = vld [vmem:[%s13317_s1 + $0x150] sm:$0xff]  }
  0x24   : > { %4281 = vrot.lane.b32.xlu1 %v11179_v3, %s11098_s9  ;;  %4279 = vrot.lane.b32.xlu0 %v11173_v2, %s11098_s9  ;;  %v10784_v46 = vld [vmem:[%s13317_s1 + $0x448] sm:$0xff]   ;;  %v10786_v48 = vld [vmem:[%s13317_s1 + $0x450] sm:$0xff]  }
  0x25   : > { %v10787_v49 = vld [vmem:[%s13317_s1 + $0x158] sm:$0xff]   ;;  %v10789_v51 = vld [vmem:[%s13317_s1 + $0x160] sm:$0xff]   ;;  %v10791_v53 = vld [vmem:[%s13317_s1 + $0x168] sm:$0xff]  }
  0x26   : > { %v10788_v50 = vld [vmem:[%s13317_s1 + $0x458] sm:$0xff]   ;;  %v10790_v52 = vld [vmem:[%s13317_s1 + $0x460] sm:$0xff]   ;;  %v10792_v54 = vld [vmem:[%s13317_s1 + $0x468] sm:$0xff]  }
  0x27   : > { %v10793_v55 = vld [vmem:[%s13317_s1 + $0x170] sm:$0xff]   ;;  %v10795_v57 = vld [vmem:[%s13317_s1 + $0x178] sm:$0xff]   ;;  %v10797_v61 = vld [vmem:[%s13317_s1 + $0x180] sm:$0xff]  }
  0x28   : > { %5095 = vrot.lane.b32.xlu1 %v11179_v3, %s11099_s10  ;;  %5093 = vrot.lane.b32.xlu0 %v11173_v2, %s11099_s10  ;;  %v10794_v56 = vld [vmem:[%s13317_s1 + $0x470] sm:$0xff]   ;;  %v10796_v58 = vld [vmem:[%s13317_s1 + $0x478] sm:$0xff]  }
  0x29   : > { %v10798_v62 = vld [vmem:[%s13317_s1 + $0x500] sm:$0xff]   ;;  %v10800_v5 = vld [vmem:[%s13317_s1 + $0x508] sm:$0xff]  }
  0x2a   : > { %v11404_v6 = vld.sshfl [vmem:[%s11169_s6] sm:$0x33 pattern:$0x76325410]  ;;  %s11103_s6 = smov 110  }
  0x2c   : > { %1839 = vrot.lane.b32.xlu1 %v11179_v3, %s11101_s29  ;;  %1837 = vrot.lane.b32.xlu0 %v11173_v2, %s11101_s29  ;;  %v10799_v2 = vld [vmem:[%s13317_s1 + $0x188] sm:$0xff]  }
  0x30   : > { %5909 = vrot.lane.b32.xlu1 %v11179_v3, %s11102_s8  ;;  %5907 = vrot.lane.b32.xlu0 %v11404_v6, %s11102_s8 }
  0x34   : > { %2653 = vrot.lane.b32.xlu1 %v11179_v3, %s11103_s6  ;;  %2651 = vrot.lane.b32.xlu0 %v11404_v6, %s11103_s6 }
  0x38   : > { %6723 = vrot.lane.b32.xlu1 %v11179_v3, %s11104_s22  ;;  %6721 = vrot.lane.b32.xlu0 %v11404_v6, %s11104_s22  ;;  %v10867_v3 = vld [vmem:[%s13317_s1 + $0x98] sm:$0xff]  }
  0x39   : > { %v10868_v6 = vld [vmem:[%s13317_s1 + $0x618] sm:$0xff]  }
  0x8e   : > { %v3466_v7 = vpop.permute.xlu1 %3465  ;;  %v532_v8 = vpop.permute.xlu0 %531 }
  0x92   : > { %v3468_v10 = vpop.permute.xlu1 %3467  ;;  %v534_v11 = vpop.permute.xlu0 %533 }
  0x93   : > { %v642_v13 = vand.u32 %v11191_v9, %v534_v11  ;;  %v11197_v14 = vand.u32 %v3468_v10, %v11191_v9  ;;  %v3470_v15 = vsel %vm3469_vm3, %v3466_v7, %v3468_v10  ;;  %v536_v16 = vsel %vm535_vm4, %v532_v8, %v534_v11  ;;  %v10801_v7 = vld [vmem:[%s13317_s1 + $0x190] sm:$0xff]   ;;  %v10803_v10 = vld [vmem:[%s13317_s1 + $0x198] sm:$0xff]  }
  0x94   : > { %v11206_v19 = vand.u32 %v3470_v15, %v11191_v9  ;;  %v639_v20 = vand.u32 %v11191_v9, %v536_v16  ;;  %v10802_v8 = vld [vmem:[%s13317_s1 + $0x510] sm:$0xff]   ;;  %v10804_v11 = vld [vmem:[%s13317_s1 + $0x518] sm:$0xff]   ;;  %v10807_v15 = vld [vmem:[%s13317_s1 + $0x1a8] sm:$0xff]  }
  0x95   : > { %644 = vmatprep.subr.bf16.mxu1 %v642_v13  ;;  %3573 = vmatprep.subr.bf16.mxu0 %v11197_v14  ;;  %v10806_v13 = vld [vmem:[%s13317_s1 + $0x520] sm:$0xff]   ;;  %v10808_v16 = vld [vmem:[%s13317_s1 + $0x528] sm:$0xff]  }
  0x96   : > { %3574 = vmatpush1.bf16.msra.mxu0 %v11206_v19  ;;  %v4282_v21 = vpop.permute.xlu1 %4281  ;;  %645 = vmatpush1.bf16.msra.mxu1 %v639_v20  ;;  %v4280_v22 = vpop.permute.xlu0 %4279  ;;  %v10811_v20 = vld [vmem:[%s13317_s1 + $0x1b8] sm:$0xff]  }
  0x97   : > { %v4385_v24 = vand.u32 %v4282_v21, %v11191_v9  ;;  %v4284_v25 = vsel %vm4283_vm5, %v4280_v22, %v4282_v21  ;;  %1259 = vmatprep.subr.bf16.mxu1 %v1257_v12  ;;  %v10805_v12 = vld [vmem:[%s13317_s1 + $0x1a0] sm:$0xff]   ;;  %v10812_v21 = vld [vmem:[%s13317_s1 + $0x538] sm:$0xff]  }
  0x98   : > { %v4382_v26 = vand.u32 %v4284_v25, %v11191_v9  ;;  %v10813_v22 = vld [vmem:[%s13317_s1 + $0x1c0] sm:$0xff]   ;;  %v10816_v25 = vld [vmem:[%s13317_s1 + $0x548] sm:$0xff]  }
  0x99   : > { %8691 = vmatmul.mubr.msk.bf16.vlgmr.msra.gmra.mrb[0].mxu1 %vm537_vm6, %v10765_v17  ;;  %9139 = vmatmul.mubr.msk.bf16.vlgmr.msra.gmra.mrb[0].mxu0 %vm537_vm6, %v10766_v18  ;;  %v10809_v17 = vld [vmem:[%s13317_s1 + $0x1b0] sm:$0xff]  }
  0x9a   : > { %4387 = vmatprep.subr.bf16.mxu0 %v4385_v24  ;;  %1260 = vmatpush1.bf16.msra.mxu1 %v1254_v23  ;;  %v11218_v27 = vpop.permute.xlu1 %5095  ;;  %v5094_v59 = vpop.permute.xlu0 %5093  ;;  %v10810_v18 = vld [vmem:[%s13317_s1 + $0x530] sm:$0xff]   ;;  %v10814_v23 = vld [vmem:[%s13317_s1 + $0x540] sm:$0xff]   ;;  %v10815_v24 = vld [vmem:[%s13317_s1 + $0x1c8] sm:$0xff]  }
  0x9b   : > { %4388 = vmatpush1.bf16.msra.mxu0 %v4382_v26  ;;  %686 = vmatprep.mubr.bf16.mxu1 %v13322_v4  ;;  %v5199_v30 = vand.u32 %v11218_v27, %v11191_v9  ;;  %v5098_v60 = vsel %vm5097_vm7, %v5094_v59, %v11218_v27  ;;  %v10817_v26 = vld [vmem:[%s13317_s1 + $0x1d0] sm:$0xff]   ;;  %v10845_v59 = vld [vmem:[%s13317_s1 + $0x40] sm:$0xff]  }
  0x9c   : > { %3615 = vmatprep.mubr.bf16.mxu0 %v13322_v4  ;;  %v5196_v0 = vand.u32 %v5098_v60, %v11191_v9  ;;  %v10818_v27 = vld [vmem:[%s13317_s1 + $0x550] sm:$0xff]   ;;  %v10846_v60 = vld [vmem:[%s13317_s1 + $0x5c0] sm:$0xff]  }
  0x9d   : > { %5201 = vmatprep.subr.bf16.mxu0 %v5199_v30  ;;  %v10821_v30 = vld [vmem:[%s13317_s1 + $0x1e0] sm:$0xff]  }
  0x9e   : > { %v11383_v63 = vpop.permute.xlu1 %1839 }
  0x9f   : > { %v1943_v1 = vand.u32 %v11383_v63, %v11191_v9 }
  0xa1   : > { %8692 = vmatmul.mubr.msk.bf16.gmra.mrb[4].mxu1 %vm537_vm6, %v10767_v28  ;;  %9140 = vmatmul.mubr.msk.bf16.gmra.mrb[4].mxu0 %vm537_vm6, %v10768_v29  ;;  %v10819_v28 = vld [vmem:[%s13317_s1 + $0x1d8] sm:$0xff]  }
  0xa2   : > { %696 = vmatprep.mubr.bf16.mxu1 %v13322_v4  ;;  %3625 = vmatprep.mubr.bf16.mxu0 %v13322_v4  ;;  %v10820_v29 = vld [vmem:[%s13317_s1 + $0x558] sm:$0xff]  }
  0xa3   : > { %1945 = vmatprep.subr.bf16.mxu1 %v1943_v1  ;;  %v10851_v1 = vld [vmem:[%s13317_s1 + $0x58] sm:$0xff]  }
  0xa9   : > { %8693 = vmatmul.mubr.msk.bf16.gmra.mrb[8].mxu1 %vm537_vm6, %v10769_v31  ;;  %9141 = vmatmul.mubr.msk.bf16.gmra.mrb[8].mxu0 %vm537_vm6, %v10770_v32  ;;  %v10822_v31 = vld [vmem:[%s13317_s1 + $0x560] sm:$0xff]   ;;  %v10823_v32 = vld [vmem:[%s13317_s1 + $0x1e8] sm:$0xff]  }
  0xaa   : > { %706 = vmatprep.mubr.bf16.mxu1 %v13322_v4  ;;  %3635 = vmatprep.mubr.bf16.mxu0 %v13322_v4 }
  0xb1   : > { %8694 = vmatmul.mubr.msk.bf16.gmra.mrb[12].mxu1 %vm537_vm6, %v10771_v33  ;;  %9142 = vmatmul.mubr.msk.bf16.gmra.mrb[12].mxu0 %vm537_vm6, %v10772_v34  ;;  %v10824_v33 = vld [vmem:[%s13317_s1 + $0x568] sm:$0xff]   ;;  %v10825_v34 = vld [vmem:[%s13317_s1 + $0x1f0] sm:$0xff]  }
  0xb2   : > { %716 = vmatprep.mubr.bf16.mxu1 %v13322_v4  ;;  %3645 = vmatprep.mubr.bf16.mxu0 %v13322_v4 }
  0xb9   : > { %8695 = vmatmul.mubr.msk.bf16.gmra.mrb[16].mxu1 %vm537_vm6, %v10773_v35  ;;  %9143 = vmatmul.mubr.msk.bf16.gmra.mrb[16].mxu0 %vm537_vm6, %v10774_v36  ;;  %v10826_v35 = vld [vmem:[%s13317_s1 + $0x570] sm:$0xff]   ;;  %v10827_v36 = vld [vmem:[%s13317_s1 + $0x1f8] sm:$0xff]  }
  0xba   : > { %726 = vmatprep.mubr.bf16.mxu1 %v13322_v4  ;;  %3655 = vmatprep.mubr.bf16.mxu0 %v13322_v4 }
  0xc1   : > { %8696 = vmatmul.mubr.msk.bf16.gmra.mrb[20].mxu1 %vm537_vm6, %v10775_v37  ;;  %9144 = vmatmul.mubr.msk.bf16.gmra.mrb[20].mxu0 %vm537_vm6, %v10776_v38  ;;  %v10828_v37 = vld [vmem:[%s13317_s1 + $0x578] sm:$0xff]   ;;  %v1838_v38 = vpop.permute.xlu0 %1837 }
  0xc2   : > { %736 = vmatprep.mubr.bf16.mxu1 %v13322_v4  ;;  %3665 = vmatprep.mubr.bf16.mxu0 %v13322_v4 }
  0xc9   : > { %8697 = vmatmul.mubr.msk.bf16.gmra.mrb[24].mxu1 %vm537_vm6, %v10777_v39  ;;  %9145 = vmatmul.mubr.msk.bf16.gmra.mrb[24].mxu0 %vm537_vm6, %v10778_v40  ;;  %v1842_v39 = vsel %vm1841_vm8, %v1838_v38, %v11383_v63  ;;  %v10829_v40 = vld [vmem:[%s13317_s1] sm:$0xff]   ;;  %v10849_v63 = vld [vmem:[%s13317_s1 + $0x50] sm:$0xff]   ;;  %v10879_v38 = vld [vmem:[%s13317_s1 + $0xc8] sm:$0xff]  }
  0xca   : > { %746 = vmatprep.mubr.bf16.mxu1 %v13322_v4  ;;  %3675 = vmatprep.mubr.bf16.mxu0 %v13322_v4 }
  0xd1   : > { %8698 = vmatmul.mubr.msk.bf16.gmra.mrb[28].mxu1 %vm537_vm6, %v10779_v41  ;;  %9146 = vmatmul.mubr.msk.bf16.gmra.mrb[28].mxu0 %vm537_vm6, %v10780_v42  ;;  %v10830_v41 = vld [vmem:[%s13317_s1 + $0x580] sm:$0xff]   ;;  %v11554_v42 = vpop.permute.xlu1 %5909 }
  0xd2   : > { %756 = vmatprep.mubr.bf16.mxu1 %v13322_v4  ;;  %3685 = vmatprep.mubr.bf16.mxu0 %v13322_v4 }
  0xd9   : > { %8699 = vmatmul.mubr.msk.bf16.gmra.mrb[32].mxu1 %vm537_vm6, %v10781_v43  ;;  %9147 = vmatmul.mubr.msk.bf16.gmra.mrb[32].mxu0 %vm537_vm6, %v10782_v44  ;;  %v1940_v43 = vand.u32 %v1842_v39, %v11191_v9  ;;  %v6013_v44 = vand.u32 %v11554_v42, %v11191_v9  ;;  %v10880_v39 = vld [vmem:[%s13317_s1 + $0x648] sm:$0xff]  }
  0xda   : > { %766 = vmatprep.mubr.bf16.mxu1 %v13322_v4  ;;  %3695 = vmatprep.mubr.bf16.mxu0 %v13322_v4 }
  0xe1   : > { %8700 = vmatmul.mubr.msk.bf16.gmra.mrb[36].mxu1 %vm537_vm6, %v10783_v45  ;;  %9148 = vmatmul.mubr.msk.bf16.gmra.mrb[36].mxu0 %vm537_vm6, %v10784_v46  ;;  %v10831_v45 = vld [vmem:[%s13317_s1 + $0x8] sm:$0xff]  }
  0xe2   : > { %776 = vmatprep.mubr.bf16.mxu1 %v13322_v4  ;;  %3705 = vmatprep.mubr.bf16.mxu0 %v13322_v4  ;;  %v10832_v46 = vld [vmem:[%s13317_s1 + $0x588] sm:$0xff]  }
  0xe9   : > { %8701 = vmatmul.mubr.msk.bf16.gmra.mrb[40].mxu1 %vm537_vm6, %v10785_v47  ;;  %9149 = vmatmul.mubr.msk.bf16.gmra.mrb[40].mxu0 %vm537_vm6, %v10786_v48  ;;  %v10833_v47 = vld [vmem:[%s13317_s1 + $0x10] sm:$0xff]  }
  0xea   : > { %786 = vmatprep.mubr.bf16.mxu1 %v13322_v4  ;;  %3715 = vmatprep.mubr.bf16.mxu0 %v13322_v4  ;;  %v10834_v48 = vld [vmem:[%s13317_s1 + $0x590] sm:$0xff]  }
  0xf1   : > { %8702 = vmatmul.mubr.msk.bf16.gmra.mrb[44].mxu1 %vm537_vm6, %v10787_v49  ;;  %9150 = vmatmul.mubr.msk.bf16.gmra.mrb[44].mxu0 %vm537_vm6, %v10788_v50  ;;  %v10835_v49 = vld [vmem:[%s13317_s1 + $0x18] sm:$0xff]  }
  0xf2   : > { %796 = vmatprep.mubr.bf16.mxu1 %v13322_v4  ;;  %3725 = vmatprep.mubr.bf16.mxu0 %v13322_v4  ;;  %v10836_v50 = vld [vmem:[%s13317_s1 + $0x598] sm:$0xff]  }
  0xf9   : > { %8703 = vmatmul.mubr.msk.bf16.gmra.mrb[48].mxu1 %vm537_vm6, %v10789_v51  ;;  %9151 = vmatmul.mubr.msk.bf16.gmra.mrb[48].mxu0 %vm537_vm6, %v10790_v52  ;;  %v10837_v51 = vld [vmem:[%s13317_s1 + $0x20] sm:$0xff]  }
  0xfa   : > { %806 = vmatprep.mubr.bf16.mxu1 %v13322_v4  ;;  %3735 = vmatprep.mubr.bf16.mxu0 %v13322_v4  ;;  %v10838_v52 = vld [vmem:[%s13317_s1 + $0x5a0] sm:$0xff]  }
 0x101   : > { %8704 = vmatmul.mubr.msk.bf16.gmra.mrb[52].mxu1 %vm537_vm6, %v10791_v53  ;;  %9152 = vmatmul.mubr.msk.bf16.gmra.mrb[52].mxu0 %vm537_vm6, %v10792_v54  ;;  %v10839_v53 = vld [vmem:[%s13317_s1 + $0x28] sm:$0xff]  }
 0x102   : > { %816 = vmatprep.mubr.bf16.mxu1 %v13322_v4  ;;  %3745 = vmatprep.mubr.bf16.mxu0 %v13322_v4  ;;  %v10840_v54 = vld [vmem:[%s13317_s1 + $0x5a8] sm:$0xff]  }
 0x109   : > { %8705 = vmatmul.mubr.msk.bf16.gmra.mrb[56].mxu1 %vm537_vm6, %v10793_v55  ;;  %9153 = vmatmul.mubr.msk.bf16.gmra.mrb[56].mxu0 %vm537_vm6, %v10794_v56  ;;  %v10841_v55 = vld [vmem:[%s13317_s1 + $0x30] sm:$0xff]  }
 0x10a   : > { %826 = vmatprep.mubr.bf16.mxu1 %v13322_v4  ;;  %3755 = vmatprep.mubr.bf16.mxu0 %v13322_v4  ;;  %v10842_v56 = vld [vmem:[%s13317_s1 + $0x5b0] sm:$0xff]  }
 0x111   : > { %8706 = vmatmul.mubr.msk.bf16.gmra.mrb[60].mxu1 %vm537_vm6, %v10795_v57  ;;  %9154 = vmatmul.mubr.msk.bf16.gmra.mrb[60].mxu0 %vm537_vm6, %v10796_v58  ;;  %v10843_v57 = vld [vmem:[%s13317_s1 + $0x38] sm:$0xff]  }
 0x112   : > { %836 = vmatprep.mubr.bf16.mxu1 %v13322_v4  ;;  %4419 = vmatprep.mubr.bf16.mxu0 %v13322_v4  ;;  %v10844_v58 = vld [vmem:[%s13317_s1 + $0x5b8] sm:$0xff]  }
 0x119   : > { %8707 = vmatmul.mubr.msk.bf16.gmra.mrb[64].mxu1 %vm537_vm6, %v10797_v61  ;;  %9267 = vmatmul.mubr.msk.bf16.vlgmr.msra.gmra.mrb[0].mxu0 %vm537_vm6, %v10798_v62  ;;  %v10847_v61 = vld [vmem:[%s13317_s1 + $0x48] sm:$0xff]  }
 0x11a   : > { %5202 = vmatpush1.bf16.msra.mxu0 %v5196_v0  ;;  %846 = vmatprep.mubr.bf16.mxu1 %v13322_v4  ;;  %v10848_v62 = vld [vmem:[%s13317_s1 + $0x5c8] sm:$0xff]   ;;  %v10850_v0 = vld [vmem:[%s13317_s1 + $0x5d0] sm:$0xff]  }
 0x11b   : > { %4429 = vmatprep.mubr.bf16.mxu0 %v13322_v4  ;;  %6015 = vmatprep.subr.bf16.mxu0 %v6013_v44  ;;  %v10885_v44 = vld [vmem:[%s13317_s1 + $0xe0] sm:$0xff]  }
 0x121   : > { %8708 = vmatmul.mubr.msk.bf16.gmra.mrb[68].mxu1 %vm537_vm6, %v10799_v2  ;;  %9268 = vmatmul.mubr.msk.bf16.gmra.mrb[4].mxu0 %vm537_vm6, %v10800_v5  ;;  %v10852_v2 = vld [vmem:[%s13317_s1 + $0x5d8] sm:$0xff]   ;;  %v10853_v5 = vld [vmem:[%s13317_s1 + $0x60] sm:$0xff]  }
 0x122   : > { %856 = vmatprep.mubr.bf16.mxu1 %v13322_v4  ;;  %4439 = vmatprep.mubr.bf16.mxu0 %v13322_v4 }
 0x129   : > { %8709 = vmatmul.mubr.msk.bf16.gmra.mrb[72].mxu1 %vm537_vm6, %v10801_v7  ;;  %9269 = vmatmul.mubr.msk.bf16.gmra.mrb[8].mxu0 %vm537_vm6, %v10802_v8  ;;  %v10854_v7 = vld [vmem:[%s13317_s1 + $0x5e0] sm:$0xff]   ;;  %v10855_v8 = vld [vmem:[%s13317_s1 + $0x68] sm:$0xff]  }
 0x12a   : > { %866 = vmatprep.mubr.bf16.mxu1 %v13322_v4  ;;  %4449 = vmatprep.mubr.bf16.mxu0 %v13322_v4 }
 0x131   : > { %8710 = vmatmul.mubr.msk.bf16.gmra.mrb[76].mxu1 %vm537_vm6, %v10803_v10  ;;  %9270 = vmatmul.mubr.msk.bf16.gmra.mrb[12].mxu0 %vm537_vm6, %v10804_v11  ;;  %v10856_v10 = vld [vmem:[%s13317_s1 + $0x5e8] sm:$0xff]   ;;  %v10857_v11 = vld [vmem:[%s13317_s1 + $0x70] sm:$0xff]  }
 0x132   : > { %876 = vmatprep.mubr.bf16.mxu1 %v13322_v4  ;;  %4459 = vmatprep.mubr.bf16.mxu0 %v13322_v4 }
 0x139   : > { %8711 = vmatmul.mubr.msk.bf16.gmra.mrb[80].mxu1 %vm537_vm6, %v10805_v12  ;;  %9271 = vmatmul.mubr.msk.bf16.gmra.mrb[16].mxu0 %vm537_vm6, %v10806_v13  ;;  %v10858_v12 = vld [vmem:[%s13317_s1 + $0x5f0] sm:$0xff]   ;;  %v10859_v13 = vld [vmem:[%s13317_s1 + $0x78] sm:$0xff]  }
 0x13a   : > { %886 = vmatprep.mubr.bf16.mxu1 %v13322_v4  ;;  %4469 = vmatprep.mubr.bf16.mxu0 %v13322_v4 }
 0x141   : > { %8712 = vmatmul.mubr.msk.bf16.gmra.mrb[84].mxu1 %vm537_vm6, %v10807_v15  ;;  %9272 = vmatmul.mubr.msk.bf16.gmra.mrb[20].mxu0 %vm537_vm6, %v10808_v16  ;;  %v10860_v15 = vld [vmem:[%s13317_s1 + $0x5f8] sm:$0xff]   ;;  %v5908_v16 = vpop.permute.xlu0 %5907 }
 0x142   : > { %896 = vmatprep.mubr.bf16.mxu1 %v13322_v4  ;;  %4479 = vmatprep.mubr.bf16.mxu0 %v13322_v4 }
 0x149   : > { %8713 = vmatmul.mubr.msk.bf16.gmra.mrb[88].mxu1 %vm537_vm6, %v10809_v17  ;;  %9273 = vmatmul.mubr.msk.bf16.gmra.mrb[24].mxu0 %vm537_vm6, %v10810_v18  ;;  %v5912_v17 = vsel %vm5911_vm9, %v5908_v16, %v11554_v42  ;;  %v10861_v18 = vld [vmem:[%s13317_s1 + $0x80] sm:$0xff]   ;;  %v10883_v42 = vld [vmem:[%s13317_s1 + $0xd8] sm:$0xff]   ;;  %v10912_v16 = vld [vmem:[%s13317_s1 + $0x6c8] sm:$0xff]  }
 0x14a   : > { %906 = vmatprep.mubr.bf16.mxu1 %v13322_v4  ;;  %4489 = vmatprep.mubr.bf16.mxu0 %v13322_v4 }
 0x151   : > { %8714 = vmatmul.mubr.msk.bf16.gmra.mrb[92].mxu1 %vm537_vm6, %v10811_v20  ;;  %9274 = vmatmul.mubr.msk.bf16.gmra.mrb[28].mxu0 %vm537_vm6, %v10812_v21  ;;  %v10862_v20 = vld [vmem:[%s13317_s1 + $0x600] sm:$0xff]   ;;  %v11722_v21 = vpop.permute.xlu1 %2653 }
 0x152   : > { %916 = vmatprep.mubr.bf16.mxu1 %v13322_v4  ;;  %4499 = vmatprep.mubr.bf16.mxu0 %v13322_v4 }
 0x159   : > { %8715 = vmatmul.mubr.msk.bf16.gmra.mrb[96].mxu1 %vm537_vm6, %v10813_v22  ;;  %9275 = vmatmul.mubr.msk.bf16.gmra.mrb[32].mxu0 %vm537_vm6, %v10814_v23  ;;  %v6010_v22 = vand.u32 %v5912_v17, %v11191_v9  ;;  %v2757_v23 = vand.u32 %v11722_v21, %v11191_v9  ;;  %v10913_v17 = vld [vmem:[%s13317_s1 + $0x250] sm:$0xff]  }
 0x15a   : > { %926 = vmatprep.mubr.bf16.mxu1 %v13322_v4  ;;  %4509 = vmatprep.mubr.bf16.mxu0 %v13322_v4 }
 0x161   : > { %8716 = vmatmul.mubr.msk.bf16.gmra.mrb[100].mxu1 %vm537_vm6, %v10815_v24  ;;  %9276 = vmatmul.mubr.msk.bf16.gmra.mrb[36].mxu0 %vm537_vm6, %v10816_v25  ;;  %v10863_v24 = vld [vmem:[%s13317_s1 + $0x88] sm:$0xff]  }
 0x162   : > { %936 = vmatprep.mubr.bf16.mxu1 %v13322_v4  ;;  %4519 = vmatprep.mubr.bf16.mxu0 %v13322_v4  ;;  %v10864_v25 = vld [vmem:[%s13317_s1 + $0x608] sm:$0xff]  }
 0x169   : > { %8717 = vmatmul.mubr.msk.bf16.gmra.mrb[104].mxu1 %vm537_vm6, %v10817_v26  ;;  %9277 = vmatmul.mubr.msk.bf16.gmra.mrb[40].mxu0 %vm537_vm6, %v10818_v27  ;;  %v10865_v26 = vld [vmem:[%s13317_s1 + $0x90] sm:$0xff]  }
 0x16a   : > { %946 = vmatprep.mubr.bf16.mxu1 %v13322_v4  ;;  %4529 = vmatprep.mubr.bf16.mxu0 %v13322_v4  ;;  %v10866_v27 = vld [vmem:[%s13317_s1 + $0x610] sm:$0xff]  }
 0x171   : > { %8718 = vmatmul.mubr.msk.bf16.gmra.mrb[108].mxu1 %vm537_vm6, %v10819_v28  ;;  %9278 = vmatmul.mubr.msk.bf16.gmra.mrb[44].mxu0 %vm537_vm6, %v10820_v29  ;;  %v10869_v28 = vld [vmem:[%s13317_s1 + $0xa0] sm:$0xff]  }
 0x172   : > { %956 = vmatprep.mubr.bf16.mxu1 %v13322_v4  ;;  %4539 = vmatprep.mubr.bf16.mxu0 %v13322_v4  ;;  %v10870_v29 = vld [vmem:[%s13317_s1 + $0x620] sm:$0xff]  }
 0x179   : > { %8719 = vmatmul.mubr.msk.bf16.gmra.mrb[112].mxu1 %vm537_vm6, %v10821_v30  ;;  %9279 = vmatmul.mubr.msk.bf16.gmra.mrb[48].mxu0 %vm537_vm6, %v10822_v31  ;;  %v10871_v30 = vld [vmem:[%s13317_s1 + $0xa8] sm:$0xff]  }
 0x17a   : > { %966 = vmatprep.mubr.bf16.mxu1 %v13322_v4  ;;  %4549 = vmatprep.mubr.bf16.mxu0 %v13322_v4  ;;  %v10872_v31 = vld [vmem:[%s13317_s1 + $0x628] sm:$0xff]  }
 0x181   : > { %8720 = vmatmul.mubr.msk.bf16.gmra.mrb[116].mxu1 %vm537_vm6, %v10823_v32  ;;  %9280 = vmatmul.mubr.msk.bf16.gmra.mrb[52].mxu0 %vm537_vm6, %v10824_v33  ;;  %v10873_v32 = vld [vmem:[%s13317_s1 + $0xb0] sm:$0xff]  }
 0x182   : > { %976 = vmatprep.mubr.bf16.mxu1 %v13322_v4  ;;  %4559 = vmatprep.mubr.bf16.mxu0 %v13322_v4  ;;  %v10874_v33 = vld [vmem:[%s13317_s1 + $0x630] sm:$0xff]  }
 0x189   : > { %8721 = vmatmul.mubr.msk.bf16.gmra.mrb[120].mxu1 %vm537_vm6, %v10825_v34  ;;  %9281 = vmatmul.mubr.msk.bf16.gmra.mrb[56].mxu0 %vm537_vm6, %v10826_v35  ;;  %v10875_v34 = vld [vmem:[%s13317_s1 + $0xb8] sm:$0xff]  }
 0x18a   : > { %986 = vmatprep.mubr.bf16.mxu1 %v13322_v4  ;;  %4569 = vmatprep.mubr.bf16.mxu0 %v13322_v4  ;;  %v10876_v35 = vld [vmem:[%s13317_s1 + $0x638] sm:$0xff]  }
 0x191   : > { %8722 = vmatmul.mubr.msk.bf16.gmra.mrb[124].mxu1 %vm537_vm6, %v10827_v36  ;;  %9282 = vmatmul.mubr.msk.bf16.gmra.mrb[60].mxu0 %vm537_vm6, %v10828_v37  ;;  %v10877_v36 = vld [vmem:[%s13317_s1 + $0xc0] sm:$0xff]  }
 0x192   : > { %1291 = vmatprep.mubr.bf16.mxu1 %v13322_v4  ;;  %4579 = vmatprep.mubr.bf16.mxu0 %v13322_v4  ;;  %v10878_v37 = vld [vmem:[%s13317_s1 + $0x640] sm:$0xff]  }
 0x199   : > { %8755 = vmatmul.mubr.msk.bf16.vlgmr.msra.gmra.mrb[0].mxu1 %vm537_vm6, %v10829_v40  ;;  %9283 = vmatmul.mubr.msk.bf16.gmra.mrb[64].mxu0 %vm537_vm6, %v10830_v41  ;;  %v10881_v40 = vld [vmem:[%s13317_s1 + $0xd0] sm:$0xff]  }
 0x19a   : > { %1946 = vmatpush1.bf16.msra.mxu1 %v1940_v43  ;;  %1301 = vmatprep.mubr.bf16.mxu1 %v13322_v4  ;;  %v10882_v41 = vld [vmem:[%s13317_s1 + $0x650] sm:$0xff]   ;;  %v10884_v43 = vld [vmem:[%s13317_s1 + $0x658] sm:$0xff]  }
 0x19b   : > { %4589 = vmatprep.mubr.bf16.mxu0 %v13322_v4  ;;  %2759 = vmatprep.subr.bf16.mxu1 %v2757_v23  ;;  %v10918_v23 = vld [vmem:[%s13317_s1 + $0x6e0] sm:$0xff]  }
 0x1a1   : > { %8756 = vmatmul.mubr.msk.bf16.gmra.mrb[4].mxu1 %vm537_vm6, %v10831_v45  ;;  %9284 = vmatmul.mubr.msk.bf16.gmra.mrb[68].mxu0 %vm537_vm6, %v10832_v46  ;;  %v10886_v45 = vld [vmem:[%s13317_s1 + $0x660] sm:$0xff]   ;;  %v10887_v46 = vld [vmem:[%s13317_s1 + $0xe8] sm:$0xff]  }
 0x1a2   : > { %1311 = vmatprep.mubr.bf16.mxu1 %v13322_v4  ;;  %4599 = vmatprep.mubr.bf16.mxu0 %v13322_v4 }
 0x1a9   : > { %8757 = vmatmul.mubr.msk.bf16.gmra.mrb[8].mxu1 %vm537_vm6, %v10833_v47  ;;  %9285 = vmatmul.mubr.msk.bf16.gmra.mrb[72].mxu0 %vm537_vm6, %v10834_v48  ;;  %v10888_v47 = vld [vmem:[%s13317_s1 + $0x668] sm:$0xff]   ;;  %v10889_v48 = vld [vmem:[%s13317_s1 + $0xf0] sm:$0xff]  }
 0x1aa   : > { %1321 = vmatprep.mubr.bf16.mxu1 %v13322_v4  ;;  %4609 = vmatprep.mubr.bf16.mxu0 %v13322_v4 }
 0x1b1   : > { %8758 = vmatmul.mubr.msk.bf16.gmra.mrb[12].mxu1 %vm537_vm6, %v10835_v49  ;;  %9286 = vmatmul.mubr.msk.bf16.gmra.mrb[76].mxu0 %vm537_vm6, %v10836_v50  ;;  %v10890_v49 = vld [vmem:[%s13317_s1 + $0x670] sm:$0xff]   ;;  %v10891_v50 = vld [vmem:[%s13317_s1 + $0xf8] sm:$0xff]  }
 0x1b2   : > { %1331 = vmatprep.mubr.bf16.mxu1 %v13322_v4  ;;  %4619 = vmatprep.mubr.bf16.mxu0 %v13322_v4 }
 0x1b9   : > { %8759 = vmatmul.mubr.msk.bf16.gmra.mrb[16].mxu1 %vm537_vm6, %v10837_v51  ;;  %9287 = vmatmul.mubr.msk.bf16.gmra.mrb[80].mxu0 %vm537_vm6, %v10838_v52  ;;  %v10892_v51 = vld [vmem:[%s13317_s1 + $0x678] sm:$0xff]   ;;  %v2652_v52 = vpop.permute.xlu0 %2651 }
 0x1ba   : > { %1341 = vmatprep.mubr.bf16.mxu1 %v13322_v4  ;;  %4629 = vmatprep.mubr.bf16.mxu0 %v13322_v4 }
 0x1c1   : > { %8760 = vmatmul.mubr.msk.bf16.gmra.mrb[20].mxu1 %vm537_vm6, %v10839_v53  ;;  %9288 = vmatmul.mubr.msk.bf16.gmra.mrb[84].mxu0 %vm537_vm6, %v10840_v54  ;;  %v2656_v53 = vsel %vm2655_vm10, %v2652_v52, %v11722_v21  ;;  %v10893_v54 = vld [vmem:[%s13317_s1 + $0x200] sm:$0xff]   ;;  %v10916_v21 = vld [vmem:[%s13317_s1 + $0x6d8] sm:$0xff]  }
 0x1c2   : > { %1351 = vmatprep.mubr.bf16.mxu1 %v13322_v4  ;;  %4639 = vmatprep.mubr.bf16.mxu0 %v13322_v4  ;;  %v10947_v52 = vld [vmem:[%s13317_s1 + $0x2d8] sm:$0xff]  }
 0x1c9   : > { %8761 = vmatmul.mubr.msk.bf16.gmra.mrb[24].mxu1 %vm537_vm6, %v10841_v55  ;;  %9289 = vmatmul.mubr.msk.bf16.gmra.mrb[88].mxu0 %vm537_vm6, %v10842_v56  ;;  %v10894_v55 = vld [vmem:[%s13317_s1 + $0x680] sm:$0xff]   ;;  %v11890_v56 = vpop.permute.xlu1 %6723 }
 0x1ca   : > { %1361 = vmatprep.mubr.bf16.mxu1 %v13322_v4  ;;  %4649 = vmatprep.mubr.bf16.mxu0 %v13322_v4 }
 0x1d1   : > { %8762 = vmatmul.mubr.msk.bf16.gmra.mrb[28].mxu1 %vm537_vm6, %v10843_v57  ;;  %9290 = vmatmul.mubr.msk.bf16.gmra.mrb[92].mxu0 %vm537_vm6, %v10844_v58  ;;  %v2754_v57 = vand.u32 %v2656_v53, %v11191_v9  ;;  %v6827_v58 = vand.u32 %v11890_v56, %v11191_v9  ;;  %v10948_v53 = vld [vmem:[%s13317_s1 + $0x758] sm:$0xff]  }
 0x1d2   : > { %1371 = vmatprep.mubr.bf16.mxu1 %v13322_v4  ;;  %4659 = vmatprep.mubr.bf16.mxu0 %v13322_v4 }
 0x1d9   : > { %8763 = vmatmul.mubr.msk.bf16.gmra.mrb[32].mxu1 %vm537_vm6, %v10845_v59  ;;  %9291 = vmatmul.mubr.msk.bf16.gmra.mrb[96].mxu0 %vm537_vm6, %v10846_v60  ;;  %v10895_v59 = vld [vmem:[%s13317_s1 + $0x208] sm:$0xff]  }
 0x1da   : > { %1381 = vmatprep.mubr.bf16.mxu1 %v13322_v4  ;;  %4669 = vmatprep.mubr.bf16.mxu0 %v13322_v4  ;;  %v10896_v60 = vld [vmem:[%s13317_s1 + $0x688] sm:$0xff]  }
 0x1e1   : > { %8764 = vmatmul.mubr.msk.bf16.gmra.mrb[36].mxu1 %vm537_vm6, %v10847_v61  ;;  %9292 = vmatmul.mubr.msk.bf16.gmra.mrb[100].mxu0 %vm537_vm6, %v10848_v62  ;;  %v10898_v61 = vld [vmem:[%s13317_s1 + $0x690] sm:$0xff]   ;;  %v10899_v62 = vld [vmem:[%s13317_s1 + $0x218] sm:$0xff]  }
 0x1e2   : > { %1391 = vmatprep.mubr.bf16.mxu1 %v13322_v4  ;;  %4679 = vmatprep.mubr.bf16.mxu0 %v13322_v4 }
 0x1e9   : > { %8765 = vmatmul.mubr.msk.bf16.gmra.mrb[40].mxu1 %vm537_vm6, %v10849_v63  ;;  %9293 = vmatmul.mubr.msk.bf16.gmra.mrb[104].mxu0 %vm537_vm6, %v10850_v0  ;;  %v10900_v63 = vld [vmem:[%s13317_s1 + $0x698] sm:$0xff]   ;;  %v10901_v0 = vld [vmem:[%s13317_s1 + $0x220] sm:$0xff]  }
 0x1ea   : > { %1401 = vmatprep.mubr.bf16.mxu1 %v13322_v4  ;;  %4689 = vmatprep.mubr.bf16.mxu0 %v13322_v4 }
 0x1f1   : > { %8766 = vmatmul.mubr.msk.bf16.gmra.mrb[44].mxu1 %vm537_vm6, %v10851_v1  ;;  %9294 = vmatmul.mubr.msk.bf16.gmra.mrb[108].mxu0 %vm537_vm6, %v10852_v2  ;;  %v10902_v1 = vld [vmem:[%s13317_s1 + $0x6a0] sm:$0xff]   ;;  %v10903_v2 = vld [vmem:[%s13317_s1 + $0x228] sm:$0xff]  }
 0x1f2   : > { %1411 = vmatprep.mubr.bf16.mxu1 %v13322_v4  ;;  %4699 = vmatprep.mubr.bf16.mxu0 %v13322_v4 }
 0x1f9   : > { %8767 = vmatmul.mubr.msk.bf16.gmra.mrb[48].mxu1 %vm537_vm6, %v10853_v5  ;;  %9295 = vmatmul.mubr.msk.bf16.gmra.mrb[112].mxu0 %vm537_vm6, %v10854_v7  ;;  %v10904_v5 = vld [vmem:[%s13317_s1 + $0x6a8] sm:$0xff]   ;;  %v10905_v7 = vld [vmem:[%s13317_s1 + $0x230] sm:$0xff]  }
 0x1fa   : > { %1421 = vmatprep.mubr.bf16.mxu1 %v13322_v4  ;;  %4709 = vmatprep.mubr.bf16.mxu0 %v13322_v4 }
 0x201   : > { %8768 = vmatmul.mubr.msk.bf16.gmra.mrb[52].mxu1 %vm537_vm6, %v10855_v8  ;;  %9296 = vmatmul.mubr.msk.bf16.gmra.mrb[116].mxu0 %vm537_vm6, %v10856_v10  ;;  %v10906_v8 = vld [vmem:[%s13317_s1 + $0x6b0] sm:$0xff]   ;;  %v10907_v10 = vld [vmem:[%s13317_s1 + $0x238] sm:$0xff]  }
 0x202   : > { %1431 = vmatprep.mubr.bf16.mxu1 %v13322_v4  ;;  %4719 = vmatprep.mubr.bf16.mxu0 %v13322_v4 }
 0x209   : > { %8769 = vmatmul.mubr.msk.bf16.gmra.mrb[56].mxu1 %vm537_vm6, %v10857_v11  ;;  %9297 = vmatmul.mubr.msk.bf16.gmra.mrb[120].mxu0 %vm537_vm6, %v10858_v12  ;;  %v10908_v11 = vld [vmem:[%s13317_s1 + $0x6b8] sm:$0xff]   ;;  %v10909_v12 = vld [vmem:[%s13317_s1 + $0x240] sm:$0xff]  }
 0x20a   : > { %1441 = vmatprep.mubr.bf16.mxu1 %v13322_v4  ;;  %4729 = vmatprep.mubr.bf16.mxu0 %v13322_v4 }
 0x211   : > { %8770 = vmatmul.mubr.msk.bf16.gmra.mrb[60].mxu1 %vm537_vm6, %v10859_v13  ;;  %9298 = vmatmul.mubr.msk.bf16.gmra.mrb[124].mxu0 %vm537_vm6, %v10860_v15  ;;  %v10910_v13 = vld [vmem:[%s13317_s1 + $0x6c0] sm:$0xff]   ;;  %v10911_v15 = vld [vmem:[%s13317_s1 + $0x248] sm:$0xff]  }
 0x212   : > { %1451 = vmatprep.mubr.bf16.mxu1 %v13322_v4  ;;  %5233 = vmatprep.mubr.bf16.mxu0 %v13322_v4 }
 0x219   : > { %8771 = vmatmul.mubr.msk.bf16.gmra.mrb[64].mxu1 %vm537_vm6, %v10861_v18  ;;  %9395 = vmatmul.mubr.msk.bf16.vlgmr.msra.gmra.mrb[0].mxu0 %vm537_vm6, %v10862_v20  ;;  %v10914_v18 = vld [vmem:[%s13317_s1 + $0x6d0] sm:$0xff]   ;;  %v10915_v20 = vld [vmem:[%s13317_s1 + $0x258] sm:$0xff]  }
 0x21a   : > { %6016 = vmatpush1.bf16.msra.mxu0 %v6010_v22  ;;  %1461 = vmatprep.mubr.bf16.mxu1 %v13322_v4  ;;  %v10917_v22 = vld [vmem:[%s13317_s1 + $0x260] sm:$0xff]  }
 0x21b   : > { %5243 = vmatprep.mubr.bf16.mxu0 %v13322_v4  ;;  %6829 = vmatprep.subr.bf16.mxu0 %v6827_v58  ;;  %v10953_v58 = vld [vmem:[%s13317_s1 + $0x2f0] sm:$0xff]  }
 0x221   : > { %8772 = vmatmul.mubr.msk.bf16.gmra.mrb[68].mxu1 %vm537_vm6, %v10863_v24  ;;  %9396 = vmatmul.mubr.msk.bf16.gmra.mrb[4].mxu0 %vm537_vm6, %v10864_v25  ;;  %v10919_v24 = vld [vmem:[%s13317_s1 + $0x268] sm:$0xff]  }
 0x222   : > { %1471 = vmatprep.mubr.bf16.mxu1 %v13322_v4  ;;  %5253 = vmatprep.mubr.bf16.mxu0 %v13322_v4  ;;  %v10920_v25 = vld [vmem:[%s13317_s1 + $0x6e8] sm:$0xff]  }
 0x229   : > { %8773 = vmatmul.mubr.msk.bf16.gmra.mrb[72].mxu1 %vm537_vm6, %v10865_v26  ;;  %9397 = vmatmul.mubr.msk.bf16.gmra.mrb[8].mxu0 %vm537_vm6, %v10866_v27  ;;  %v10921_v26 = vld [vmem:[%s13317_s1 + $0x270] sm:$0xff]  }
 0x22a   : > { %1481 = vmatprep.mubr.bf16.mxu1 %v13322_v4  ;;  %5263 = vmatprep.mubr.bf16.mxu0 %v13322_v4  ;;  %v10922_v27 = vld [vmem:[%s13317_s1 + $0x6f0] sm:$0xff]  }
 0x231   : > { %8774 = vmatmul.mubr.msk.bf16.gmra.mrb[76].mxu1 %vm537_vm6, %v10867_v3  ;;  %9398 = vmatmul.mubr.msk.bf16.gmra.mrb[12].mxu0 %vm537_vm6, %v10868_v6  ;;  %v10923_v3 = vld [vmem:[%s13317_s1 + $0x278] sm:$0xff]  }
 0x232   : > { %1491 = vmatprep.mubr.bf16.mxu1 %v13322_v4  ;;  %5273 = vmatprep.mubr.bf16.mxu0 %v13322_v4  ;;  %v10924_v6 = vld [vmem:[%s13317_s1 + $0x6f8] sm:$0xff]  }
 0x239   : > { %8775 = vmatmul.mubr.msk.bf16.gmra.mrb[80].mxu1 %vm537_vm6, %v10869_v28  ;;  %9399 = vmatmul.mubr.msk.bf16.gmra.mrb[16].mxu0 %vm537_vm6, %v10870_v29  ;;  %v6722_v28 = vpop.permute.xlu0 %6721 }
 0x23a   : > { %1501 = vmatprep.mubr.bf16.mxu1 %v13322_v4  ;;  %5283 = vmatprep.mubr.bf16.mxu0 %v13322_v4  ;;  %v6726_v29 = vsel %vm6725_vm11, %v6722_v28, %v11890_v56  ;;  %v10951_v56 = vld [vmem:[%s13317_s1 + $0x2e8] sm:$0xff]   ;;  %v10974_v28 = vld [vmem:[%s13317_s1 + $0x7c0] sm:$0xff]  }
 0x241   : > { %8776 = vmatmul.mubr.msk.bf16.gmra.mrb[84].mxu1 %vm537_vm6, %v10871_v30  ;;  %9400 = vmatmul.mubr.msk.bf16.gmra.mrb[20].mxu0 %vm537_vm6, %v10872_v31  ;;  %v10925_v30 = vld [vmem:[%s13317_s1 + $0x280] sm:$0xff]  }
 0x242   : > { %1511 = vmatprep.mubr.bf16.mxu1 %v13322_v4  ;;  %5293 = vmatprep.mubr.bf16.mxu0 %v13322_v4  ;;  %v10926_v31 = vld [vmem:[%s13317_s1 + $0x700] sm:$0xff]  }
 0x249   : > { %8777 = vmatmul.mubr.msk.bf16.gmra.mrb[88].mxu1 %vm537_vm6, %v10873_v32  ;;  %9401 = vmatmul.mubr.msk.bf16.gmra.mrb[24].mxu0 %vm537_vm6, %v10874_v33  ;;  %v6824_v32 = vand.u32 %v6726_v29, %v11191_v9  ;;  %v10927_v33 = vld [vmem:[%s13317_s1 + $0x288] sm:$0xff]   ;;  %v10929_v9 = vld [vmem:[%s13317_s1 + $0x290] sm:$0xff]   ;;  %v7321_v29 = vld [vmem:[%s13318_s2 + $0x58] sm:$0xff] }
 0x24a   : > { %1521 = vmatprep.mubr.bf16.mxu1 %v13322_v4  ;;  %5303 = vmatprep.mubr.bf16.mxu0 %v13322_v4 }
 0x251   : > { %8778 = vmatmul.mubr.msk.bf16.gmra.mrb[92].mxu1 %vm537_vm6, %v10875_v34  ;;  %9402 = vmatmul.mubr.msk.bf16.gmra.mrb[28].mxu0 %vm537_vm6, %v10876_v35  ;;  %v10928_v34 = vld [vmem:[%s13317_s1 + $0x708] sm:$0xff]   ;;  %v10930_v35 = vld [vmem:[%s13317_s1 + $0x710] sm:$0xff]  }
 0x252   : > { %1531 = vmatprep.mubr.bf16.mxu1 %v13322_v4  ;;  %5313 = vmatprep.mubr.bf16.mxu0 %v13322_v4 }
 0x259   : > { %8779 = vmatmul.mubr.msk.bf16.gmra.mrb[96].mxu1 %vm537_vm6, %v10877_v36  ;;  %9403 = vmatmul.mubr.msk.bf16.gmra.mrb[32].mxu0 %vm537_vm6, %v10878_v37  ;;  %v10931_v36 = vld [vmem:[%s13317_s1 + $0x298] sm:$0xff]  }
 0x25a   : > { %1541 = vmatprep.mubr.bf16.mxu1 %v13322_v4  ;;  %5323 = vmatprep.mubr.bf16.mxu0 %v13322_v4  ;;  %v10932_v37 = vld [vmem:[%s13317_s1 + $0x718] sm:$0xff]  }
 0x261   : > { %8780 = vmatmul.mubr.msk.bf16.gmra.mrb[100].mxu1 %vm537_vm6, %v10879_v38  ;;  %9404 = vmatmul.mubr.msk.bf16.gmra.mrb[36].mxu0 %vm537_vm6, %v10880_v39  ;;  %v10933_v38 = vld [vmem:[%s13317_s1 + $0x2a0] sm:$0xff]  }
 0x262   : > { %1551 = vmatprep.mubr.bf16.mxu1 %v13322_v4  ;;  %5333 = vmatprep.mubr.bf16.mxu0 %v13322_v4  ;;  %v10934_v39 = vld [vmem:[%s13317_s1 + $0x720] sm:$0xff]  }
 0x269   : > { %8781 = vmatmul.mubr.msk.bf16.gmra.mrb[104].mxu1 %vm537_vm6, %v10881_v40  ;;  %9405 = vmatmul.mubr.msk.bf16.gmra.mrb[40].mxu0 %vm537_vm6, %v10882_v41  ;;  %v10935_v40 = vld [vmem:[%s13317_s1 + $0x2a8] sm:$0xff]  }
 0x26a   : > { %1561 = vmatprep.mubr.bf16.mxu1 %v13322_v4  ;;  %5343 = vmatprep.mubr.bf16.mxu0 %v13322_v4  ;;  %v10936_v41 = vld [vmem:[%s13317_s1 + $0x728] sm:$0xff]  }
 0x271   : > { %8782 = vmatmul.mubr.msk.bf16.gmra.mrb[108].mxu1 %vm537_vm6, %v10883_v42  ;;  %9406 = vmatmul.mubr.msk.bf16.gmra.mrb[44].mxu0 %vm537_vm6, %v10884_v43  ;;  %v10937_v42 = vld [vmem:[%s13317_s1 + $0x2b0] sm:$0xff]  }
 0x272   : > { %1571 = vmatprep.mubr.bf16.mxu1 %v13322_v4  ;;  %5353 = vmatprep.mubr.bf16.mxu0 %v13322_v4  ;;  %v10938_v43 = vld [vmem:[%s13317_s1 + $0x730] sm:$0xff]  }
 0x279   : > { %8783 = vmatmul.mubr.msk.bf16.gmra.mrb[112].mxu1 %vm537_vm6, %v10885_v44  ;;  %9407 = vmatmul.mubr.msk.bf16.gmra.mrb[48].mxu0 %vm537_vm6, %v10886_v45  ;;  %v10939_v44 = vld [vmem:[%s13317_s1 + $0x2b8] sm:$0xff]  }
 0x27a   : > { %1581 = vmatprep.mubr.bf16.mxu1 %v13322_v4  ;;  %5363 = vmatprep.mubr.bf16.mxu0 %v13322_v4  ;;  %v10940_v45 = vld [vmem:[%s13317_s1 + $0x738] sm:$0xff]  }
 0x281   : > { %8784 = vmatmul.mubr.msk.bf16.gmra.mrb[116].mxu1 %vm537_vm6, %v10887_v46  ;;  %9408 = vmatmul.mubr.msk.bf16.gmra.mrb[52].mxu0 %vm537_vm6, %v10888_v47  ;;  %v10941_v46 = vld [vmem:[%s13317_s1 + $0x2c0] sm:$0xff]  }
 0x282   : > { %1591 = vmatprep.mubr.bf16.mxu1 %v13322_v4  ;;  %5373 = vmatprep.mubr.bf16.mxu0 %v13322_v4  ;;  %v10942_v47 = vld [vmem:[%s13317_s1 + $0x740] sm:$0xff]  }
 0x289   : > { %8785 = vmatmul.mubr.msk.bf16.gmra.mrb[120].mxu1 %vm537_vm6, %v10889_v48  ;;  %9409 = vmatmul.mubr.msk.bf16.gmra.mrb[56].mxu0 %vm537_vm6, %v10890_v49  ;;  %v10943_v48 = vld [vmem:[%s13317_s1 + $0x2c8] sm:$0xff]  }
 0x28a   : > { %1601 = vmatprep.mubr.bf16.mxu1 %v13322_v4  ;;  %5383 = vmatprep.mubr.bf16.mxu0 %v13322_v4  ;;  %v10944_v49 = vld [vmem:[%s13317_s1 + $0x748] sm:$0xff]  }
 0x291   : > { %8786 = vmatmul.mubr.msk.bf16.gmra.mrb[124].mxu1 %vm537_vm6, %v10891_v50  ;;  %9410 = vmatmul.mubr.msk.bf16.gmra.mrb[60].mxu0 %vm537_vm6, %v10892_v51  ;;  %v10945_v50 = vld [vmem:[%s13317_s1 + $0x2d0] sm:$0xff]  }
 0x292   : > { %1977 = vmatprep.mubr.bf16.mxu1 %v13322_v4  ;;  %5393 = vmatprep.mubr.bf16.mxu0 %v13322_v4  ;;  %v10946_v51 = vld [vmem:[%s13317_s1 + $0x750] sm:$0xff]  }
 0x299   : > { %8883 = vmatmul.mubr.msk.bf16.vlgmr.msra.gmra.mrb[0].mxu1 %vm537_vm6, %v10893_v54  ;;  %9411 = vmatmul.mubr.msk.bf16.gmra.mrb[64].mxu0 %vm537_vm6, %v10894_v55  ;;  %v10949_v54 = vld [vmem:[%s13317_s1 + $0x2e0] sm:$0xff]  }
 0x29a   : > { %2760 = vmatpush1.bf16.msra.mxu1 %v2754_v57  ;;  %1987 = vmatprep.mubr.bf16.mxu1 %v13322_v4  ;;  %v10950_v55 = vld [vmem:[%s13317_s1 + $0x760] sm:$0xff]   ;;  %v10952_v57 = vld [vmem:[%s13317_s1 + $0x768] sm:$0xff]  }
 0x29b   : > { %9685 = vmatprep.subr.bf16.mxu1 %v11197_v14  ;;  %5403 = vmatprep.mubr.bf16.mxu0 %v13322_v4  ;;  %v10897_v14 = vld [vmem:[%s13317_s1 + $0x210] sm:$0xff]  }
 0x2a1   : > { %8884 = vmatmul.mubr.msk.bf16.gmra.mrb[4].mxu1 %vm537_vm6, %v10895_v59  ;;  %9412 = vmatmul.mubr.msk.bf16.gmra.mrb[68].mxu0 %vm537_vm6, %v10896_v60  ;;  %v10954_v59 = vld [vmem:[%s13317_s1 + $0x770] sm:$0xff]   ;;  %v10955_v60 = vld [vmem:[%s13317_s1 + $0x2f8] sm:$0xff]  }
 0x2a2   : > { %1997 = vmatprep.mubr.bf16.mxu1 %v13322_v4  ;;  %5413 = vmatprep.mubr.bf16.mxu0 %v13322_v4 }
 0x2a9   : > { %8885 = vmatmul.mubr.msk.bf16.gmra.mrb[8].mxu1 %vm537_vm6, %v10897_v14  ;;  %9413 = vmatmul.mubr.msk.bf16.gmra.mrb[72].mxu0 %vm537_vm6, %v10898_v61  ;;  %v10956_v14 = vld [vmem:[%s13317_s1 + $0x778] sm:$0xff]   ;;  %v10957_v61 = vld [vmem:[%s13317_s1 + $0x300] sm:$0xff]  }
 0x2aa   : > { %2007 = vmatprep.mubr.bf16.mxu1 %v13322_v4  ;;  %5423 = vmatprep.mubr.bf16.mxu0 %v13322_v4 }
 0x2b1   : > { %8886 = vmatmul.mubr.msk.bf16.gmra.mrb[12].mxu1 %vm537_vm6, %v10899_v62  ;;  %9414 = vmatmul.mubr.msk.bf16.gmra.mrb[76].mxu0 %vm537_vm6, %v10900_v63  ;;  %v10958_v62 = vld [vmem:[%s13317_s1 + $0x780] sm:$0xff]   ;;  %v10959_v63 = vld [vmem:[%s13317_s1 + $0x308] sm:$0xff]  }
 0x2b2   : > { %2017 = vmatprep.mubr.bf16.mxu1 %v13322_v4  ;;  %5433 = vmatprep.mubr.bf16.mxu0 %v13322_v4 }
 0x2b9   : > { %8887 = vmatmul.mubr.msk.bf16.gmra.mrb[16].mxu1 %vm537_vm6, %v10901_v0  ;;  %9415 = vmatmul.mubr.msk.bf16.gmra.mrb[80].mxu0 %vm537_vm6, %v10902_v1  ;;  %v10960_v0 = vld [vmem:[%s13317_s1 + $0x788] sm:$0xff]   ;;  %v10962_v1 = vld [vmem:[%s13317_s1 + $0x790] sm:$0xff]  }
 0x2ba   : > { %2027 = vmatprep.mubr.bf16.mxu1 %v13322_v4  ;;  %5443 = vmatprep.mubr.bf16.mxu0 %v13322_v4 }
 0x2c1   : > { %8888 = vmatmul.mubr.msk.bf16.gmra.mrb[20].mxu1 %vm537_vm6, %v10903_v2  ;;  %9416 = vmatmul.mubr.msk.bf16.gmra.mrb[84].mxu0 %vm537_vm6, %v10904_v5  ;;  %v10963_v2 = vld [vmem:[%s13317_s1 + $0x318] sm:$0xff]  }
 0x2c2   : > { %2037 = vmatprep.mubr.bf16.mxu1 %v13322_v4  ;;  %5453 = vmatprep.mubr.bf16.mxu0 %v13322_v4  ;;  %v10964_v5 = vld [vmem:[%s13317_s1 + $0x798] sm:$0xff]  }
 0x2c9   : > { %8889 = vmatmul.mubr.msk.bf16.gmra.mrb[24].mxu1 %vm537_vm6, %v10905_v7  ;;  %9417 = vmatmul.mubr.msk.bf16.gmra.mrb[88].mxu0 %vm537_vm6, %v10906_v8  ;;  %v10965_v7 = vld [vmem:[%s13317_s1 + $0x320] sm:$0xff]  }
 0x2ca   : > { %2047 = vmatprep.mubr.bf16.mxu1 %v13322_v4  ;;  %5463 = vmatprep.mubr.bf16.mxu0 %v13322_v4  ;;  %v10966_v8 = vld [vmem:[%s13317_s1 + $0x7a0] sm:$0xff]  }
 0x2d1   : > { %8890 = vmatmul.mubr.msk.bf16.gmra.mrb[28].mxu1 %vm537_vm6, %v10907_v10  ;;  %9418 = vmatmul.mubr.msk.bf16.gmra.mrb[92].mxu0 %vm537_vm6, %v10908_v11  ;;  %v10967_v10 = vld [vmem:[%s13317_s1 + $0x328] sm:$0xff]  }
 0x2d2   : > { %2057 = vmatprep.mubr.bf16.mxu1 %v13322_v4  ;;  %5473 = vmatprep.mubr.bf16.mxu0 %v13322_v4  ;;  %v10968_v11 = vld [vmem:[%s13317_s1 + $0x7a8] sm:$0xff]  }
 0x2d9   : > { %8891 = vmatmul.mubr.msk.bf16.gmra.mrb[32].mxu1 %vm537_vm6, %v10909_v12  ;;  %9419 = vmatmul.mubr.msk.bf16.gmra.mrb[96].mxu0 %vm537_vm6, %v10910_v13  ;;  %v7311_v12 = vld [vmem:[%s13318_s2 + $0x8] sm:$0xff]  ;;  %v7310_v13 = vld [vmem:[%s13318_s2] sm:$0xff] }
 0x2da   : > { %2067 = vmatprep.mubr.bf16.mxu1 %v13322_v4  ;;  %5483 = vmatprep.mubr.bf16.mxu0 %v13322_v4 }
 0x2db   : > { %7381 = vperm.xlu1 %10764, %v7311_v12   ;;  %7376 = vperm.xlu0 %10763, %v7310_v13   ;;  %v7351_v12 = vld [vmem:[%s13318_s2 + $0x148] sm:$0xff]  ;;  %v7352_v13 = vld [vmem:[%s13318_s2 + $0x150] sm:$0xff] }
 0x2e1   : > { %8892 = vmatmul.mubr.msk.bf16.gmra.mrb[36].mxu1 %vm537_vm6, %v10911_v15  ;;  %9420 = vmatmul.mubr.msk.bf16.gmra.mrb[100].mxu0 %vm537_vm6, %v10912_v16  ;;  %v7312_v15 = vld [vmem:[%s13318_s2 + $0x10] sm:$0xff] }
 0x2e2   : > { %2077 = vmatprep.mubr.bf16.mxu1 %v13322_v4  ;;  %5493 = vmatprep.mubr.bf16.mxu0 %v13322_v4  ;;  %v10969_v16 = vld [vmem:[%s13317_s1 + $0x330] sm:$0xff]  }
 0x2e3   : > { %7386 = vperm.xlu1 %10764, %v7312_v15   ;;  %v7353_v15 = vld [vmem:[%s13318_s2 + $0x158] sm:$0xff] }
 0x2e9   : > { %8893 = vmatmul.mubr.msk.bf16.gmra.mrb[40].mxu1 %vm537_vm6, %v10913_v17  ;;  %9421 = vmatmul.mubr.msk.bf16.gmra.mrb[104].mxu0 %vm537_vm6, %v10914_v18  ;;  %v10970_v17 = vld [vmem:[%s13317_s1 + $0x7b0] sm:$0xff]   ;;  %v7313_v18 = vld [vmem:[%s13318_s2 + $0x18] sm:$0xff] }
 0x2ea   : > { %2087 = vmatprep.mubr.bf16.mxu1 %v13322_v4  ;;  %5503 = vmatprep.mubr.bf16.mxu0 %v13322_v4 }
 0x2eb   : > { %7391 = vperm.xlu0 %10763, %v7313_v18   ;;  %v10992_v18 = vld [vmem:[%s13317_s1 + $0x808] sm:$0xff]  }
 0x2f1   : > { %8894 = vmatmul.mubr.msk.bf16.gmra.mrb[44].mxu1 %vm537_vm6, %v10915_v20  ;;  %9422 = vmatmul.mubr.msk.bf16.gmra.mrb[108].mxu0 %vm537_vm6, %v10916_v21  ;;  %v7314_v20 = vld [vmem:[%s13318_s2 + $0x20] sm:$0xff]  ;;  %v7315_v21 = vld [vmem:[%s13318_s2 + $0x28] sm:$0xff] }
 0x2f2   : > { %2097 = vmatprep.mubr.bf16.mxu1 %v13322_v4  ;;  %5513 = vmatprep.mubr.bf16.mxu0 %v13322_v4 }
 0x2f3   : > { %7396 = vperm.xlu1 %10764, %v7314_v20   ;;  %7401 = vperm.xlu0 %10763, %v7315_v21   ;;  %v7355_v20 = vld [vmem:[%s13318_s2 + $0x168] sm:$0xff]  ;;  %v7356_v21 = vld [vmem:[%s13318_s2 + $0x170] sm:$0xff] }
 0x2f9   : > { %8895 = vmatmul.mubr.msk.bf16.gmra.mrb[48].mxu1 %vm537_vm6, %v10917_v22  ;;  %9423 = vmatmul.mubr.msk.bf16.gmra.mrb[112].mxu0 %vm537_vm6, %v10918_v23  ;;  %v7316_v22 = vld [vmem:[%s13318_s2 + $0x30] sm:$0xff]  ;;  %v10971_v23 = vld [vmem:[%s13317_s1 + $0x338] sm:$0xff]  }
 0x2fa   : > { %2107 = vmatprep.mubr.bf16.mxu1 %v13322_v4  ;;  %5523 = vmatprep.mubr.bf16.mxu0 %v13322_v4 }
 0x2fb   : > { %7406 = vperm.xlu1 %10764, %v7316_v22   ;;  %v7357_v22 = vld [vmem:[%s13318_s2 + $0x178] sm:$0xff] }
 0x301   : > { %8896 = vmatmul.mubr.msk.bf16.gmra.mrb[52].mxu1 %vm537_vm6, %v10919_v24  ;;  %9424 = vmatmul.mubr.msk.bf16.gmra.mrb[116].mxu0 %vm537_vm6, %v10920_v25  ;;  %v10972_v24 = vld [vmem:[%s13317_s1 + $0x7b8] sm:$0xff]  }
 0x302   : > { %2117 = vmatprep.mubr.bf16.mxu1 %v13322_v4  ;;  %5533 = vmatprep.mubr.bf16.mxu0 %v13322_v4  ;;  %v7317_v25 = vld [vmem:[%s13318_s2 + $0x38] sm:$0xff] }
 0x303   : > { %7411 = vperm.xlu0 %10763, %v7317_v25   ;;  %v10994_v25 = vld [vmem:[%s13317_s1 + $0x810] sm:$0xff]  }
 0x309   : > { %8897 = vmatmul.mubr.msk.bf16.gmra.mrb[56].mxu1 %vm537_vm6, %v10921_v26  ;;  %9425 = vmatmul.mubr.msk.bf16.gmra.mrb[120].mxu0 %vm537_vm6, %v10922_v27  ;;  %v7318_v26 = vld [vmem:[%s13318_s2 + $0x40] sm:$0xff]  ;;  %v7319_v27 = vld [vmem:[%s13318_s2 + $0x48] sm:$0xff] }
 0x30a   : > { %2127 = vmatprep.mubr.bf16.mxu1 %v13322_v4  ;;  %5543 = vmatprep.mubr.bf16.mxu0 %v13322_v4 }
 0x30b   : > { %7416 = vperm.xlu1 %10764, %v7318_v26   ;;  %7421 = vperm.xlu0 %10763, %v7319_v27   ;;  %v7359_v26 = vld [vmem:[%s13318_s2 + $0x188] sm:$0xff]  ;;  %v7360_v27 = vld [vmem:[%s13318_s2 + $0x190] sm:$0xff] }
 0x30f   : > { %7431 = vperm.xlu0 %10763, %v7321_v29   ;;  %v10996_v29 = vld [vmem:[%s13317_s1 + $0x818] sm:$0xff]  }
 0x311   : > { %8898 = vmatmul.mubr.msk.bf16.gmra.mrb[60].mxu1 %vm537_vm6, %v10923_v3  ;;  %9426 = vmatmul.mubr.msk.bf16.gmra.mrb[124].mxu0 %vm537_vm6, %v10924_v6  ;;  %v7320_v3 = vld [vmem:[%s13318_s2 + $0x50] sm:$0xff]  ;;  %v10973_v6 = vld [vmem:[%s13317_s1 + $0x340] sm:$0xff]  }
 0x312   : > { %2137 = vmatprep.mubr.bf16.mxu1 %v13322_v4  ;;  %6047 = vmatprep.mubr.bf16.mxu0 %v13322_v4 }
 0x313   : > { %7426 = vperm.xlu1 %10764, %v7320_v3   ;;  %v7361_v3 = vld [vmem:[%s13318_s2 + $0x198] sm:$0xff] }
 0x319   : > { %8899 = vmatmul.mubr.msk.bf16.gmra.mrb[64].mxu1 %vm537_vm6, %v10925_v30  ;;  %9523 = vmatmul.mubr.msk.bf16.vlgmr.msra.gmra.mrb[0].mxu0 %vm537_vm6, %v10926_v31  ;;  %v7322_v30 = vld [vmem:[%s13318_s2 + $0x60] sm:$0xff]  ;;  %v7323_v31 = vld [vmem:[%s13318_s2 + $0x68] sm:$0xff] }
 0x31a   : > { %6830 = vmatpush1.bf16.msra.mxu0 %v6824_v32  ;;  %2147 = vmatprep.mubr.bf16.mxu1 %v13322_v4  ;;  %v7324_v32 = vld [vmem:[%s13318_s2 + $0x70] sm:$0xff] }
 0x31b   : > { %6057 = vmatprep.mubr.bf16.mxu0 %v13322_v4  ;;  %7436 = vperm.xlu1 %10764, %v7322_v30   ;;  %v7363_v30 = vld [vmem:[%s13318_s2 + $0x1a8] sm:$0xff] }
 0x31c   : > { %7441 = vperm.xlu0 %10763, %v7323_v31   ;;  %v7364_v31 = vld [vmem:[%s13318_s2 + $0x1b0] sm:$0xff] }
 0x31f   : > { %7446 = vperm.xlu1 %10764, %v7324_v32   ;;  %v7365_v32 = vld [vmem:[%s13318_s2 + $0x1b8] sm:$0xff] }
 0x321   : > { %8900 = vmatmul.mubr.msk.bf16.gmra.mrb[68].mxu1 %vm537_vm6, %v10927_v33  ;;  %9524 = vmatmul.mubr.msk.bf16.gmra.mrb[4].mxu0 %vm537_vm6, %v10928_v34  ;;  %v10975_v33 = vld [vmem:[%s13317_s1 + $0x348] sm:$0xff]  }
 0x322   : > { %2157 = vmatprep.mubr.bf16.mxu1 %v13322_v4  ;;  %6067 = vmatprep.mubr.bf16.mxu0 %v13322_v4  ;;  %v10976_v34 = vld [vmem:[%s13317_s1 + $0x7c8] sm:$0xff]  }
 0x329   : > { %8901 = vmatmul.mubr.msk.bf16.gmra.mrb[72].mxu1 %vm537_vm6, %v10929_v9  ;;  %9525 = vmatmul.mubr.msk.bf16.gmra.mrb[8].mxu0 %vm537_vm6, %v10930_v35  ;;  %v7325_v9 = vld [vmem:[%s13318_s2 + $0x78] sm:$0xff]  ;;  %v7326_v35 = vld [vmem:[%s13318_s2 + $0x80] sm:$0xff] }
 0x32a   : > { %2167 = vmatprep.mubr.bf16.mxu1 %v13322_v4  ;;  %6077 = vmatprep.mubr.bf16.mxu0 %v13322_v4 }
 0x32b   : > { %7451 = vperm.xlu0 %10763, %v7325_v9   ;;  %7456 = vperm.xlu1 %10764, %v7326_v35   ;;  %v10998_v9 = vld [vmem:[%s13317_s1 + $0x820] sm:$0xff]   ;;  %v7367_v35 = vld [vmem:[%s13318_s2 + $0x1c8] sm:$0xff] }
 0x331   : > { %8902 = vmatmul.mubr.msk.bf16.gmra.mrb[76].mxu1 %vm537_vm6, %v10931_v36  ;;  %9526 = vmatmul.mubr.msk.bf16.gmra.mrb[12].mxu0 %vm537_vm6, %v10932_v37  ;;  %v7327_v36 = vld [vmem:[%s13318_s2 + $0x88] sm:$0xff]  ;;  %v7328_v37 = vld [vmem:[%s13318_s2 + $0x90] sm:$0xff] }
 0x332   : > { %2177 = vmatprep.mubr.bf16.mxu1 %v13322_v4  ;;  %6087 = vmatprep.mubr.bf16.mxu0 %v13322_v4 }
 0x333   : > { %7461 = vperm.xlu0 %10763, %v7327_v36   ;;  %7466 = vperm.xlu1 %10764, %v7328_v37   ;;  %v7368_v36 = vld [vmem:[%s13318_s2 + $0x1d0] sm:$0xff]  ;;  %v7369_v37 = vld [vmem:[%s13318_s2 + $0x1d8] sm:$0xff] }
 0x339   : > { %8903 = vmatmul.mubr.msk.bf16.gmra.mrb[80].mxu1 %vm537_vm6, %v10933_v38  ;;  %9527 = vmatmul.mubr.msk.bf16.gmra.mrb[16].mxu0 %vm537_vm6, %v10934_v39  ;;  %v10977_v38 = vld [vmem:[%s13317_s1 + $0x350] sm:$0xff]  }
 0x33a   : > { %2187 = vmatprep.mubr.bf16.mxu1 %v13322_v4  ;;  %6097 = vmatprep.mubr.bf16.mxu0 %v13322_v4  ;;  %v10978_v39 = vld [vmem:[%s13317_s1 + $0x7d0] sm:$0xff]  }
 0x341   : > { %8904 = vmatmul.mubr.msk.bf16.gmra.mrb[84].mxu1 %vm537_vm6, %v10935_v40  ;;  %9528 = vmatmul.mubr.msk.bf16.gmra.mrb[20].mxu0 %vm537_vm6, %v10936_v41  ;;  %v7329_v40 = vld [vmem:[%s13318_s2 + $0x98] sm:$0xff]  ;;  %v7330_v41 = vld [vmem:[%s13318_s2 + $0xa0] sm:$0xff] }
 0x342   : > { %2197 = vmatprep.mubr.bf16.mxu1 %v13322_v4  ;;  %6107 = vmatprep.mubr.bf16.mxu0 %v13322_v4 }
 0x343   : > { %7471 = vperm.xlu0 %10763, %v7329_v40   ;;  %7476 = vperm.xlu1 %10764, %v7330_v41   ;;  %v11000_v40 = vld [vmem:[%s13317_s1 + $0x828] sm:$0xff]  }
 0x344   : > { %v7371_v41 = vld [vmem:[%s13318_s2 + $0x1e8] sm:$0xff] }
 0x349   : > { %8905 = vmatmul.mubr.msk.bf16.gmra.mrb[88].mxu1 %vm537_vm6, %v10937_v42  ;;  %9529 = vmatmul.mubr.msk.bf16.gmra.mrb[24].mxu0 %vm537_vm6, %v10938_v43  ;;  %v10979_v42 = vld [vmem:[%s13317_s1 + $0x358] sm:$0xff]  }
 0x34a   : > { %2207 = vmatprep.mubr.bf16.mxu1 %v13322_v4  ;;  %6117 = vmatprep.mubr.bf16.mxu0 %v13322_v4  ;;  %v10980_v43 = vld [vmem:[%s13317_s1 + $0x7d8] sm:$0xff]  }
 0x351   : > { %8906 = vmatmul.mubr.msk.bf16.gmra.mrb[92].mxu1 %vm537_vm6, %v10939_v44  ;;  %9530 = vmatmul.mubr.msk.bf16.gmra.mrb[28].mxu0 %vm537_vm6, %v10940_v45  ;;  %v7331_v44 = vld [vmem:[%s13318_s2 + $0xa8] sm:$0xff]  ;;  %v7332_v45 = vld [vmem:[%s13318_s2 + $0xb0] sm:$0xff] }
 0x352   : > { %2217 = vmatprep.mubr.bf16.mxu1 %v13322_v4  ;;  %6127 = vmatprep.mubr.bf16.mxu0 %v13322_v4 }
 0x353   : > { %7481 = vperm.xlu0 %10763, %v7331_v44   ;;  %7486 = vperm.xlu1 %10764, %v7332_v45   ;;  %v11001_v44 = vld [vmem:[%s13317_s1 + $0x3b0] sm:$0xff]  }
 0x354   : > { %v11002_v45 = vld [vmem:[%s13317_s1 + $0x830] sm:$0xff]  }
 0x359   : > { %8907 = vmatmul.mubr.msk.bf16.gmra.mrb[96].mxu1 %vm537_vm6, %v10941_v46  ;;  %9531 = vmatmul.mubr.msk.bf16.gmra.mrb[32].mxu0 %vm537_vm6, %v10942_v47  ;;  %v7333_v46 = vld [vmem:[%s13318_s2 + $0xb8] sm:$0xff]  ;;  %v7334_v47 = vld [vmem:[%s13318_s2 + $0xc0] sm:$0xff] }
 0x35a   : > { %2227 = vmatprep.mubr.bf16.mxu1 %v13322_v4  ;;  %6137 = vmatprep.mubr.bf16.mxu0 %v13322_v4 }
 0x35b   : > { %7491 = vperm.xlu0 %10763, %v7333_v46   ;;  %7496 = vperm.xlu1 %10764, %v7334_v47   ;;  %v11003_v46 = vld [vmem:[%s13317_s1 + $0x3b8] sm:$0xff]  }
 0x35c   : > { %v11004_v47 = vld [vmem:[%s13317_s1 + $0x838] sm:$0xff]  }
 0x361   : > { %8908 = vmatmul.mubr.msk.bf16.gmra.mrb[100].mxu1 %vm537_vm6, %v10943_v48  ;;  %9532 = vmatmul.mubr.msk.bf16.gmra.mrb[36].mxu0 %vm537_vm6, %v10944_v49  ;;  %v10981_v48 = vld [vmem:[%s13317_s1 + $0x360] sm:$0xff]  }
 0x362   : > { %2237 = vmatprep.mubr.bf16.mxu1 %v13322_v4  ;;  %6147 = vmatprep.mubr.bf16.mxu0 %v13322_v4  ;;  %v10982_v49 = vld [vmem:[%s13317_s1 + $0x7e0] sm:$0xff]  }
 0x369   : > { %8909 = vmatmul.mubr.msk.bf16.gmra.mrb[104].mxu1 %vm537_vm6, %v10945_v50  ;;  %9533 = vmatmul.mubr.msk.bf16.gmra.mrb[40].mxu0 %vm537_vm6, %v10946_v51  ;;  %v7335_v50 = vld [vmem:[%s13318_s2 + $0xc8] sm:$0xff]  ;;  %v7336_v51 = vld [vmem:[%s13318_s2 + $0xd0] sm:$0xff] }
 0x36a   : > { %2247 = vmatprep.mubr.bf16.mxu1 %v13322_v4  ;;  %6157 = vmatprep.mubr.bf16.mxu0 %v13322_v4 }
 0x36b   : > { %7501 = vperm.xlu0 %10763, %v7335_v50   ;;  %7506 = vperm.xlu1 %10764, %v7336_v51   ;;  %v11007_v50 = vld [vmem:[%s13317_s1 + $0x3c8] sm:$0xff]  }
 0x36c   : > { %v11008_v51 = vld [vmem:[%s13317_s1 + $0x848] sm:$0xff]  }
 0x371   : > { %8910 = vmatmul.mubr.msk.bf16.gmra.mrb[108].mxu1 %vm537_vm6, %v10947_v52  ;;  %9534 = vmatmul.mubr.msk.bf16.gmra.mrb[44].mxu0 %vm537_vm6, %v10948_v53  ;;  %v7337_v52 = vld [vmem:[%s13318_s2 + $0xd8] sm:$0xff]  ;;  %v7338_v53 = vld [vmem:[%s13318_s2 + $0xe0] sm:$0xff] }
 0x372   : > { %2257 = vmatprep.mubr.bf16.mxu1 %v13322_v4  ;;  %6167 = vmatprep.mubr.bf16.mxu0 %v13322_v4 }
 0x373   : > { %7511 = vperm.xlu0 %10763, %v7337_v52   ;;  %7516 = vperm.xlu1 %10764, %v7338_v53   ;;  %v11009_v52 = vld [vmem:[%s13317_s1 + $0x3d0] sm:$0xff]  }
 0x374   : > { %v11010_v53 = vld [vmem:[%s13317_s1 + $0x850] sm:$0xff]  }
 0x379   : > { %8911 = vmatmul.mubr.msk.bf16.gmra.mrb[112].mxu1 %vm537_vm6, %v10949_v54  ;;  %9535 = vmatmul.mubr.msk.bf16.gmra.mrb[48].mxu0 %vm537_vm6, %v10950_v55  ;;  %v10983_v54 = vld [vmem:[%s13317_s1 + $0x368] sm:$0xff]  }
 0x37a   : > { %2267 = vmatprep.mubr.bf16.mxu1 %v13322_v4  ;;  %6177 = vmatprep.mubr.bf16.mxu0 %v13322_v4  ;;  %v10984_v55 = vld [vmem:[%s13317_s1 + $0x7e8] sm:$0xff]  }
 0x381   : > { %8912 = vmatmul.mubr.msk.bf16.gmra.mrb[116].mxu1 %vm537_vm6, %v10951_v56  ;;  %9536 = vmatmul.mubr.msk.bf16.gmra.mrb[52].mxu0 %vm537_vm6, %v10952_v57  ;;  %v7339_v56 = vld [vmem:[%s13318_s2 + $0xe8] sm:$0xff]  ;;  %v7340_v57 = vld [vmem:[%s13318_s2 + $0xf0] sm:$0xff] }
 0x382   : > { %2277 = vmatprep.mubr.bf16.mxu1 %v13322_v4  ;;  %6187 = vmatprep.mubr.bf16.mxu0 %v13322_v4 }
 0x383   : > { %7521 = vperm.xlu0 %10763, %v7339_v56   ;;  %7526 = vperm.xlu1 %10764, %v7340_v57   ;;  %v11011_v56 = vld [vmem:[%s13317_s1 + $0x3d8] sm:$0xff]  }
 0x384   : > { %v11012_v57 = vld [vmem:[%s13317_s1 + $0x858] sm:$0xff]  }
 0x389   : > { %8913 = vmatmul.mubr.msk.bf16.gmra.mrb[120].mxu1 %vm537_vm6, %v10953_v58  ;;  %9537 = vmatmul.mubr.msk.bf16.gmra.mrb[56].mxu0 %vm537_vm6, %v10954_v59  ;;  %v7341_v58 = vld [vmem:[%s13318_s2 + $0xf8] sm:$0xff]  ;;  %v7342_v59 = vld [vmem:[%s13318_s2 + $0x100] sm:$0xff] }
 0x38a   : > { %2287 = vmatprep.mubr.bf16.mxu1 %v13322_v4  ;;  %6197 = vmatprep.mubr.bf16.mxu0 %v13322_v4 }
 0x38b   : > { %7531 = vperm.xlu0 %10763, %v7341_v58   ;;  %7536 = vperm.xlu1 %10764, %v7342_v59  }
 0x391   : > { %8914 = vmatmul.mubr.msk.bf16.gmra.mrb[124].mxu1 %vm537_vm6, %v10955_v60  ;;  %9538 = vmatmul.mubr.msk.bf16.gmra.mrb[60].mxu0 %vm537_vm6, %v10956_v14  ;;  %v10985_v60 = vld [vmem:[%s13317_s1 + $0x370] sm:$0xff]  }
 0x392   : > { %2791 = vmatprep.mubr.bf16.mxu1 %v13322_v4  ;;  %6207 = vmatprep.mubr.bf16.mxu0 %v13322_v4  ;;  %v10986_v14 = vld [vmem:[%s13317_s1 + $0x7f0] sm:$0xff]  }
 0x399   : > { %9011 = vmatmul.mubr.msk.bf16.vlgmr.msra.gmra.mrb[0].mxu1 %vm537_vm6, %v10957_v61  ;;  %9539 = vmatmul.mubr.msk.bf16.gmra.mrb[64].mxu0 %vm537_vm6, %v10958_v62  ;;  %v7343_v61 = vld [vmem:[%s13318_s2 + $0x108] sm:$0xff]  ;;  %v7344_v62 = vld [vmem:[%s13318_s2 + $0x110] sm:$0xff] }
 0x39a   : > { %9686 = vmatpush1.bf16.msra.mxu1 %v11206_v19  ;;  %2801 = vmatprep.mubr.bf16.mxu1 %v13322_v4  ;;  %v10961_v19 = vld [vmem:[%s13317_s1 + $0x310] sm:$0xff]  }
 0x39b   : > { %6217 = vmatprep.mubr.bf16.mxu0 %v13322_v4  ;;  %7541 = vperm.xlu0 %10763, %v7343_v61   ;;  %v11013_v61 = vld [vmem:[%s13317_s1 + $0x3e0] sm:$0xff]  }
 0x39c   : > { %7546 = vperm.xlu1 %10764, %v7344_v62   ;;  %v11014_v62 = vld [vmem:[%s13317_s1 + $0x860] sm:$0xff]  }
 0x3a1   : > { %9012 = vmatmul.mubr.msk.bf16.gmra.mrb[4].mxu1 %vm537_vm6, %v10959_v63  ;;  %9540 = vmatmul.mubr.msk.bf16.gmra.mrb[68].mxu0 %vm537_vm6, %v10960_v0  ;;  %v7345_v63 = vld [vmem:[%s13318_s2 + $0x118] sm:$0xff]  ;;  %v7346_v0 = vld [vmem:[%s13318_s2 + $0x120] sm:$0xff] }
 0x3a2   : > { %2811 = vmatprep.mubr.bf16.mxu1 %v13322_v4  ;;  %6227 = vmatprep.mubr.bf16.mxu0 %v13322_v4 }
 0x3a3   : > { %7551 = vperm.xlu0 %10763, %v7345_v63   ;;  %7556 = vperm.xlu1 %10764, %v7346_v0  }
 0x3a9   : > { %9013 = vmatmul.mubr.msk.bf16.gmra.mrb[8].mxu1 %vm537_vm6, %v10961_v19  ;;  %9541 = vmatmul.mubr.msk.bf16.gmra.mrb[72].mxu0 %vm537_vm6, %v10962_v1  ;;  %v10987_v19 = vld [vmem:[%s13317_s1 + $0x378] sm:$0xff]  }
 0x3aa   : > { %2821 = vmatprep.mubr.bf16.mxu1 %v13322_v4  ;;  %6237 = vmatprep.mubr.bf16.mxu0 %v13322_v4  ;;  %v10988_v1 = vld [vmem:[%s13317_s1 + $0x7f8] sm:$0xff]  }
 0x3b1   : > { %9014 = vmatmul.mubr.msk.bf16.gmra.mrb[12].mxu1 %vm537_vm6, %v10963_v2  ;;  %9542 = vmatmul.mubr.msk.bf16.gmra.mrb[76].mxu0 %vm537_vm6, %v10964_v5  ;;  %v7347_v2 = vld [vmem:[%s13318_s2 + $0x128] sm:$0xff]  ;;  %v7348_v5 = vld [vmem:[%s13318_s2 + $0x130] sm:$0xff] }
 0x3b2   : > { %2831 = vmatprep.mubr.bf16.mxu1 %v13322_v4  ;;  %6247 = vmatprep.mubr.bf16.mxu0 %v13322_v4 }
 0x3b3   : > { %7561 = vperm.xlu0 %10763, %v7347_v2   ;;  %7566 = vperm.xlu1 %10764, %v7348_v5   ;;  %v11015_v2 = vld [vmem:[%s13317_s1 + $0x3e8] sm:$0xff]  }
 0x3b4   : > { %v11016_v5 = vld [vmem:[%s13317_s1 + $0x868] sm:$0xff]  }
 0x3b9   : > { %9015 = vmatmul.mubr.msk.bf16.gmra.mrb[16].mxu1 %vm537_vm6, %v10965_v7  ;;  %9543 = vmatmul.mubr.msk.bf16.gmra.mrb[80].mxu0 %vm537_vm6, %v10966_v8  ;;  %v7349_v7 = vld [vmem:[%s13318_s2 + $0x138] sm:$0xff]  ;;  %v7350_v8 = vld [vmem:[%s13318_s2 + $0x140] sm:$0xff] }
 0x3ba   : > { %2841 = vmatprep.mubr.bf16.mxu1 %v13322_v4  ;;  %6257 = vmatprep.mubr.bf16.mxu0 %v13322_v4 }
 0x3bb   : > { %7571 = vperm.xlu0 %10763, %v7349_v7   ;;  %7576 = vperm.xlu1 %10764, %v7350_v8  }
 0x3bf   : > { %7581 = vperm.xlu0 %10763, %v7351_v12   ;;  %7586 = vperm.xlu1 %10764, %v7352_v13   ;;  %v11017_v12 = vld [vmem:[%s13317_s1 + $0x3f0] sm:$0xff]  }
 0x3c0   : > { %v11018_v13 = vld [vmem:[%s13317_s1 + $0x870] sm:$0xff]  }
 0x3c1   : > { %9016 = vmatmul.mubr.msk.bf16.gmra.mrb[20].mxu1 %vm537_vm6, %v10967_v10  ;;  %9544 = vmatmul.mubr.msk.bf16.gmra.mrb[84].mxu0 %vm537_vm6, %v10968_v11  ;;  %v10989_v10 = vld [vmem:[%s13317_s1 + $0x380] sm:$0xff]  }
 0x3c2   : > { %2851 = vmatprep.mubr.bf16.mxu1 %v13322_v4  ;;  %6267 = vmatprep.mubr.bf16.mxu0 %v13322_v4  ;;  %v10990_v11 = vld [vmem:[%s13317_s1 + $0x800] sm:$0xff]  }
 0x3c3   : > { %7591 = vperm.xlu0 %10763, %v7353_v15  }
 0x3c7   : > { %7601 = vperm.xlu0 %10763, %v7355_v20   ;;  %v11019_v20 = vld [vmem:[%s13317_s1 + $0x3f8] sm:$0xff]  }
 0x3c9   : > { %9017 = vmatmul.mubr.msk.bf16.gmra.mrb[24].mxu1 %vm537_vm6, %v10969_v16  ;;  %9545 = vmatmul.mubr.msk.bf16.gmra.mrb[88].mxu0 %vm537_vm6, %v10970_v17  ;;  %v7354_v16 = vld [vmem:[%s13318_s2 + $0x160] sm:$0xff]  ;;  %v10991_v17 = vld [vmem:[%s13317_s1 + $0x388] sm:$0xff]  }
 0x3ca   : > { %2861 = vmatprep.mubr.bf16.mxu1 %v13322_v4  ;;  %6277 = vmatprep.mubr.bf16.mxu0 %v13322_v4 }
 0x3cb   : > { %7596 = vperm.xlu1 %10764, %v7354_v16   ;;  %7611 = vperm.xlu0 %10763, %v7357_v22  }
 0x3cf   : > { %7606 = vperm.xlu1 %10764, %v7356_v21   ;;  %7621 = vperm.xlu0 %10763, %v7359_v26   ;;  %v11020_v21 = vld [vmem:[%s13317_s1 + $0x878] sm:$0xff]   ;;  %v11021_v26 = vld [vmem:[%s13317_s1 + $0x480] sm:$0xff]  }
 0x3d1   : > { %9018 = vmatmul.mubr.msk.bf16.gmra.mrb[28].mxu1 %vm537_vm6, %v10971_v23  ;;  %9546 = vmatmul.mubr.msk.bf16.gmra.mrb[92].mxu0 %vm537_vm6, %v10972_v24  ;;  %v7358_v23 = vld [vmem:[%s13318_s2 + $0x180] sm:$0xff]  ;;  %v10993_v24 = vld [vmem:[%s13317_s1 + $0x390] sm:$0xff]  }
 0x3d2   : > { %2871 = vmatprep.mubr.bf16.mxu1 %v13322_v4  ;;  %6287 = vmatprep.mubr.bf16.mxu0 %v13322_v4 }
 0x3d3   : > { %7616 = vperm.xlu1 %10764, %v7358_v23   ;;  %7631 = vperm.xlu0 %10763, %v7361_v3  }
 0x3d7   : > { %7626 = vperm.xlu1 %10764, %v7360_v27   ;;  %7641 = vperm.xlu0 %10763, %v7363_v30   ;;  %v11022_v27 = vld [vmem:[%s13317_s1 + $0x880] sm:$0xff]   ;;  %v11023_v30 = vld [vmem:[%s13317_s1 + $0x488] sm:$0xff]  }
 0x3d9   : > { %9019 = vmatmul.mubr.msk.bf16.gmra.mrb[32].mxu1 %vm537_vm6, %v10973_v6  ;;  %9547 = vmatmul.mubr.msk.bf16.gmra.mrb[96].mxu0 %vm537_vm6, %v10974_v28  ;;  %v7362_v6 = vld [vmem:[%s13318_s2 + $0x1a0] sm:$0xff]  ;;  %v10995_v28 = vld [vmem:[%s13317_s1 + $0x398] sm:$0xff]  }
 0x3da   : > { %2881 = vmatprep.mubr.bf16.mxu1 %v13322_v4  ;;  %6297 = vmatprep.mubr.bf16.mxu0 %v13322_v4 }
 0x3db   : > { %7636 = vperm.xlu1 %10764, %v7362_v6   ;;  %7651 = vperm.xlu0 %10763, %v7365_v32  }
 0x3df   : > { %7646 = vperm.xlu1 %10764, %v7364_v31   ;;  %7661 = vperm.xlu0 %10763, %v7367_v35   ;;  %v11024_v31 = vld [vmem:[%s13317_s1 + $0x888] sm:$0xff]   ;;  %v11025_v35 = vld [vmem:[%s13317_s1 + $0x490] sm:$0xff]  }
 0x3e1   : > { %9020 = vmatmul.mubr.msk.bf16.gmra.mrb[36].mxu1 %vm537_vm6, %v10975_v33  ;;  %9548 = vmatmul.mubr.msk.bf16.gmra.mrb[100].mxu0 %vm537_vm6, %v10976_v34  ;;  %v7366_v33 = vld [vmem:[%s13318_s2 + $0x1c0] sm:$0xff] }
 0x3e2   : > { %2891 = vmatprep.mubr.bf16.mxu1 %v13322_v4  ;;  %6307 = vmatprep.mubr.bf16.mxu0 %v13322_v4  ;;  %v10997_v34 = vld [vmem:[%s13317_s1 + $0x3a0] sm:$0xff]  }
 0x3e3   : > { %7656 = vperm.xlu1 %10764, %v7366_v33   ;;  %7671 = vperm.xlu0 %10763, %v7369_v37  }
 0x3e7   : > { %7666 = vperm.xlu1 %10764, %v7368_v36   ;;  %7681 = vperm.xlu0 %10763, %v7371_v41   ;;  %v11026_v36 = vld [vmem:[%s13317_s1 + $0x890] sm:$0xff]   ;;  %v11027_v41 = vld [vmem:[%s13317_s1 + $0x498] sm:$0xff]  }
 0x3e9   : > { %9021 = vmatmul.mubr.msk.bf16.gmra.mrb[40].mxu1 %vm537_vm6, %v10977_v38  ;;  %9549 = vmatmul.mubr.msk.bf16.gmra.mrb[104].mxu0 %vm537_vm6, %v10978_v39  ;;  %v7370_v38 = vld [vmem:[%s13318_s2 + $0x1e0] sm:$0xff]  ;;  %v10999_v39 = vld [vmem:[%s13317_s1 + $0x3a8] sm:$0xff]  }
 0x3ea   : > { %2901 = vmatprep.mubr.bf16.mxu1 %v13322_v4  ;;  %6317 = vmatprep.mubr.bf16.mxu0 %v13322_v4 }
 0x3eb   : > { %7676 = vperm.xlu1 %10764, %v7370_v38  }
 0x3f1   : > { %9022 = vmatmul.mubr.msk.bf16.gmra.mrb[44].mxu1 %vm537_vm6, %v10979_v42  ;;  %9550 = vmatmul.mubr.msk.bf16.gmra.mrb[108].mxu0 %vm537_vm6, %v10980_v43  ;;  %v7372_v42 = vld [vmem:[%s13318_s2 + $0x1f0] sm:$0xff]  ;;  %v7373_v43 = vld [vmem:[%s13318_s2 + $0x1f8] sm:$0xff] }
 0x3f2   : > { %2911 = vmatprep.mubr.bf16.mxu1 %v13322_v4  ;;  %6327 = vmatprep.mubr.bf16.mxu0 %v13322_v4 }
 0x3f3   : > { %7686 = vperm.xlu1 %10764, %v7372_v42   ;;  %7691 = vperm.xlu0 %10763, %v7373_v43   ;;  %v11028_v42 = vld [vmem:[%s13317_s1 + $0x898] sm:$0xff]  }
 0x3f9   : > { %9023 = vmatmul.mubr.msk.bf16.gmra.mrb[48].mxu1 %vm537_vm6, %v10981_v48  ;;  %9551 = vmatmul.mubr.msk.bf16.gmra.mrb[112].mxu0 %vm537_vm6, %v10982_v49  ;;  %v11005_v48 = vld [vmem:[%s13317_s1 + $0x3c0] sm:$0xff]  }
 0x3fa   : > { %2921 = vmatprep.mubr.bf16.mxu1 %v13322_v4  ;;  %6337 = vmatprep.mubr.bf16.mxu0 %v13322_v4  ;;  %v11006_v49 = vld [vmem:[%s13317_s1 + $0x840] sm:$0xff]  }
 0x401   : > { %9024 = vmatmul.mubr.msk.bf16.gmra.mrb[52].mxu1 %vm537_vm6, %v10983_v54  ;;  %9552 = vmatmul.mubr.msk.bf16.gmra.mrb[116].mxu0 %vm537_vm6, %v10984_v55 }
 0x402   : > { %2931 = vmatprep.mubr.bf16.mxu1 %v13322_v4  ;;  %6347 = vmatprep.mubr.bf16.mxu0 %v13322_v4 }
 0x409   : > { %9025 = vmatmul.mubr.msk.bf16.gmra.mrb[56].mxu1 %vm537_vm6, %v10985_v60  ;;  %9553 = vmatmul.mubr.msk.bf16.gmra.mrb[120].mxu0 %vm537_vm6, %v10986_v14 }
 0x40a   : > { %2941 = vmatprep.mubr.bf16.mxu1 %v13322_v4  ;;  %6357 = vmatprep.mubr.bf16.mxu0 %v13322_v4 }
 0x411   : > { %9026 = vmatmul.mubr.msk.bf16.gmra.mrb[60].mxu1 %vm537_vm6, %v10987_v19  ;;  %9554 = vmatmul.mubr.msk.bf16.gmra.mrb[124].mxu0 %vm537_vm6, %v10988_v1 }
 0x412   : > { %2951 = vmatprep.mubr.bf16.mxu1 %v13322_v4  ;;  %6861 = vmatprep.mubr.bf16.mxu0 %v13322_v4 }
 0x419   : > { %9027 = vmatmul.mubr.msk.bf16.gmra.mrb[64].mxu1 %vm537_vm6, %v10989_v10  ;;  %9651 = vmatmul.mubr.msk.bf16.vlgmr.msra.gmra.mrb[0].mxu0 %vm537_vm6, %v10990_v11 }
 0x41a   : > { %2961 = vmatprep.mubr.bf16.mxu1 %v13322_v4  ;;  %6871 = vmatprep.mubr.bf16.mxu0 %v13322_v4 }
 0x421   : > { %9028 = vmatmul.mubr.msk.bf16.gmra.mrb[68].mxu1 %vm537_vm6, %v10991_v17  ;;  %9652 = vmatmul.mubr.msk.bf16.gmra.mrb[4].mxu0 %vm537_vm6, %v10992_v18 }
 0x422   : > { %2971 = vmatprep.mubr.bf16.mxu1 %v13322_v4  ;;  %6881 = vmatprep.mubr.bf16.mxu0 %v13322_v4 }
 0x429   : > { %9029 = vmatmul.mubr.msk.bf16.gmra.mrb[72].mxu1 %vm537_vm6, %v10993_v24  ;;  %9653 = vmatmul.mubr.msk.bf16.gmra.mrb[8].mxu0 %vm537_vm6, %v10994_v25 }
 0x42a   : > { %2981 = vmatprep.mubr.bf16.mxu1 %v13322_v4  ;;  %6891 = vmatprep.mubr.bf16.mxu0 %v13322_v4 }
 0x431   : > { %9030 = vmatmul.mubr.msk.bf16.gmra.mrb[76].mxu1 %vm537_vm6, %v10995_v28  ;;  %9654 = vmatmul.mubr.msk.bf16.gmra.mrb[12].mxu0 %vm537_vm6, %v10996_v29 }
 0x432   : > { %2991 = vmatprep.mubr.bf16.mxu1 %v13322_v4  ;;  %6901 = vmatprep.mubr.bf16.mxu0 %v13322_v4 }
 0x439   : > { %9031 = vmatmul.mubr.msk.bf16.gmra.mrb[80].mxu1 %vm537_vm6, %v10997_v34  ;;  %9655 = vmatmul.mubr.msk.bf16.gmra.mrb[16].mxu0 %vm537_vm6, %v10998_v9 }
 0x43a   : > { %3001 = vmatprep.mubr.bf16.mxu1 %v13322_v4  ;;  %6911 = vmatprep.mubr.bf16.mxu0 %v13322_v4 }
 0x441   : > { %9032 = vmatmul.mubr.msk.bf16.gmra.mrb[84].mxu1 %vm537_vm6, %v10999_v39  ;;  %9656 = vmatmul.mubr.msk.bf16.gmra.mrb[20].mxu0 %vm537_vm6, %v11000_v40 }
 0x442   : > { %3011 = vmatprep.mubr.bf16.mxu1 %v13322_v4  ;;  %6921 = vmatprep.mubr.bf16.mxu0 %v13322_v4 }
 0x449   : > { %9033 = vmatmul.mubr.msk.bf16.gmra.mrb[88].mxu1 %vm537_vm6, %v11001_v44  ;;  %9657 = vmatmul.mubr.msk.bf16.gmra.mrb[24].mxu0 %vm537_vm6, %v11002_v45 }
 0x44a   : > { %3021 = vmatprep.mubr.bf16.mxu1 %v13322_v4  ;;  %6931 = vmatprep.mubr.bf16.mxu0 %v13322_v4 }
 0x451   : > { %9034 = vmatmul.mubr.msk.bf16.gmra.mrb[92].mxu1 %vm537_vm6, %v11003_v46  ;;  %9658 = vmatmul.mubr.msk.bf16.gmra.mrb[28].mxu0 %vm537_vm6, %v11004_v47  ;;  %v11029_v47 = vld [vmem:[%s13317_s1 + $0x4a0] sm:$0xff]  }
 0x452   : > { %3031 = vmatprep.mubr.bf16.mxu1 %v13322_v4  ;;  %6941 = vmatprep.mubr.bf16.mxu0 %v13322_v4 }
 0x459   : > { %9035 = vmatmul.mubr.msk.bf16.gmra.mrb[96].mxu1 %vm537_vm6, %v11005_v48  ;;  %9659 = vmatmul.mubr.msk.bf16.gmra.mrb[32].mxu0 %vm537_vm6, %v11006_v49  ;;  %v11030_v48 = vld [vmem:[%s13317_s1 + $0x8a0] sm:$0xff]  }
 0x45a   : > { %3041 = vmatprep.mubr.bf16.mxu1 %v13322_v4  ;;  %6951 = vmatprep.mubr.bf16.mxu0 %v13322_v4 }
 0x461   : > { %9036 = vmatmul.mubr.msk.bf16.gmra.mrb[100].mxu1 %vm537_vm6, %v11007_v50  ;;  %9660 = vmatmul.mubr.msk.bf16.gmra.mrb[36].mxu0 %vm537_vm6, %v11008_v51 }
 0x462   : > { %3051 = vmatprep.mubr.bf16.mxu1 %v13322_v4  ;;  %6961 = vmatprep.mubr.bf16.mxu0 %v13322_v4 }
 0x469   : > { %9037 = vmatmul.mubr.msk.bf16.gmra.mrb[104].mxu1 %vm537_vm6, %v11009_v52  ;;  %9661 = vmatmul.mubr.msk.bf16.gmra.mrb[40].mxu0 %vm537_vm6, %v11010_v53  ;;  %v11031_v53 = vld [vmem:[%s13317_s1 + $0x4a8] sm:$0xff]  }
 0x46a   : > { %3061 = vmatprep.mubr.bf16.mxu1 %v13322_v4  ;;  %6971 = vmatprep.mubr.bf16.mxu0 %v13322_v4 }
 0x46c   : > { %v12675_v54 = vpop.f32.mrb[0].mxu1 }
 0x46d   : > { %v12677_v55 = vpop.f32.mrb[1].mxu1 }
 0x46e   : > { %v12685_v58 = vpop.f32.mrb[2].mxu1 }
 0x46f   : > { %v12687_v59 = vpop.f32.mrb[3].mxu1 }
 0x471   : > { %9038 = vmatmul.mubr.msk.bf16.gmra.mrb[108].mxu1 %vm537_vm6, %v11011_v56  ;;  %9662 = vmatmul.mubr.msk.bf16.gmra.mrb[44].mxu0 %vm537_vm6, %v11012_v57  ;;  %v11032_v56 = vld [vmem:[%s13317_s1 + $0x8a8] sm:$0xff]  }
 0x472   : > { %3071 = vmatprep.mubr.bf16.mxu1 %v13322_v4  ;;  %6981 = vmatprep.mubr.bf16.mxu0 %v13322_v4 }
 0x474   : > { %v12693_v60 = vpop.f32.mrb[4].mxu1 }
 0x475   : > { %v12695_v14 = vpop.f32.mrb[5].mxu1 }
 0x476   : > { %v12703_v63 = vpop.f32.mrb[6].mxu1 }
 0x477   : > { %v12705_v0 = vpop.f32.mrb[7].mxu1 }
 0x479   : > { %9039 = vmatmul.mubr.msk.bf16.gmra.mrb[112].mxu1 %vm537_vm6, %v11013_v61  ;;  %9663 = vmatmul.mubr.msk.bf16.gmra.mrb[48].mxu0 %vm537_vm6, %v11014_v62 }
 0x47a   : > { %3081 = vmatprep.mubr.bf16.mxu1 %v13322_v4  ;;  %6991 = vmatprep.mubr.bf16.mxu0 %v13322_v4 }
 0x47c   : > { %v12711_v19 = vpop.f32.mrb[8].mxu1 }
 0x47d   : > { %v12713_v1 = vpop.f32.mrb[9].mxu1 }
 0x47e   : > { %v12721_v7 = vpop.f32.mrb[10].mxu1 }
 0x47f   : > { %v12723_v8 = vpop.f32.mrb[11].mxu1 }
 0x481   : > { %9040 = vmatmul.mubr.msk.bf16.gmra.mrb[116].mxu1 %vm537_vm6, %v11015_v2  ;;  %9664 = vmatmul.mubr.msk.bf16.gmra.mrb[52].mxu0 %vm537_vm6, %v11016_v5  ;;  %v11033_v5 = vld [vmem:[%s13317_s1 + $0x4b0] sm:$0xff]  }
 0x482   : > { %3091 = vmatprep.mubr.bf16.mxu1 %v13322_v4  ;;  %7001 = vmatprep.mubr.bf16.mxu0 %v13322_v4 }
 0x484   : > { %v12729_v10 = vpop.f32.mrb[12].mxu1 }
 0x485   : > { %v12731_v11 = vpop.f32.mrb[13].mxu1 }
 0x486   : > { %v12739_v15 = vpop.f32.mrb[14].mxu1 }
 0x487   : > { %v12741_v16 = vpop.f32.mrb[15].mxu1 }
 0x489   : > { %9041 = vmatmul.mubr.msk.bf16.gmra.mrb[120].mxu1 %vm537_vm6, %v11017_v12  ;;  %9665 = vmatmul.mubr.msk.bf16.gmra.mrb[56].mxu0 %vm537_vm6, %v11018_v13  ;;  %v11034_v12 = vld [vmem:[%s13317_s1 + $0x8b0] sm:$0xff]  }
 0x48a   : > { %3101 = vmatprep.mubr.bf16.mxu1 %v13322_v4  ;;  %7011 = vmatprep.mubr.bf16.mxu0 %v13322_v4 }
 0x48c   : > { %v12747_v17 = vpop.f32.mrb[16].mxu1 }
 0x48d   : > { %v12749_v18 = vpop.f32.mrb[17].mxu1 }
 0x48e   : > { %v12757_v22 = vpop.f32.mrb[18].mxu1 }
 0x48f   : > { %v12759_v23 = vpop.f32.mrb[19].mxu1 }
 0x491   : > { %9042 = vmatmul.mubr.msk.bf16.gmra.mrb[124].mxu1 %vm537_vm6, %v11019_v20  ;;  %9666 = vmatmul.mubr.msk.bf16.gmra.mrb[60].mxu0 %vm537_vm6, %v11020_v21 }
 0x492   : > { %3765 = vmatprep.mubr.bf16.mxu1 %v13322_v4  ;;  %7021 = vmatprep.mubr.bf16.mxu0 %v13322_v4 }
 0x494   : > { %v12765_v24 = vpop.f32.mrb[20].mxu1 }
 0x495   : > { %v12767_v25 = vpop.f32.mrb[21].mxu1 }
 0x496   : > { %v12775_v3 = vpop.f32.mrb[22].mxu1 }
 0x497   : > { %v12777_v6 = vpop.f32.mrb[23].mxu1 }
 0x499   : > { %9155 = vmatmul.mubr.msk.bf16.vlgmr.msra.gmra.mrb[64].mxu1 %vm537_vm6, %v11021_v26  ;;  %9667 = vmatmul.mubr.msk.bf16.gmra.mrb[64].mxu0 %vm537_vm6, %v11022_v27  ;;  %v11035_v27 = vld [vmem:[%s13317_s1 + $0x4b8] sm:$0xff]  }
 0x49a   : > { %3775 = vmatprep.mubr.bf16.mxu1 %v13322_v4  ;;  %7031 = vmatprep.mubr.bf16.mxu0 %v13322_v4 }
 0x49c   : > { %v12783_v28 = vpop.f32.mrb[24].mxu1 }
 0x49d   : > { %v12785_v29 = vpop.f32.mrb[25].mxu1 }
 0x49e   : > { %v12793_v32 = vpop.f32.mrb[26].mxu1 }
 0x49f   : > { %v12795_v33 = vpop.f32.mrb[27].mxu1 }
 0x4a1   : > { %9156 = vmatmul.mubr.msk.bf16.gmra.mrb[68].mxu1 %vm537_vm6, %v11023_v30  ;;  %9668 = vmatmul.mubr.msk.bf16.gmra.mrb[68].mxu0 %vm537_vm6, %v11024_v31  ;;  %v11036_v30 = vld [vmem:[%s13317_s1 + $0x8b8] sm:$0xff]  }
 0x4a2   : > { %3785 = vmatprep.mubr.bf16.mxu1 %v13322_v4  ;;  %7041 = vmatprep.mubr.bf16.mxu0 %v13322_v4 }
 0x4a4   : > { %v12801_v34 = vpop.f32.mrb[28].mxu1 }
 0x4a5   : > { %v12803_v9 = vpop.f32.mrb[29].mxu1 }
 0x4a6   : > { %v12811_v37 = vpop.f32.mrb[30].mxu1 }
 0x4a7   : > { %v12813_v38 = vpop.f32.mrb[31].mxu1 }
 0x4a9   : > { %9157 = vmatmul.mubr.msk.bf16.gmra.mrb[72].mxu1 %vm537_vm6, %v11025_v35  ;;  %9669 = vmatmul.mubr.msk.bf16.gmra.mrb[72].mxu0 %vm537_vm6, %v11026_v36 }
 0x4aa   : > { %3795 = vmatprep.mubr.bf16.mxu1 %v13322_v4  ;;  %7051 = vmatprep.mubr.bf16.mxu0 %v13322_v4 }
 0x4ac   : > { %v12819_v39 = vpop.f32.mrb[32].mxu1 }
 0x4ad   : > { %v12821_v40 = vpop.f32.mrb[33].mxu1 }
 0x4ae   : > { %v12829_v43 = vpop.f32.mrb[34].mxu1 }
 0x4af   : > { %v12831_v44 = vpop.f32.mrb[35].mxu1 }
 0x4b1   : > { %9158 = vmatmul.mubr.msk.bf16.gmra.mrb[76].mxu1 %vm537_vm6, %v11027_v41  ;;  %9670 = vmatmul.mubr.msk.bf16.gmra.mrb[76].mxu0 %vm537_vm6, %v11028_v42  ;;  %v11037_v42 = vld [vmem:[%s13317_s1 + $0x4c0] sm:$0xff]  }
 0x4b2   : > { %3805 = vmatprep.mubr.bf16.mxu1 %v13322_v4  ;;  %7061 = vmatprep.mubr.bf16.mxu0 %v13322_v4 }
 0x4b4   : > { %v12837_v45 = vpop.f32.mrb[36].mxu1 }
 0x4b5   : > { %v12839_v46 = vpop.f32.mrb[37].mxu1 }
 0x4b6   : > { %v12847_v49 = vpop.f32.mrb[38].mxu1 }
 0x4b7   : > { %v12849_v50 = vpop.f32.mrb[39].mxu1 }
 0x4b9   : > { %9159 = vmatmul.mubr.msk.bf16.gmra.mrb[80].mxu1 %vm537_vm6, %v11029_v47  ;;  %9671 = vmatmul.mubr.msk.bf16.gmra.mrb[80].mxu0 %vm537_vm6, %v11030_v48  ;;  %v11038_v47 = vld [vmem:[%s13317_s1 + $0x8c0] sm:$0xff]  }
 0x4ba   : > { %3815 = vmatprep.mubr.bf16.mxu1 %v13322_v4  ;;  %7071 = vmatprep.mubr.bf16.mxu0 %v13322_v4 }
 0x4bc   : > { %v12855_v51 = vpop.f32.mrb[40].mxu1 }
 0x4bd   : > { %v12857_v52 = vpop.f32.mrb[41].mxu1 }
 0x4be   : > { %v12865_v57 = vpop.f32.mrb[42].mxu1 }
 0x4bf   : > { %v12867_v61 = vpop.f32.mrb[43].mxu1 }
 0x4c0   : > { %13325 = vst [vmem:[#allocation2_spill] sm:$0xff] %v12867_v61 }
 0x4c1   : > { %9160 = vmatmul.mubr.msk.bf16.gmra.mrb[84].mxu1 %vm537_vm6, %v11031_v53  ;;  %9672 = vmatmul.mubr.msk.bf16.gmra.mrb[84].mxu0 %vm537_vm6, %v11032_v56 }
 0x4c2   : > { %3825 = vmatprep.mubr.bf16.mxu1 %v13322_v4  ;;  %7081 = vmatprep.mubr.bf16.mxu0 %v13322_v4 }
 0x4c4   : > { %v12873_v62 = vpop.f32.mrb[44].mxu1 }
 0x4c5   : > { %13326 = vst [vmem:[#allocation3_spill] sm:$0xff] %v12873_v62  ;;  %v12875_v2 = vpop.f32.mrb[45].mxu1 }
 0x4c6   : > { %13327 = vst [vmem:[#allocation4_spill] sm:$0xff] %v12875_v2  ;;  %v12883_v13 = vpop.f32.mrb[46].mxu1 }
 0x4c7   : > { %13328 = vst [vmem:[#allocation5_spill] sm:$0xff] %v12883_v13  ;;  %v12885_v20 = vpop.f32.mrb[47].mxu1 }
 0x4c8   : > { %13329 = vst [vmem:[#allocation6_spill] sm:$0xff] %v12885_v20 }
 0x4c9   : > { %9161 = vmatmul.mubr.msk.bf16.gmra.mrb[88].mxu1 %vm537_vm6, %v11033_v5  ;;  %9673 = vmatmul.mubr.msk.bf16.gmra.mrb[88].mxu0 %vm537_vm6, %v11034_v12  ;;  %v11039_v12 = vld [vmem:[%s13317_s1 + $0x4c8] sm:$0xff]  }
 0x4ca   : > { %3835 = vmatprep.mubr.bf16.mxu1 %v13322_v4  ;;  %7091 = vmatprep.mubr.bf16.mxu0 %v13322_v4 }
 0x4cc   : > { %v12891_v21 = vpop.f32.mrb[48].mxu1 }
 0x4cd   : > { %13330 = vst [vmem:[#allocation7_spill] sm:$0xff] %v12891_v21  ;;  %v12893_v26 = vpop.f32.mrb[49].mxu1 }
 0x4ce   : > { %13331 = vst [vmem:[#allocation8_spill] sm:$0xff] %v12893_v26  ;;  %v12901_v31 = vpop.f32.mrb[50].mxu1 }
 0x4cf   : > { %13332 = vst [vmem:[#allocation9_spill] sm:$0xff] %v12901_v31  ;;  %v12903_v35 = vpop.f32.mrb[51].mxu1  ;;  %v7382_v31 = vpop.permute.xlu1 %7381 }
 0x4d0   : > { %13333 = vst [vmem:[#allocation10_spill] sm:$0xff] %v12903_v35 }
 0x4d1   : > { %9162 = vmatmul.mubr.msk.bf16.gmra.mrb[92].mxu1 %vm537_vm6, %v11035_v27  ;;  %9674 = vmatmul.mubr.msk.bf16.gmra.mrb[92].mxu0 %vm537_vm6, %v11036_v30  ;;  %v11040_v27 = vld [vmem:[%s13317_s1 + $0x8c8] sm:$0xff]  }
 0x4d2   : > { %3845 = vmatprep.mubr.bf16.mxu1 %v13322_v4  ;;  %7101 = vmatprep.mubr.bf16.mxu0 %v13322_v4 }
 0x4d4   : > { %v12909_v36 = vpop.f32.mrb[52].mxu1 }
 0x4d5   : > { %13334 = vst [vmem:[#allocation11_spill] sm:$0xff] %v12909_v36  ;;  %v12911_v41 = vpop.f32.mrb[53].mxu1 }
 0x4d6   : > { %13335 = vst [vmem:[#allocation12_spill] sm:$0xff] %v12911_v41  ;;  %v12919_v48 = vpop.f32.mrb[54].mxu1 }
 0x4d7   : > { %13336 = vst [vmem:[#allocation13_spill] sm:$0xff] %v12919_v48  ;;  %v12921_v53 = vpop.f32.mrb[55].mxu1 }
 0x4d8   : > { %13337 = vst [vmem:[#allocation14_spill] sm:$0xff] %v12921_v53  ;;  %v11041_v53 = vld [vmem:[%s13317_s1 + $0x4d0] sm:$0xff]  }
 0x4d9   : > { %9163 = vmatmul.mubr.msk.bf16.gmra.mrb[96].mxu1 %vm537_vm6, %v11037_v42  ;;  %9675 = vmatmul.mubr.msk.bf16.gmra.mrb[96].mxu0 %vm537_vm6, %v11038_v47 }
 0x4da   : > { %3855 = vmatprep.mubr.bf16.mxu1 %v13322_v4  ;;  %7111 = vmatprep.mubr.bf16.mxu0 %v13322_v4 }
 0x4dc   : > { %v12927_v56 = vpop.f32.mrb[56].mxu1 }
 0x4dd   : > { %13338 = vst [vmem:[#allocation15_spill] sm:$0xff] %v12927_v56  ;;  %v12929_v5 = vpop.f32.mrb[57].mxu1 }
 0x4de   : > { %13339 = vst [vmem:[#allocation16_spill] sm:$0xff] %v12929_v5  ;;  %v12937_v30 = vpop.f32.mrb[58].mxu1  ;;  %v13321_v5 = vlaneseq }
 0x4df   : > { %13340 = vst [vmem:[#allocation17_spill] sm:$0xff] %v12937_v30  ;;  %v12939_v42 = vpop.f32.mrb[59].mxu1 }
 0x4e0   : > { %13341 = vst [vmem:[#allocation18_spill] sm:$0xff] %v12939_v42  ;;  %v11042_v42 = vld [vmem:[%s13317_s1 + $0x8d0] sm:$0xff]   ;;  %v12960_v30 = vshrl.u32 %v13321_v5, 7 }
 0x4e1   : > { %9164 = vmatmul.mubr.msk.bf16.gmra.mrb[100].mxu1 %vm537_vm6, %v11039_v12  ;;  %9676 = vmatmul.mubr.msk.bf16.gmra.mrb[100].mxu0 %vm537_vm6, %v11040_v27 }
 0x4e2   : > { %3865 = vmatprep.mubr.bf16.mxu1 %v13322_v4  ;;  %7121 = vmatprep.mubr.bf16.mxu0 %v13322_v4  ;;  %13346 = vst [vmem:[#allocation23_spill] sm:$0xff] %v12960_v30  ;;  %v7954_v5 = vsub.s32 0, %v12960_v30 }
 0x4e4   : > { %v12945_v47 = vpop.f32.mrb[60].mxu1 }
 0x4e5   : > { %13342 = vst [vmem:[#allocation19_spill] sm:$0xff] %v12945_v47  ;;  %v12947_v56 = vpop.f32.mrb[61].mxu1  ;;  %v7958_v47 = vsub.s32 1, %v12960_v30 }
 0x4e6   : > { %13343 = vst [vmem:[#allocation20_spill] sm:$0xff] %v12947_v56  ;;  %v12955_v12 = vpop.f32.mrb[62].mxu1 }
 0x4e7   : > { %13344 = vst [vmem:[#allocation21_spill] sm:$0xff] %v12955_v12  ;;  %v12957_v27 = vpop.f32.mrb[63].mxu1 }
 0x4e8   : > { %13345 = vst [vmem:[#allocation22_spill] sm:$0xff] %v12957_v27  ;;  %v11043_v27 = vld [vmem:[%s13317_s1 + $0x4d8] sm:$0xff]  }
 0x4e9   : > { %9165 = vmatmul.mubr.msk.bf16.gmra.mrb[104].mxu1 %vm537_vm6, %v11041_v53  ;;  %9677 = vmatmul.mubr.msk.bf16.gmra.mrb[104].mxu0 %vm537_vm6, %v11042_v42  ;;  %v11044_v53 = vld [vmem:[%s13317_s1 + $0x8d8] sm:$0xff]   ;;  %v7950_v42 = vld [vmem:[%s13319_s3] sm:$0x3] }
 0x4ea   : > { %3875 = vmatprep.mubr.bf16.mxu1 %v13322_v4  ;;  %7131 = vmatprep.mubr.bf16.mxu0 %v13322_v4  ;;  %v7377_v4 = vpop.permute.xlu0 %7376  ;;  %v12981_v20 = vrot.slane %v7950_v42, %v7958_v47  ;;  %v12985_v30 = vrot.slane %v7950_v42, %v7954_v5  ;;  %v11045_v5 = vld [vmem:[%s13317_s1 + $0x4e0] sm:$0xff]  }
 0x4ec   : > { %v6863_v56 = vpop.f32.mrb[0].mxu0 }
 0x4ed   : > { %v9687_v48 = vadd.f32 %v6863_v56, %v12675_v54  ;;  %v6865_v41 = vpop.f32.mrb[1].mxu0 }
 0x4ee   : > { %v9688_v12 = vadd.f32 %v6865_v41, %v12677_v55  ;;  %v6867_v36 = vpop.f32.mrb[2].mxu0 }
 0x4ef   : > { %v7694_v54 = vadd.f32 %v9687_v48, %v7377_v4  ;;  %v9689_v56 = vadd.f32 %v6867_v36, %v12685_v58  ;;  %v6869_v35 = vpop.f32.mrb[3].mxu0  ;;  %v13347_v48 = vmov 0  }
 0x4f0   : > { %v7695_v26 = vadd.f32 %v9688_v12, %v7377_v4  ;;  %v9690_v21 = vadd.f32 %v6869_v35, %v12687_v59 }
 0x4f1   : > { %v7822_v13 = vmax.f32 %v7694_v54, 0.0  ;;  %v7696_v2 = vadd.f32 %v9689_v56, %v7382_v31  ;;  %9166 = vmatmul.mubr.msk.bf16.gmra.mrb[108].mxu1 %vm537_vm6, %v11043_v27  ;;  %9678 = vmatmul.mubr.msk.bf16.gmra.mrb[108].mxu0 %vm537_vm6, %v11044_v53 }
 0x4f2   : > { %v7823_v55 = vmax.f32 %v7695_v26, 0.0  ;;  %v7697_v41 = vadd.f32 %v9690_v21, %v7382_v31  ;;  %3885 = vmatprep.mubr.bf16.mxu1 %v13347_v48  ;;  %7141 = vmatprep.mubr.bf16.mxu0 %v13347_v48  ;;  %v11046_v21 = vld [vmem:[%s13317_s1 + $0x8e0] sm:$0xff]   ;;  %v7387_v31 = vpop.permute.xlu1 %7386 }
 0x4f3   : > { %v7824_v58 = vmax.f32 %v7696_v2, 0.0  ;;  %v7962_v26 = vmul.f32 %v12985_v30, %v7822_v13 }
 0x4f4   : > { %v7825_v4 = vmax.f32 %v7697_v41, 0.0  ;;  %v6873_v59 = vpop.f32.mrb[4].mxu0  ;;  %v7963_v35 = vmul.f32 %v12981_v20, %v7823_v55  ;;  %v7392_v41 = vpop.permute.xlu0 %7391 }
 0x4f5   : > { %v9691_v36 = vadd.f32 %v6873_v59, %v12693_v60  ;;  %v6875_v47 = vpop.f32.mrb[5].mxu0  ;;  %v7964_v55 = vmul.f32 %v12985_v30, %v7824_v58 }
 0x4f6   : > { %v9692_v2 = vadd.f32 %v6875_v47, %v12695_v14  ;;  %v6877_v12 = vpop.f32.mrb[6].mxu0  ;;  %v8091_v27 = vsel %vm8090_vm12, %v7963_v35, 0.0  ;;  %v7965_v53 = vmul.f32 %v12981_v20, %v7825_v4 }
 0x4f7   : > { %v7698_v60 = vadd.f32 %v9691_v36, %v7387_v31  ;;  %v9693_v42 = vadd.f32 %v6877_v12, %v12703_v63  ;;  %v6879_v54 = vpop.f32.mrb[7].mxu0  ;;  %v8092_v56 = vadd.f32 %v8091_v27, %v7962_v26 }
 0x4f8   : > { %v7699_v59 = vadd.f32 %v9692_v2, %v7387_v31  ;;  %v9694_v62 = vadd.f32 %v6879_v54, %v12705_v0  ;;  %v8095_v13 = vsel %vm8090_vm12, %v7965_v53, 0.0  ;;  %v7397_v2 = vpop.permute.xlu1 %7396 }
 0x4f9   : > { %v7826_v61 = vmax.f32 %v7698_v60, 0.0  ;;  %v7700_v14 = vadd.f32 %v9693_v42, %v7392_v41  ;;  %9167 = vmatmul.mubr.msk.bf16.gmra.mrb[112].mxu1 %vm537_vm6, %v11045_v5  ;;  %9679 = vmatmul.mubr.msk.bf16.gmra.mrb[112].mxu0 %vm537_vm6, %v11046_v21  ;;  %v8096_v4 = vadd.f32 %v8095_v13, %v7964_v55  ;;  %v11047_v5 = vld [vmem:[%s13317_s1 + $0x4e8] sm:$0xff]  }
 0x4fa   : > { %v7827_v35 = vmax.f32 %v7699_v59, 0.0  ;;  %v7701_v36 = vadd.f32 %v9694_v62, %v7392_v41  ;;  %8093 = vadd.xlane.f32.xlu1 %v8092_v56  ;;  %3895 = vmatprep.mubr.bf16.mxu1 %v13347_v48  ;;  %v11048_v62 = vld [vmem:[%s13317_s1 + $0x8e8] sm:$0xff]   ;;  %v7402_v41 = vpop.permute.xlu0 %7401 }
 0x4fb   : > { %v7828_v63 = vmax.f32 %v7700_v14, 0.0  ;;  %8097 = vadd.xlane.f32.xlu0 %v8096_v4  ;;  %7151 = vmatprep.mubr.bf16.mxu0 %v13347_v48  ;;  %v7966_v21 = vmul.f32 %v12985_v30, %v7826_v61 }
 0x4fc   : > { %v7829_v58 = vmax.f32 %v7701_v36, 0.0  ;;  %v6883_v0 = vpop.f32.mrb[8].mxu0  ;;  %v7967_v47 = vmul.f32 %v12981_v20, %v7827_v35 }
 0x4fd   : > { %v9695_v26 = vadd.f32 %v6883_v0, %v12711_v19  ;;  %v6885_v31 = vpop.f32.mrb[9].mxu0  ;;  %v7968_v55 = vmul.f32 %v12985_v30, %v7828_v63 }
 0x4fe   : > { %v9696_v12 = vadd.f32 %v6885_v31, %v12713_v1  ;;  %v6887_v27 = vpop.f32.mrb[10].mxu0  ;;  %v8099_v53 = vsel %vm8090_vm12, %v7967_v47, 0.0  ;;  %v7969_v60 = vmul.f32 %v12981_v20, %v7829_v58  ;;  %v11050_v31 = vld [vmem:[%s13317_s1 + $0x8f0] sm:$0xff]  }
 0x4ff   : > { %v7702_v19 = vadd.f32 %v9695_v26, %v7397_v2  ;;  %v9697_v42 = vadd.f32 %v6887_v27, %v12721_v7  ;;  %v6889_v54 = vpop.f32.mrb[11].mxu0  ;;  %v8100_v56 = vadd.f32 %v8099_v53, %v7966_v21  ;;  %v11049_v26 = vld [vmem:[%s13317_s1 + $0x4f0] sm:$0xff]  }
 0x500   : > { %v7703_v59 = vadd.f32 %v9696_v12, %v7397_v2  ;;  %v9698_v13 = vadd.f32 %v6889_v54, %v12723_v8  ;;  %v8103_v61 = vsel %vm8090_vm12, %v7969_v60, 0.0  ;;  %v7412_v54 = vpop.permute.xlu0 %7411 }
 0x501   : > { %v7830_v14 = vmax.f32 %v7702_v19, 0.0  ;;  %v7704_v1 = vadd.f32 %v9697_v42, %v7402_v41  ;;  %9168 = vmatmul.mubr.msk.bf16.gmra.mrb[116].mxu1 %vm537_vm6, %v11047_v5  ;;  %9680 = vmatmul.mubr.msk.bf16.gmra.mrb[116].mxu0 %vm537_vm6, %v11048_v62  ;;  %v8104_v4 = vadd.f32 %v8103_v61, %v7968_v55  ;;  %v7407_v62 = vpop.permute.xlu1 %7406 }
 0x502   : > { %v7831_v35 = vmax.f32 %v7703_v59, 0.0  ;;  %v7705_v36 = vadd.f32 %v9698_v13, %v7402_v41  ;;  %8101 = vadd.xlane.f32.xlu0 %v8100_v56  ;;  %3905 = vmatprep.mubr.bf16.mxu1 %v13347_v48 }
 0x503   : > { %v7832_v7 = vmax.f32 %v7704_v1, 0.0  ;;  %8105 = vadd.xlane.f32.xlu1 %v8104_v4  ;;  %7161 = vmatprep.mubr.bf16.mxu0 %v13347_v48  ;;  %v7970_v5 = vmul.f32 %v12985_v30, %v7830_v14 }
 0x504   : > { %v7833_v63 = vmax.f32 %v7705_v36, 0.0  ;;  %v6893_v8 = vpop.f32.mrb[12].mxu0  ;;  %v7971_v58 = vmul.f32 %v12981_v20, %v7831_v35 }
 0x505   : > { %v9699_v0 = vadd.f32 %v6893_v8, %v12729_v10  ;;  %v6895_v47 = vpop.f32.mrb[13].mxu0  ;;  %v7972_v42 = vmul.f32 %v12985_v30, %v7832_v7  ;;  %v11051_v7 = vld [vmem:[%s13317_s1 + $0x4f8] sm:$0xff]  }
 0x506   : > { %v9700_v21 = vadd.f32 %v6895_v47, %v12731_v11  ;;  %v6897_v2 = vpop.f32.mrb[14].mxu0  ;;  %v8107_v12 = vsel %vm8090_vm12, %v7971_v58, 0.0  ;;  %v7973_v27 = vmul.f32 %v12981_v20, %v7833_v63  ;;  %v11052_v63 = vld [vmem:[%s13317_s1 + $0x8f8] sm:$0xff]   ;;  %v7417_v58 = vpop.permute.xlu1 %7416 }
 0x507   : > { %v7706_v10 = vadd.f32 %v9699_v0, %v7407_v62  ;;  %v9701_v53 = vadd.f32 %v6897_v2, %v12739_v15  ;;  %v6899_v60 = vpop.f32.mrb[15].mxu0  ;;  %v8108_v19 = vadd.f32 %v8107_v12, %v7970_v5  ;;  %v7422_v2 = vpop.permute.xlu0 %7421 }
 0x508   : > { %v7707_v56 = vadd.f32 %v9700_v21, %v7407_v62  ;;  %v9702_v55 = vadd.f32 %v6899_v60, %v12741_v16  ;;  %v8111_v41 = vsel %vm8090_vm12, %v7973_v27, 0.0 }
 0x509   : > { %v7834_v59 = vmax.f32 %v7706_v10, 0.0  ;;  %v7708_v11 = vadd.f32 %v9701_v53, %v7412_v54  ;;  %9169 = vmatmul.mubr.msk.bf16.gmra.mrb[120].mxu1 %vm537_vm6, %v11049_v26  ;;  %9681 = vmatmul.mubr.msk.bf16.gmra.mrb[120].mxu0 %vm537_vm6, %v11050_v31  ;;  %v8112_v13 = vadd.f32 %v8111_v41, %v7972_v42 }
 0x50a   : > { %v7835_v61 = vmax.f32 %v7707_v56, 0.0  ;;  %v7709_v14 = vadd.f32 %v9702_v55, %v7412_v54  ;;  %8109 = vadd.xlane.f32.xlu0 %v8108_v19  ;;  %3915 = vmatprep.mubr.bf16.mxu1 %v13347_v48 }
 0x50b   : > { %v7836_v15 = vmax.f32 %v7708_v11, 0.0  ;;  %8113 = vadd.xlane.f32.xlu1 %v8112_v13  ;;  %7171 = vmatprep.mubr.bf16.mxu0 %v13347_v48  ;;  %v7974_v8 = vmul.f32 %v12985_v30, %v7834_v59  ;;  %v7427_v11 = vpop.permute.xlu1 %7426 }
 0x50c   : > { %v7837_v1 = vmax.f32 %v7709_v14, 0.0  ;;  %v6903_v16 = vpop.f32.mrb[16].mxu0  ;;  %v7975_v4 = vmul.f32 %v12981_v20, %v7835_v61 }
 0x50d   : > { %v9703_v35 = vadd.f32 %v6903_v16, %v12747_v17  ;;  %v6905_v36 = vpop.f32.mrb[17].mxu0  ;;  %v7976_v21 = vmul.f32 %v12985_v30, %v7836_v15 }
 0x50e   : > { %v9704_v48 = vadd.f32 %v6905_v36, %v12749_v18  ;;  %v6907_v0 = vpop.f32.mrb[18].mxu0  ;;  %v8115_v47 = vsel %vm8090_vm12, %v7975_v4, 0.0  ;;  %v7977_v26 = vmul.f32 %v12981_v20, %v7837_v1 }
 0x50f   : > { %v7710_v17 = vadd.f32 %v9703_v35, %v7417_v58  ;;  %v9705_v31 = vadd.f32 %v6907_v0, %v12757_v22  ;;  %v6909_v5 = vpop.f32.mrb[19].mxu0  ;;  %v8116_v62 = vadd.f32 %v8115_v47, %v7974_v8 }
 0x510   : > { %v7711_v12 = vadd.f32 %v9704_v48, %v7417_v58  ;;  %v9706_v27 = vadd.f32 %v6909_v5, %v12759_v23  ;;  %v8119_v10 = vsel %vm8090_vm12, %v7977_v26, 0.0 }
 0x511   : > { %v7838_v53 = vmax.f32 %v7710_v17, 0.0  ;;  %v7712_v18 = vadd.f32 %v9705_v31, %v7422_v2  ;;  %9170 = vmatmul.mubr.msk.bf16.gmra.mrb[124].mxu1 %vm537_vm6, %v11051_v7  ;;  %9682 = vmatmul.mubr.msk.bf16.gmra.mrb[124].mxu0 %vm537_vm6, %v11052_v63  ;;  %v8120_v60 = vadd.f32 %v8119_v10, %v7976_v21  ;;  %v7432_v7 = vpop.permute.xlu0 %7431 }
 0x512   : > { %v7839_v19 = vmax.f32 %v7711_v12, 0.0  ;;  %v7713_v42 = vadd.f32 %v9706_v27, %v7422_v2  ;;  %8117 = vadd.xlane.f32.xlu0 %v8116_v62 }
 0x513   : > { %v7840_v22 = vmax.f32 %v7712_v18, 0.0  ;;  %8121 = vadd.xlane.f32.xlu1 %v8120_v60  ;;  %v7978_v59 = vmul.f32 %v12985_v30, %v7838_v53 }
 0x514   : > { %v7841_v54 = vmax.f32 %v7713_v42, 0.0  ;;  %v6913_v56 = vpop.f32.mrb[20].mxu0  ;;  %v7979_v55 = vmul.f32 %v12981_v20, %v7839_v19 }
 0x515   : > { %v9707_v23 = vadd.f32 %v6913_v56, %v12765_v24  ;;  %v6915_v41 = vpop.f32.mrb[21].mxu0  ;;  %v7980_v36 = vmul.f32 %v12985_v30, %v7840_v22  ;;  %v7442_v22 = vpop.permute.xlu0 %7441 }
 0x516   : > { %v9708_v13 = vadd.f32 %v6915_v41, %v12767_v25  ;;  %v6917_v61 = vpop.f32.mrb[22].mxu0  ;;  %v8123_v14 = vsel %vm8090_vm12, %v7979_v55, 0.0  ;;  %v7981_v15 = vmul.f32 %v12981_v20, %v7841_v54 }
 0x517   : > { %v7714_v1 = vadd.f32 %v9707_v23, %v7427_v11  ;;  %v9709_v16 = vadd.f32 %v6917_v61, %v12775_v3  ;;  %v6919_v4 = vpop.f32.mrb[23].mxu0  ;;  %v8124_v35 = vadd.f32 %v8123_v14, %v7978_v59 }
 0x518   : > { %v7715_v24 = vadd.f32 %v9708_v13, %v7427_v11  ;;  %v9710_v63 = vadd.f32 %v6919_v4, %v12777_v6  ;;  %v8127_v8 = vsel %vm8090_vm12, %v7981_v15, 0.0  ;;  %v7437_v6 = vpop.permute.xlu1 %7436 }
 0x519   : > { %v7842_v58 = vmax.f32 %v7714_v1, 0.0  ;;  %v7716_v25 = vadd.f32 %v9709_v16, %v7432_v7  ;;  %8125 = vadd.xlane.f32.xlu0 %v8124_v35  ;;  %v8128_v48 = vadd.f32 %v8127_v8, %v7980_v36 }
 0x51a   : > { %v7843_v0 = vmax.f32 %v7715_v24, 0.0  ;;  %v7717_v47 = vadd.f32 %v9710_v63, %v7432_v7 }
 0x51b   : > { %v7844_v26 = vmax.f32 %v7716_v25, 0.0  ;;  %8129 = vadd.xlane.f32.xlu1 %v8128_v48  ;;  %v7982_v21 = vmul.f32 %v12985_v30, %v7842_v58  ;;  %v7452_v25 = vpop.permute.xlu0 %7451 }
 0x51c   : > { %v7845_v17 = vmax.f32 %v7717_v47, 0.0  ;;  %v6923_v3 = vpop.f32.mrb[24].mxu0  ;;  %v7983_v31 = vmul.f32 %v12981_v20, %v7843_v0 }
 0x51d   : > { %v9711_v5 = vadd.f32 %v6923_v3, %v12783_v28  ;;  %v6925_v62 = vpop.f32.mrb[25].mxu0  ;;  %v7984_v42 = vmul.f32 %v12985_v30, %v7844_v26 }
 0x51e   : > { %v9712_v2 = vadd.f32 %v6925_v62, %v12785_v29  ;;  %v6927_v12 = vpop.f32.mrb[26].mxu0  ;;  %v8131_v27 = vsel %vm8090_vm12, %v7983_v31, 0.0  ;;  %v7985_v10 = vmul.f32 %v12981_v20, %v7845_v17 }
 0x51f   : > { %v7718_v53 = vadd.f32 %v9711_v5, %v7437_v6  ;;  %v9713_v18 = vadd.f32 %v6927_v12, %v12793_v32  ;;  %v6929_v60 = vpop.f32.mrb[27].mxu0  ;;  %v8132_v19 = vadd.f32 %v8131_v27, %v7982_v21 }
 0x520   : > { %v7719_v28 = vadd.f32 %v9712_v2, %v7437_v6  ;;  %v9714_v54 = vadd.f32 %v6929_v60, %v12795_v33  ;;  %v8135_v56 = vsel %vm8090_vm12, %v7985_v10, 0.0  ;;  %v7447_v33 = vpop.permute.xlu1 %7446 }
 0x521   : > { %v7846_v55 = vmax.f32 %v7718_v53, 0.0  ;;  %v7720_v29 = vadd.f32 %v9713_v18, %v7442_v22  ;;  %8133 = vadd.xlane.f32.xlu0 %v8132_v19  ;;  %v8136_v23 = vadd.f32 %v8135_v56, %v7984_v42 }
 0x522   : > { %v7847_v41 = vmax.f32 %v7719_v28, 0.0  ;;  %v7721_v59 = vadd.f32 %v9714_v54, %v7442_v22  ;;  %v7462_v28 = vpop.permute.xlu0 %7461 }
 0x523   : > { %v7848_v11 = vmax.f32 %v7720_v29, 0.0  ;;  %8137 = vadd.xlane.f32.xlu1 %v8136_v23  ;;  %v7986_v1 = vmul.f32 %v12985_v30, %v7846_v55 }
 0x524   : > { %v7849_v13 = vmax.f32 %v7721_v59, 0.0  ;;  %v6933_v32 = vpop.f32.mrb[28].mxu0  ;;  %v7987_v61 = vmul.f32 %v12981_v20, %v7847_v41 }
 0x525   : > { %v9715_v14 = vadd.f32 %v6933_v32, %v12801_v34  ;;  %v6935_v15 = vpop.f32.mrb[29].mxu0  ;;  %v7988_v58 = vmul.f32 %v12985_v30, %v7848_v11 }
 0x526   : > { %v9716_v16 = vadd.f32 %v6935_v15, %v12803_v9  ;;  %v6937_v4 = vpop.f32.mrb[30].mxu0  ;;  %v8139_v35 = vsel %vm8090_vm12, %v7987_v61, 0.0  ;;  %v7989_v36 = vmul.f32 %v12981_v20, %v7849_v13 }
 0x527   : > { %v7722_v7 = vadd.f32 %v9715_v14, %v7447_v33  ;;  %v9717_v24 = vadd.f32 %v6937_v4, %v12811_v37  ;;  %v6939_v63 = vpop.f32.mrb[31].mxu0  ;;  %v8140_v8 = vadd.f32 %v8139_v35, %v7986_v1 }
 0x528   : > { %v7723_v34 = vadd.f32 %v9716_v16, %v7447_v33  ;;  %v9718_v48 = vadd.f32 %v6939_v63, %v12813_v38  ;;  %v8143_v0 = vsel %vm8090_vm12, %v7989_v36, 0.0  ;;  %v7457_v38 = vpop.permute.xlu1 %7456  ;;  %v7472_v63 = vpop.permute.xlu0 %7471 }
 0x529   : > { %v7850_v47 = vmax.f32 %v7722_v7, 0.0  ;;  %v7724_v9 = vadd.f32 %v9717_v24, %v7452_v25  ;;  %8141 = vadd.xlane.f32.xlu0 %v8140_v8  ;;  %v8144_v26 = vadd.f32 %v8143_v0, %v7988_v58 }
 0x52a   : > { %v7851_v17 = vmax.f32 %v7723_v34, 0.0  ;;  %v7725_v3 = vadd.f32 %v9718_v48, %v7452_v25 }
 0x52b   : > { %v7852_v31 = vmax.f32 %v7724_v9, 0.0  ;;  %8145 = vadd.xlane.f32.xlu1 %v8144_v26  ;;  %v7990_v2 = vmul.f32 %v12985_v30, %v7850_v47 }
 0x52c   : > { %v7853_v5 = vmax.f32 %v7725_v3, 0.0  ;;  %v6943_v37 = vpop.f32.mrb[32].mxu0  ;;  %v7991_v62 = vmul.f32 %v12981_v20, %v7851_v17 }
 0x52d   : > { %v9719_v21 = vadd.f32 %v6943_v37, %v12819_v39  ;;  %v6945_v6 = vpop.f32.mrb[33].mxu0  ;;  %v7992_v22 = vmul.f32 %v12985_v30, %v7852_v31 }
 0x52e   : > { %v9720_v12 = vadd.f32 %v6945_v6, %v12821_v40  ;;  %v6947_v27 = vpop.f32.mrb[34].mxu0  ;;  %v8147_v10 = vsel %vm8090_vm12, %v7991_v62, 0.0  ;;  %v7993_v53 = vmul.f32 %v12981_v20, %v7853_v5 }
 0x52f   : > { %v7726_v18 = vadd.f32 %v9719_v21, %v7457_v38  ;;  %v9721_v60 = vadd.f32 %v6947_v27, %v12829_v43  ;;  %v6949_v19 = vpop.f32.mrb[35].mxu0  ;;  %v8148_v42 = vadd.f32 %v8147_v10, %v7990_v2  ;;  %v7482_v10 = vpop.permute.xlu0 %7481 }
 0x530   : > { %v7727_v39 = vadd.f32 %v9720_v12, %v7457_v38  ;;  %v9722_v54 = vadd.f32 %v6949_v19, %v12831_v44  ;;  %v8151_v56 = vsel %vm8090_vm12, %v7993_v53, 0.0  ;;  %v7467_v44 = vpop.permute.xlu1 %7466 }
 0x531   : > { %v7854_v55 = vmax.f32 %v7726_v18, 0.0  ;;  %v7728_v40 = vadd.f32 %v9721_v60, %v7462_v28  ;;  %8149 = vadd.xlane.f32.xlu0 %v8148_v42  ;;  %v8152_v29 = vadd.f32 %v8151_v56, %v7992_v22  ;;  %v13348_v18 = vld [vmem:[#allocation2_spill] sm:$0xff] }
 0x532   : > { %v7855_v23 = vmax.f32 %v7727_v39, 0.0  ;;  %v7729_v41 = vadd.f32 %v9722_v54, %v7462_v28 }
 0x533   : > { %v7856_v59 = vmax.f32 %v7728_v40, 0.0  ;;  %8153 = vadd.xlane.f32.xlu1 %v8152_v29  ;;  %v7994_v14 = vmul.f32 %v12985_v30, %v7854_v55  ;;  %v13349_v40 = vld [vmem:[#allocation3_spill] sm:$0xff] }
 0x534   : > { %v7857_v11 = vmax.f32 %v7729_v41, 0.0  ;;  %v6953_v43 = vpop.f32.mrb[36].mxu0  ;;  %v7995_v13 = vmul.f32 %v12981_v20, %v7855_v23 }
 0x535   : > { %v9723_v32 = vadd.f32 %v6953_v43, %v12837_v45  ;;  %v6955_v61 = vpop.f32.mrb[37].mxu0  ;;  %v7996_v24 = vmul.f32 %v12985_v30, %v7856_v59 }
 0x536   : > { %v9724_v15 = vadd.f32 %v6955_v61, %v12839_v46  ;;  %v6957_v1 = vpop.f32.mrb[38].mxu0  ;;  %v8155_v33 = vsel %vm8090_vm12, %v7995_v13, 0.0  ;;  %v7997_v16 = vmul.f32 %v12981_v20, %v7857_v11  ;;  %v13350_v11 = vld [vmem:[#allocation4_spill] sm:$0xff] }
 0x537   : > { %v7730_v4 = vadd.f32 %v9723_v32, %v7467_v44  ;;  %v9725_v35 = vadd.f32 %v6957_v1, %v12847_v49  ;;  %v6959_v36 = vpop.f32.mrb[39].mxu0  ;;  %v8156_v7 = vadd.f32 %v8155_v33, %v7994_v14 }
 0x538   : > { %v7731_v45 = vadd.f32 %v9724_v15, %v7467_v44  ;;  %v9726_v8 = vadd.f32 %v6959_v36, %v12849_v50  ;;  %v8159_v58 = vsel %vm8090_vm12, %v7997_v16, 0.0  ;;  %v7477_v50 = vpop.permute.xlu1 %7476  ;;  %v13351_v44 = vld [vmem:[#allocation5_spill] sm:$0xff]  ;;  %v7492_v16 = vpop.permute.xlu0 %7491 }
 0x539   : > { %v7858_v25 = vmax.f32 %v7730_v4, 0.0  ;;  %v7732_v46 = vadd.f32 %v9725_v35, %v7472_v63  ;;  %8157 = vadd.xlane.f32.xlu0 %v8156_v7  ;;  %v8160_v34 = vadd.f32 %v8159_v58, %v7996_v24  ;;  %v13352_v35 = vld [vmem:[#allocation6_spill] sm:$0xff] }
 0x53a   : > { %v7859_v48 = vmax.f32 %v7731_v45, 0.0  ;;  %v7733_v0 = vadd.f32 %v9726_v8, %v7472_v63 }
 0x53b   : > { %v7860_v47 = vmax.f32 %v7732_v46, 0.0  ;;  %8161 = vadd.xlane.f32.xlu1 %v8160_v34  ;;  %v7998_v17 = vmul.f32 %v12985_v30, %v7858_v25 }
 0x53c   : > { %v7999_v49 = vmul.f32 %v12981_v20, %v7859_v48  ;;  %v7861_v9 = vmax.f32 %v7733_v0, 0.0  ;;  %v6963_v26 = vpop.f32.mrb[40].mxu0  ;;  %v7487_v41 = vpop.permute.xlu1 %7486 }
 0x53d   : > { %v9727_v3 = vadd.f32 %v6963_v26, %v12855_v51  ;;  %v6965_v31 = vpop.f32.mrb[41].mxu0  ;;  %v8000_v6 = vmul.f32 %v12985_v30, %v7860_v47  ;;  %v13353_v47 = vld [vmem:[#allocation7_spill] sm:$0xff] }
 0x53e   : > { %v8001_v5 = vmul.f32 %v12981_v20, %v7861_v9  ;;  %v9728_v37 = vadd.f32 %v6965_v31, %v12857_v52  ;;  %v6967_v62 = vpop.f32.mrb[42].mxu0  ;;  %v8163_v21 = vsel %vm8090_vm12, %v7999_v49, 0.0 }
 0x53f   : > { %v7734_v2 = vadd.f32 %v9727_v3, %v7477_v50  ;;  %v9729_v38 = vadd.f32 %v6967_v62, %v12865_v57  ;;  %v6969_v12 = vpop.f32.mrb[43].mxu0  ;;  %v8164_v27 = vadd.f32 %v8163_v21, %v7998_v17  ;;  %v13354_v3 = vld [vmem:[#allocation8_spill] sm:$0xff]  ;;  %v13355_v21 = vld [vmem:[#allocation9_spill] sm:$0xff] }
 0x540   : > { %v7735_v53 = vadd.f32 %v9728_v37, %v7477_v50  ;;  %v9730_v51 = vadd.f32 %v6969_v12, %v13348_v18  ;;  %v8167_v60 = vsel %vm8090_vm12, %v8001_v5, 0.0  ;;  %v7497_v26 = vpop.permute.xlu1 %7496  ;;  %v7502_v12 = vpop.permute.xlu0 %7501 }
 0x541   : > { %v7862_v19 = vmax.f32 %v7734_v2, 0.0  ;;  %v7736_v42 = vadd.f32 %v9729_v38, %v7482_v10  ;;  %8165 = vadd.xlane.f32.xlu0 %v8164_v27  ;;  %v8168_v52 = vadd.f32 %v8167_v60, %v8000_v6 }
 0x542   : > { %v7863_v22 = vmax.f32 %v7735_v53, 0.0  ;;  %v7737_v28 = vadd.f32 %v9730_v51, %v7482_v10  ;;  %v13356_v10 = vld [vmem:[#allocation10_spill] sm:$0xff] }
 0x543   : > { %v7864_v39 = vmax.f32 %v7736_v42, 0.0  ;;  %8169 = vadd.xlane.f32.xlu1 %v8168_v52  ;;  %v8002_v55 = vmul.f32 %v12985_v30, %v7862_v19 }
 0x544   : > { %v8003_v54 = vmul.f32 %v12981_v20, %v7863_v22  ;;  %v7865_v56 = vmax.f32 %v7737_v28, 0.0  ;;  %v6973_v57 = vpop.f32.mrb[44].mxu0 }
 0x545   : > { %v9731_v29 = vadd.f32 %v6973_v57, %v13349_v40  ;;  %v6975_v23 = vpop.f32.mrb[45].mxu0  ;;  %v8004_v61 = vmul.f32 %v12985_v30, %v7864_v39  ;;  %v13357_v57 = vld [vmem:[#allocation11_spill] sm:$0xff] }
 0x546   : > { %v8005_v59 = vmul.f32 %v12981_v20, %v7865_v56  ;;  %v9732_v43 = vadd.f32 %v6975_v23, %v13350_v11  ;;  %v6977_v13 = vpop.f32.mrb[46].mxu0  ;;  %v8171_v32 = vsel %vm8090_vm12, %v8003_v54, 0.0 }
 0x547   : > { %v7738_v14 = vadd.f32 %v9731_v29, %v7487_v41  ;;  %v9733_v15 = vadd.f32 %v6977_v13, %v13351_v44  ;;  %v6979_v1 = vpop.f32.mrb[47].mxu0  ;;  %v8172_v33 = vadd.f32 %v8171_v32, %v8002_v55  ;;  %v7507_v29 = vpop.permute.xlu1 %7506 }
 0x548   : > { %v7739_v4 = vadd.f32 %v9732_v43, %v7487_v41  ;;  %v9734_v36 = vadd.f32 %v6979_v1, %v13352_v35  ;;  %v8175_v7 = vsel %vm8090_vm12, %v8005_v59, 0.0  ;;  %v13358_v41 = vld [vmem:[#allocation12_spill] sm:$0xff]  ;;  %v7512_v1 = vpop.permute.xlu0 %7511 }
 0x549   : > { %v7866_v24 = vmax.f32 %v7738_v14, 0.0  ;;  %v7740_v63 = vadd.f32 %v9733_v15, %v7492_v16  ;;  %8173 = vadd.xlane.f32.xlu0 %v8172_v33  ;;  %v8176_v45 = vadd.f32 %v8175_v7, %v8004_v61  ;;  %v13359_v61 = vld [vmem:[#allocation13_spill] sm:$0xff] }
 0x54a   : > { %v7867_v8 = vmax.f32 %v7739_v4, 0.0  ;;  %v7741_v58 = vadd.f32 %v9734_v36, %v7492_v16  ;;  %v13360_v16 = vld [vmem:[#allocation14_spill] sm:$0xff] }
 0x54b   : > { %v7868_v25 = vmax.f32 %v7740_v63, 0.0  ;;  %8177 = vadd.xlane.f32.xlu1 %v8176_v45  ;;  %v8006_v0 = vmul.f32 %v12985_v30, %v7866_v24 }
 0x54c   : > { %v8007_v46 = vmul.f32 %v12981_v20, %v7867_v8  ;;  %v7869_v34 = vmax.f32 %v7741_v58, 0.0  ;;  %v6983_v48 = vpop.f32.mrb[48].mxu0 }
 0x54d   : > { %v9735_v49 = vadd.f32 %v6983_v48, %v13353_v47  ;;  %v6985_v9 = vpop.f32.mrb[49].mxu0  ;;  %v8008_v37 = vmul.f32 %v12985_v30, %v7868_v25  ;;  %v13361_v48 = vld [vmem:[#allocation15_spill] sm:$0xff] }
 0x54e   : > { %v8009_v17 = vmul.f32 %v12981_v20, %v7869_v34  ;;  %v9736_v31 = vadd.f32 %v6985_v9, %v13354_v3  ;;  %v6987_v50 = vpop.f32.mrb[50].mxu0  ;;  %v8179_v5 = vsel %vm8090_vm12, %v8007_v46, 0.0 }
 0x54f   : > { %v7742_v62 = vadd.f32 %v9735_v49, %v7497_v26  ;;  %v9737_v6 = vadd.f32 %v6987_v50, %v13355_v21  ;;  %v6989_v2 = vpop.f32.mrb[51].mxu0  ;;  %v8180_v38 = vadd.f32 %v8179_v5, %v8006_v0  ;;  %v7517_v49 = vpop.permute.xlu1 %7516 }
 0x550   : > { %v7743_v27 = vadd.f32 %v9736_v31, %v7497_v26  ;;  %v9738_v53 = vadd.f32 %v6989_v2, %v13356_v10  ;;  %v8183_v18 = vsel %vm8090_vm12, %v8009_v17, 0.0  ;;  %v13362_v26 = vld [vmem:[#allocation16_spill] sm:$0xff]  ;;  %v7522_v2 = vpop.permute.xlu0 %7521 }
 0x551   : > { %v7870_v51 = vmax.f32 %v7742_v62, 0.0  ;;  %v7744_v60 = vadd.f32 %v9737_v6, %v7502_v12  ;;  %8181 = vadd.xlane.f32.xlu0 %v8180_v38  ;;  %v8184_v19 = vadd.f32 %v8183_v18, %v8008_v37  ;;  %v13363_v37 = vld [vmem:[#allocation17_spill] sm:$0xff] }
 0x552   : > { %v7871_v42 = vmax.f32 %v7743_v27, 0.0  ;;  %v7745_v52 = vadd.f32 %v9738_v53, %v7502_v12  ;;  %v13364_v12 = vld [vmem:[#allocation18_spill] sm:$0xff] }
 0x553   : > { %v7872_v22 = vmax.f32 %v7744_v60, 0.0  ;;  %8185 = vadd.xlane.f32.xlu1 %v8184_v19  ;;  %v8010_v56 = vmul.f32 %v12985_v30, %v7870_v51 }
 0x554   : > { %v8011_v28 = vmul.f32 %v12981_v20, %v7871_v42  ;;  %v7873_v39 = vmax.f32 %v7745_v52, 0.0  ;;  %v6993_v54 = vpop.f32.mrb[52].mxu0 }
 0x555   : > { %v9739_v55 = vadd.f32 %v6993_v54, %v13357_v57  ;;  %v6995_v40 = vpop.f32.mrb[53].mxu0  ;;  %v8012_v13 = vmul.f32 %v12985_v30, %v7872_v22 }
 0x556   : > { %v8013_v23 = vmul.f32 %v12981_v20, %v7873_v39  ;;  %v9740_v59 = vadd.f32 %v6995_v40, %v13358_v41  ;;  %v6997_v11 = vpop.f32.mrb[54].mxu0  ;;  %v8187_v43 = vsel %vm8090_vm12, %v8011_v28, 0.0  ;;  %v7527_v39 = vpop.permute.xlu1 %7526 }
 0x557   : > { %v7746_v32 = vadd.f32 %v9739_v55, %v7507_v29  ;;  %v9741_v14 = vadd.f32 %v6997_v11, %v13359_v61  ;;  %v6999_v44 = vpop.f32.mrb[55].mxu0  ;;  %v8188_v15 = vadd.f32 %v8187_v43, %v8010_v56  ;;  %v13365_v56 = vld [vmem:[#allocation19_spill] sm:$0xff] }
 0x558   : > { %v7747_v33 = vadd.f32 %v9740_v59, %v7507_v29  ;;  %v9742_v4 = vadd.f32 %v6999_v44, %v13360_v16  ;;  %v8191_v35 = vsel %vm8090_vm12, %v8013_v23, 0.0  ;;  %v13366_v29 = vld [vmem:[#allocation20_spill] sm:$0xff]  ;;  %v7532_v44 = vpop.permute.xlu0 %7531 }
 0x559   : > { %v7874_v36 = vmax.f32 %v7746_v32, 0.0  ;;  %v7748_v7 = vadd.f32 %v9741_v14, %v7512_v1  ;;  %8189 = vadd.xlane.f32.xlu0 %v8188_v15  ;;  %v8192_v24 = vadd.f32 %v8191_v35, %v8012_v13  ;;  %v13367_v13 = vld [vmem:[#allocation21_spill] sm:$0xff] }
 0x55a   : > { %v7875_v63 = vmax.f32 %v7747_v33, 0.0  ;;  %v7749_v45 = vadd.f32 %v9742_v4, %v7512_v1  ;;  %v13368_v1 = vld [vmem:[#allocation22_spill] sm:$0xff] }
 0x55b   : > { %v7876_v8 = vmax.f32 %v7748_v7, 0.0  ;;  %8193 = vadd.xlane.f32.xlu1 %v8192_v24  ;;  %v8014_v34 = vmul.f32 %v12985_v30, %v7874_v36 }
 0x55c   : > { %v8015_v58 = vmul.f32 %v12981_v20, %v7875_v63  ;;  %v7877_v25 = vmax.f32 %v7749_v45, 0.0  ;;  %v7003_v46 = vpop.f32.mrb[56].mxu0  ;;  %v7537_v63 = vpop.permute.xlu1 %7536 }
 0x55d   : > { %v9743_v0 = vadd.f32 %v7003_v46, %v13361_v48  ;;  %v7005_v47 = vpop.f32.mrb[57].mxu0  ;;  %v8016_v50 = vmul.f32 %v12985_v30, %v7876_v8 }
 0x55e   : > { %v8017_v9 = vmul.f32 %v12981_v20, %v7877_v25  ;;  %v9744_v17 = vadd.f32 %v7005_v47, %v13362_v26  ;;  %v7007_v3 = vpop.f32.mrb[58].mxu0  ;;  %v8195_v31 = vsel %vm8090_vm12, %v8015_v58, 0.0 }
 0x55f   : > { %v7750_v5 = vadd.f32 %v9743_v0, %v7517_v49  ;;  %v9745_v62 = vadd.f32 %v7007_v3, %v13363_v37  ;;  %v7009_v21 = vpop.f32.mrb[59].mxu0  ;;  %v8196_v6 = vadd.f32 %v8195_v31, %v8014_v34 }
 0x560   : > { %v7751_v38 = vadd.f32 %v9744_v17, %v7517_v49  ;;  %v9746_v27 = vadd.f32 %v7009_v21, %v13364_v12  ;;  %v8199_v10 = vsel %vm8090_vm12, %v8017_v9, 0.0 }
 0x561   : > { %v7878_v53 = vmax.f32 %v7750_v5, 0.0  ;;  %v7752_v18 = vadd.f32 %v9745_v62, %v7522_v2  ;;  %8197 = vadd.xlane.f32.xlu0 %v8196_v6  ;;  %v8200_v51 = vadd.f32 %v8199_v10, %v8016_v50  ;;  %v7542_v6 = vpop.permute.xlu0 %7541 }
 0x562   : > { %v7879_v60 = vmax.f32 %v7751_v38, 0.0  ;;  %v7753_v19 = vadd.f32 %v9746_v27, %v7522_v2 }
 0x563   : > { %v7880_v42 = vmax.f32 %v7752_v18, 0.0  ;;  %8201 = vadd.xlane.f32.xlu1 %v8200_v51  ;;  %v8018_v54 = vmul.f32 %v12985_v30, %v7878_v53 }
 0x564   : > { %v8019_v52 = vmul.f32 %v12981_v20, %v7879_v60  ;;  %v7881_v22 = vmax.f32 %v7753_v19, 0.0  ;;  %v7013_v28 = vpop.f32.mrb[60].mxu0  ;;  %v7547_v60 = vpop.permute.xlu1 %7546 }
 0x565   : > { %v9747_v57 = vadd.f32 %v7013_v28, %v13365_v56  ;;  %v7015_v55 = vpop.f32.mrb[61].mxu0  ;;  %v8020_v11 = vmul.f32 %v12985_v30, %v7880_v42 }
 0x566   : > { %v8021_v40 = vmul.f32 %v12981_v20, %v7881_v22  ;;  %v9748_v23 = vadd.f32 %v7015_v55, %v13366_v29  ;;  %v7017_v41 = vpop.f32.mrb[62].mxu0  ;;  %v8203_v59 = vsel %vm8090_vm12, %v8019_v52, 0.0 }
 0x567   : > { %v7754_v43 = vadd.f32 %v9747_v57, %v7527_v39  ;;  %v9749_v32 = vadd.f32 %v7017_v41, %v13367_v13  ;;  %v7019_v61 = vpop.f32.mrb[63].mxu0  ;;  %v8204_v14 = vadd.f32 %v8203_v59, %v8018_v54 }
 0x568   : > { %v7755_v15 = vadd.f32 %v9748_v23, %v7527_v39  ;;  %v9750_v33 = vadd.f32 %v7019_v61, %v13368_v1  ;;  %v8207_v16 = vsel %vm8090_vm12, %v8021_v40, 0.0 }
 0x569   : > { %v7882_v4 = vmax.f32 %v7754_v43, 0.0  ;;  %v7756_v35 = vadd.f32 %v9749_v32, %v7532_v44  ;;  %8205 = vadd.xlane.f32.xlu0 %v8204_v14  ;;  %v8208_v36 = vadd.f32 %v8207_v16, %v8020_v11  ;;  %v7552_v14 = vpop.permute.xlu0 %7551 }
 0x56a   : > { %v7883_v7 = vmax.f32 %v7755_v15, 0.0  ;;  %v7757_v24 = vadd.f32 %v9750_v33, %v7532_v44 }
 0x56b   : > { %v7884_v45 = vmax.f32 %v7756_v35, 0.0  ;;  %8209 = vadd.xlane.f32.xlu1 %v8208_v36  ;;  %v8022_v34 = vmul.f32 %v12985_v30, %v7882_v4 }
 0x56c   : > { %v8023_v8 = vmul.f32 %v12981_v20, %v7883_v7  ;;  %v7885_v58 = vmax.f32 %v7757_v24, 0.0  ;;  %v3767_v25 = vpop.f32.mrb[64].mxu1  ;;  %v7023_v46 = vpop.f32.mrb[64].mxu0 }
 0x56d   : > { %v9751_v48 = vadd.f32 %v7023_v46, %v3767_v25  ;;  %v3769_v0 = vpop.f32.mrb[65].mxu1  ;;  %v7025_v47 = vpop.f32.mrb[65].mxu0  ;;  %v8024_v31 = vmul.f32 %v12985_v30, %v7884_v45 }
 0x56e   : > { %v8025_v49 = vmul.f32 %v12981_v20, %v7885_v58  ;;  %v9752_v9 = vadd.f32 %v7025_v47, %v3769_v0  ;;  %v3771_v26 = vpop.f32.mrb[66].mxu1  ;;  %v7027_v17 = vpop.f32.mrb[66].mxu0  ;;  %v8211_v3 = vsel %vm8090_vm12, %v8023_v8, 0.0 }
 0x56f   : > { %v7758_v50 = vadd.f32 %v9751_v48, %v7537_v63  ;;  %v9753_v5 = vadd.f32 %v7027_v17, %v3771_v26  ;;  %v3773_v37 = vpop.f32.mrb[67].mxu1  ;;  %v7029_v62 = vpop.f32.mrb[67].mxu0  ;;  %v8212_v21 = vadd.f32 %v8211_v3, %v8022_v34 }
 0x570   : > { %v7759_v2 = vadd.f32 %v9752_v9, %v7537_v63  ;;  %v9754_v38 = vadd.f32 %v7029_v62, %v3773_v37  ;;  %v8215_v12 = vsel %vm8090_vm12, %v8025_v49, 0.0  ;;  %v7557_v7 = vpop.permute.xlu1 %7556  ;;  %v7562_v62 = vpop.permute.xlu0 %7561 }
 0x571   : > { %v7886_v27 = vmax.f32 %v7758_v50, 0.0  ;;  %v7760_v10 = vadd.f32 %v9753_v5, %v7542_v6  ;;  %8213 = vadd.xlane.f32.xlu0 %v8212_v21  ;;  %v8216_v53 = vadd.f32 %v8215_v12, %v8024_v31 }
 0x572   : > { %v7887_v18 = vmax.f32 %v7759_v2, 0.0  ;;  %v7761_v51 = vadd.f32 %v9754_v38, %v7542_v6 }
 0x573   : > { %v7888_v19 = vmax.f32 %v7760_v10, 0.0  ;;  %8217 = vadd.xlane.f32.xlu1 %v8216_v53  ;;  %v8026_v39 = vmul.f32 %v12985_v30, %v7886_v27 }
 0x574   : > { %v8027_v42 = vmul.f32 %v12981_v20, %v7887_v18  ;;  %v7889_v52 = vmax.f32 %v7761_v51, 0.0  ;;  %v3777_v22 = vpop.f32.mrb[68].mxu1  ;;  %v7033_v28 = vpop.f32.mrb[68].mxu0 }
 0x575   : > { %v9755_v54 = vadd.f32 %v7033_v28, %v3777_v22  ;;  %v3779_v56 = vpop.f32.mrb[69].mxu1  ;;  %v7035_v57 = vpop.f32.mrb[69].mxu0  ;;  %v8028_v59 = vmul.f32 %v12985_v30, %v7888_v19 }
 0x576   : > { %v8029_v55 = vmul.f32 %v12981_v20, %v7889_v52  ;;  %v9756_v40 = vadd.f32 %v7035_v57, %v3779_v56  ;;  %v3781_v29 = vpop.f32.mrb[70].mxu1  ;;  %v7037_v23 = vpop.f32.mrb[70].mxu0  ;;  %v8219_v41 = vsel %vm8090_vm12, %v8027_v42, 0.0 }
 0x577   : > { %v7762_v11 = vadd.f32 %v9755_v54, %v7547_v60  ;;  %v9757_v43 = vadd.f32 %v7037_v23, %v3781_v29  ;;  %v3783_v13 = vpop.f32.mrb[71].mxu1  ;;  %v7039_v32 = vpop.f32.mrb[71].mxu0  ;;  %v8220_v61 = vadd.f32 %v8219_v41, %v8026_v39 }
 0x578   : > { %v7763_v44 = vadd.f32 %v9756_v40, %v7547_v60  ;;  %v9758_v15 = vadd.f32 %v7039_v32, %v3783_v13  ;;  %v8223_v1 = vsel %vm8090_vm12, %v8029_v55, 0.0  ;;  %v7567_v18 = vpop.permute.xlu1 %7566  ;;  %v7572_v13 = vpop.permute.xlu0 %7571 }
 0x579   : > { %v7890_v33 = vmax.f32 %v7762_v11, 0.0  ;;  %v7764_v16 = vadd.f32 %v9757_v43, %v7552_v14  ;;  %8221 = vadd.xlane.f32.xlu0 %v8220_v61  ;;  %v8224_v4 = vadd.f32 %v8223_v1, %v8028_v59 }
 0x57a   : > { %v7891_v35 = vmax.f32 %v7763_v44, 0.0  ;;  %v7765_v36 = vadd.f32 %v9758_v15, %v7552_v14 }
 0x57b   : > { %v7892_v24 = vmax.f32 %v7764_v16, 0.0  ;;  %8225 = vadd.xlane.f32.xlu1 %v8224_v4  ;;  %v8030_v25 = vmul.f32 %v12985_v30, %v7890_v33 }
 0x57c   : > { %v8031_v63 = vmul.f32 %v12981_v20, %v7891_v35  ;;  %v7893_v45 = vmax.f32 %v7765_v36, 0.0  ;;  %v3787_v8 = vpop.f32.mrb[72].mxu1  ;;  %v7043_v58 = vpop.f32.mrb[72].mxu0 }
 0x57d   : > { %v9759_v46 = vadd.f32 %v7043_v58, %v3787_v8  ;;  %v3789_v34 = vpop.f32.mrb[73].mxu1  ;;  %v7045_v48 = vpop.f32.mrb[73].mxu0  ;;  %v8032_v17 = vmul.f32 %v12985_v30, %v7892_v24 }
 0x57e   : > { %v8033_v0 = vmul.f32 %v12981_v20, %v7893_v45  ;;  %v9760_v47 = vadd.f32 %v7045_v48, %v3789_v34  ;;  %v3791_v49 = vpop.f32.mrb[74].mxu1  ;;  %v7047_v9 = vpop.f32.mrb[74].mxu0  ;;  %v8227_v26 = vsel %vm8090_vm12, %v8031_v63, 0.0 }
 0x57f   : > { %v7766_v3 = vadd.f32 %v9759_v46, %v7557_v7  ;;  %v9761_v31 = vadd.f32 %v7047_v9, %v3791_v49  ;;  %v3793_v50 = vpop.f32.mrb[75].mxu1  ;;  %v7049_v5 = vpop.f32.mrb[75].mxu0  ;;  %v8228_v37 = vadd.f32 %v8227_v26, %v8030_v25 }
 0x580   : > { %v7767_v21 = vadd.f32 %v9760_v47, %v7557_v7  ;;  %v9762_v6 = vadd.f32 %v7049_v5, %v3793_v50  ;;  %v8231_v2 = vsel %vm8090_vm12, %v8033_v0, 0.0  ;;  %v7577_v4 = vpop.permute.xlu1 %7576 }
 0x581   : > { %v7894_v38 = vmax.f32 %v7766_v3, 0.0  ;;  %v7768_v12 = vadd.f32 %v9761_v31, %v7562_v62  ;;  %8229 = vadd.xlane.f32.xlu0 %v8228_v37  ;;  %v8232_v27 = vadd.f32 %v8231_v2, %v8032_v17  ;;  %v7582_v31 = vpop.permute.xlu0 %7581 }
 0x582   : > { %v7895_v10 = vmax.f32 %v7767_v21, 0.0  ;;  %v7769_v53 = vadd.f32 %v9762_v6, %v7562_v62 }
 0x583   : > { %v7896_v51 = vmax.f32 %v7768_v12, 0.0  ;;  %8233 = vadd.xlane.f32.xlu1 %v8232_v27  ;;  %v8034_v22 = vmul.f32 %v12985_v30, %v7894_v38 }
 0x584   : > { %v8035_v60 = vmul.f32 %v12981_v20, %v7895_v10  ;;  %v7897_v19 = vmax.f32 %v7769_v53, 0.0  ;;  %v3797_v42 = vpop.f32.mrb[76].mxu1  ;;  %v7053_v52 = vpop.f32.mrb[76].mxu0 }
 0x585   : > { %v9763_v28 = vadd.f32 %v7053_v52, %v3797_v42  ;;  %v3799_v39 = vpop.f32.mrb[77].mxu1  ;;  %v7055_v54 = vpop.f32.mrb[77].mxu0  ;;  %v8036_v23 = vmul.f32 %v12985_v30, %v7896_v51 }
 0x586   : > { %v8037_v56 = vmul.f32 %v12981_v20, %v7897_v19  ;;  %v9764_v57 = vadd.f32 %v7055_v54, %v3799_v39  ;;  %v7057_v55 = vpop.f32.mrb[78].mxu0  ;;  %v3801_v40 = vpop.f32.mrb[78].mxu1  ;;  %v8235_v29 = vsel %vm8090_vm12, %v8035_v60, 0.0 }
 0x587   : > { %v7770_v41 = vadd.f32 %v9763_v28, %v7567_v18  ;;  %v9765_v59 = vadd.f32 %v7057_v55, %v3801_v40  ;;  %v3803_v11 = vpop.f32.mrb[79].mxu1  ;;  %v8236_v43 = vadd.f32 %v8235_v29, %v8034_v22  ;;  %v7059_v61 = vpop.f32.mrb[79].mxu0 }
 0x588   : > { %v7771_v32 = vadd.f32 %v9764_v57, %v7567_v18  ;;  %v8239_v14 = vsel %vm8090_vm12, %v8037_v56, 0.0  ;;  %v9766_v1 = vadd.f32 %v7059_v61, %v3803_v11  ;;  %v7587_v27 = vpop.permute.xlu1 %7586 }
 0x589   : > { %v7898_v44 = vmax.f32 %v7770_v41, 0.0  ;;  %v7772_v15 = vadd.f32 %v9765_v59, %v7572_v13  ;;  %8237 = vadd.xlane.f32.xlu0 %v8236_v43  ;;  %v8240_v33 = vadd.f32 %v8239_v14, %v8036_v23  ;;  %v7592_v59 = vpop.permute.xlu0 %7591 }
 0x58a   : > { %v7899_v16 = vmax.f32 %v7771_v32, 0.0  ;;  %v7773_v35 = vadd.f32 %v9766_v1, %v7572_v13 }
 0x58b   : > { %8241 = vadd.xlane.f32.xlu1 %v8240_v33  ;;  %v7900_v7 = vmax.f32 %v7772_v15, 0.0  ;;  %v8038_v45 = vmul.f32 %v12985_v30, %v7898_v44 }
 0x58c   : > { %v8039_v36 = vmul.f32 %v12981_v20, %v7899_v16  ;;  %v3807_v24 = vpop.f32.mrb[80].mxu1  ;;  %v7063_v63 = vpop.f32.mrb[80].mxu0  ;;  %v7901_v8 = vmax.f32 %v7773_v35, 0.0 }
 0x58d   : > { %v9767_v58 = vadd.f32 %v7063_v63, %v3807_v24  ;;  %v3809_v25 = vpop.f32.mrb[81].mxu1  ;;  %v7065_v46 = vpop.f32.mrb[81].mxu0  ;;  %v8040_v50 = vmul.f32 %v12985_v30, %v7900_v7 }
 0x58e   : > { %v9768_v34 = vadd.f32 %v7065_v46, %v3809_v25  ;;  %v7067_v48 = vpop.f32.mrb[82].mxu0  ;;  %v3811_v0 = vpop.f32.mrb[82].mxu1  ;;  %v8243_v47 = vsel %vm8090_vm12, %v8039_v36, 0.0  ;;  %v8041_v49 = vmul.f32 %v12981_v20, %v7901_v8 }
 0x58f   : > { %v7774_v9 = vadd.f32 %v9767_v58, %v7577_v4  ;;  %v9769_v26 = vadd.f32 %v7067_v48, %v3811_v0  ;;  %v3813_v17 = vpop.f32.mrb[83].mxu1  ;;  %v8244_v3 = vadd.f32 %v8243_v47, %v8038_v45  ;;  %v7069_v37 = vpop.f32.mrb[83].mxu0 }
 0x590   : > { %v7775_v5 = vadd.f32 %v9768_v34, %v7577_v4  ;;  %v9770_v6 = vadd.f32 %v7069_v37, %v3813_v17  ;;  %v8247_v2 = vsel %vm8090_vm12, %v8041_v49, 0.0  ;;  %v7597_v33 = vpop.permute.xlu1 %7596  ;;  %v7602_v17 = vpop.permute.xlu0 %7601 }
 0x591   : > { %v7902_v62 = vmax.f32 %v7774_v9, 0.0  ;;  %v7776_v21 = vadd.f32 %v9769_v26, %v7582_v31  ;;  %8245 = vadd.xlane.f32.xlu0 %v8244_v3  ;;  %v8248_v12 = vadd.f32 %v8247_v2, %v8040_v50 }
 0x592   : > { %v7903_v38 = vmax.f32 %v7775_v5, 0.0  ;;  %v7777_v10 = vadd.f32 %v9770_v6, %v7582_v31 }
 0x593   : > { %v7904_v18 = vmax.f32 %v7776_v21, 0.0  ;;  %8249 = vadd.xlane.f32.xlu1 %v8248_v12  ;;  %v8042_v19 = vmul.f32 %v12985_v30, %v7902_v62 }
 0x594   : > { %v8043_v53 = vmul.f32 %v12981_v20, %v7903_v38  ;;  %v3817_v51 = vpop.f32.mrb[84].mxu1  ;;  %v7073_v60 = vpop.f32.mrb[84].mxu0  ;;  %v7905_v42 = vmax.f32 %v7777_v10, 0.0 }
 0x595   : > { %v9771_v52 = vadd.f32 %v7073_v60, %v3817_v51  ;;  %v3819_v22 = vpop.f32.mrb[85].mxu1  ;;  %v7075_v28 = vpop.f32.mrb[85].mxu0  ;;  %v8044_v11 = vmul.f32 %v12985_v30, %v7904_v18 }
 0x596   : > { %v9772_v39 = vadd.f32 %v7075_v28, %v3819_v22  ;;  %v7077_v54 = vpop.f32.mrb[86].mxu0  ;;  %v3821_v56 = vpop.f32.mrb[86].mxu1  ;;  %v8251_v57 = vsel %vm8090_vm12, %v8043_v53, 0.0  ;;  %v8045_v55 = vmul.f32 %v12981_v20, %v7905_v42 }
 0x597   : > { %v7778_v40 = vadd.f32 %v9771_v52, %v7587_v27  ;;  %v9773_v29 = vadd.f32 %v7077_v54, %v3821_v56  ;;  %v3823_v23 = vpop.f32.mrb[87].mxu1  ;;  %v8252_v41 = vadd.f32 %v8251_v57, %v8042_v19  ;;  %v7079_v13 = vpop.f32.mrb[87].mxu0 }
 0x598   : > { %v7779_v43 = vadd.f32 %v9772_v39, %v7587_v27  ;;  %v9774_v14 = vadd.f32 %v7079_v13, %v3823_v23  ;;  %v8255_v44 = vsel %vm8090_vm12, %v8045_v55, 0.0  ;;  %v7607_v52 = vpop.permute.xlu1 %7606 }
 0x599   : > { %v7906_v32 = vmax.f32 %v7778_v40, 0.0  ;;  %v7780_v61 = vadd.f32 %v9773_v29, %v7592_v59  ;;  %8253 = vadd.xlane.f32.xlu0 %v8252_v41  ;;  %v8256_v1 = vadd.f32 %v8255_v44, %v8044_v11  ;;  %v7612_v11 = vpop.permute.xlu0 %7611 }
 0x59a   : > { %v7907_v15 = vmax.f32 %v7779_v43, 0.0  ;;  %v7781_v16 = vadd.f32 %v9774_v14, %v7592_v59 }
 0x59b   : > { %v7908_v35 = vmax.f32 %v7780_v61, 0.0  ;;  %8257 = vadd.xlane.f32.xlu1 %v8256_v1  ;;  %v8046_v24 = vmul.f32 %v12985_v30, %v7906_v32 }
 0x59c   : > { %v8047_v4 = vmul.f32 %v12981_v20, %v7907_v15  ;;  %v3827_v36 = vpop.f32.mrb[88].mxu1  ;;  %v7083_v7 = vpop.f32.mrb[88].mxu0  ;;  %v7909_v63 = vmax.f32 %v7781_v16, 0.0 }
 0x59d   : > { %v9775_v45 = vadd.f32 %v7083_v7, %v3827_v36  ;;  %v3829_v8 = vpop.f32.mrb[89].mxu1  ;;  %v7085_v58 = vpop.f32.mrb[89].mxu0  ;;  %v8048_v3 = vmul.f32 %v12985_v30, %v7908_v35 }
 0x59e   : > { %v9776_v25 = vadd.f32 %v7085_v58, %v3829_v8  ;;  %v7087_v46 = vpop.f32.mrb[90].mxu0  ;;  %v3831_v34 = vpop.f32.mrb[90].mxu1  ;;  %v8259_v48 = vsel %vm8090_vm12, %v8047_v4, 0.0  ;;  %v8049_v0 = vmul.f32 %v12981_v20, %v7909_v63 }
 0x59f   : > { %v7782_v47 = vadd.f32 %v9775_v45, %v7597_v33  ;;  %v9777_v49 = vadd.f32 %v7087_v46, %v3831_v34  ;;  %v3833_v9 = vpop.f32.mrb[91].mxu1  ;;  %v8260_v26 = vadd.f32 %v8259_v48, %v8046_v24  ;;  %v7089_v50 = vpop.f32.mrb[91].mxu0 }
 0x5a0   : > { %v7783_v31 = vadd.f32 %v9776_v25, %v7597_v33  ;;  %v9778_v62 = vadd.f32 %v7089_v50, %v3833_v9  ;;  %v8263_v21 = vsel %vm8090_vm12, %v8049_v0, 0.0  ;;  %v7617_v45 = vpop.permute.xlu1 %7616 }
 0x5a1   : > { %v7910_v5 = vmax.f32 %v7782_v47, 0.0  ;;  %v7784_v37 = vadd.f32 %v9777_v49, %v7602_v17  ;;  %8261 = vadd.xlane.f32.xlu0 %v8260_v26  ;;  %v8264_v2 = vadd.f32 %v8263_v21, %v8048_v3  ;;  %v7622_v3 = vpop.permute.xlu0 %7621 }
 0x5a2   : > { %v7911_v6 = vmax.f32 %v7783_v31, 0.0  ;;  %v7785_v38 = vadd.f32 %v9778_v62, %v7602_v17 }
 0x5a3   : > { %v7912_v27 = vmax.f32 %v7784_v37, 0.0  ;;  %8265 = vadd.xlane.f32.xlu1 %v8264_v2  ;;  %v8050_v18 = vmul.f32 %v12985_v30, %v7910_v5 }
 0x5a4   : > { %v8051_v12 = vmul.f32 %v12981_v20, %v7911_v6  ;;  %v3837_v10 = vpop.f32.mrb[92].mxu1  ;;  %v7093_v53 = vpop.f32.mrb[92].mxu0  ;;  %v7913_v51 = vmax.f32 %v7785_v38, 0.0 }
 0x5a5   : > { %v9779_v60 = vadd.f32 %v7093_v53, %v3837_v10  ;;  %v3839_v19 = vpop.f32.mrb[93].mxu1  ;;  %v7095_v42 = vpop.f32.mrb[93].mxu0  ;;  %v8052_v29 = vmul.f32 %v12985_v30, %v7912_v27 }
 0x5a6   : > { %v9780_v22 = vadd.f32 %v7095_v42, %v3839_v19  ;;  %v7097_v28 = vpop.f32.mrb[94].mxu0  ;;  %v8267_v39 = vsel %vm8090_vm12, %v8051_v12, 0.0  ;;  %v8053_v54 = vmul.f32 %v12981_v20, %v7913_v51  ;;  %v3841_v57 = vpop.f32.mrb[94].mxu1 }
 0x5a7   : > { %v7786_v56 = vadd.f32 %v9779_v60, %v7607_v52  ;;  %v7099_v55 = vpop.f32.mrb[95].mxu0  ;;  %v8268_v40 = vadd.f32 %v8267_v39, %v8050_v18  ;;  %v9781_v41 = vadd.f32 %v7097_v28, %v3841_v57  ;;  %v3843_v59 = vpop.f32.mrb[95].mxu1 }
 0x5a8   : > { %v7787_v23 = vadd.f32 %v9780_v22, %v7607_v52  ;;  %v9782_v13 = vadd.f32 %v7099_v55, %v3843_v59  ;;  %v8271_v32 = vsel %vm8090_vm12, %v8053_v54, 0.0  ;;  %v7627_v19 = vpop.permute.xlu1 %7626 }
 0x5a9   : > { %v7914_v43 = vmax.f32 %v7786_v56, 0.0  ;;  %8269 = vadd.xlane.f32.xlu0 %v8268_v40  ;;  %v7788_v14 = vadd.f32 %v9781_v41, %v7612_v11  ;;  %v8272_v44 = vadd.f32 %v8271_v32, %v8052_v29  ;;  %v7632_v41 = vpop.permute.xlu0 %7631 }
 0x5aa   : > { %v7915_v61 = vmax.f32 %v7787_v23, 0.0  ;;  %v7789_v15 = vadd.f32 %v9782_v13, %v7612_v11 }
 0x5ab   : > { %v7916_v33 = vmax.f32 %v7788_v14, 0.0  ;;  %8273 = vadd.xlane.f32.xlu1 %v8272_v44  ;;  %v8054_v35 = vmul.f32 %v12985_v30, %v7914_v43 }
 0x5ac   : > { %v8055_v1 = vmul.f32 %v12981_v20, %v7915_v61  ;;  %v3847_v16 = vpop.f32.mrb[96].mxu1  ;;  %v7103_v4 = vpop.f32.mrb[96].mxu0  ;;  %v7917_v36 = vmax.f32 %v7789_v15, 0.0 }
 0x5ad   : > { %v9783_v7 = vadd.f32 %v7103_v4, %v3847_v16  ;;  %v3849_v24 = vpop.f32.mrb[97].mxu1  ;;  %v7105_v63 = vpop.f32.mrb[97].mxu0  ;;  %v8056_v49 = vmul.f32 %v12985_v30, %v7916_v33 }
 0x5ae   : > { %v9784_v8 = vadd.f32 %v7105_v63, %v3849_v24  ;;  %v7107_v58 = vpop.f32.mrb[98].mxu0  ;;  %v8275_v25 = vsel %vm8090_vm12, %v8055_v1, 0.0  ;;  %v8057_v46 = vmul.f32 %v12981_v20, %v7917_v36  ;;  %v3851_v48 = vpop.f32.mrb[98].mxu1 }
 0x5af   : > { %v7790_v34 = vadd.f32 %v9783_v7, %v7617_v45  ;;  %v7109_v0 = vpop.f32.mrb[99].mxu0  ;;  %v8276_v47 = vadd.f32 %v8275_v25, %v8054_v35  ;;  %v9785_v26 = vadd.f32 %v7107_v58, %v3851_v48  ;;  %v3853_v17 = vpop.f32.mrb[99].mxu1 }
 0x5b0   : > { %v7791_v9 = vadd.f32 %v9784_v8, %v7617_v45  ;;  %v9786_v50 = vadd.f32 %v7109_v0, %v3853_v17  ;;  %v8279_v5 = vsel %vm8090_vm12, %v8057_v46, 0.0  ;;  %v7637_v24 = vpop.permute.xlu1 %7636 }
 0x5b1   : > { %v7918_v31 = vmax.f32 %v7790_v34, 0.0  ;;  %8277 = vadd.xlane.f32.xlu0 %v8276_v47  ;;  %v7792_v62 = vadd.f32 %v9785_v26, %v7622_v3  ;;  %v8280_v21 = vadd.f32 %v8279_v5, %v8056_v49  ;;  %v7642_v26 = vpop.permute.xlu0 %7641 }
 0x5b2   : > { %v7919_v37 = vmax.f32 %v7791_v9, 0.0  ;;  %v7793_v6 = vadd.f32 %v9786_v50, %v7622_v3 }
 0x5b3   : > { %v7920_v38 = vmax.f32 %v7792_v62, 0.0  ;;  %8281 = vadd.xlane.f32.xlu1 %v8280_v21  ;;  %v8058_v10 = vmul.f32 %v12985_v30, %v7918_v31 }
 0x5b4   : > { %v8059_v2 = vmul.f32 %v12981_v20, %v7919_v37  ;;  %v3857_v12 = vpop.f32.mrb[100].mxu1  ;;  %v7113_v27 = vpop.f32.mrb[100].mxu0  ;;  %v7921_v53 = vmax.f32 %v7793_v6, 0.0 }
 0x5b5   : > { %v9787_v18 = vadd.f32 %v7113_v27, %v3857_v12  ;;  %v3859_v51 = vpop.f32.mrb[101].mxu1  ;;  %v7115_v60 = vpop.f32.mrb[101].mxu0  ;;  %v8060_v55 = vmul.f32 %v12985_v30, %v7920_v38 }
 0x5b6   : > { %v9788_v42 = vadd.f32 %v7115_v60, %v3859_v51  ;;  %v7117_v52 = vpop.f32.mrb[102].mxu0  ;;  %v8283_v22 = vsel %vm8090_vm12, %v8059_v2, 0.0  ;;  %v8061_v28 = vmul.f32 %v12981_v20, %v7921_v53  ;;  %v3861_v54 = vpop.f32.mrb[102].mxu1 }
 0x5b7   : > { %v7794_v39 = vadd.f32 %v9787_v18, %v7627_v19  ;;  %v7119_v56 = vpop.f32.mrb[103].mxu0  ;;  %v8284_v57 = vadd.f32 %v8283_v22, %v8058_v10  ;;  %v9789_v29 = vadd.f32 %v7117_v52, %v3861_v54  ;;  %v3863_v23 = vpop.f32.mrb[103].mxu1 }
 0x5b8   : > { %v7795_v40 = vadd.f32 %v9788_v42, %v7627_v19  ;;  %v9790_v11 = vadd.f32 %v7119_v56, %v3863_v23  ;;  %v8287_v43 = vsel %vm8090_vm12, %v8061_v28, 0.0  ;;  %v7647_v51 = vpop.permute.xlu1 %7646 }
 0x5b9   : > { %v7922_v59 = vmax.f32 %v7794_v39, 0.0  ;;  %8285 = vadd.xlane.f32.xlu0 %v8284_v57  ;;  %v7796_v32 = vadd.f32 %v9789_v29, %v7632_v41  ;;  %v8288_v61 = vadd.f32 %v8287_v43, %v8060_v55  ;;  %v7652_v29 = vpop.permute.xlu0 %7651 }
 0x5ba   : > { %v7923_v13 = vmax.f32 %v7795_v40, 0.0  ;;  %v7797_v14 = vadd.f32 %v9790_v11, %v7632_v41 }
 0x5bb   : > { %v7924_v15 = vmax.f32 %v7796_v32, 0.0  ;;  %8289 = vadd.xlane.f32.xlu1 %v8288_v61  ;;  %v8062_v16 = vmul.f32 %v12985_v30, %v7922_v59 }
 0x5bc   : > { %v8063_v44 = vmul.f32 %v12981_v20, %v7923_v13  ;;  %v3867_v1 = vpop.f32.mrb[104].mxu1  ;;  %v7123_v33 = vpop.f32.mrb[104].mxu0  ;;  %v7925_v4 = vmax.f32 %v7797_v14, 0.0 }
 0x5bd   : > { %v9791_v35 = vadd.f32 %v7123_v33, %v3867_v1  ;;  %v3869_v36 = vpop.f32.mrb[105].mxu1  ;;  %v7125_v7 = vpop.f32.mrb[105].mxu0  ;;  %v8064_v0 = vmul.f32 %v12985_v30, %v7924_v15 }
 0x5be   : > { %v9792_v63 = vadd.f32 %v7125_v7, %v3869_v36  ;;  %v7127_v45 = vpop.f32.mrb[106].mxu0  ;;  %v8291_v8 = vsel %vm8090_vm12, %v8063_v44, 0.0  ;;  %v8065_v58 = vmul.f32 %v12981_v20, %v7925_v4  ;;  %v3871_v46 = vpop.f32.mrb[106].mxu1 }
 0x5bf   : > { %v7798_v25 = vadd.f32 %v9791_v35, %v7637_v24  ;;  %v7129_v34 = vpop.f32.mrb[107].mxu0  ;;  %v8292_v48 = vadd.f32 %v8291_v8, %v8062_v16  ;;  %v9793_v49 = vadd.f32 %v7127_v45, %v3871_v46  ;;  %v3873_v9 = vpop.f32.mrb[107].mxu1 }
 0x5c0   : > { %v7799_v47 = vadd.f32 %v9792_v63, %v7637_v24  ;;  %v9794_v3 = vadd.f32 %v7129_v34, %v3873_v9  ;;  %v8295_v31 = vsel %vm8090_vm12, %v8065_v58, 0.0  ;;  %v7657_v36 = vpop.permute.xlu1 %7656 }
 0x5c1   : > { %v7926_v17 = vmax.f32 %v7798_v25, 0.0  ;;  %8293 = vadd.xlane.f32.xlu0 %v8292_v48  ;;  %v7800_v5 = vadd.f32 %v9793_v49, %v7642_v26  ;;  %v8296_v37 = vadd.f32 %v8295_v31, %v8064_v0  ;;  %v7662_v49 = vpop.permute.xlu0 %7661 }
 0x5c2   : > { %v7927_v50 = vmax.f32 %v7799_v47, 0.0  ;;  %v7801_v62 = vadd.f32 %v9794_v3, %v7642_v26 }
 0x5c3   : > { %v7928_v6 = vmax.f32 %v7800_v5, 0.0  ;;  %8297 = vadd.xlane.f32.xlu1 %v8296_v37  ;;  %v8066_v12 = vmul.f32 %v12985_v30, %v7926_v17 }
 0x5c4   : > { %v8067_v21 = vmul.f32 %v12981_v20, %v7927_v50  ;;  %v3877_v2 = vpop.f32.mrb[108].mxu1  ;;  %v7133_v38 = vpop.f32.mrb[108].mxu0  ;;  %v7929_v27 = vmax.f32 %v7801_v62, 0.0 }
 0x5c5   : > { %v9795_v10 = vadd.f32 %v7133_v38, %v3877_v2  ;;  %v3879_v53 = vpop.f32.mrb[109].mxu1  ;;  %v7135_v18 = vpop.f32.mrb[109].mxu0  ;;  %v8068_v56 = vmul.f32 %v12985_v30, %v7928_v6 }
 0x5c6   : > { %v9796_v60 = vadd.f32 %v7135_v18, %v3879_v53  ;;  %v7137_v19 = vpop.f32.mrb[110].mxu0  ;;  %v8299_v42 = vsel %vm8090_vm12, %v8067_v21, 0.0  ;;  %v8069_v52 = vmul.f32 %v12981_v20, %v7929_v27  ;;  %v3881_v28 = vpop.f32.mrb[110].mxu1 }
 0x5c7   : > { %v7802_v22 = vadd.f32 %v9795_v10, %v7647_v51  ;;  %v7139_v39 = vpop.f32.mrb[111].mxu0  ;;  %v13247_v54 = vadd.f32 %v8299_v42, %v8066_v12  ;;  %v9797_v55 = vadd.f32 %v7137_v19, %v3881_v28  ;;  %v3883_v40 = vpop.f32.mrb[111].mxu1 }
 0x5c8   : > { %v7803_v57 = vadd.f32 %v9796_v60, %v7647_v51  ;;  %v9798_v41 = vadd.f32 %v7139_v39, %v3883_v40  ;;  %v8303_v59 = vsel %vm8090_vm12, %v8069_v52, 0.0  ;;  %v7667_v53 = vpop.permute.xlu1 %7666  ;;  %v7672_v40 = vpop.permute.xlu0 %7671 }
 0x5c9   : > { %v7930_v23 = vmax.f32 %v7802_v22, 0.0  ;;  %v7804_v43 = vadd.f32 %v9797_v55, %v7652_v29  ;;  %v8304_v13 = vadd.f32 %v8303_v59, %v8068_v56 }
 0x5ca   : > { %v7931_v11 = vmax.f32 %v7803_v57, 0.0  ;;  %v7805_v32 = vadd.f32 %v9798_v41, %v7652_v29 }
 0x5cb   : > { %v7932_v14 = vmax.f32 %v7804_v43, 0.0  ;;  %8305 = vadd.xlane.f32.xlu1 %v8304_v13  ;;  %v8070_v1 = vmul.f32 %v12985_v30, %v7930_v23 }
 0x5cc   : > { %v8071_v61 = vmul.f32 %v12981_v20, %v7931_v11  ;;  %v3887_v44 = vpop.f32.mrb[112].mxu1  ;;  %v7143_v15 = vpop.f32.mrb[112].mxu0  ;;  %v7933_v33 = vmax.f32 %v7805_v32, 0.0 }
 0x5cd   : > { %v9799_v16 = vadd.f32 %v7143_v15, %v3887_v44  ;;  %v3889_v4 = vpop.f32.mrb[113].mxu1  ;;  %v7145_v35 = vpop.f32.mrb[113].mxu0  ;;  %v8072_v34 = vmul.f32 %v12985_v30, %v7932_v14 }
 0x5ce   : > { %v9800_v7 = vadd.f32 %v7145_v35, %v3889_v4  ;;  %v7147_v24 = vpop.f32.mrb[114].mxu0  ;;  %v8307_v63 = vsel %vm8090_vm12, %v8071_v61, 0.0  ;;  %v8073_v45 = vmul.f32 %v12981_v20, %v7933_v33  ;;  %v3891_v58 = vpop.f32.mrb[114].mxu1 }
 0x5cf   : > { %v7806_v8 = vadd.f32 %v9799_v16, %v7657_v36  ;;  %v7149_v25 = vpop.f32.mrb[115].mxu0  ;;  %v13255_v46 = vadd.f32 %v8307_v63, %v8070_v1  ;;  %v9801_v0 = vadd.f32 %v7147_v24, %v3891_v58  ;;  %v3893_v47 = vpop.f32.mrb[115].mxu1 }
 0x5d0   : > { %v7807_v48 = vadd.f32 %v9800_v7, %v7657_v36  ;;  %v9802_v26 = vadd.f32 %v7149_v25, %v3893_v47  ;;  %v8311_v17 = vsel %vm8090_vm12, %v8073_v45, 0.0  ;;  %v7677_v35 = vpop.permute.xlu1 %7676 }
 0x5d1   : > { %v7934_v9 = vmax.f32 %v7806_v8, 0.0  ;;  %v7808_v31 = vadd.f32 %v9801_v0, %v7662_v49  ;;  %v8312_v50 = vadd.f32 %v8311_v17, %v8072_v34 }
 0x5d2   : > { %v7935_v3 = vmax.f32 %v7807_v48, 0.0  ;;  %v7809_v5 = vadd.f32 %v9802_v26, %v7662_v49  ;;  %v7682_v49 = vpop.permute.xlu0 %7681 }
 0x5d3   : > { %v7936_v62 = vmax.f32 %v7808_v31, 0.0  ;;  %8313 = vadd.xlane.f32.xlu1 %v8312_v50  ;;  %v8074_v2 = vmul.f32 %v12985_v30, %v7934_v9 }
 0x5d4   : > { %v8075_v37 = vmul.f32 %v12981_v20, %v7935_v3  ;;  %v3897_v21 = vpop.f32.mrb[116].mxu1  ;;  %v7153_v6 = vpop.f32.mrb[116].mxu0  ;;  %v7937_v38 = vmax.f32 %v7809_v5, 0.0 }
 0x5d5   : > { %v9803_v12 = vadd.f32 %v7153_v6, %v3897_v21  ;;  %v3899_v27 = vpop.f32.mrb[117].mxu1  ;;  %v7155_v10 = vpop.f32.mrb[117].mxu0  ;;  %v8076_v39 = vmul.f32 %v12985_v30, %v7936_v62 }
 0x5d6   : > { %v9804_v18 = vadd.f32 %v7155_v10, %v3899_v27  ;;  %v7157_v51 = vpop.f32.mrb[118].mxu0  ;;  %v8315_v60 = vsel %vm8090_vm12, %v8075_v37, 0.0  ;;  %v8077_v19 = vmul.f32 %v12981_v20, %v7937_v38  ;;  %v3901_v52 = vpop.f32.mrb[118].mxu1 }
 0x5d7   : > { %v7810_v42 = vadd.f32 %v9803_v12, %v7667_v53  ;;  %v7159_v22 = vpop.f32.mrb[119].mxu0  ;;  %v13263_v28 = vadd.f32 %v8315_v60, %v8074_v2  ;;  %v9805_v57 = vadd.f32 %v7157_v51, %v3901_v52  ;;  %v3903_v55 = vpop.f32.mrb[119].mxu1 }
 0x5d8   : > { %v7811_v56 = vadd.f32 %v9804_v18, %v7667_v53  ;;  %v9806_v23 = vadd.f32 %v7159_v22, %v3903_v55  ;;  %v8319_v41 = vsel %vm8090_vm12, %v8077_v19, 0.0  ;;  %v7687_v53 = vpop.permute.xlu1 %7686 }
 0x5d9   : > { %v7938_v29 = vmax.f32 %v7810_v42, 0.0  ;;  %v7812_v11 = vadd.f32 %v9805_v57, %v7672_v40  ;;  %v8320_v43 = vadd.f32 %v8319_v41, %v8076_v39 }
 0x5da   : > { %v7939_v59 = vmax.f32 %v7811_v56, 0.0  ;;  %v7813_v13 = vadd.f32 %v9806_v23, %v7672_v40 }
 0x5db   : > { %v7940_v61 = vmax.f32 %v7812_v11, 0.0  ;;  %8321 = vadd.xlane.f32.xlu1 %v8320_v43  ;;  %v8078_v15 = vmul.f32 %v12985_v30, %v7938_v29  ;;  %v7692_v29 = vpop.permute.xlu0 %7691 }
 0x5dc   : > { %v8079_v32 = vmul.f32 %v12981_v20, %v7939_v59  ;;  %v3907_v14 = vpop.f32.mrb[120].mxu1  ;;  %v7163_v44 = vpop.f32.mrb[120].mxu0  ;;  %v7941_v1 = vmax.f32 %v7813_v13, 0.0 }
 0x5dd   : > { %v9807_v33 = vadd.f32 %v7163_v44, %v3907_v14  ;;  %v3909_v16 = vpop.f32.mrb[121].mxu1  ;;  %v7165_v4 = vpop.f32.mrb[121].mxu0  ;;  %v8080_v34 = vmul.f32 %v12985_v30, %v7940_v61 }
 0x5de   : > { %v9808_v36 = vadd.f32 %v7165_v4, %v3909_v16  ;;  %v7167_v7 = vpop.f32.mrb[122].mxu0  ;;  %v8323_v24 = vsel %vm8090_vm12, %v8079_v32, 0.0  ;;  %v8081_v63 = vmul.f32 %v12981_v20, %v7941_v1  ;;  %v3911_v8 = vpop.f32.mrb[122].mxu1 }
 0x5df   : > { %v7814_v45 = vadd.f32 %v9807_v33, %v7677_v35  ;;  %v7169_v58 = vpop.f32.mrb[123].mxu0  ;;  %v13271_v25 = vadd.f32 %v8323_v24, %v8078_v15  ;;  %v9809_v0 = vadd.f32 %v7167_v7, %v3911_v8  ;;  %v3913_v47 = vpop.f32.mrb[123].mxu1 }
 0x5e0   : > { %v7815_v48 = vadd.f32 %v9808_v36, %v7677_v35  ;;  %v9810_v26 = vadd.f32 %v7169_v58, %v3913_v47  ;;  %v8327_v17 = vsel %vm8090_vm12, %v8081_v63, 0.0  ;;  %v8094_v44 = vpop.xlane.xlu1 %8093  ;;  %v8098_v36 = vpop.xlane.xlu0 %8097 }
 0x5e1   : > { %v7942_v9 = vmax.f32 %v7814_v45, 0.0  ;;  %v7816_v31 = vadd.f32 %v9809_v0, %v7682_v49  ;;  %v8328_v50 = vadd.f32 %v8327_v17, %v8080_v34 }
 0x5e2   : > { %v7943_v3 = vmax.f32 %v7815_v48, 0.0  ;;  %v7817_v5 = vadd.f32 %v9810_v26, %v7682_v49 }
 0x5e3   : > { %v7944_v62 = vmax.f32 %v7816_v31, 0.0  ;;  %8329 = vadd.xlane.f32.xlu1 %v8328_v50  ;;  %v8082_v2 = vmul.f32 %v12985_v30, %v7942_v9 }
 0x5e4   : > { %v8083_v37 = vmul.f32 %v12981_v20, %v7943_v3  ;;  %v3917_v21 = vpop.f32.mrb[124].mxu1  ;;  %v7173_v6 = vpop.f32.mrb[124].mxu0  ;;  %v7945_v38 = vmax.f32 %v7817_v5, 0.0 }
 0x5e5   : > { %v9811_v12 = vadd.f32 %v7173_v6, %v3917_v21  ;;  %v3919_v27 = vpop.f32.mrb[125].mxu1  ;;  %v7175_v10 = vpop.f32.mrb[125].mxu0  ;;  %v8084_v56 = vmul.f32 %v12985_v30, %v7944_v62 }
 0x5e6   : > { %v9812_v18 = vadd.f32 %v7175_v10, %v3919_v27  ;;  %v7177_v51 = vpop.f32.mrb[126].mxu0  ;;  %v8331_v60 = vsel %vm8090_vm12, %v8083_v37, 0.0  ;;  %v8085_v19 = vmul.f32 %v12981_v20, %v7945_v38  ;;  %v3921_v52 = vpop.f32.mrb[126].mxu1 }
 0x5e7   : > { %v7818_v42 = vadd.f32 %v9811_v12, %v7687_v53  ;;  %v7179_v22 = vpop.f32.mrb[127].mxu0  ;;  %v13279_v39 = vadd.f32 %v8331_v60, %v8082_v2  ;;  %v9813_v55 = vadd.f32 %v7177_v51, %v3921_v52  ;;  %v3923_v40 = vpop.f32.mrb[127].mxu1 }
 0x5e8   : > { %v7819_v57 = vadd.f32 %v9812_v18, %v7687_v53  ;;  %v9814_v41 = vadd.f32 %v7179_v22, %v3923_v40  ;;  %v8335_v59 = vsel %vm8090_vm12, %v8085_v19, 0.0  ;;  %v8102_v63 = vpop.xlane.xlu0 %8101  ;;  %v8106_v45 = vpop.xlane.xlu1 %8105 }
 0x5e9   : > { %v7946_v23 = vmax.f32 %v7818_v42, 0.0  ;;  %v7820_v43 = vadd.f32 %v9813_v55, %v7692_v29  ;;  %v8336_v13 = vadd.f32 %v8335_v59, %v8084_v56 }
 0x5ea   : > { %v7947_v11 = vmax.f32 %v7819_v57, 0.0  ;;  %v7821_v32 = vadd.f32 %v9814_v41, %v7692_v29 }
 0x5eb   : > { %v7948_v14 = vmax.f32 %v7820_v43, 0.0  ;;  %8337 = vadd.xlane.f32.xlu1 %v8336_v13  ;;  %v8086_v15 = vmul.f32 %v12985_v30, %v7946_v23 }
 0x5ec   : > { %v8087_v61 = vmul.f32 %v12981_v20, %v7947_v11  ;;  %v7949_v1 = vmax.f32 %v7821_v32, 0.0  ;;  %v8110_v8 = vpop.xlane.xlu0 %8109  ;;  %v8114_v58 = vpop.xlane.xlu1 %8113 }
 0x5ed   : > { %v8088_v35 = vmul.f32 %v12985_v30, %v7948_v14 }
 0x5ee   : > { %8348 = vxpose.xlu0.b32.start [1/16] (narrow) %v8094_v44, 8  ;;  %v8339_v33 = vsel %vm8090_vm12, %v8087_v61, 0.0  ;;  %v8089_v16 = vmul.f32 %v12981_v20, %v7949_v1 }
 0x5ef   : > { %v13287_v4 = vadd.f32 %v8339_v33, %v8086_v15 }
 0x5f0   : > { %v8343_v7 = vsel %vm8090_vm12, %v8089_v16, 0.0  ;;  %v8118_v34 = vpop.xlane.xlu0 %8117  ;;  %v8122_v20 = vpop.xlane.xlu1 %8121 }
 0x5f1   : > { %v8344_v24 = vadd.f32 %v8343_v7, %v8088_v35 }
 0x5f2   : > { %8349 = vxpose.xlu0.b32.cont [2/16] (narrow) %v8098_v36, 8 }
 0x5f3   : > { %8345 = vadd.xlane.f32.xlu1 %v8344_v24  ;;  %v11105_v24 = vmov 1966171168  }
 0x5f4   : > { %v8126_v48 = vpop.xlane.xlu0 %8125  ;;  %v8130_v30 = vpop.xlane.xlu1 %8129 }
 0x5f6   : > { %8350 = vxpose.xlu0.b32.cont [3/16] (narrow) %v8102_v63, 8  ;;  %v8483_v63 = vunpack.c.l.s4 %v11105_v24 }
 0x5f8   : > { %v8134_v0 = vpop.xlane.xlu0 %8133  ;;  %v8138_v47 = vpop.xlane.xlu1 %8137 }
 0x5fa   : > { %8351 = vxpose.xlu0.b32.cont [4/16] (narrow) %v8106_v45, 8  ;;  %v8484_v45 = vunpack.c.0.s8 %v8483_v63 }
 0x5fc   : > { %v8142_v49 = vpop.xlane.xlu0 %8141  ;;  %v8146_v9 = vpop.xlane.xlu1 %8145 }
 0x5fe   : > { %8352 = vxpose.xlu0.b32.cont [5/16] (narrow) %v8110_v8, 8 }
 0x600   : > { %v8150_v26 = vpop.xlane.xlu0 %8149  ;;  %v8154_v17 = vpop.xlane.xlu1 %8153 }
 0x602   : > { %8353 = vxpose.xlu0.b32.cont [6/16] (narrow) %v8114_v58, 8 }
 0x604   : > { %v8158_v3 = vpop.xlane.xlu0 %8157  ;;  %v8162_v31 = vpop.xlane.xlu1 %8161 }
 0x606   : > { %8354 = vxpose.xlu0.b32.cont [7/16] (narrow) %v8118_v34, 8  ;;  %v13369_v34 = vld [vmem:[#allocation23_spill] sm:$0xff] }
 0x608   : > { %v8166_v50 = vpop.xlane.xlu0 %8165  ;;  %v8170_v5 = vpop.xlane.xlu1 %8169 }
 0x60a   : > { %8355 = vxpose.xlu0.b32.cont [8/16] (narrow) %v8122_v20, 8  ;;  %v8487_v20 = vsub.s32 %v8484_v45, %v13369_v34 }
 0x60c   : > { %v8174_v37 = vpop.xlane.xlu0 %8173  ;;  %v8178_v62 = vpop.xlane.xlu1 %8177 }
 0x60e   : > { %8356 = vxpose.xlu0.b32.cont [9/16] (narrow) %v8126_v48, 8 }
 0x610   : > { %v8182_v21 = vpop.xlane.xlu0 %8181  ;;  %v8186_v6 = vpop.xlane.xlu1 %8185 }
 0x612   : > { %8357 = vxpose.xlu0.b32.cont [10/16] (narrow) %v8130_v30, 8 }
 0x614   : > { %v8190_v2 = vpop.xlane.xlu0 %8189  ;;  %v8194_v38 = vpop.xlane.xlu1 %8193 }
 0x616   : > { %8358 = vxpose.xlu0.b32.cont [11/16] (narrow) %v8134_v0, 8 }
 0x618   : > { %v8198_v12 = vpop.xlane.xlu0 %8197  ;;  %v8202_v27 = vpop.xlane.xlu1 %8201 }
 0x61a   : > { %8359 = vxpose.xlu0.b32.cont [12/16] (narrow) %v8138_v47, 8 }
 0x61c   : > { %v8206_v10 = vpop.xlane.xlu0 %8205  ;;  %v8210_v53 = vpop.xlane.xlu1 %8209 }
 0x61e   : > { %8360 = vxpose.xlu0.b32.cont [13/16] (narrow) %v8142_v49, 8 }
 0x620   : > { %v8214_v18 = vpop.xlane.xlu0 %8213  ;;  %v8218_v51 = vpop.xlane.xlu1 %8217 }
 0x622   : > { %8361 = vxpose.xlu0.b32.cont [14/16] (narrow) %v8146_v9, 8 }
 0x624   : > { %v8222_v60 = vpop.xlane.xlu0 %8221  ;;  %v8226_v19 = vpop.xlane.xlu1 %8225 }
 0x626   : > { %8362 = vxpose.xlu0.b32.cont [15/16] (narrow) %v8150_v26, 8  ;;  %8380 = vxpose.xlu1.b32.start [1/16] (narrow) %v8158_v3, 8  ;;  %v8347_v26 = vld [vmem:[%s11164_s27] sm:$0xf]  ;;  %v13370_v3 = vlaneseq }
 0x628   : > { %v8230_v42 = vpop.xlane.xlu0 %8229  ;;  %v8234_v52 = vpop.xlane.xlu1 %8233  ;;  %vm8508_vm13 = vcmp.lt.s32.totalorder %v13370_v3, 512 }
 0x62a   : > { %8363 = vxpose.xlu0.b32.end [16/16] (narrow) %v8154_v17, 8  ;;  %8381 = vxpose.xlu1.b32.cont [2/16] (narrow) %v8162_v31, 8 }
 0x62c   : > { %v8238_v22 = vpop.xlane.xlu0 %8237  ;;  %v8242_v56 = vpop.xlane.xlu1 %8241 }
 0x62e   : > { %8382 = vxpose.xlu1.b32.cont [3/16] (narrow) %v8166_v50, 8 }
 0x630   : > { %v8246_v57 = vpop.xlane.xlu0 %8245  ;;  %v8250_v55 = vpop.xlane.xlu1 %8249 }
 0x632   : > { %8383 = vxpose.xlu1.b32.cont [4/16] (narrow) %v8170_v5, 8 }
 0x634   : > { %v8254_v40 = vpop.xlane.xlu0 %8253  ;;  %v8258_v29 = vpop.xlane.xlu1 %8257 }
 0x636   : > { %8384 = vxpose.xlu1.b32.cont [5/16] (narrow) %v8174_v37, 8 }
 0x638   : > { %v8262_v23 = vpop.xlane.xlu0 %8261  ;;  %v8266_v41 = vpop.xlane.xlu1 %8265 }
 0x63a   : > { %8385 = vxpose.xlu1.b32.cont [6/16] (narrow) %v8178_v62, 8 }
 0x63c   : > { %v8270_v59 = vpop.xlane.xlu0 %8269  ;;  %v8274_v11 = vpop.xlane.xlu1 %8273 }
 0x63e   : > { %8386 = vxpose.xlu1.b32.cont [7/16] (narrow) %v8182_v21, 8 }
 0x640   : > { %v8278_v43 = vpop.xlane.xlu0 %8277  ;;  %v8282_v13 = vpop.xlane.xlu1 %8281 }
 0x642   : > { %8387 = vxpose.xlu1.b32.cont [8/16] (narrow) %v8186_v6, 8 }
 0x646   : > { %8388 = vxpose.xlu1.b32.cont [9/16] (narrow) %v8190_v2, 8  ;;  %v8286_v32 = vpop.xlane.xlu0 %8285 }
 0x64a   : > { %8389 = vxpose.xlu1.b32.cont [10/16] (narrow) %v8194_v38, 8 }
 0x64e   : > { %8390 = vxpose.xlu1.b32.cont [11/16] (narrow) %v8198_v12, 8 }
 0x652   : > { %8391 = vxpose.xlu1.b32.cont [12/16] (narrow) %v8202_v27, 8 }
 0x656   : > { %8392 = vxpose.xlu1.b32.cont [13/16] (narrow) %v8206_v10, 8 }
 0x657   : > { %8301 = vadd.xlane.f32.xlu0 %v13247_v54  ;;  %v8290_v54 = vpop.xlane.xlu1 %8289 }
 0x65a   : > { %8393 = vxpose.xlu1.b32.cont [14/16] (narrow) %v8210_v53, 8 }
 0x65b   : > { %8309 = vadd.xlane.f32.xlu0 %v13255_v46  ;;  %v8294_v46 = vpop.xlane.xlu0 %8293  ;;  %v8298_v61 = vpop.xlane.xlu1 %8297 }
 0x65e   : > { %8394 = vxpose.xlu1.b32.cont [15/16] (narrow) %v8214_v18, 8 }
 0x65f   : > { %8317 = vadd.xlane.f32.xlu0 %v13263_v28 }
 0x662   : > { %8395 = vxpose.xlu1.b32.end [16/16] (narrow) %v8218_v51, 8 }
 0x663   : > { %8325 = vadd.xlane.f32.xlu0 %v13271_v25 }
 0x666   : > { %8444 = vxpose.xlu1.b32.start [1/16] (narrow) %v8286_v32, 8 }
 0x667   : > { %8333 = vadd.xlane.f32.xlu0 %v13279_v39  ;;  %v8306_v39 = vpop.xlane.xlu1 %8305 }
 0x66a   : > { %8445 = vxpose.xlu1.b32.cont [2/16] (narrow) %v8290_v54, 8 }
 0x66b   : > { %8341 = vadd.xlane.f32.xlu0 %v13287_v4  ;;  %v8314_v44 = vpop.xlane.xlu1 %8313 }
 0x66e   : > { %8446 = vxpose.xlu1.b32.cont [3/16] (narrow) %v8294_v46, 8  ;;  %v8364_v28 = vpop.trf.xlu0 }
 0x66f   : > { %v8322_v1 = vpop.xlane.xlu1 %8321 }
 0x672   : > { %8447 = vxpose.xlu1.b32.cont [4/16] (narrow) %v8298_v61, 8 }
 0x673   : > { %v8330_v16 = vpop.xlane.xlu1 %8329 }
 0x678   : > { %v8338_v35 = vpop.xlane.xlu1 %8337 }
 0x680   : > { %v8346_v7 = vpop.xlane.xlu1 %8345 }
 0x698   : > { %8412 = vxpose.xlu0.b32.start [1/16] (narrow) %v8222_v60, 8 }
 0x69c   : > { %8413 = vxpose.xlu0.b32.cont [2/16] (narrow) %v8226_v19, 8 }
 0x6a0   : > { %8414 = vxpose.xlu0.b32.cont [3/16] (narrow) %v8230_v42, 8 }
 0x6a4   : > { %8415 = vxpose.xlu0.b32.cont [4/16] (narrow) %v8234_v52, 8 }
 0x6a6   : > { %v8396_v8 = vpop.trf.xlu1 }
 0x6a7   : > { %v8480_v48 = vcombine.low %v8364_v28, %v8396_v8 }
 0x6a8   : > { %8416 = vxpose.xlu0.b32.cont [5/16] (narrow) %v8238_v22, 8 }
 0x6a9   : > { %v8488_v47 = vrot.slane %v8480_v48, %v8487_v20 }
 0x6ac   : > { %8417 = vxpose.xlu0.b32.cont [6/16] (narrow) %v8242_v56, 8 }
 0x6b0   : > { %8418 = vxpose.xlu0.b32.cont [7/16] (narrow) %v8246_v57, 8 }
 0x6b4   : > { %8419 = vxpose.xlu0.b32.cont [8/16] (narrow) %v8250_v55, 8 }
 0x6b8   : > { %8420 = vxpose.xlu0.b32.cont [9/16] (narrow) %v8254_v40, 8 }
 0x6bc   : > { %8421 = vxpose.xlu0.b32.cont [10/16] (narrow) %v8258_v29, 8 }
 0x6c0   : > { %8422 = vxpose.xlu0.b32.cont [11/16] (narrow) %v8262_v23, 8 }
 0x6c4   : > { %8423 = vxpose.xlu0.b32.cont [12/16] (narrow) %v8266_v41, 8 }
 0x6c8   : > { %8424 = vxpose.xlu0.b32.cont [13/16] (narrow) %v8270_v59, 8 }
 0x6cc   : > { %8425 = vxpose.xlu0.b32.cont [14/16] (narrow) %v8274_v11, 8 }
 0x6d0   : > { %8426 = vxpose.xlu0.b32.cont [15/16] (narrow) %v8278_v43, 8 }
 0x6d4   : > { %8427 = vxpose.xlu0.b32.end [16/16] (narrow) %v8282_v13, 8 }
 0x6e4   : > { %v8302_v25 = vpop.xlane.xlu0 %8301 }
 0x6e5   : > { %8448 = vxpose.xlu1.b32.cont [5/16] (narrow) %v8302_v25, 8 }
 0x6e8   : > { %v8310_v14 = vpop.xlane.xlu0 %8309 }
 0x6e9   : > { %8449 = vxpose.xlu1.b32.cont [6/16] (narrow) %v8306_v39, 8 }
 0x6ec   : > { %v8318_v15 = vpop.xlane.xlu0 %8317 }
 0x6ed   : > { %8450 = vxpose.xlu1.b32.cont [7/16] (narrow) %v8310_v14, 8 }
 0x6f0   : > { %v8326_v33 = vpop.xlane.xlu0 %8325 }
 0x6f1   : > { %8451 = vxpose.xlu1.b32.cont [8/16] (narrow) %v8314_v44, 8 }
 0x6f4   : > { %v8334_v4 = vpop.xlane.xlu0 %8333 }
 0x6f5   : > { %8452 = vxpose.xlu1.b32.cont [9/16] (narrow) %v8318_v15, 8 }
 0x6f8   : > { %v8342_v36 = vpop.xlane.xlu0 %8341 }
 0x6f9   : > { %8453 = vxpose.xlu1.b32.cont [10/16] (narrow) %v8322_v1, 8 }
 0x6fd   : > { %8454 = vxpose.xlu1.b32.cont [11/16] (narrow) %v8326_v33, 8 }
 0x701   : > { %8455 = vxpose.xlu1.b32.cont [12/16] (narrow) %v8330_v16, 8 }
 0x705   : > { %8456 = vxpose.xlu1.b32.cont [13/16] (narrow) %v8334_v4, 8 }
 0x709   : > { %8457 = vxpose.xlu1.b32.cont [14/16] (narrow) %v8338_v35, 8 }
 0x70d   : > { %8458 = vxpose.xlu1.b32.cont [15/16] (narrow) %v8342_v36, 8 }
 0x711   : > { %8459 = vxpose.xlu1.b32.end [16/16] (narrow) %v8346_v7, 8 }
 0x718   : > { %v8428_v58 = vpop.trf.xlu0 }
 0x755   : > { %v8460_v30 = vpop.trf.xlu1 }
 0x756   : > { %v8481_v0 = vcombine.low %v8428_v58, %v8460_v30 }
 0x758   : > { %v8495_v49 = vrot.slane %v8481_v0, %v8487_v20 }
 0x75a   : > { %v8496_v9 = vcombine.low %v8488_v47, %v8495_v49 }
 0x75c   : > { %v8503_v17 = vrot.slane %v8496_v9, %v8487_v20 }
 0x75e   : > { %v8505_v31 = vadd.f32 %v8503_v17, %v8347_v26 }
 0x760   : > { %8510 = vst.msk [vmem:[%s11164_s27] sm:$0xf] %vm8508_vm13, %v8505_v31 }
 0x761 PF: > { %s14_s19 = sadd.s32 1, %s11092_s19   ;;  %s13371_s15 = smov %s11084_s17 }
 0x762   : > { %p11_p8 = scmp.ge.s32.totalorder %s14_s19, 10   ;;  %s13372_s16 = smov %s11088_s18 }
 0x763   : > { %s13373_s17 = smov %s13376_s20  ;;  %s13374_s18 = smov %s13380_s21 }
 0x764   :  { %13 = sbr.rel (!%p11_p8) target bundleno = 3 (0x3), region = 78 }

</bundles_post_ra>
